<compile_context>
chip_gen: v7x
topology: tpu7x:2x2x1
jax: 0.10.0
libtpu: 0.0.40
codegen_flags: <defaults>
</compile_context>

<pallas_src>
import functools

import jax
import jax.numpy as jnp
from jax.experimental import pallas as pl
from jax.experimental.pallas import tpu as pltpu


def _sigmoid(x):
    # sigmoid(x) == 0.5 * tanh(0.5 * x) + 0.5 : one EUP tanh instead of
    # exp + reciprocal on the serial per-step dependency chain.
    return 0.5 * jnp.tanh(0.5 * x) + 0.5


def sentiment_lstm_kernel(x_ref, wx_ref, wh_ref, b_ref, fcw_ref, fcb_ref,
                          out_ref, xproj_sc, *, seq_len, batch_block):
    S = seq_len
    TB = batch_block
    H = wh_ref.shape[0]

    # ---- 1) Hoisted input projection for this batch block: one big
    #         (S*TB, E) @ (E, 4H) bf16 MXU matmul, f32 accumulate, bias added
    #         once, result stored as bf16 scratch.
    xproj_sc[...] = (
        jnp.dot(x_ref[...], wx_ref[...], preferred_element_type=jnp.float32)
        + b_ref[...]).astype(xproj_sc.dtype)

    wh = wh_ref[...]  # bf16 (H, 4H), loop-invariant
    # TODO(synk): hold W_h weight-stationary on the MXU across all S steps via
    # pltpu.matmul_push_rhs / matmul_acc_lhs / matmul_pop to drop the per-step
    # weight pushes.
    # TODO(synk): at production S (200+), time-chunk x / xproj (emit_pipeline)
    # instead of keeping the whole sequence resident, and interleave the
    # projection chunks with the recurrence's EUP/VPU gate phase.

    # ---- 2) Sequential recurrence over time.
    def step(t, carry):
        h, c = carry  # f32 (TB, H)
        row = pl.multiple_of(t * TB, TB)
        x_g = xproj_sc[pl.ds(row, TB), :]                     # bf16 (TB, 4H)
        gates = x_g + jnp.dot(h.astype(jnp.bfloat16), wh,
                              preferred_element_type=jnp.float32)
        f_t = _sigmoid(gates[:, 0 * H:1 * H])
        i_t = _sigmoid(gates[:, 1 * H:2 * H])
        c_tilde = jnp.tanh(gates[:, 2 * H:3 * H])
        o_t = _sigmoid(gates[:, 3 * H:4 * H])
        c_new = f_t * c + i_t * c_tilde
        h_new = o_t * jnp.tanh(c_new)
        return h_new, c_new

    h0 = jnp.zeros((TB, H), jnp.float32)
    c0 = jnp.zeros((TB, H), jnp.float32)
    unroll = True if S <= 16 else 8   # full unroll only for short sequences
    h_last, _ = jax.lax.fori_loop(0, S, step, (h0, c0), unroll=unroll)

    # ---- 3) Final fc + sigmoid. O == 1 -> VPU multiply + lane reduction
    #         (an N=1 MXU pass would waste nearly all columns).
    O = fcw_ref.shape[0]
    if O == 1:
        logits = (jnp.sum(h_last * fcw_ref[...], axis=-1, keepdims=True)
                  + fcb_ref[...])
    else:
        logits = jax.lax.dot_general(
            h_last, fcw_ref[...],
            dimension_numbers=(((1,), (1,)), ((), ())),
            preferred_element_type=jnp.float32) + fcb_ref[...]
    out_ref[...] = _sigmoid(logits)


def sentiment_lstm_forward(token_ids, embedding_matrix, wx, wh, b, fc_w, fc_b,
                           *, batch_block=None):
    """token_ids: (B, S) int32 -> (B, O) float32 probabilities."""
    B, S = token_ids.shape
    E = embedding_matrix.shape[1]
    H = wh.shape[0]
    O = fc_w.shape[1]

    if batch_block is None:
        batch_block = min(B, 128)   # fill MXU rows per step
    assert B % batch_block == 0, "batch must be a multiple of batch_block"
    TB = batch_block
    nb = B // TB

    # Embedding lookup (glue, plain JAX gather), time-major directly: (S, B, E).
    embedded = jnp.take(embedding_matrix, token_ids.T, axis=0)          # (S,B,E)
    # Pre-block per batch chunk so each grid step sees one contiguous
    # (S*TB, E) slab (for nb == 1 this is just a reshape).
    x_blocked = (embedded.reshape(S, nb, TB, E)
                 .transpose(1, 0, 2, 3)
                 .reshape(nb, S * TB, E)
                 .astype(jnp.bfloat16))                                  # (nb, S*TB, E)

    # bf16 matmul operands (MXU-native); biases / fc params stay f32.
    wx_bf = wx.astype(jnp.bfloat16)
    wh_bf = wh.astype(jnp.bfloat16)
    b_f32 = b.astype(jnp.float32)
    fcw_row = jnp.transpose(fc_w).astype(jnp.float32)                    # (O, H)
    fcb_f32 = fc_b.astype(jnp.float32)

    kernel = functools.partial(sentiment_lstm_kernel, seq_len=S,
                               batch_block=TB)

    grid_spec = pltpu.PrefetchScalarGridSpec(
        num_scalar_prefetch=0,
        grid=(nb,),   # independent batch blocks -> "parallel" (2 TCs on v7x)
        in_specs=[
            pl.BlockSpec((None, S * TB, E), lambda i: (i, 0, 0)),  # x block
            pl.BlockSpec((E, 4 * H), lambda i: (0, 0)),            # W_x
            pl.BlockSpec((H, 4 * H), lambda i: (0, 0)),            # W_h
            pl.BlockSpec((1, 4 * H), lambda i: (0, 0)),            # b
            pl.BlockSpec((O, H), lambda i: (0, 0)),                # fc weight^T
            pl.BlockSpec((1, O), lambda i: (0, 0)),                # fc bias
        ],
        out_specs=pl.BlockSpec((TB, O), lambda i: (i, 0)),
        scratch_shapes=[
            pltpu.VMEM((S * TB, 4 * H), jnp.bfloat16),   # hoisted x-projection
        ],
    )

    return pl.pallas_call(
        kernel,
        out_shape=jax.ShapeDtypeStruct((B, O), jnp.float32),
        grid_spec=grid_spec,
        compiler_params=pltpu.CompilerParams(
            dimension_semantics=("parallel",),
            vmem_limit_bytes=64 * 1024 * 1024),
    )(x_blocked, wx_bf, wh_bf, b_f32, fcw_row, fcb_f32)


def sentiment_lstm_reference(token_ids, embedding_matrix, wx, wh, b, fc_w, fc_b):
    """Pure-JAX f32 reference matching the PyTorch module's forward."""
    B, S = token_ids.shape
    H = wh.shape[0]
    x = jnp.take(embedding_matrix, token_ids, axis=0)   # (B, S, E)
    h = jnp.zeros((B, H), jnp.float32)
    c = jnp.zeros((B, H), jnp.float32)
    for t in range(S):
        gates = x[:, t, :] @ wx + h @ wh + b
        f_t = jax.nn.sigmoid(gates[:, 0 * H:1 * H])
        i_t = jax.nn.sigmoid(gates[:, 1 * H:2 * H])
        c_tilde = jnp.tanh(gates[:, 2 * H:3 * H])
        o_t = jax.nn.sigmoid(gates[:, 3 * H:4 * H])
        c = f_t * c + i_t * c_tilde
        h = o_t * jnp.tanh(c)
    return jax.nn.sigmoid(h @ fc_w + fc_b)


def init_params(key, vocab_size, embedding_dim, hidden_size, output_size):
    """Deterministic synthetic parameters matching the PyTorch module shapes."""
    k_emb, k_w, k_b, k_fw, k_fb = jax.random.split(key, 5)
    E, H, O = embedding_dim, hidden_size, output_size
    embedding_matrix = jax.random.uniform(
        k_emb, (vocab_size, E), jnp.float32, -0.5, 0.5)
    # 4 gate Linears of shape (E+H, H) packed as [f | i | c~ | o] along the
    # out axis, split along the input axis into the x-part and h-part.
    scale = 1.0 / jnp.sqrt(jnp.float32(E + H))
    w_full = jax.random.uniform(k_w, (E + H, 4 * H), jnp.float32, -scale, scale)
    wx = w_full[:E, :]
    wh = w_full[E:, :]
    b = jax.random.uniform(k_b, (1, 4 * H), jnp.float32, -scale, scale)
    fscale = 1.0 / jnp.sqrt(jnp.float32(H))
    fc_w = jax.random.uniform(k_fw, (H, O), jnp.float32, -fscale, fscale)
    fc_b = jax.random.uniform(k_fb, (1, O), jnp.float32, -fscale, fscale)
    return embedding_matrix, wx, wh, b, fc_w, fc_b


if __name__ == "__main__":
    key = jax.random.PRNGKey(0)

    # Small shapes consistent with the module (E, H multiples of 128; batch
    # matches the module's batch_size=128 and fills the MXU's M dimension).
    vocab_size = 64
    embedding_dim = 128   # stand-in for 300-d fasttext embeddings
    hidden_size = 128
    output_size = 1
    batch = 128
    seq_len = 8

    k_params, k_tokens = jax.random.split(key)
    emb, wx, wh, b, fc_w, fc_b = init_params(
        k_params, vocab_size, embedding_dim, hidden_size, output_size)
    token_ids = jax.random.randint(k_tokens, (batch, seq_len), 1, vocab_size,
                                   dtype=jnp.int32)

    out = sentiment_lstm_forward(token_ids, emb, wx, wh, b, fc_w, fc_b)
    out = jax.block_until_ready(out)

    assert out.shape == (batch, output_size)
    assert bool(jnp.all(jnp.isfinite(out)))
    assert bool(jnp.all((out >= 0.0) & (out <= 1.0)))

    # Tolerance check against the pure-JAX f32 reference (bf16 matmul drift).
    ref = sentiment_lstm_reference(token_ids, emb, wx, wh, b, fc_w, fc_b)
    max_err = float(jnp.max(jnp.abs(out - ref)))
    assert max_err < 1e-2, f"max abs err vs f32 reference: {max_err}"

    print("KERNEL_OK")
</pallas_src>

<mosaic_0001>
module attributes {stable_mosaic.version = 11 : i64} {
  func.func @sentiment_lstm_kernel(%arg0: i32, %arg1: memref<1x1024x128xbf16, #tpu.memory_space<vmem>>, %arg2: memref<128x512xbf16, #tpu.memory_space<vmem>>, %arg3: memref<128x512xbf16, #tpu.memory_space<vmem>>, %arg4: memref<1x512xf32, #tpu.memory_space<vmem>>, %arg5: memref<1x128xf32, #tpu.memory_space<vmem>>, %arg6: memref<1x1xf32, #tpu.memory_space<vmem>>, %arg7: memref<128x1xf32, #tpu.memory_space<vmem>>, %arg8: memref<1024x512xbf16, #tpu.memory_space<vmem>>) attributes {dimension_semantics = [#tpu.dimension_semantics<parallel>], iteration_bounds = array<i64: 1>, scalar_prefetch = 0 : i64, scratch_operands = 1 : i64, tpu.core_type = #tpu.core_type<tc>, window_params = [{transform_indices = @transform_0, window_bounds = array<i64: 1, 1024, 128>}, {pipeline_mode = #tpu.pipeline_mode<synchronous>, transform_indices = @transform_1, window_bounds = array<i64: 128, 512>}, {pipeline_mode = #tpu.pipeline_mode<synchronous>, transform_indices = @transform_2, window_bounds = array<i64: 128, 512>}, {pipeline_mode = #tpu.pipeline_mode<synchronous>, transform_indices = @transform_3, window_bounds = array<i64: 1, 512>}, {pipeline_mode = #tpu.pipeline_mode<synchronous>, transform_indices = @transform_4, window_bounds = array<i64: 1, 128>}, {pipeline_mode = #tpu.pipeline_mode<synchronous>, transform_indices = @transform_5, window_bounds = array<i64: 1, 1>}, {transform_indices = @transform_6, window_bounds = array<i64: 128, 1>}]} {
    %c0 = arith.constant 0 : index
    %c0_0 = arith.constant 0 : index
    %c0_1 = arith.constant 0 : index
    %0 = vector.load %arg1[%c0, %c0_0, %c0_1] : memref<1x1024x128xbf16, #tpu.memory_space<vmem>>, vector<1x1024x128xbf16>
    %1 = vector.shape_cast %0 : vector<1x1024x128xbf16> to vector<1024x128xbf16>
    %c0_2 = arith.constant 0 : index
    %c0_3 = arith.constant 0 : index
    %2 = vector.load %arg2[%c0_2, %c0_3] : memref<128x512xbf16, #tpu.memory_space<vmem>>, vector<128x512xbf16>
    %cst = arith.constant dense<0.000000e+00> : vector<1024x512xf32>
    %3 = tpu.matmul %1, %2, %cst {dimension_numbers = #tpu.dot_dimension_numbers<[1], [0], [0], [1], [0, 0, 1, 1], [], []>} : vector<1024x128xbf16>, vector<128x512xbf16>, vector<1024x512xf32> -> vector<1024x512xf32>
    %c0_4 = arith.constant 0 : index
    %c0_5 = arith.constant 0 : index
    %4 = vector.load %arg4[%c0_4, %c0_5] : memref<1x512xf32, #tpu.memory_space<vmem>>, vector<1x512xf32>
    %5 = vector.broadcast %4 : vector<1x512xf32> to vector<1024x512xf32>
    %6 = arith.addf %3, %5 : vector<1024x512xf32>
    %7 = arith.truncf %6 : vector<1024x512xf32> to vector<1024x512xbf16>
    %c0_6 = arith.constant 0 : index
    %c0_7 = arith.constant 0 : index
    %8 = vector.load %arg8[%c0_6, %c0_7] : memref<1024x512xbf16, #tpu.memory_space<vmem>>, vector<1024x512xbf16>
    tpu.vector_store %arg8[%c0_6, %c0_7], %7 {strides = array<i32>} : memref<1024x512xbf16, #tpu.memory_space<vmem>>, vector<1024x512xbf16>,
    %c0_8 = arith.constant 0 : index
    %c0_9 = arith.constant 0 : index
    %9 = vector.load %arg3[%c0_8, %c0_9] : memref<128x512xbf16, #tpu.memory_space<vmem>>, vector<128x512xbf16>
    %cst_10 = arith.constant 0.000000e+00 : f32
    %10 = vector.broadcast %cst_10 : f32 to vector<128x128xf32>
    %cst_11 = arith.constant 0.000000e+00 : f32
    %11 = vector.broadcast %cst_11 : f32 to vector<128x128xf32>
    %c0_i32 = arith.constant 0 : i32
    %c128_i32 = arith.constant 128 : i32
    %12 = arith.muli %c0_i32, %c128_i32 : i32
    %13 = tpu.assume_multiple %12, 128 : i32
    %14 = arith.index_cast %13 : i32 to index
    %c0_12 = arith.constant 0 : index
    %15 = vector.load %arg8[%14, %c0_12] : memref<1024x512xbf16, #tpu.memory_space<vmem>>, vector<128x512xbf16>
    %16 = arith.truncf %10 : vector<128x128xf32> to vector<128x128xbf16>
    %cst_13 = arith.constant dense<0.000000e+00> : vector<128x512xf32>
    %17 = tpu.matmul %16, %9, %cst_13 {dimension_numbers = #tpu.dot_dimension_numbers<[1], [0], [0], [1], [0, 0, 1, 1], [], []>} : vector<128x128xbf16>, vector<128x512xbf16>, vector<128x512xf32> -> vector<128x512xf32>
    %18 = arith.extf %15 : vector<128x512xbf16> to vector<128x512xf32>
    %19 = arith.addf %18, %17 : vector<128x512xf32>
    %20 = vector.extract_strided_slice %19 {offsets = [0, 0], sizes = [128, 128], strides = [1, 1]} : vector<128x512xf32> to vector<128x128xf32>
    %cst_14 = arith.constant 5.000000e-01 : f32
    %21 = vector.broadcast %cst_14 : f32 to vector<128x128xf32>
    %22 = arith.mulf %21, %20 : vector<128x128xf32>
    %23 = math.tanh %22 : vector<128x128xf32>
    %cst_15 = arith.constant 5.000000e-01 : f32
    %24 = vector.broadcast %cst_15 : f32 to vector<128x128xf32>
    %25 = arith.mulf %24, %23 : vector<128x128xf32>
    %cst_16 = arith.constant 5.000000e-01 : f32
    %26 = vector.broadcast %cst_16 : f32 to vector<128x128xf32>
    %27 = arith.addf %25, %26 : vector<128x128xf32>
    %28 = vector.extract_strided_slice %19 {offsets = [0, 128], sizes = [128, 128], strides = [1, 1]} : vector<128x512xf32> to vector<128x128xf32>
    %cst_17 = arith.constant 5.000000e-01 : f32
    %29 = vector.broadcast %cst_17 : f32 to vector<128x128xf32>
    %30 = arith.mulf %29, %28 : vector<128x128xf32>
    %31 = math.tanh %30 : vector<128x128xf32>
    %cst_18 = arith.constant 5.000000e-01 : f32
    %32 = vector.broadcast %cst_18 : f32 to vector<128x128xf32>
    %33 = arith.mulf %32, %31 : vector<128x128xf32>
    %cst_19 = arith.constant 5.000000e-01 : f32
    %34 = vector.broadcast %cst_19 : f32 to vector<128x128xf32>
    %35 = arith.addf %33, %34 : vector<128x128xf32>
    %36 = vector.extract_strided_slice %19 {offsets = [0, 256], sizes = [128, 128], strides = [1, 1]} : vector<128x512xf32> to vector<128x128xf32>
    %37 = math.tanh %36 : vector<128x128xf32>
    %38 = vector.extract_strided_slice %19 {offsets = [0, 384], sizes = [128, 128], strides = [1, 1]} : vector<128x512xf32> to vector<128x128xf32>
    %cst_20 = arith.constant 5.000000e-01 : f32
    %39 = vector.broadcast %cst_20 : f32 to vector<128x128xf32>
    %40 = arith.mulf %39, %38 : vector<128x128xf32>
    %41 = math.tanh %40 : vector<128x128xf32>
    %cst_21 = arith.constant 5.000000e-01 : f32
    %42 = vector.broadcast %cst_21 : f32 to vector<128x128xf32>
    %43 = arith.mulf %42, %41 : vector<128x128xf32>
    %cst_22 = arith.constant 5.000000e-01 : f32
    %44 = vector.broadcast %cst_22 : f32 to vector<128x128xf32>
    %45 = arith.addf %43, %44 : vector<128x128xf32>
    %46 = arith.mulf %27, %11 : vector<128x128xf32>
    %47 = arith.mulf %35, %37 : vector<128x128xf32>
    %48 = arith.addf %46, %47 : vector<128x128xf32>
    %49 = math.tanh %48 : vector<128x128xf32>
    %50 = arith.mulf %45, %49 : vector<128x128xf32>
    %c1_i32 = arith.constant 1 : i32
    %c128_i32_23 = arith.constant 128 : i32
    %51 = arith.muli %c1_i32, %c128_i32_23 : i32
    %52 = tpu.assume_multiple %51, 128 : i32
    %53 = arith.index_cast %52 : i32 to index
    %c0_24 = arith.constant 0 : index
    %54 = vector.load %arg8[%53, %c0_24] : memref<1024x512xbf16, #tpu.memory_space<vmem>>, vector<128x512xbf16>
    %55 = arith.truncf %50 : vector<128x128xf32> to vector<128x128xbf16>
    %cst_25 = arith.constant dense<0.000000e+00> : vector<128x512xf32>
    %56 = tpu.matmul %55, %9, %cst_25 {dimension_numbers = #tpu.dot_dimension_numbers<[1], [0], [0], [1], [0, 0, 1, 1], [], []>} : vector<128x128xbf16>, vector<128x512xbf16>, vector<128x512xf32> -> vector<128x512xf32>
    %57 = arith.extf %54 : vector<128x512xbf16> to vector<128x512xf32>
    %58 = arith.addf %57, %56 : vector<128x512xf32>
    %59 = vector.extract_strided_slice %58 {offsets = [0, 0], sizes = [128, 128], strides = [1, 1]} : vector<128x512xf32> to vector<128x128xf32>
    %cst_26 = arith.constant 5.000000e-01 : f32
    %60 = vector.broadcast %cst_26 : f32 to vector<128x128xf32>
    %61 = arith.mulf %60, %59 : vector<128x128xf32>
    %62 = math.tanh %61 : vector<128x128xf32>
    %cst_27 = arith.constant 5.000000e-01 : f32
    %63 = vector.broadcast %cst_27 : f32 to vector<128x128xf32>
    %64 = arith.mulf %63, %62 : vector<128x128xf32>
    %cst_28 = arith.constant 5.000000e-01 : f32
    %65 = vector.broadcast %cst_28 : f32 to vector<128x128xf32>
    %66 = arith.addf %64, %65 : vector<128x128xf32>
    %67 = vector.extract_strided_slice %58 {offsets = [0, 128], sizes = [128, 128], strides = [1, 1]} : vector<128x512xf32> to vector<128x128xf32>
    %cst_29 = arith.constant 5.000000e-01 : f32
    %68 = vector.broadcast %cst_29 : f32 to vector<128x128xf32>
    %69 = arith.mulf %68, %67 : vector<128x128xf32>
    %70 = math.tanh %69 : vector<128x128xf32>
    %cst_30 = arith.constant 5.000000e-01 : f32
    %71 = vector.broadcast %cst_30 : f32 to vector<128x128xf32>
    %72 = arith.mulf %71, %70 : vector<128x128xf32>
    %cst_31 = arith.constant 5.000000e-01 : f32
    %73 = vector.broadcast %cst_31 : f32 to vector<128x128xf32>
    %74 = arith.addf %72, %73 : vector<128x128xf32>
    %75 = vector.extract_strided_slice %58 {offsets = [0, 256], sizes = [128, 128], strides = [1, 1]} : vector<128x512xf32> to vector<128x128xf32>
    %76 = math.tanh %75 : vector<128x128xf32>
    %77 = vector.extract_strided_slice %58 {offsets = [0, 384], sizes = [128, 128], strides = [1, 1]} : vector<128x512xf32> to vector<128x128xf32>
    %cst_32 = arith.constant 5.000000e-01 : f32
    %78 = vector.broadcast %cst_32 : f32 to vector<128x128xf32>
    %79 = arith.mulf %78, %77 : vector<128x128xf32>
    %80 = math.tanh %79 : vector<128x128xf32>
    %cst_33 = arith.constant 5.000000e-01 : f32
    %81 = vector.broadcast %cst_33 : f32 to vector<128x128xf32>
    %82 = arith.mulf %81, %80 : vector<128x128xf32>
    %cst_34 = arith.constant 5.000000e-01 : f32
    %83 = vector.broadcast %cst_34 : f32 to vector<128x128xf32>
    %84 = arith.addf %82, %83 : vector<128x128xf32>
    %85 = arith.mulf %66, %48 : vector<128x128xf32>
    %86 = arith.mulf %74, %76 : vector<128x128xf32>
    %87 = arith.addf %85, %86 : vector<128x128xf32>
    %88 = math.tanh %87 : vector<128x128xf32>
    %89 = arith.mulf %84, %88 : vector<128x128xf32>
    %c2_i32 = arith.constant 2 : i32
    %c128_i32_35 = arith.constant 128 : i32
    %90 = arith.muli %c2_i32, %c128_i32_35 : i32
    %91 = tpu.assume_multiple %90, 128 : i32
    %92 = arith.index_cast %91 : i32 to index
    %c0_36 = arith.constant 0 : index
    %93 = vector.load %arg8[%92, %c0_36] : memref<1024x512xbf16, #tpu.memory_space<vmem>>, vector<128x512xbf16>
    %94 = arith.truncf %89 : vector<128x128xf32> to vector<128x128xbf16>
    %cst_37 = arith.constant dense<0.000000e+00> : vector<128x512xf32>
    %95 = tpu.matmul %94, %9, %cst_37 {dimension_numbers = #tpu.dot_dimension_numbers<[1], [0], [0], [1], [0, 0, 1, 1], [], []>} : vector<128x128xbf16>, vector<128x512xbf16>, vector<128x512xf32> -> vector<128x512xf32>
    %96 = arith.extf %93 : vector<128x512xbf16> to vector<128x512xf32>
    %97 = arith.addf %96, %95 : vector<128x512xf32>
    %98 = vector.extract_strided_slice %97 {offsets = [0, 0], sizes = [128, 128], strides = [1, 1]} : vector<128x512xf32> to vector<128x128xf32>
    %cst_38 = arith.constant 5.000000e-01 : f32
    %99 = vector.broadcast %cst_38 : f32 to vector<128x128xf32>
    %100 = arith.mulf %99, %98 : vector<128x128xf32>
    %101 = math.tanh %100 : vector<128x128xf32>
    %cst_39 = arith.constant 5.000000e-01 : f32
    %102 = vector.broadcast %cst_39 : f32 to vector<128x128xf32>
    %103 = arith.mulf %102, %101 : vector<128x128xf32>
    %cst_40 = arith.constant 5.000000e-01 : f32
    %104 = vector.broadcast %cst_40 : f32 to vector<128x128xf32>
    %105 = arith.addf %103, %104 : vector<128x128xf32>
    %106 = vector.extract_strided_slice %97 {offsets = [0, 128], sizes = [128, 128], strides = [1, 1]} : vector<128x512xf32> to vector<128x128xf32>
    %cst_41 = arith.constant 5.000000e-01 : f32
    %107 = vector.broadcast %cst_41 : f32 to vector<128x128xf32>
    %108 = arith.mulf %107, %106 : vector<128x128xf32>
    %109 = math.tanh %108 : vector<128x128xf32>
    %cst_42 = arith.constant 5.000000e-01 : f32
    %110 = vector.broadcast %cst_42 : f32 to vector<128x128xf32>
    %111 = arith.mulf %110, %109 : vector<128x128xf32>
    %cst_43 = arith.constant 5.000000e-01 : f32
    %112 = vector.broadcast %cst_43 : f32 to vector<128x128xf32>
    %113 = arith.addf %111, %112 : vector<128x128xf32>
    %114 = vector.extract_strided_slice %97 {offsets = [0, 256], sizes = [128, 128], strides = [1, 1]} : vector<128x512xf32> to vector<128x128xf32>
    %115 = math.tanh %114 : vector<128x128xf32>
    %116 = vector.extract_strided_slice %97 {offsets = [0, 384], sizes = [128, 128], strides = [1, 1]} : vector<128x512xf32> to vector<128x128xf32>
    %cst_44 = arith.constant 5.000000e-01 : f32
    %117 = vector.broadcast %cst_44 : f32 to vector<128x128xf32>
    %118 = arith.mulf %117, %116 : vector<128x128xf32>
    %119 = math.tanh %118 : vector<128x128xf32>
    %cst_45 = arith.constant 5.000000e-01 : f32
    %120 = vector.broadcast %cst_45 : f32 to vector<128x128xf32>
    %121 = arith.mulf %120, %119 : vector<128x128xf32>
    %cst_46 = arith.constant 5.000000e-01 : f32
    %122 = vector.broadcast %cst_46 : f32 to vector<128x128xf32>
    %123 = arith.addf %121, %122 : vector<128x128xf32>
    %124 = arith.mulf %105, %87 : vector<128x128xf32>
    %125 = arith.mulf %113, %115 : vector<128x128xf32>
    %126 = arith.addf %124, %125 : vector<128x128xf32>
    %127 = math.tanh %126 : vector<128x128xf32>
    %128 = arith.mulf %123, %127 : vector<128x128xf32>
    %c3_i32 = arith.constant 3 : i32
    %c128_i32_47 = arith.constant 128 : i32
    %129 = arith.muli %c3_i32, %c128_i32_47 : i32
    %130 = tpu.assume_multiple %129, 128 : i32
    %131 = arith.index_cast %130 : i32 to index
    %c0_48 = arith.constant 0 : index
    %132 = vector.load %arg8[%131, %c0_48] : memref<1024x512xbf16, #tpu.memory_space<vmem>>, vector<128x512xbf16>
    %133 = arith.truncf %128 : vector<128x128xf32> to vector<128x128xbf16>
    %cst_49 = arith.constant dense<0.000000e+00> : vector<128x512xf32>
    %134 = tpu.matmul %133, %9, %cst_49 {dimension_numbers = #tpu.dot_dimension_numbers<[1], [0], [0], [1], [0, 0, 1, 1], [], []>} : vector<128x128xbf16>, vector<128x512xbf16>, vector<128x512xf32> -> vector<128x512xf32>
    %135 = arith.extf %132 : vector<128x512xbf16> to vector<128x512xf32>
    %136 = arith.addf %135, %134 : vector<128x512xf32>
    %137 = vector.extract_strided_slice %136 {offsets = [0, 0], sizes = [128, 128], strides = [1, 1]} : vector<128x512xf32> to vector<128x128xf32>
    %cst_50 = arith.constant 5.000000e-01 : f32
    %138 = vector.broadcast %cst_50 : f32 to vector<128x128xf32>
    %139 = arith.mulf %138, %137 : vector<128x128xf32>
    %140 = math.tanh %139 : vector<128x128xf32>
    %cst_51 = arith.constant 5.000000e-01 : f32
    %141 = vector.broadcast %cst_51 : f32 to vector<128x128xf32>
    %142 = arith.mulf %141, %140 : vector<128x128xf32>
    %cst_52 = arith.constant 5.000000e-01 : f32
    %143 = vector.broadcast %cst_52 : f32 to vector<128x128xf32>
    %144 = arith.addf %142, %143 : vector<128x128xf32>
    %145 = vector.extract_strided_slice %136 {offsets = [0, 128], sizes = [128, 128], strides = [1, 1]} : vector<128x512xf32> to vector<128x128xf32>
    %cst_53 = arith.constant 5.000000e-01 : f32
    %146 = vector.broadcast %cst_53 : f32 to vector<128x128xf32>
    %147 = arith.mulf %146, %145 : vector<128x128xf32>
    %148 = math.tanh %147 : vector<128x128xf32>
    %cst_54 = arith.constant 5.000000e-01 : f32
    %149 = vector.broadcast %cst_54 : f32 to vector<128x128xf32>
    %150 = arith.mulf %149, %148 : vector<128x128xf32>
    %cst_55 = arith.constant 5.000000e-01 : f32
    %151 = vector.broadcast %cst_55 : f32 to vector<128x128xf32>
    %152 = arith.addf %150, %151 : vector<128x128xf32>
    %153 = vector.extract_strided_slice %136 {offsets = [0, 256], sizes = [128, 128], strides = [1, 1]} : vector<128x512xf32> to vector<128x128xf32>
    %154 = math.tanh %153 : vector<128x128xf32>
    %155 = vector.extract_strided_slice %136 {offsets = [0, 384], sizes = [128, 128], strides = [1, 1]} : vector<128x512xf32> to vector<128x128xf32>
    %cst_56 = arith.constant 5.000000e-01 : f32
    %156 = vector.broadcast %cst_56 : f32 to vector<128x128xf32>
    %157 = arith.mulf %156, %155 : vector<128x128xf32>
    %158 = math.tanh %157 : vector<128x128xf32>
    %cst_57 = arith.constant 5.000000e-01 : f32
    %159 = vector.broadcast %cst_57 : f32 to vector<128x128xf32>
    %160 = arith.mulf %159, %158 : vector<128x128xf32>
    %cst_58 = arith.constant 5.000000e-01 : f32
    %161 = vector.broadcast %cst_58 : f32 to vector<128x128xf32>
    %162 = arith.addf %160, %161 : vector<128x128xf32>
    %163 = arith.mulf %144, %126 : vector<128x128xf32>
    %164 = arith.mulf %152, %154 : vector<128x128xf32>
    %165 = arith.addf %163, %164 : vector<128x128xf32>
    %166 = math.tanh %165 : vector<128x128xf32>
    %167 = arith.mulf %162, %166 : vector<128x128xf32>
    %c4_i32 = arith.constant 4 : i32
    %c128_i32_59 = arith.constant 128 : i32
    %168 = arith.muli %c4_i32, %c128_i32_59 : i32
    %169 = tpu.assume_multiple %168, 128 : i32
    %170 = arith.index_cast %169 : i32 to index
    %c0_60 = arith.constant 0 : index
    %171 = vector.load %arg8[%170, %c0_60] : memref<1024x512xbf16, #tpu.memory_space<vmem>>, vector<128x512xbf16>
    %172 = arith.truncf %167 : vector<128x128xf32> to vector<128x128xbf16>
    %cst_61 = arith.constant dense<0.000000e+00> : vector<128x512xf32>
    %173 = tpu.matmul %172, %9, %cst_61 {dimension_numbers = #tpu.dot_dimension_numbers<[1], [0], [0], [1], [0, 0, 1, 1], [], []>} : vector<128x128xbf16>, vector<128x512xbf16>, vector<128x512xf32> -> vector<128x512xf32>
    %174 = arith.extf %171 : vector<128x512xbf16> to vector<128x512xf32>
    %175 = arith.addf %174, %173 : vector<128x512xf32>
    %176 = vector.extract_strided_slice %175 {offsets = [0, 0], sizes = [128, 128], strides = [1, 1]} : vector<128x512xf32> to vector<128x128xf32>
    %cst_62 = arith.constant 5.000000e-01 : f32
    %177 = vector.broadcast %cst_62 : f32 to vector<128x128xf32>
    %178 = arith.mulf %177, %176 : vector<128x128xf32>
    %179 = math.tanh %178 : vector<128x128xf32>
    %cst_63 = arith.constant 5.000000e-01 : f32
    %180 = vector.broadcast %cst_63 : f32 to vector<128x128xf32>
    %181 = arith.mulf %180, %179 : vector<128x128xf32>
    %cst_64 = arith.constant 5.000000e-01 : f32
    %182 = vector.broadcast %cst_64 : f32 to vector<128x128xf32>
    %183 = arith.addf %181, %182 : vector<128x128xf32>
    %184 = vector.extract_strided_slice %175 {offsets = [0, 128], sizes = [128, 128], strides = [1, 1]} : vector<128x512xf32> to vector<128x128xf32>
    %cst_65 = arith.constant 5.000000e-01 : f32
    %185 = vector.broadcast %cst_65 : f32 to vector<128x128xf32>
    %186 = arith.mulf %185, %184 : vector<128x128xf32>
    %187 = math.tanh %186 : vector<128x128xf32>
    %cst_66 = arith.constant 5.000000e-01 : f32
    %188 = vector.broadcast %cst_66 : f32 to vector<128x128xf32>
    %189 = arith.mulf %188, %187 : vector<128x128xf32>
    %cst_67 = arith.constant 5.000000e-01 : f32
    %190 = vector.broadcast %cst_67 : f32 to vector<128x128xf32>
    %191 = arith.addf %189, %190 : vector<128x128xf32>
    %192 = vector.extract_strided_slice %175 {offsets = [0, 256], sizes = [128, 128], strides = [1, 1]} : vector<128x512xf32> to vector<128x128xf32>
    %193 = math.tanh %192 : vector<128x128xf32>
    %194 = vector.extract_strided_slice %175 {offsets = [0, 384], sizes = [128, 128], strides = [1, 1]} : vector<128x512xf32> to vector<128x128xf32>
    %cst_68 = arith.constant 5.000000e-01 : f32
    %195 = vector.broadcast %cst_68 : f32 to vector<128x128xf32>
    %196 = arith.mulf %195, %194 : vector<128x128xf32>
    %197 = math.tanh %196 : vector<128x128xf32>
    %cst_69 = arith.constant 5.000000e-01 : f32
    %198 = vector.broadcast %cst_69 : f32 to vector<128x128xf32>
    %199 = arith.mulf %198, %197 : vector<128x128xf32>
    %cst_70 = arith.constant 5.000000e-01 : f32
    %200 = vector.broadcast %cst_70 : f32 to vector<128x128xf32>
    %201 = arith.addf %199, %200 : vector<128x128xf32>
    %202 = arith.mulf %183, %165 : vector<128x128xf32>
    %203 = arith.mulf %191, %193 : vector<128x128xf32>
    %204 = arith.addf %202, %203 : vector<128x128xf32>
    %205 = math.tanh %204 : vector<128x128xf32>
    %206 = arith.mulf %201, %205 : vector<128x128xf32>
    %c5_i32 = arith.constant 5 : i32
    %c128_i32_71 = arith.constant 128 : i32
    %207 = arith.muli %c5_i32, %c128_i32_71 : i32
    %208 = tpu.assume_multiple %207, 128 : i32
    %209 = arith.index_cast %208 : i32 to index
    %c0_72 = arith.constant 0 : index
    %210 = vector.load %arg8[%209, %c0_72] : memref<1024x512xbf16, #tpu.memory_space<vmem>>, vector<128x512xbf16>
    %211 = arith.truncf %206 : vector<128x128xf32> to vector<128x128xbf16>
    %cst_73 = arith.constant dense<0.000000e+00> : vector<128x512xf32>
    %212 = tpu.matmul %211, %9, %cst_73 {dimension_numbers = #tpu.dot_dimension_numbers<[1], [0], [0], [1], [0, 0, 1, 1], [], []>} : vector<128x128xbf16>, vector<128x512xbf16>, vector<128x512xf32> -> vector<128x512xf32>
    %213 = arith.extf %210 : vector<128x512xbf16> to vector<128x512xf32>
    %214 = arith.addf %213, %212 : vector<128x512xf32>
    %215 = vector.extract_strided_slice %214 {offsets = [0, 0], sizes = [128, 128], strides = [1, 1]} : vector<128x512xf32> to vector<128x128xf32>
    %cst_74 = arith.constant 5.000000e-01 : f32
    %216 = vector.broadcast %cst_74 : f32 to vector<128x128xf32>
    %217 = arith.mulf %216, %215 : vector<128x128xf32>
    %218 = math.tanh %217 : vector<128x128xf32>
    %cst_75 = arith.constant 5.000000e-01 : f32
    %219 = vector.broadcast %cst_75 : f32 to vector<128x128xf32>
    %220 = arith.mulf %219, %218 : vector<128x128xf32>
    %cst_76 = arith.constant 5.000000e-01 : f32
    %221 = vector.broadcast %cst_76 : f32 to vector<128x128xf32>
    %222 = arith.addf %220, %221 : vector<128x128xf32>
    %223 = vector.extract_strided_slice %214 {offsets = [0, 128], sizes = [128, 128], strides = [1, 1]} : vector<128x512xf32> to vector<128x128xf32>
    %cst_77 = arith.constant 5.000000e-01 : f32
    %224 = vector.broadcast %cst_77 : f32 to vector<128x128xf32>
    %225 = arith.mulf %224, %223 : vector<128x128xf32>
    %226 = math.tanh %225 : vector<128x128xf32>
    %cst_78 = arith.constant 5.000000e-01 : f32
    %227 = vector.broadcast %cst_78 : f32 to vector<128x128xf32>
    %228 = arith.mulf %227, %226 : vector<128x128xf32>
    %cst_79 = arith.constant 5.000000e-01 : f32
    %229 = vector.broadcast %cst_79 : f32 to vector<128x128xf32>
    %230 = arith.addf %228, %229 : vector<128x128xf32>
    %231 = vector.extract_strided_slice %214 {offsets = [0, 256], sizes = [128, 128], strides = [1, 1]} : vector<128x512xf32> to vector<128x128xf32>
    %232 = math.tanh %231 : vector<128x128xf32>
    %233 = vector.extract_strided_slice %214 {offsets = [0, 384], sizes = [128, 128], strides = [1, 1]} : vector<128x512xf32> to vector<128x128xf32>
    %cst_80 = arith.constant 5.000000e-01 : f32
    %234 = vector.broadcast %cst_80 : f32 to vector<128x128xf32>
    %235 = arith.mulf %234, %233 : vector<128x128xf32>
    %236 = math.tanh %235 : vector<128x128xf32>
    %cst_81 = arith.constant 5.000000e-01 : f32
    %237 = vector.broadcast %cst_81 : f32 to vector<128x128xf32>
    %238 = arith.mulf %237, %236 : vector<128x128xf32>
    %cst_82 = arith.constant 5.000000e-01 : f32
    %239 = vector.broadcast %cst_82 : f32 to vector<128x128xf32>
    %240 = arith.addf %238, %239 : vector<128x128xf32>
    %241 = arith.mulf %222, %204 : vector<128x128xf32>
    %242 = arith.mulf %230, %232 : vector<128x128xf32>
    %243 = arith.addf %241, %242 : vector<128x128xf32>
    %244 = math.tanh %243 : vector<128x128xf32>
    %245 = arith.mulf %240, %244 : vector<128x128xf32>
    %c6_i32 = arith.constant 6 : i32
    %c128_i32_83 = arith.constant 128 : i32
    %246 = arith.muli %c6_i32, %c128_i32_83 : i32
    %247 = tpu.assume_multiple %246, 128 : i32
    %248 = arith.index_cast %247 : i32 to index
    %c0_84 = arith.constant 0 : index
    %249 = vector.load %arg8[%248, %c0_84] : memref<1024x512xbf16, #tpu.memory_space<vmem>>, vector<128x512xbf16>
    %250 = arith.truncf %245 : vector<128x128xf32> to vector<128x128xbf16>
    %cst_85 = arith.constant dense<0.000000e+00> : vector<128x512xf32>
    %251 = tpu.matmul %250, %9, %cst_85 {dimension_numbers = #tpu.dot_dimension_numbers<[1], [0], [0], [1], [0, 0, 1, 1], [], []>} : vector<128x128xbf16>, vector<128x512xbf16>, vector<128x512xf32> -> vector<128x512xf32>
    %252 = arith.extf %249 : vector<128x512xbf16> to vector<128x512xf32>
    %253 = arith.addf %252, %251 : vector<128x512xf32>
    %254 = vector.extract_strided_slice %253 {offsets = [0, 0], sizes = [128, 128], strides = [1, 1]} : vector<128x512xf32> to vector<128x128xf32>
    %cst_86 = arith.constant 5.000000e-01 : f32
    %255 = vector.broadcast %cst_86 : f32 to vector<128x128xf32>
    %256 = arith.mulf %255, %254 : vector<128x128xf32>
    %257 = math.tanh %256 : vector<128x128xf32>
    %cst_87 = arith.constant 5.000000e-01 : f32
    %258 = vector.broadcast %cst_87 : f32 to vector<128x128xf32>
    %259 = arith.mulf %258, %257 : vector<128x128xf32>
    %cst_88 = arith.constant 5.000000e-01 : f32
    %260 = vector.broadcast %cst_88 : f32 to vector<128x128xf32>
    %261 = arith.addf %259, %260 : vector<128x128xf32>
    %262 = vector.extract_strided_slice %253 {offsets = [0, 128], sizes = [128, 128], strides = [1, 1]} : vector<128x512xf32> to vector<128x128xf32>
    %cst_89 = arith.constant 5.000000e-01 : f32
    %263 = vector.broadcast %cst_89 : f32 to vector<128x128xf32>
    %264 = arith.mulf %263, %262 : vector<128x128xf32>
    %265 = math.tanh %264 : vector<128x128xf32>
    %cst_90 = arith.constant 5.000000e-01 : f32
    %266 = vector.broadcast %cst_90 : f32 to vector<128x128xf32>
    %267 = arith.mulf %266, %265 : vector<128x128xf32>
    %cst_91 = arith.constant 5.000000e-01 : f32
    %268 = vector.broadcast %cst_91 : f32 to vector<128x128xf32>
    %269 = arith.addf %267, %268 : vector<128x128xf32>
    %270 = vector.extract_strided_slice %253 {offsets = [0, 256], sizes = [128, 128], strides = [1, 1]} : vector<128x512xf32> to vector<128x128xf32>
    %271 = math.tanh %270 : vector<128x128xf32>
    %272 = vector.extract_strided_slice %253 {offsets = [0, 384], sizes = [128, 128], strides = [1, 1]} : vector<128x512xf32> to vector<128x128xf32>
    %cst_92 = arith.constant 5.000000e-01 : f32
    %273 = vector.broadcast %cst_92 : f32 to vector<128x128xf32>
    %274 = arith.mulf %273, %272 : vector<128x128xf32>
    %275 = math.tanh %274 : vector<128x128xf32>
    %cst_93 = arith.constant 5.000000e-01 : f32
    %276 = vector.broadcast %cst_93 : f32 to vector<128x128xf32>
    %277 = arith.mulf %276, %275 : vector<128x128xf32>
    %cst_94 = arith.constant 5.000000e-01 : f32
    %278 = vector.broadcast %cst_94 : f32 to vector<128x128xf32>
    %279 = arith.addf %277, %278 : vector<128x128xf32>
    %280 = arith.mulf %261, %243 : vector<128x128xf32>
    %281 = arith.mulf %269, %271 : vector<128x128xf32>
    %282 = arith.addf %280, %281 : vector<128x128xf32>
    %283 = math.tanh %282 : vector<128x128xf32>
    %284 = arith.mulf %279, %283 : vector<128x128xf32>
    %c7_i32 = arith.constant 7 : i32
    %c128_i32_95 = arith.constant 128 : i32
    %285 = arith.muli %c7_i32, %c128_i32_95 : i32
    %286 = tpu.assume_multiple %285, 128 : i32
    %287 = arith.index_cast %286 : i32 to index
    %c0_96 = arith.constant 0 : index
    %288 = vector.load %arg8[%287, %c0_96] : memref<1024x512xbf16, #tpu.memory_space<vmem>>, vector<128x512xbf16>
    %289 = arith.truncf %284 : vector<128x128xf32> to vector<128x128xbf16>
    %cst_97 = arith.constant dense<0.000000e+00> : vector<128x512xf32>
    %290 = tpu.matmul %289, %9, %cst_97 {dimension_numbers = #tpu.dot_dimension_numbers<[1], [0], [0], [1], [0, 0, 1, 1], [], []>} : vector<128x128xbf16>, vector<128x512xbf16>, vector<128x512xf32> -> vector<128x512xf32>
    %291 = arith.extf %288 : vector<128x512xbf16> to vector<128x512xf32>
    %292 = arith.addf %291, %290 : vector<128x512xf32>
    %293 = vector.extract_strided_slice %292 {offsets = [0, 0], sizes = [128, 128], strides = [1, 1]} : vector<128x512xf32> to vector<128x128xf32>
    %cst_98 = arith.constant 5.000000e-01 : f32
    %294 = vector.broadcast %cst_98 : f32 to vector<128x128xf32>
    %295 = arith.mulf %294, %293 : vector<128x128xf32>
    %296 = math.tanh %295 : vector<128x128xf32>
    %cst_99 = arith.constant 5.000000e-01 : f32
    %297 = vector.broadcast %cst_99 : f32 to vector<128x128xf32>
    %298 = arith.mulf %297, %296 : vector<128x128xf32>
    %cst_100 = arith.constant 5.000000e-01 : f32
    %299 = vector.broadcast %cst_100 : f32 to vector<128x128xf32>
    %300 = arith.addf %298, %299 : vector<128x128xf32>
    %301 = vector.extract_strided_slice %292 {offsets = [0, 128], sizes = [128, 128], strides = [1, 1]} : vector<128x512xf32> to vector<128x128xf32>
    %cst_101 = arith.constant 5.000000e-01 : f32
    %302 = vector.broadcast %cst_101 : f32 to vector<128x128xf32>
    %303 = arith.mulf %302, %301 : vector<128x128xf32>
    %304 = math.tanh %303 : vector<128x128xf32>
    %cst_102 = arith.constant 5.000000e-01 : f32
    %305 = vector.broadcast %cst_102 : f32 to vector<128x128xf32>
    %306 = arith.mulf %305, %304 : vector<128x128xf32>
    %cst_103 = arith.constant 5.000000e-01 : f32
    %307 = vector.broadcast %cst_103 : f32 to vector<128x128xf32>
    %308 = arith.addf %306, %307 : vector<128x128xf32>
    %309 = vector.extract_strided_slice %292 {offsets = [0, 256], sizes = [128, 128], strides = [1, 1]} : vector<128x512xf32> to vector<128x128xf32>
    %310 = math.tanh %309 : vector<128x128xf32>
    %311 = vector.extract_strided_slice %292 {offsets = [0, 384], sizes = [128, 128], strides = [1, 1]} : vector<128x512xf32> to vector<128x128xf32>
    %cst_104 = arith.constant 5.000000e-01 : f32
    %312 = vector.broadcast %cst_104 : f32 to vector<128x128xf32>
    %313 = arith.mulf %312, %311 : vector<128x128xf32>
    %314 = math.tanh %313 : vector<128x128xf32>
    %cst_105 = arith.constant 5.000000e-01 : f32
    %315 = vector.broadcast %cst_105 : f32 to vector<128x128xf32>
    %316 = arith.mulf %315, %314 : vector<128x128xf32>
    %cst_106 = arith.constant 5.000000e-01 : f32
    %317 = vector.broadcast %cst_106 : f32 to vector<128x128xf32>
    %318 = arith.addf %316, %317 : vector<128x128xf32>
    %319 = arith.mulf %300, %282 : vector<128x128xf32>
    %320 = arith.mulf %308, %310 : vector<128x128xf32>
    %321 = arith.addf %319, %320 : vector<128x128xf32>
    %322 = math.tanh %321 : vector<128x128xf32>
    %323 = arith.mulf %318, %322 : vector<128x128xf32>
    %c8_i32 = arith.constant 8 : i32
    %c0_107 = arith.constant 0 : index
    %c0_108 = arith.constant 0 : index
    %324 = vector.load %arg5[%c0_107, %c0_108] : memref<1x128xf32, #tpu.memory_space<vmem>>, vector<1x128xf32>
    %325 = vector.broadcast %324 : vector<1x128xf32> to vector<128x128xf32>
    %326 = arith.mulf %323, %325 : vector<128x128xf32>
    %cst_109 = arith.constant dense<0.000000e+00> : vector<128xf32>
    %327 = vector.multi_reduction <add>, %326, %cst_109 [1] : vector<128x128xf32> to vector<128xf32>
    %328 = vector.shape_cast %327 : vector<128xf32> to vector<128x1xf32>
    %c0_110 = arith.constant 0 : index
    %c0_111 = arith.constant 0 : index
    %329 = vector.load %arg6[%c0_110, %c0_111] : memref<1x1xf32, #tpu.memory_space<vmem>>, vector<1x1xf32>
    %330 = vector.broadcast %329 : vector<1x1xf32> to vector<128x1xf32>
    %331 = arith.addf %328, %330 : vector<128x1xf32>
    %cst_112 = arith.constant 5.000000e-01 : f32
    %332 = vector.broadcast %cst_112 : f32 to vector<128x1xf32>
    %333 = arith.mulf %332, %331 : vector<128x1xf32>
    %334 = math.tanh %333 : vector<128x1xf32>
    %cst_113 = arith.constant 5.000000e-01 : f32
    %335 = vector.broadcast %cst_113 : f32 to vector<128x1xf32>
    %336 = arith.mulf %335, %334 : vector<128x1xf32>
    %cst_114 = arith.constant 5.000000e-01 : f32
    %337 = vector.broadcast %cst_114 : f32 to vector<128x1xf32>
    %338 = arith.addf %336, %337 : vector<128x1xf32>
    %c0_115 = arith.constant 0 : index
    %c0_116 = arith.constant 0 : index
    %339 = vector.load %arg7[%c0_115, %c0_116] : memref<128x1xf32, #tpu.memory_space<vmem>>, vector<128x1xf32>
    tpu.vector_store %arg7[%c0_115, %c0_116], %338 {strides = array<i32>} : memref<128x1xf32, #tpu.memory_space<vmem>>, vector<128x1xf32>,
    return
  }
  func.func @transform_0(%arg0: i32) -> (i32, i32, i32) {
    %c0_i32 = arith.constant 0 : i32
    %c0_i32_0 = arith.constant 0 : i32
    %c0_i32_1 = arith.constant 0 : i32
    return %arg0, %c0_i32, %c0_i32_0 : i32, i32, i32
  }
  func.func @transform_1(%arg0: i32) -> (i32, i32) {
    %c0_i32 = arith.constant 0 : i32
    %c0_i32_0 = arith.constant 0 : i32
    %c0_i32_1 = arith.constant 0 : i32
    return %c0_i32, %c0_i32_0 : i32, i32
  }
  func.func @transform_2(%arg0: i32) -> (i32, i32) {
    %c0_i32 = arith.constant 0 : i32
    %c0_i32_0 = arith.constant 0 : i32
    %c0_i32_1 = arith.constant 0 : i32
    return %c0_i32, %c0_i32_0 : i32, i32
  }
  func.func @transform_3(%arg0: i32) -> (i32, i32) {
    %c0_i32 = arith.constant 0 : i32
    %c0_i32_0 = arith.constant 0 : i32
    %c0_i32_1 = arith.constant 0 : i32
    return %c0_i32, %c0_i32_0 : i32, i32
  }
  func.func @transform_4(%arg0: i32) -> (i32, i32) {
    %c0_i32 = arith.constant 0 : i32
    %c0_i32_0 = arith.constant 0 : i32
    %c0_i32_1 = arith.constant 0 : i32
    return %c0_i32, %c0_i32_0 : i32, i32
  }
  func.func @transform_5(%arg0: i32) -> (i32, i32) {
    %c0_i32 = arith.constant 0 : i32
    %c0_i32_0 = arith.constant 0 : i32
    %c0_i32_1 = arith.constant 0 : i32
    return %c0_i32, %c0_i32_0 : i32, i32
  }
  func.func @transform_6(%arg0: i32) -> (i32, i32) {
    %c0_i32 = arith.constant 0 : i32
    %c0_i32_0 = arith.constant 0 : i32
    return %arg0, %c0_i32 : i32, i32
  }
}

</mosaic_0001>

<bundles_post_ra>
// kernel: tpu_custom_call.1
= control target key start
LH: loop header
LB: loop body
LE: loop exit
PB: predicated region body
PF: predicated region fallthrough
CT: control target
= control target key end

     0   :  { %s13774_s0 = inlined_call_operand.hbm [shape: bf16[1,1024,128], index: 0, kind: input, shape index: {}]   ;;  %s13775_s1 = inlined_call_operand.hbm [shape: bf16[128,512], index: 1, kind: input, shape index: {}]   ;;  %s13776_s2 = inlined_call_operand.hbm [shape: bf16[128,512], index: 2, kind: input, shape index: {}]   ;;  %s13777_s3 = inlined_call_operand.hbm [shape: f32[1,512], index: 3, kind: input, shape index: {}]   ;;  %s13778_s4 = inlined_call_operand.hbm [shape: f32[1,128], index: 4, kind: input, shape index: {}]   ;;  %s13779_s5 = inlined_call_operand.<no memory space> [shape: f32[1,1], index: 5, kind: input, shape index: {}]   ;;  %s13780_s6 = inlined_call_operand.hbm [shape: f32[128,1], index: 6, kind: output, shape index: {}]  }
   0x1   :  { %v11_v0 = vstv %s13779_s5 }
   0x2   :  { %12 = vst [vmem:[#allocation3] sm:$0x1] %v11_v0 }
   0x3   :  { %13 = vsyncpa [#allocation5], 0 }
   0x4   :  { %14 = vsyncpa [#allocation8], 0 }
   0x5   :  { %15 = vsyncpa [#allocation11], 0 }
   0x6   :  { %16 = vsyncpa [#allocation6], 0  ;;  %s10503_s23 = smov [#allocation7]   ;;  %s10363_s27 = scalar_lea.hbm %s13775_s1, 4096 }
   0x7   :  { %s34_s24 = sshll.u32 %s10503_s23, 4  ;;  %p10364_p0 = scmp.ne.s32.totalorder %s13775_s1, %s10363_s27  ;;  %s35_s24 = int_to_ptr.vmem [resolvable:$true] %s34_s24 }
   0x8   :  { %p10367_p1 = scmp.lt.u32.totalorder %s10363_s27, %s13775_s1 }
   0xa   :  { %p10369_p2 = pnand %p10367_p1, %p10364_p0 }
   0xc   :  { %10372 = shalt.err (!%p10369_p2)
}
   0xd   :  { %s10373_s5 = scalar_lea.vmem %s35_s24, 4096  ;;  %p10378_p4 = scmp.lt.s32.totalorder %s35_s24, %s35_s24 }
   0xe   :  { %p10374_p3 = scmp.ne.s32.totalorder %s35_s24, %s10373_s5  ;;  %p10379_p5 = scmp.lt.s32.totalorder %s10373_s5, %s10373_s5 }
  0x10   :  { %p10380_p6 = por %p10379_p5, %p10378_p4 }
  0x12   :  { %p10381_p7 = pnand %p10380_p6, %p10374_p3 }
  0x14   :  { %10384 = shalt.err (!%p10381_p7)
}
  0x15   :  { %s10504_s8 = smov 256   ;;  %s10505_s9 = smov 16  }
  0x16   :  { %40 = dma.hbm_to_vmem [thread:$0]  %s13775_s1, 4096, %s35_s24, [#allocation8], %s10504_s8, %s10504_s8, %s10505_s9  }
  0x17   :  { %s10506_s12 = smov [#allocation10]   ;;  %s10507_s14 = smov [#allocation4]  }
  0x18   :  { %s59_s13 = sshll.u32 %s10506_s12, 4  ;;  %s22_s15 = sshll.u32 %s10507_s14, 4  ;;  %s60_s13 = int_to_ptr.vmem [resolvable:$true] %s59_s13  ;;  %s23_s15 = int_to_ptr.vmem [resolvable:$true] %s22_s15 }
  0x19   :  { %s10385_s18 = scalar_lea.hbm %s13777_s3, 64 }
  0x1a   :  { %p10386_p8 = scmp.ne.s32.totalorder %s13777_s3, %s10385_s18  ;;  %p10389_p9 = scmp.lt.u32.totalorder %s10385_s18, %s13777_s3 }
  0x1c   :  { %p10391_p10 = pnand %p10389_p9, %p10386_p8 }
  0x1e   :  { %10394 = shalt.err (!%p10391_p10)
}
  0x1f   :  { %s10395_s1 = scalar_lea.vmem %s60_s13, 64  ;;  %p10400_p12 = scmp.lt.s32.totalorder %s60_s13, %s60_s13 }
  0x20   :  { %p10396_p11 = scmp.ne.s32.totalorder %s60_s13, %s10395_s1  ;;  %p10401_p13 = scmp.lt.s32.totalorder %s10395_s1, %s10395_s1 }
  0x22   :  { %p10402_p0 = por %p10401_p13, %p10400_p12 }
  0x24   :  { %p10403_p1 = pnand %p10402_p0, %p10396_p11 }
  0x26   :  { %10406 = shalt.err (!%p10403_p1)
}
  0x27   :  { %62 = dma.hbm_to_vmem [thread:$0]  %s13777_s3, 64, %s60_s13, [#allocation11]  }
  0x28   :  { %s10407_s27 = scalar_lea.hbm %s13774_s0, 8192 }
  0x29   :  { %p10408_p2 = scmp.ne.s32.totalorder %s13774_s0, %s10407_s27  ;;  %p10411_p3 = scmp.lt.u32.totalorder %s10407_s27, %s13774_s0 }
  0x2b   :  { %p10413_p4 = pnand %p10411_p3, %p10408_p2 }
  0x2d   :  { %10416 = shalt.err (!%p10413_p4)
}
  0x2e   :  { %s10417_s5 = scalar_lea.vmem %s23_s15, 8192  ;;  %p10422_p6 = scmp.lt.s32.totalorder %s23_s15, %s23_s15 }
  0x2f   :  { %p10418_p5 = scmp.ne.s32.totalorder %s23_s15, %s10417_s5  ;;  %p10423_p7 = scmp.lt.s32.totalorder %s10417_s5, %s10417_s5 }
  0x31   :  { %p10424_p8 = por %p10423_p7, %p10422_p6 }
  0x33   :  { %p10425_p9 = pnand %p10424_p8, %p10418_p5 }
  0x35   :  { %10428 = shalt.err (!%p10425_p9)
}
  0x36   :  { %s10508_s3 = smov 64   ;;  %s10509_s10 = smov 4  }
  0x37   :  { %28 = dma.hbm_to_vmem [thread:$0]  %s13774_s0, 8192, %s23_s15, [#allocation5], %s10508_s3, %s10508_s3, %s10509_s10  }
  0x38   :  { %s10510_s13 = smov [#allocation9]   ;;  %s10511_s16 = smov [#allocation12]  }
  0x39   :  { %s46_s14 = sshll.u32 %s10510_s13, 4  ;;  %s69_s17 = sshll.u32 %s10511_s16, 4  ;;  %s47_s14 = int_to_ptr.vmem [resolvable:$true] %s46_s14  ;;  %s70_s17 = int_to_ptr.vmem [resolvable:$true] %s69_s17 }
  0x3a   :  { %s10429_s20 = scalar_lea.hbm %s13776_s2, 4096 }
  0x3b   :  { %p10430_p10 = scmp.ne.s32.totalorder %s13776_s2, %s10429_s20  ;;  %p10433_p11 = scmp.lt.u32.totalorder %s10429_s20, %s13776_s2 }
  0x3d   :  { %p10435_p12 = pnand %p10433_p11, %p10430_p10 }
  0x3f   :  { %10438 = shalt.err (!%p10435_p12)
}
  0x40   :  { %s10439_s0 = scalar_lea.vmem %s47_s14, 4096  ;;  %p10444_p0 = scmp.lt.s32.totalorder %s47_s14, %s47_s14 }
  0x41   :  { %p10440_p13 = scmp.ne.s32.totalorder %s47_s14, %s10439_s0  ;;  %p10445_p1 = scmp.lt.s32.totalorder %s10439_s0, %s10439_s0 }
  0x43   :  { %p10446_p2 = por %p10445_p1, %p10444_p0 }
  0x45   :  { %p10447_p3 = pnand %p10446_p2, %p10440_p13 }
  0x47   :  { %10450 = shalt.err (!%p10447_p3)
}
  0x48   :  { %52 = dma.hbm_to_vmem [thread:$0]  %s13776_s2, 4096, %s47_s14, [#allocation8], %s10504_s8, %s10504_s8, %s10505_s9  }
  0x49   :  { %s10451_s27 = scalar_lea.hbm %s13778_s4, 16 }
  0x4a   :  { %p10452_p4 = scmp.ne.s32.totalorder %s13778_s4, %s10451_s27  ;;  %p10455_p5 = scmp.lt.u32.totalorder %s10451_s27, %s13778_s4 }
  0x4c   :  { %p10457_p6 = pnand %p10455_p5, %p10452_p4 }
  0x4e   :  { %10460 = shalt.err (!%p10457_p6)
}
  0x4f   :  { %s10461_s5 = scalar_lea.vmem %s70_s17, 16  ;;  %s10465_s3 = scalar_lea.vmem %s70_s17, 32 }
  0x50   :  { %p10462_p7 = scmp.ne.s32.totalorder %s70_s17, %s10461_s5  ;;  %p10466_p8 = scmp.lt.s32.totalorder %s70_s17, %s70_s17 }
  0x51   :  { %p10467_p9 = scmp.lt.s32.totalorder %s10465_s3, %s10461_s5 }
  0x53   :  { %p10468_p10 = por %p10467_p9, %p10466_p8 }
  0x55   :  { %p10469_p11 = pnand %p10468_p10, %p10462_p7 }
  0x57   :  { %10472 = shalt.err (!%p10469_p11)
}
  0x58   :  { %72 = dma.hbm_to_vmem [thread:$0]  %s13778_s4, 16, %s70_s17, [#allocation11]  }
  0x59   :  { %10495 = dma.done.wait [#allocation5], 8192  }
  0x5a   :  { %10496 = vsyncadd [#allocation5], 4294959104 }
  0x5b   :  { %10497 = dma.done.wait [#allocation8], 8192  }
  0x5c   :  { %10498 = vsyncadd [#allocation8], 4294959104 }
  0x5d   :  { %10499 = dma.done.wait [#allocation11], 80  }
  0x5e   :  { %10500 = vsyncadd [#allocation11], 4294967216  ;;  %v13781_v1 = vmov 0   ;;  %v8667_v2 = vld [vmem:[#allocation7 + $0x4] ss:$16 sps:$4 sm:$0xff]   ;;  %v8721_v43 = vld [vmem:[#allocation4 + $0x8] sm:$0xff]  }
  0x5f   :  { %849 = vmatprep.mubr.bf16.mxu0 %v13781_v1  ;;  %1522 = vmatprep.mubr.bf16.mxu1 %v13781_v1  ;;  %v8669_v3 = vld [vmem:[#allocation7 + $0xc] ss:$16 sps:$4 sm:$0xff]   ;;  %v8671_v4 = vld [vmem:[#allocation7] ss:$16 sps:$4 sm:$0xff]   ;;  %v8672_v5 = vld [vmem:[#allocation7 + $0x8] ss:$16 sps:$4 sm:$0xff]  }
  0x60   :  { %817 = vmatprep.subr.bf16.mxu0 %v8667_v2  ;;  %1490 = vmatprep.subr.bf16.mxu1 %v8669_v3  ;;  %v8673_v6 = vld [vmem:[#allocation7 + $0x24] ss:$16 sps:$4 sm:$0xff]   ;;  %v8675_v7 = vld [vmem:[#allocation7 + $0x2c] ss:$16 sps:$4 sm:$0xff]   ;;  %v8677_v8 = vld [vmem:[#allocation7 + $0x20] ss:$16 sps:$4 sm:$0xff]  }
  0x61   :  { %818 = vmatpush1.bf16.msra.mxu0 %v8671_v4  ;;  %1491 = vmatpush1.bf16.msra.mxu1 %v8672_v5  ;;  %v8678_v9 = vld [vmem:[#allocation7 + $0x28] ss:$16 sps:$4 sm:$0xff]   ;;  %v8679_v10 = vld [vmem:[#allocation7 + $0x44] ss:$16 sps:$4 sm:$0xff]   ;;  %v8681_v11 = vld [vmem:[#allocation7 + $0x4c] ss:$16 sps:$4 sm:$0xff]  }
  0x62   :  { %819 = vmatprep.subr.bf16.mxu0 %v8673_v6  ;;  %1492 = vmatprep.subr.bf16.mxu1 %v8675_v7  ;;  %v8683_v12 = vld [vmem:[#allocation7 + $0x40] ss:$16 sps:$4 sm:$0xff]   ;;  %v8684_v13 = vld [vmem:[#allocation7 + $0x48] ss:$16 sps:$4 sm:$0xff]   ;;  %v8685_v14 = vld [vmem:[#allocation7 + $0x64] ss:$16 sps:$4 sm:$0xff]  }
  0x63   :  { %v8687_v15 = vld [vmem:[#allocation7 + $0x6c] ss:$16 sps:$4 sm:$0xff]   ;;  %v8689_v16 = vld [vmem:[#allocation7 + $0x60] ss:$16 sps:$4 sm:$0xff]   ;;  %v8690_v17 = vld [vmem:[#allocation7 + $0x68] ss:$16 sps:$4 sm:$0xff]  }
  0x64   :  { %v8691_v18 = vld [vmem:[#allocation7 + $0x84] ss:$16 sps:$4 sm:$0xff]   ;;  %v8693_v19 = vld [vmem:[#allocation7 + $0x8c] ss:$16 sps:$4 sm:$0xff]   ;;  %v8695_v20 = vld [vmem:[#allocation7 + $0x80] ss:$16 sps:$4 sm:$0xff]  }
  0x65   :  { %820 = vmatpush1.bf16.msra.mxu0 %v8677_v8  ;;  %1493 = vmatpush1.bf16.msra.mxu1 %v8678_v9  ;;  %v8696_v21 = vld [vmem:[#allocation7 + $0x88] ss:$16 sps:$4 sm:$0xff]   ;;  %v8697_v22 = vld [vmem:[#allocation7 + $0xa4] ss:$16 sps:$4 sm:$0xff]   ;;  %v8699_v23 = vld [vmem:[#allocation7 + $0xac] ss:$16 sps:$4 sm:$0xff]  }
  0x66   :  { %821 = vmatprep.subr.bf16.mxu0 %v8679_v10  ;;  %1494 = vmatprep.subr.bf16.mxu1 %v8681_v11  ;;  %v8701_v24 = vld [vmem:[#allocation7 + $0xa0] ss:$16 sps:$4 sm:$0xff]   ;;  %v8702_v25 = vld [vmem:[#allocation7 + $0xa8] ss:$16 sps:$4 sm:$0xff]   ;;  %v8703_v26 = vld [vmem:[#allocation7 + $0xc4] ss:$16 sps:$4 sm:$0xff]  }
  0x67   :  { %v8705_v27 = vld [vmem:[#allocation7 + $0xcc] ss:$16 sps:$4 sm:$0xff]   ;;  %v8707_v28 = vld [vmem:[#allocation7 + $0xc0] ss:$16 sps:$4 sm:$0xff]   ;;  %v8708_v29 = vld [vmem:[#allocation7 + $0xc8] ss:$16 sps:$4 sm:$0xff]  }
  0x68   :  { %v8709_v30 = vld [vmem:[#allocation7 + $0xe4] ss:$16 sps:$4 sm:$0xff]   ;;  %v8711_v31 = vld [vmem:[#allocation7 + $0xec] ss:$16 sps:$4 sm:$0xff]   ;;  %v8713_v32 = vld [vmem:[#allocation7 + $0xe0] ss:$16 sps:$4 sm:$0xff]  }
  0x69   :  { %822 = vmatpush1.bf16.msra.mxu0 %v8683_v12  ;;  %1495 = vmatpush1.bf16.msra.mxu1 %v8684_v13  ;;  %v8714_v33 = vld [vmem:[#allocation7 + $0xe8] ss:$16 sps:$4 sm:$0xff]   ;;  %v8716_v34 = vld [vmem:[#allocation9 + $0x4] ss:$16 sps:$4 sm:$0xff]   ;;  %v8719_v35 = vld [vmem:[#allocation9 + $0xc] ss:$16 sps:$4 sm:$0xff]  }
  0x6a   :  { %823 = vmatprep.subr.bf16.mxu0 %v8685_v14  ;;  %1496 = vmatprep.subr.bf16.mxu1 %v8687_v15  ;;  %v8715_v36 = vld [vmem:[#allocation4] sm:$0xff]   ;;  %v8722_v38 = vld [vmem:[#allocation9 + $0x8] ss:$16 sps:$4 sm:$0xff]   ;;  %v8733_v40 = vld [vmem:[#allocation9 + $0x2c] ss:$16 sps:$4 sm:$0xff]   ;;  %vm8481_vm0 = vcmask 7168  }
  0x6b   :  { %v8718_v37 = vld [vmem:[#allocation9] ss:$16 sps:$4 sm:$0xff]   ;;  %v8730_v39 = vld [vmem:[#allocation9 + $0x24] ss:$16 sps:$4 sm:$0xff]   ;;  %v8736_v42 = vld [vmem:[#allocation9 + $0x28] ss:$16 sps:$4 sm:$0xff]  }
  0x6c   :  { %v8732_v41 = vld [vmem:[#allocation9 + $0x20] ss:$16 sps:$4 sm:$0xff]   ;;  %v8744_v44 = vld [vmem:[#allocation9 + $0x44] ss:$16 sps:$4 sm:$0xff]   ;;  %v8747_v46 = vld [vmem:[#allocation9 + $0x4c] ss:$16 sps:$4 sm:$0xff]  }
  0x6d   :  { %824 = vmatpush1.bf16.msra.mxu0 %v8689_v16  ;;  %1497 = vmatpush1.bf16.msra.mxu1 %v8690_v17  ;;  %v8746_v45 = vld [vmem:[#allocation9 + $0x40] ss:$16 sps:$4 sm:$0xff]   ;;  %v8750_v48 = vld [vmem:[#allocation9 + $0x48] ss:$16 sps:$4 sm:$0xff]   ;;  %v8758_v55 = vld [vmem:[#allocation9 + $0x64] ss:$16 sps:$4 sm:$0xff]  }
  0x6e   :  { %825 = vmatprep.subr.bf16.mxu0 %v8691_v18  ;;  %1498 = vmatprep.subr.bf16.mxu1 %v8693_v19  ;;  %v8723_v47 = vld [vmem:[#allocation4 + $0x10] sm:$0xff]   ;;  %v8724_v49 = vld [vmem:[#allocation4 + $0x18] sm:$0xff]   ;;  %v8725_v50 = vld [vmem:[#allocation4 + $0x20] sm:$0xff]   ;;  %v253_v19 = vlaneseq  ;;  %s10513_s4 = smov [#allocation13]  }
  0x6f   :  { %v8726_v51 = vld [vmem:[#allocation4 + $0x28] sm:$0xff]   ;;  %v8727_v52 = vld [vmem:[#allocation4 + $0x30] sm:$0xff]   ;;  %v8728_v53 = vld [vmem:[#allocation4 + $0x38] sm:$0xff]   ;;  %s8503_s9 = sshll.u32 %s10513_s4, 4  ;;  %s8504_s9 = int_to_ptr.vmem [resolvable:$true] %s8503_s9 }
  0x70   :  { %v8729_v54 = vld [vmem:[#allocation4 + $0x40] sm:$0xff]   ;;  %v8761_v57 = vld [vmem:[#allocation9 + $0x6c] ss:$16 sps:$4 sm:$0xff]   ;;  %v8764_v59 = vld [vmem:[#allocation9 + $0x68] ss:$16 sps:$4 sm:$0xff]   ;;  %s10473_s10 = scalar_lea.vmem %s8504_s9, 2048  ;;  %p10478_p13 = scmp.lt.s32.totalorder %s8504_s9, %s8504_s9 }
  0x71   :  { %826 = vmatpush1.bf16.msra.mxu0 %v8695_v20  ;;  %1499 = vmatpush1.bf16.msra.mxu1 %v8696_v21  ;;  %v8760_v56 = vld [vmem:[#allocation9 + $0x60] ss:$16 sps:$4 sm:$0xff]   ;;  %v8735_v58 = vld [vmem:[#allocation4 + $0x48] sm:$0xff]   ;;  %v8738_v61 = vld [vmem:[#allocation4 + $0x58] sm:$0xff]   ;;  %p10474_p12 = scmp.ne.s32.totalorder %s8504_s9, %s10473_s10  ;;  %p10479_p0 = scmp.lt.s32.totalorder %s10473_s10, %s10473_s10 }
  0x72   :  { %827 = vmatprep.subr.bf16.mxu0 %v8697_v22  ;;  %1500 = vmatprep.subr.bf16.mxu1 %v8699_v23  ;;  %v8737_v60 = vld [vmem:[#allocation4 + $0x50] sm:$0xff]   ;;  %v8739_v62 = vld [vmem:[#allocation4 + $0x60] sm:$0xff]   ;;  %v8740_v63 = vld [vmem:[#allocation4 + $0x68] sm:$0xff]   ;;  %v254_v22 = vshrl.u32 %v253_v19, 7 }
  0x73   :  { %v8741_v0 = vld [vmem:[#allocation4 + $0x70] sm:$0xff]   ;;  %v8742_v2 = vld [vmem:[#allocation4 + $0x78] sm:$0xff]   ;;  %v8743_v3 = vld [vmem:[#allocation4 + $0x80] sm:$0xff]   ;;  %p10480_p1 = por %p10479_p0, %p10478_p13 }
  0x74   :  { %v8772_v4 = vld [vmem:[#allocation9 + $0x84] ss:$16 sps:$4 sm:$0xff]   ;;  %v8774_v5 = vld [vmem:[#allocation9 + $0x80] ss:$16 sps:$4 sm:$0xff]   ;;  %v8749_v6 = vld [vmem:[#allocation4 + $0x88] sm:$0xff]  }
  0x75   :  { %828 = vmatpush1.bf16.msra.mxu0 %v8701_v24  ;;  %1501 = vmatpush1.bf16.msra.mxu1 %v8702_v25  ;;  %v8775_v7 = vld [vmem:[#allocation9 + $0x8c] ss:$16 sps:$4 sm:$0xff]   ;;  %v8778_v8 = vld [vmem:[#allocation9 + $0x88] ss:$16 sps:$4 sm:$0xff]   ;;  %v8751_v9 = vld [vmem:[#allocation4 + $0x90] sm:$0xff]   ;;  %v263_v24 = vsub.s32 2, %v254_v22  ;;  %p10481_p2 = pnand %p10480_p1, %p10474_p12 }
  0x76   :  { %829 = vmatprep.subr.bf16.mxu0 %v8703_v26  ;;  %1502 = vmatprep.subr.bf16.mxu1 %v8705_v27  ;;  %v8752_v10 = vld [vmem:[#allocation4 + $0x98] sm:$0xff]   ;;  %v8753_v11 = vld [vmem:[#allocation4 + $0xa0] sm:$0xff]   ;;  %v8754_v12 = vld [vmem:[#allocation4 + $0xa8] sm:$0xff]   ;;  %v267_v25 = vsub.s32 3, %v254_v22  ;;  %v255_v26 = vsub.s32 0, %v254_v22 }
  0x77   :  { %v8755_v13 = vld [vmem:[#allocation4 + $0xb0] sm:$0xff]   ;;  %v8756_v14 = vld [vmem:[#allocation4 + $0xb8] sm:$0xff]   ;;  %v8757_v15 = vld [vmem:[#allocation4 + $0xc0] sm:$0xff]  }
  0x78   :  { %v8786_v16 = vld [vmem:[#allocation9 + $0xa4] ss:$16 sps:$4 sm:$0xff]   ;;  %v8788_v17 = vld [vmem:[#allocation9 + $0xa0] ss:$16 sps:$4 sm:$0xff]   ;;  %v8763_v18 = vld [vmem:[#allocation4 + $0xc8] sm:$0xff]  }
  0x79   :  { %830 = vmatpush1.bf16.msra.mxu0 %v8707_v28  ;;  %1503 = vmatpush1.bf16.msra.mxu1 %v8708_v29  ;;  %v8789_v20 = vld [vmem:[#allocation9 + $0xac] ss:$16 sps:$4 sm:$0xff]   ;;  %v8792_v21 = vld [vmem:[#allocation9 + $0xa8] ss:$16 sps:$4 sm:$0xff]   ;;  %v8765_v23 = vld [vmem:[#allocation4 + $0xd0] sm:$0xff]   ;;  %v259_v28 = vsub.s32 1, %v254_v22 }
  0x7a   :  { %831 = vmatprep.subr.bf16.mxu0 %v8709_v30  ;;  %1504 = vmatprep.subr.bf16.mxu1 %v8711_v31  ;;  %v251_v27 = vld [vmem:[#allocation10] sm:$0xf] }
  0x7b   :  { %v10674_v29 = vrot.slane %v251_v27, %v263_v24  ;;  %v10678_v30 = vrot.slane %v251_v27, %v267_v25  ;;  %v10680_v31 = vrot.slane %v251_v27, %v255_v26 }
  0x7d   :  { %832 = vmatpush1.bf16.msra.mxu0 %v8713_v32  ;;  %1505 = vmatpush1.bf16.msra.mxu1 %v8714_v33  ;;  %v10682_v33 = vrot.slane %v251_v27, %v259_v28 }
  0x7e   :  { %2902 = vmatprep.subr.bf16.mxu0 %v8716_v34  ;;  %3015 = vmatprep.subr.bf16.mxu1 %v8719_v35 }
  0x80   :  { %850 = vmatmul.mubr.bf16.vlgmr.msra.gmra.mrb[0].mxu0 %v8715_v36  ;;  %1523 = vmatmul.mubr.bf16.vlgmr.msra.gmra.mrb[0].mxu1 %v8715_v36  ;;  %v8766_v36 = vld [vmem:[#allocation4 + $0xd8] sm:$0xff]  }
  0x81   :  { %2903 = vmatpush1.bf16.msra.mxu0 %v8718_v37  ;;  %859 = vmatprep.mubr.bf16.mxu0 %v13781_v1 }
  0x82   :  { %1532 = vmatprep.mubr.bf16.mxu1 %v13781_v1  ;;  %3016 = vmatpush1.bf16.msra.mxu1 %v8722_v38 }
  0x83   :  { %2904 = vmatprep.subr.bf16.mxu0 %v8730_v39  ;;  %3017 = vmatprep.subr.bf16.mxu1 %v8733_v40 }
  0x85   :  { %2905 = vmatpush1.bf16.msra.mxu0 %v8732_v41 }
  0x86   :  { %3018 = vmatpush1.bf16.msra.mxu1 %v8736_v42  ;;  %2906 = vmatprep.subr.bf16.mxu0 %v8744_v44 }
  0x87   :  { %3019 = vmatprep.subr.bf16.mxu1 %v8747_v46 }
  0x88   :  { %860 = vmatmul.mubr.bf16.gmra.mrb[4].mxu0 %v8721_v43  ;;  %1533 = vmatmul.mubr.bf16.gmra.mrb[4].mxu1 %v8721_v43 }
  0x89   :  { %869 = vmatprep.mubr.bf16.mxu0 %v13781_v1  ;;  %1542 = vmatprep.mubr.bf16.mxu1 %v13781_v1 }
  0x8a   :  { %2907 = vmatpush1.bf16.msra.mxu0 %v8746_v45  ;;  %3020 = vmatpush1.bf16.msra.mxu1 %v8750_v48 }
  0x8b   :  { %2908 = vmatprep.subr.bf16.mxu0 %v8758_v55  ;;  %3021 = vmatprep.subr.bf16.mxu1 %v8761_v57  ;;  %v8767_v57 = vld [vmem:[#allocation4 + $0xe0] sm:$0xff]  }
  0x8e   :  { %2909 = vmatpush1.bf16.msra.mxu0 %v8760_v56  ;;  %3022 = vmatpush1.bf16.msra.mxu1 %v8764_v59 }
  0x8f   :  { %2910 = vmatprep.subr.bf16.mxu0 %v8772_v4  ;;  %3023 = vmatprep.subr.bf16.mxu1 %v8775_v7 }
  0x90   :  { %870 = vmatmul.mubr.bf16.gmra.mrb[8].mxu0 %v8723_v47  ;;  %1543 = vmatmul.mubr.bf16.gmra.mrb[8].mxu1 %v8723_v47 }
  0x91   :  { %879 = vmatprep.mubr.bf16.mxu0 %v13781_v1  ;;  %1552 = vmatprep.mubr.bf16.mxu1 %v13781_v1 }
  0x92   :  { %2911 = vmatpush1.bf16.msra.mxu0 %v8774_v5  ;;  %3024 = vmatpush1.bf16.msra.mxu1 %v8778_v8 }
  0x93   :  { %2912 = vmatprep.subr.bf16.mxu0 %v8786_v16  ;;  %3025 = vmatprep.subr.bf16.mxu1 %v8789_v20 }
  0x96   :  { %2913 = vmatpush1.bf16.msra.mxu0 %v8788_v17  ;;  %3026 = vmatpush1.bf16.msra.mxu1 %v8792_v21 }
  0x98   :  { %880 = vmatmul.mubr.bf16.gmra.mrb[12].mxu0 %v8724_v49  ;;  %1553 = vmatmul.mubr.bf16.gmra.mrb[12].mxu1 %v8724_v49 }
  0x99   :  { %889 = vmatprep.mubr.bf16.mxu0 %v13781_v1  ;;  %1562 = vmatprep.mubr.bf16.mxu1 %v13781_v1 }
  0xa0   :  { %890 = vmatmul.mubr.bf16.gmra.mrb[16].mxu0 %v8725_v50  ;;  %1563 = vmatmul.mubr.bf16.gmra.mrb[16].mxu1 %v8725_v50 }
  0xa1   :  { %899 = vmatprep.mubr.bf16.mxu0 %v13781_v1  ;;  %1572 = vmatprep.mubr.bf16.mxu1 %v13781_v1 }
  0xa8   :  { %900 = vmatmul.mubr.bf16.gmra.mrb[20].mxu0 %v8726_v51  ;;  %1573 = vmatmul.mubr.bf16.gmra.mrb[20].mxu1 %v8726_v51 }
  0xa9   :  { %909 = vmatprep.mubr.bf16.mxu0 %v13781_v1  ;;  %1582 = vmatprep.mubr.bf16.mxu1 %v13781_v1 }
  0xb0   :  { %910 = vmatmul.mubr.bf16.gmra.mrb[24].mxu0 %v8727_v52  ;;  %1583 = vmatmul.mubr.bf16.gmra.mrb[24].mxu1 %v8727_v52 }
  0xb1   :  { %919 = vmatprep.mubr.bf16.mxu0 %v13781_v1  ;;  %1592 = vmatprep.mubr.bf16.mxu1 %v13781_v1 }
  0xb8   :  { %920 = vmatmul.mubr.bf16.gmra.mrb[28].mxu0 %v8728_v53  ;;  %1593 = vmatmul.mubr.bf16.gmra.mrb[28].mxu1 %v8728_v53 }
  0xb9   :  { %929 = vmatprep.mubr.bf16.mxu0 %v13781_v1  ;;  %1602 = vmatprep.mubr.bf16.mxu1 %v13781_v1 }
  0xc0   :  { %930 = vmatmul.mubr.bf16.gmra.mrb[32].mxu0 %v8729_v54  ;;  %1603 = vmatmul.mubr.bf16.gmra.mrb[32].mxu1 %v8729_v54 }
  0xc1   :  { %939 = vmatprep.mubr.bf16.mxu0 %v13781_v1  ;;  %1612 = vmatprep.mubr.bf16.mxu1 %v13781_v1 }
  0xc8   :  { %940 = vmatmul.mubr.bf16.gmra.mrb[36].mxu0 %v8735_v58  ;;  %1613 = vmatmul.mubr.bf16.gmra.mrb[36].mxu1 %v8735_v58 }
  0xc9   :  { %949 = vmatprep.mubr.bf16.mxu0 %v13781_v1  ;;  %1622 = vmatprep.mubr.bf16.mxu1 %v13781_v1 }
  0xd0   :  { %950 = vmatmul.mubr.bf16.gmra.mrb[40].mxu0 %v8737_v60  ;;  %1623 = vmatmul.mubr.bf16.gmra.mrb[40].mxu1 %v8737_v60 }
  0xd1   :  { %959 = vmatprep.mubr.bf16.mxu0 %v13781_v1  ;;  %1632 = vmatprep.mubr.bf16.mxu1 %v13781_v1 }
  0xd8   :  { %960 = vmatmul.mubr.bf16.gmra.mrb[44].mxu0 %v8738_v61  ;;  %1633 = vmatmul.mubr.bf16.gmra.mrb[44].mxu1 %v8738_v61 }
  0xd9   :  { %969 = vmatprep.mubr.bf16.mxu0 %v13781_v1  ;;  %1642 = vmatprep.mubr.bf16.mxu1 %v13781_v1 }
  0xe0   :  { %970 = vmatmul.mubr.bf16.gmra.mrb[48].mxu0 %v8739_v62  ;;  %1643 = vmatmul.mubr.bf16.gmra.mrb[48].mxu1 %v8739_v62 }
  0xe1   :  { %979 = vmatprep.mubr.bf16.mxu0 %v13781_v1  ;;  %1652 = vmatprep.mubr.bf16.mxu1 %v13781_v1 }
  0xe8   :  { %980 = vmatmul.mubr.bf16.gmra.mrb[52].mxu0 %v8740_v63  ;;  %1653 = vmatmul.mubr.bf16.gmra.mrb[52].mxu1 %v8740_v63 }
  0xe9   :  { %989 = vmatprep.mubr.bf16.mxu0 %v13781_v1  ;;  %1662 = vmatprep.mubr.bf16.mxu1 %v13781_v1 }
  0xf0   :  { %990 = vmatmul.mubr.bf16.gmra.mrb[56].mxu0 %v8741_v0  ;;  %1663 = vmatmul.mubr.bf16.gmra.mrb[56].mxu1 %v8741_v0 }
  0xf1   :  { %999 = vmatprep.mubr.bf16.mxu0 %v13781_v1  ;;  %1672 = vmatprep.mubr.bf16.mxu1 %v13781_v1 }
  0xf8   :  { %1000 = vmatmul.mubr.bf16.gmra.mrb[60].mxu0 %v8742_v2  ;;  %1673 = vmatmul.mubr.bf16.gmra.mrb[60].mxu1 %v8742_v2 }
  0xf9   :  { %1009 = vmatprep.mubr.bf16.mxu0 %v13781_v1  ;;  %1682 = vmatprep.mubr.bf16.mxu1 %v13781_v1 }
 0x100   :  { %1010 = vmatmul.mubr.bf16.gmra.mrb[64].mxu0 %v8743_v3  ;;  %1683 = vmatmul.mubr.bf16.gmra.mrb[64].mxu1 %v8743_v3 }
 0x101   :  { %1019 = vmatprep.mubr.bf16.mxu0 %v13781_v1  ;;  %1692 = vmatprep.mubr.bf16.mxu1 %v13781_v1 }
 0x108   :  { %1020 = vmatmul.mubr.bf16.gmra.mrb[68].mxu0 %v8749_v6  ;;  %1693 = vmatmul.mubr.bf16.gmra.mrb[68].mxu1 %v8749_v6 }
 0x109   :  { %1029 = vmatprep.mubr.bf16.mxu0 %v13781_v1  ;;  %1702 = vmatprep.mubr.bf16.mxu1 %v13781_v1 }
 0x110   :  { %1030 = vmatmul.mubr.bf16.gmra.mrb[72].mxu0 %v8751_v9  ;;  %1703 = vmatmul.mubr.bf16.gmra.mrb[72].mxu1 %v8751_v9 }
 0x111   :  { %1039 = vmatprep.mubr.bf16.mxu0 %v13781_v1  ;;  %1712 = vmatprep.mubr.bf16.mxu1 %v13781_v1 }
 0x118   :  { %1040 = vmatmul.mubr.bf16.gmra.mrb[76].mxu0 %v8752_v10  ;;  %1713 = vmatmul.mubr.bf16.gmra.mrb[76].mxu1 %v8752_v10 }
 0x119   :  { %1049 = vmatprep.mubr.bf16.mxu0 %v13781_v1  ;;  %1722 = vmatprep.mubr.bf16.mxu1 %v13781_v1 }
 0x120   :  { %1050 = vmatmul.mubr.bf16.gmra.mrb[80].mxu0 %v8753_v11  ;;  %1723 = vmatmul.mubr.bf16.gmra.mrb[80].mxu1 %v8753_v11 }
 0x121   :  { %1059 = vmatprep.mubr.bf16.mxu0 %v13781_v1  ;;  %1732 = vmatprep.mubr.bf16.mxu1 %v13781_v1 }
 0x128   :  { %1060 = vmatmul.mubr.bf16.gmra.mrb[84].mxu0 %v8754_v12  ;;  %1733 = vmatmul.mubr.bf16.gmra.mrb[84].mxu1 %v8754_v12 }
 0x129   :  { %1069 = vmatprep.mubr.bf16.mxu0 %v13781_v1  ;;  %1742 = vmatprep.mubr.bf16.mxu1 %v13781_v1 }
 0x130   :  { %1070 = vmatmul.mubr.bf16.gmra.mrb[88].mxu0 %v8755_v13  ;;  %1743 = vmatmul.mubr.bf16.gmra.mrb[88].mxu1 %v8755_v13 }
 0x131   :  { %1079 = vmatprep.mubr.bf16.mxu0 %v13781_v1  ;;  %1752 = vmatprep.mubr.bf16.mxu1 %v13781_v1 }
 0x138   :  { %1080 = vmatmul.mubr.bf16.gmra.mrb[92].mxu0 %v8756_v14  ;;  %1753 = vmatmul.mubr.bf16.gmra.mrb[92].mxu1 %v8756_v14 }
 0x139   :  { %1089 = vmatprep.mubr.bf16.mxu0 %v13781_v1  ;;  %1762 = vmatprep.mubr.bf16.mxu1 %v13781_v1 }
 0x140   :  { %1090 = vmatmul.mubr.bf16.gmra.mrb[96].mxu0 %v8757_v15  ;;  %1763 = vmatmul.mubr.bf16.gmra.mrb[96].mxu1 %v8757_v15  ;;  %v8768_v15 = vld [vmem:[#allocation4 + $0xe8] sm:$0xff]  }
 0x141   :  { %1099 = vmatprep.mubr.bf16.mxu0 %v13781_v1  ;;  %1772 = vmatprep.mubr.bf16.mxu1 %v13781_v1 }
 0x148   :  { %1100 = vmatmul.mubr.bf16.gmra.mrb[100].mxu0 %v8763_v18  ;;  %1773 = vmatmul.mubr.bf16.gmra.mrb[100].mxu1 %v8763_v18 }
 0x149   :  { %1109 = vmatprep.mubr.bf16.mxu0 %v13781_v1  ;;  %1782 = vmatprep.mubr.bf16.mxu1 %v13781_v1 }
 0x150   :  { %1110 = vmatmul.mubr.bf16.gmra.mrb[104].mxu0 %v8765_v23  ;;  %1783 = vmatmul.mubr.bf16.gmra.mrb[104].mxu1 %v8765_v23 }
 0x151   :  { %1119 = vmatprep.mubr.bf16.mxu0 %v13781_v1  ;;  %1792 = vmatprep.mubr.bf16.mxu1 %v13781_v1 }
 0x153   :  { %v851_v32 = vpop.f32.mrb[0].mxu0  ;;  %v1524_v34 = vpop.f32.mrb[0].mxu1 }
 0x154   :  { %v853_v35 = vpop.f32.mrb[1].mxu0  ;;  %v1525_v37 = vadd.f32 %v1524_v34, %v10674_v29  ;;  %v1526_v38 = vpop.f32.mrb[1].mxu1  ;;  %v852_v42 = vadd.f32 %v851_v32, %v10680_v31 }
 0x155   :  { %v855_v39 = vpop.f32.mrb[2].mxu0  ;;  %v1527_v40 = vadd.f32 %v1526_v38, %v10678_v30  ;;  %v1528_v41 = vpop.f32.mrb[2].mxu1  ;;  %v854_v47 = vadd.f32 %v853_v35, %v10682_v33 }
 0x156   :  { %v856_v43 = vadd.f32 %v855_v39, %v10680_v31  ;;  %v857_v44 = vpop.f32.mrb[3].mxu0  ;;  %v1529_v45 = vadd.f32 %v1528_v41, %v10674_v29  ;;  %v1530_v46 = vpop.f32.mrb[3].mxu1 }
 0x157   :  { %v858_v48 = vadd.f32 %v857_v44, %v10682_v33  ;;  %v1531_v49 = vadd.f32 %v1530_v46, %v10678_v30 }
 0x158   :  { %1120 = vmatmul.mubr.bf16.gmra.mrb[108].mxu0 %v8766_v36  ;;  %1793 = vmatmul.mubr.bf16.gmra.mrb[108].mxu1 %v8766_v36  ;;  %v10692_v50 = vpack.c.bf16 %v856_v43, %v852_v42  ;;  %v10694_v51 = vpack.c.bf16 %v1529_v45, %v1525_v37 }
 0x159   :  { %1129 = vmatprep.mubr.bf16.mxu0 %v13781_v1  ;;  %1802 = vmatprep.mubr.bf16.mxu1 %v13781_v1  ;;  %v10698_v52 = vpack.c.bf16 %v858_v48, %v854_v47  ;;  %v10700_v53 = vpack.c.bf16 %v1531_v49, %v1527_v40  ;;  %v8769_v40 = vld [vmem:[#allocation4 + $0xf0] sm:$0xff]  }
 0x15b   :  { %v861_v54 = vpop.f32.mrb[4].mxu0  ;;  %v1534_v55 = vpop.f32.mrb[4].mxu1 }
 0x15c   :  { %v863_v56 = vpop.f32.mrb[5].mxu0  ;;  %v1535_v58 = vadd.f32 %v1534_v55, %v10674_v29  ;;  %v1536_v59 = vpop.f32.mrb[5].mxu1  ;;  %v862_v63 = vadd.f32 %v861_v54, %v10680_v31 }
 0x15d   :  { %v865_v60 = vpop.f32.mrb[6].mxu0  ;;  %v1537_v61 = vadd.f32 %v1536_v59, %v10678_v30  ;;  %v1538_v62 = vpop.f32.mrb[6].mxu1  ;;  %v864_v5 = vadd.f32 %v863_v56, %v10682_v33 }
 0x15e   :  { %v866_v0 = vadd.f32 %v865_v60, %v10680_v31  ;;  %v867_v2 = vpop.f32.mrb[7].mxu0  ;;  %v1539_v3 = vadd.f32 %v1538_v62, %v10674_v29  ;;  %v1540_v4 = vpop.f32.mrb[7].mxu1 }
 0x15f   :  { %v868_v6 = vadd.f32 %v867_v2, %v10682_v33  ;;  %v1541_v7 = vadd.f32 %v1540_v4, %v10678_v30  ;;  %v8770_v2 = vld [vmem:[#allocation4 + $0xf8] sm:$0xff]  }
 0x160   :  { %1130 = vmatmul.mubr.bf16.gmra.mrb[112].mxu0 %v8767_v57  ;;  %1803 = vmatmul.mubr.bf16.gmra.mrb[112].mxu1 %v8767_v57  ;;  %v10710_v8 = vpack.c.bf16 %v866_v0, %v862_v63  ;;  %v10712_v9 = vpack.c.bf16 %v1539_v3, %v1535_v58 }
 0x161   :  { %1139 = vmatprep.mubr.bf16.mxu0 %v13781_v1  ;;  %1812 = vmatprep.mubr.bf16.mxu1 %v13781_v1  ;;  %v10716_v10 = vpack.c.bf16 %v868_v6, %v864_v5  ;;  %v10718_v11 = vpack.c.bf16 %v1541_v7, %v1537_v61 }
 0x163   :  { %v871_v12 = vpop.f32.mrb[8].mxu0  ;;  %v1544_v13 = vpop.f32.mrb[8].mxu1 }
 0x164   :  { %v873_v14 = vpop.f32.mrb[9].mxu0  ;;  %v1545_v16 = vadd.f32 %v1544_v13, %v10674_v29  ;;  %v1546_v17 = vpop.f32.mrb[9].mxu1  ;;  %v872_v21 = vadd.f32 %v871_v12, %v10680_v31 }
 0x165   :  { %v875_v18 = vpop.f32.mrb[10].mxu0  ;;  %v1547_v19 = vadd.f32 %v1546_v17, %v10678_v30  ;;  %v1548_v20 = vpop.f32.mrb[10].mxu1  ;;  %v874_v26 = vadd.f32 %v873_v14, %v10682_v33 }
 0x166   :  { %v876_v22 = vadd.f32 %v875_v18, %v10680_v31  ;;  %v877_v23 = vpop.f32.mrb[11].mxu0  ;;  %v1549_v24 = vadd.f32 %v1548_v20, %v10674_v29  ;;  %v1550_v25 = vpop.f32.mrb[11].mxu1 }
 0x167   :  { %v878_v27 = vadd.f32 %v877_v23, %v10682_v33  ;;  %v1551_v28 = vadd.f32 %v1550_v25, %v10678_v30 }
 0x168   :  { %1140 = vmatmul.mubr.bf16.gmra.mrb[116].mxu0 %v8768_v15  ;;  %1813 = vmatmul.mubr.bf16.gmra.mrb[116].mxu1 %v8768_v15  ;;  %v10728_v32 = vpack.c.bf16 %v876_v22, %v872_v21  ;;  %v10730_v34 = vpack.c.bf16 %v1549_v24, %v1545_v16 }
 0x169   :  { %1149 = vmatprep.mubr.bf16.mxu0 %v13781_v1  ;;  %1822 = vmatprep.mubr.bf16.mxu1 %v13781_v1  ;;  %v10734_v35 = vpack.c.bf16 %v878_v27, %v874_v26  ;;  %v10736_v36 = vpack.c.bf16 %v1551_v28, %v1547_v19  ;;  %v8771_v27 = vld [vmem:[#allocation4 + $0x100] sm:$0xff]  }
 0x16b   :  { %v881_v37 = vpop.f32.mrb[12].mxu0  ;;  %v1554_v38 = vpop.f32.mrb[12].mxu1 }
 0x16c   :  { %v883_v39 = vpop.f32.mrb[13].mxu0  ;;  %v1555_v41 = vadd.f32 %v1554_v38, %v10674_v29  ;;  %v1556_v42 = vpop.f32.mrb[13].mxu1  ;;  %v882_v46 = vadd.f32 %v881_v37, %v10680_v31 }
 0x16d   :  { %v885_v43 = vpop.f32.mrb[14].mxu0  ;;  %v1557_v44 = vadd.f32 %v1556_v42, %v10678_v30  ;;  %v1558_v45 = vpop.f32.mrb[14].mxu1  ;;  %v884_v55 = vadd.f32 %v883_v39, %v10682_v33 }
 0x16e   :  { %v886_v47 = vadd.f32 %v885_v43, %v10680_v31  ;;  %v887_v48 = vpop.f32.mrb[15].mxu0  ;;  %v1559_v49 = vadd.f32 %v1558_v45, %v10674_v29  ;;  %v1560_v54 = vpop.f32.mrb[15].mxu1 }
 0x16f   :  { %v888_v56 = vadd.f32 %v887_v48, %v10682_v33  ;;  %v1561_v57 = vadd.f32 %v1560_v54, %v10678_v30  ;;  %v8802_v54 = vld [vmem:[#allocation9 + $0xc0] ss:$16 sps:$4 sm:$0xff]  }
 0x170   :  { %1150 = vmatmul.mubr.bf16.gmra.mrb[120].mxu0 %v8769_v40  ;;  %1823 = vmatmul.mubr.bf16.gmra.mrb[120].mxu1 %v8769_v40  ;;  %v10746_v58 = vpack.c.bf16 %v886_v47, %v882_v46  ;;  %v10748_v59 = vpack.c.bf16 %v1559_v49, %v1555_v41  ;;  %v8800_v49 = vld [vmem:[#allocation9 + $0xc4] ss:$16 sps:$4 sm:$0xff]  }
 0x171   :  { %1159 = vmatprep.mubr.bf16.mxu0 %v13781_v1  ;;  %1832 = vmatprep.mubr.bf16.mxu1 %v13781_v1  ;;  %v10752_v60 = vpack.c.bf16 %v888_v56, %v884_v55  ;;  %v10754_v61 = vpack.c.bf16 %v1561_v57, %v1557_v44 }
 0x172   :  { %2914 = vmatprep.subr.bf16.mxu0 %v8800_v49 }
 0x173   :  { %v891_v62 = vpop.f32.mrb[16].mxu0  ;;  %v1564_v63 = vpop.f32.mrb[16].mxu1  ;;  %2915 = vmatpush1.bf16.msra.mxu0 %v8802_v54 }
 0x174   :  { %v893_v0 = vpop.f32.mrb[17].mxu0  ;;  %v1565_v3 = vadd.f32 %v1564_v63, %v10674_v29  ;;  %v1566_v4 = vpop.f32.mrb[17].mxu1  ;;  %v892_v12 = vadd.f32 %v891_v62, %v10680_v31 }
 0x175   :  { %v895_v5 = vpop.f32.mrb[18].mxu0  ;;  %v1567_v6 = vadd.f32 %v1566_v4, %v10678_v30  ;;  %v1568_v7 = vpop.f32.mrb[18].mxu1  ;;  %v894_v17 = vadd.f32 %v893_v0, %v10682_v33 }
 0x176   :  { %v896_v13 = vadd.f32 %v895_v5, %v10680_v31  ;;  %v897_v14 = vpop.f32.mrb[19].mxu0  ;;  %v1569_v15 = vadd.f32 %v1568_v7, %v10674_v29  ;;  %v1570_v16 = vpop.f32.mrb[19].mxu1 }
 0x177   :  { %v898_v18 = vadd.f32 %v897_v14, %v10682_v33  ;;  %v1571_v19 = vadd.f32 %v1570_v16, %v10678_v30 }
 0x178   :  { %1160 = vmatmul.mubr.bf16.gmra.mrb[124].mxu0 %v8770_v2  ;;  %1833 = vmatmul.mubr.bf16.gmra.mrb[124].mxu1 %v8770_v2  ;;  %v10764_v20 = vpack.c.bf16 %v896_v13, %v892_v12  ;;  %v10766_v21 = vpack.c.bf16 %v1569_v15, %v1565_v3  ;;  %v8777_v3 = vld [vmem:[#allocation4 + $0x108] sm:$0xff]  }
 0x179   :  { %1169 = vmatprep.mubr.bf16.mxu0 %v13781_v1  ;;  %1842 = vmatprep.mubr.bf16.mxu1 %v13781_v1  ;;  %v10770_v22 = vpack.c.bf16 %v898_v18, %v894_v17  ;;  %v10772_v23 = vpack.c.bf16 %v1571_v19, %v1567_v6 }
 0x17b   :  { %v901_v24 = vpop.f32.mrb[20].mxu0  ;;  %v1574_v25 = vpop.f32.mrb[20].mxu1 }
 0x17c   :  { %v903_v26 = vpop.f32.mrb[21].mxu0  ;;  %v1575_v28 = vadd.f32 %v1574_v25, %v10674_v29  ;;  %v1576_v37 = vpop.f32.mrb[21].mxu1  ;;  %v902_v41 = vadd.f32 %v901_v24, %v10680_v31  ;;  %v8803_v25 = vld [vmem:[#allocation9 + $0xcc] ss:$16 sps:$4 sm:$0xff]  }
 0x17d   :  { %v905_v38 = vpop.f32.mrb[22].mxu0  ;;  %v1577_v39 = vadd.f32 %v1576_v37, %v10678_v30  ;;  %v1578_v40 = vpop.f32.mrb[22].mxu1  ;;  %v904_v46 = vadd.f32 %v903_v26, %v10682_v33  ;;  %v8806_v26 = vld [vmem:[#allocation9 + $0xc8] ss:$16 sps:$4 sm:$0xff]   ;;  %3027 = vmatprep.subr.bf16.mxu1 %v8803_v25 }
 0x17e   :  { %v906_v42 = vadd.f32 %v905_v38, %v10680_v31  ;;  %v907_v43 = vpop.f32.mrb[23].mxu0  ;;  %v1579_v44 = vadd.f32 %v1578_v40, %v10674_v29  ;;  %v1580_v45 = vpop.f32.mrb[23].mxu1  ;;  %3028 = vmatpush1.bf16.msra.mxu1 %v8806_v26 }
 0x17f   :  { %v908_v47 = vadd.f32 %v907_v43, %v10682_v33  ;;  %v1581_v48 = vadd.f32 %v1580_v45, %v10678_v30 }
 0x180   :  { %1170 = vmatmul.mubr.bf16.gmra.mrb[128].mxu0 %v8771_v27  ;;  %1843 = vmatmul.mubr.bf16.gmra.mrb[128].mxu1 %v8771_v27  ;;  %v10782_v55 = vpack.c.bf16 %v906_v42, %v902_v41  ;;  %v10784_v56 = vpack.c.bf16 %v1579_v44, %v1575_v28  ;;  %v8779_v42 = vld [vmem:[#allocation4 + $0x110] sm:$0xff]  }
 0x181   :  { %1179 = vmatprep.mubr.bf16.mxu0 %v13781_v1  ;;  %1852 = vmatprep.mubr.bf16.mxu1 %v13781_v1  ;;  %v10788_v57 = vpack.c.bf16 %v908_v47, %v904_v46  ;;  %v10790_v62 = vpack.c.bf16 %v1581_v48, %v1577_v39 }
 0x183   :  { %v911_v63 = vpop.f32.mrb[24].mxu0  ;;  %v1584_v0 = vpop.f32.mrb[24].mxu1 }
 0x184   :  { %v913_v2 = vpop.f32.mrb[25].mxu0  ;;  %v1585_v4 = vadd.f32 %v1584_v0, %v10674_v29  ;;  %v1586_v5 = vpop.f32.mrb[25].mxu1  ;;  %v912_v13 = vadd.f32 %v911_v63, %v10680_v31 }
 0x185   :  { %v915_v6 = vpop.f32.mrb[26].mxu0  ;;  %v1587_v7 = vadd.f32 %v1586_v5, %v10678_v30  ;;  %v1588_v12 = vpop.f32.mrb[26].mxu1  ;;  %v914_v18 = vadd.f32 %v913_v2, %v10682_v33 }
 0x186   :  { %v916_v14 = vadd.f32 %v915_v6, %v10680_v31  ;;  %v917_v15 = vpop.f32.mrb[27].mxu0  ;;  %v1589_v16 = vadd.f32 %v1588_v12, %v10674_v29  ;;  %v1590_v17 = vpop.f32.mrb[27].mxu1 }
 0x187   :  { %v918_v19 = vadd.f32 %v917_v15, %v10682_v33  ;;  %v1591_v24 = vadd.f32 %v1590_v17, %v10678_v30 }
 0x188   :  { %1180 = vmatmul.mubr.bf16.gmra.mrb[132].mxu0 %v8777_v3  ;;  %1853 = vmatmul.mubr.bf16.gmra.mrb[132].mxu1 %v8777_v3  ;;  %v10800_v27 = vpack.c.bf16 %v916_v14, %v912_v13  ;;  %v10802_v28 = vpack.c.bf16 %v1589_v16, %v1585_v4  ;;  %v8780_v16 = vld [vmem:[#allocation4 + $0x118] sm:$0xff]  }
 0x189   :  { %1189 = vmatprep.mubr.bf16.mxu0 %v13781_v1  ;;  %1862 = vmatprep.mubr.bf16.mxu1 %v13781_v1  ;;  %v10806_v37 = vpack.c.bf16 %v918_v19, %v914_v18  ;;  %v10808_v38 = vpack.c.bf16 %v1591_v24, %v1587_v7 }
 0x18b   :  { %v921_v39 = vpop.f32.mrb[28].mxu0  ;;  %v1594_v40 = vpop.f32.mrb[28].mxu1 }
 0x18c   :  { %v923_v41 = vpop.f32.mrb[29].mxu0  ;;  %v1595_v43 = vadd.f32 %v1594_v40, %v10674_v29  ;;  %v1596_v44 = vpop.f32.mrb[29].mxu1  ;;  %v922_v48 = vadd.f32 %v921_v39, %v10680_v31 }
 0x18d   :  { %v925_v45 = vpop.f32.mrb[30].mxu0  ;;  %v1597_v46 = vadd.f32 %v1596_v44, %v10678_v30  ;;  %v1598_v47 = vpop.f32.mrb[30].mxu1  ;;  %v924_v2 = vadd.f32 %v923_v41, %v10682_v33 }
 0x18e   :  { %v926_v49 = vadd.f32 %v925_v45, %v10680_v31  ;;  %v927_v54 = vpop.f32.mrb[31].mxu0  ;;  %v1599_v63 = vadd.f32 %v1598_v47, %v10674_v29  ;;  %v1600_v0 = vpop.f32.mrb[31].mxu1 }
 0x18f   :  { %v928_v3 = vadd.f32 %v927_v54, %v10682_v33  ;;  %v1601_v4 = vadd.f32 %v1600_v0, %v10678_v30 }
 0x190   :  { %1190 = vmatmul.mubr.bf16.gmra.mrb[136].mxu0 %v8779_v42  ;;  %1863 = vmatmul.mubr.bf16.gmra.mrb[136].mxu1 %v8779_v42  ;;  %v10818_v5 = vpack.c.bf16 %v926_v49, %v922_v48  ;;  %v10820_v6 = vpack.c.bf16 %v1599_v63, %v1595_v43 }
 0x191   :  { %1199 = vmatprep.mubr.bf16.mxu0 %v13781_v1  ;;  %1872 = vmatprep.mubr.bf16.mxu1 %v13781_v1  ;;  %v10824_v7 = vpack.c.bf16 %v928_v3, %v924_v2  ;;  %v10826_v12 = vpack.c.bf16 %v1601_v4, %v1597_v46  ;;  %v8781_v2 = vld [vmem:[#allocation4 + $0x120] sm:$0xff]  }
 0x193   :  { %v931_v13 = vpop.f32.mrb[32].mxu0  ;;  %v1604_v14 = vpop.f32.mrb[32].mxu1 }
 0x194   :  { %v933_v15 = vpop.f32.mrb[33].mxu0  ;;  %v1605_v17 = vadd.f32 %v1604_v14, %v10674_v29  ;;  %v1606_v18 = vpop.f32.mrb[33].mxu1  ;;  %v932_v26 = vadd.f32 %v931_v13, %v10680_v31 }
 0x195   :  { %v935_v19 = vpop.f32.mrb[34].mxu0  ;;  %v1607_v24 = vadd.f32 %v1606_v18, %v10678_v30  ;;  %v1608_v25 = vpop.f32.mrb[34].mxu1  ;;  %v934_v43 = vadd.f32 %v933_v15, %v10682_v33 }
 0x196   :  { %v936_v39 = vadd.f32 %v935_v19, %v10680_v31  ;;  %v937_v40 = vpop.f32.mrb[35].mxu0  ;;  %v1609_v41 = vadd.f32 %v1608_v25, %v10674_v29  ;;  %v1610_v42 = vpop.f32.mrb[35].mxu1 }
 0x197   :  { %v938_v44 = vadd.f32 %v937_v40, %v10682_v33  ;;  %v1611_v45 = vadd.f32 %v1610_v42, %v10678_v30 }
 0x198   :  { %1200 = vmatmul.mubr.bf16.gmra.mrb[140].mxu0 %v8780_v16  ;;  %1873 = vmatmul.mubr.bf16.gmra.mrb[140].mxu1 %v8780_v16  ;;  %v10836_v46 = vpack.c.bf16 %v936_v39, %v932_v26  ;;  %v10838_v47 = vpack.c.bf16 %v1609_v41, %v1605_v17 }
 0x199   :  { %1209 = vmatprep.mubr.bf16.mxu0 %v13781_v1  ;;  %1882 = vmatprep.mubr.bf16.mxu1 %v13781_v1  ;;  %v10842_v48 = vpack.c.bf16 %v938_v44, %v934_v43  ;;  %v10844_v49 = vpack.c.bf16 %v1611_v45, %v1607_v24 }
 0x19b   :  { %v941_v54 = vpop.f32.mrb[36].mxu0  ;;  %v1614_v63 = vpop.f32.mrb[36].mxu1 }
 0x19c   :  { %v943_v0 = vpop.f32.mrb[37].mxu0  ;;  %v1615_v3 = vadd.f32 %v1614_v63, %v10674_v29  ;;  %v1616_v4 = vpop.f32.mrb[37].mxu1  ;;  %v942_v16 = vadd.f32 %v941_v54, %v10680_v31  ;;  %v8782_v63 = vld [vmem:[#allocation4 + $0x128] sm:$0xff]  }
 0x19d   :  { %v945_v13 = vpop.f32.mrb[38].mxu0  ;;  %v1617_v14 = vadd.f32 %v1616_v4, %v10678_v30  ;;  %v1618_v15 = vpop.f32.mrb[38].mxu1  ;;  %v944_v25 = vadd.f32 %v943_v0, %v10682_v33 }
 0x19e   :  { %v946_v17 = vadd.f32 %v945_v13, %v10680_v31  ;;  %v947_v18 = vpop.f32.mrb[39].mxu0  ;;  %v1619_v19 = vadd.f32 %v1618_v15, %v10674_v29  ;;  %v1620_v24 = vpop.f32.mrb[39].mxu1 }
 0x19f   :  { %v948_v26 = vadd.f32 %v947_v18, %v10682_v33  ;;  %v1621_v39 = vadd.f32 %v1620_v24, %v10678_v30 }
 0x1a0   :  { %1210 = vmatmul.mubr.bf16.gmra.mrb[144].mxu0 %v8781_v2  ;;  %1883 = vmatmul.mubr.bf16.gmra.mrb[144].mxu1 %v8781_v2  ;;  %v10854_v40 = vpack.c.bf16 %v946_v17, %v942_v16  ;;  %v10856_v41 = vpack.c.bf16 %v1619_v19, %v1615_v3 }
 0x1a1   :  { %1219 = vmatprep.mubr.bf16.mxu0 %v13781_v1  ;;  %1892 = vmatprep.mubr.bf16.mxu1 %v13781_v1  ;;  %v10860_v42 = vpack.c.bf16 %v948_v26, %v944_v25  ;;  %v10862_v43 = vpack.c.bf16 %v1621_v39, %v1617_v14 }
 0x1a2   :  { %14006 = vst [vmem:[#allocation18_spill] sm:$0xff] %v10856_v41 }
 0x1a3   :  { %14007 = vst [vmem:[#allocation19_spill] sm:$0xff] %v10860_v42  ;;  %14008 = vst [vmem:[#allocation20_spill] sm:$0xff] %v10862_v43  ;;  %v951_v44 = vpop.f32.mrb[40].mxu0  ;;  %v1624_v45 = vpop.f32.mrb[40].mxu1 }
 0x1a4   :  { %v953_v54 = vpop.f32.mrb[41].mxu0  ;;  %v1625_v0 = vadd.f32 %v1624_v45, %v10674_v29  ;;  %v1626_v4 = vpop.f32.mrb[41].mxu1  ;;  %v952_v15 = vadd.f32 %v951_v44, %v10680_v31 }
 0x1a5   :  { %v955_v2 = vpop.f32.mrb[42].mxu0  ;;  %v1627_v13 = vadd.f32 %v1626_v4, %v10678_v30  ;;  %v1628_v3 = vpop.f32.mrb[42].mxu1  ;;  %v954_v19 = vadd.f32 %v953_v54, %v10682_v33 }
 0x1a6   :  { %v956_v16 = vadd.f32 %v955_v2, %v10680_v31  ;;  %v957_v17 = vpop.f32.mrb[43].mxu0  ;;  %v1629_v18 = vadd.f32 %v1628_v3, %v10674_v29  ;;  %v1630_v14 = vpop.f32.mrb[43].mxu1  ;;  %v8783_v3 = vld [vmem:[#allocation4 + $0x130] sm:$0xff]  }
 0x1a7   :  { %v958_v24 = vadd.f32 %v957_v17, %v10682_v33  ;;  %v1631_v25 = vadd.f32 %v1630_v14, %v10678_v30 }
 0x1a8   :  { %1220 = vmatmul.mubr.bf16.gmra.mrb[148].mxu0 %v8782_v63  ;;  %1893 = vmatmul.mubr.bf16.gmra.mrb[148].mxu1 %v8782_v63  ;;  %v10872_v26 = vpack.c.bf16 %v956_v16, %v952_v15  ;;  %v10874_v39 = vpack.c.bf16 %v1629_v18, %v1625_v0 }
 0x1a9   :  { %1229 = vmatprep.mubr.bf16.mxu0 %v13781_v1  ;;  %1902 = vmatprep.mubr.bf16.mxu1 %v13781_v1  ;;  %v10878_v44 = vpack.c.bf16 %v958_v24, %v954_v19  ;;  %v10880_v45 = vpack.c.bf16 %v1631_v25, %v1627_v13 }
 0x1aa   :  { %14009 = vst [vmem:[#allocation21_spill] sm:$0xff] %v10872_v26  ;;  %14010 = vst [vmem:[#allocation22_spill] sm:$0xff] %v10874_v39 }
 0x1ab   :  { %14011 = vst [vmem:[#allocation23_spill] sm:$0xff] %v10878_v44  ;;  %14012 = vst [vmem:[#allocation24_spill] sm:$0xff] %v10880_v45  ;;  %v961_v4 = vpop.f32.mrb[44].mxu0  ;;  %v1634_v54 = vpop.f32.mrb[44].mxu1  ;;  %v14015_v44 = vmov 0  }
 0x1ac   :  { %v963_v2 = vpop.f32.mrb[45].mxu0  ;;  %v1635_v17 = vadd.f32 %v1634_v54, %v10674_v29  ;;  %v1636_v14 = vpop.f32.mrb[45].mxu1  ;;  %v962_v16 = vadd.f32 %v961_v4, %v10680_v31 }
 0x1ad   :  { %v965_v63 = vpop.f32.mrb[46].mxu0  ;;  %v1637_v15 = vadd.f32 %v1636_v14, %v10678_v30  ;;  %v1638_v0 = vpop.f32.mrb[46].mxu1  ;;  %v964_v24 = vadd.f32 %v963_v2, %v10682_v33 }
 0x1ae   :  { %v966_v18 = vadd.f32 %v965_v63, %v10680_v31  ;;  %v967_v1 = vpop.f32.mrb[47].mxu0  ;;  %v1639_v19 = vadd.f32 %v1638_v0, %v10674_v29  ;;  %v1640_v13 = vpop.f32.mrb[47].mxu1 }
 0x1af   :  { %v968_v25 = vadd.f32 %v967_v1, %v10682_v33  ;;  %v1641_v45 = vadd.f32 %v1640_v13, %v10678_v30  ;;  %v8784_v1 = vld [vmem:[#allocation4 + $0x138] sm:$0xff]  }
 0x1b0   :  { %1230 = vmatmul.mubr.bf16.gmra.mrb[152].mxu0 %v8783_v3  ;;  %1903 = vmatmul.mubr.bf16.gmra.mrb[152].mxu1 %v8783_v3  ;;  %v10890_v54 = vpack.c.bf16 %v966_v18, %v962_v16  ;;  %v10892_v14 = vpack.c.bf16 %v1639_v19, %v1635_v17 }
 0x1b1   :  { %1239 = vmatprep.mubr.bf16.mxu0 %v14015_v44  ;;  %1912 = vmatprep.mubr.bf16.mxu1 %v14015_v44  ;;  %v10896_v4 = vpack.c.bf16 %v968_v25, %v964_v24  ;;  %v10898_v63 = vpack.c.bf16 %v1641_v45, %v1637_v15 }
 0x1b2   :  { %14013 = vst [vmem:[#allocation25_spill] sm:$0xff] %v10890_v54  ;;  %14014 = vst [vmem:[#allocation26_spill] sm:$0xff] %v10892_v14 }
 0x1b3   :  { %14016 = vst [vmem:[#allocation27_spill] sm:$0xff] %v10896_v4  ;;  %14017 = vst [vmem:[#allocation28_spill] sm:$0xff] %v10898_v63  ;;  %v971_v0 = vpop.f32.mrb[48].mxu0  ;;  %v1644_v2 = vpop.f32.mrb[48].mxu1 }
 0x1b4   :  { %v973_v39 = vpop.f32.mrb[49].mxu0  ;;  %v1645_v13 = vadd.f32 %v1644_v2, %v10674_v29  ;;  %v1646_v26 = vpop.f32.mrb[49].mxu1  ;;  %v972_v18 = vadd.f32 %v971_v0, %v10680_v31 }
 0x1b5   :  { %v975_v3 = vpop.f32.mrb[50].mxu0  ;;  %v1647_v16 = vadd.f32 %v1646_v26, %v10678_v30  ;;  %v1648_v17 = vpop.f32.mrb[50].mxu1  ;;  %v974_v15 = vadd.f32 %v973_v39, %v10682_v33 }
 0x1b6   :  { %v976_v19 = vadd.f32 %v975_v3, %v10680_v31  ;;  %v977_v14 = vpop.f32.mrb[51].mxu0  ;;  %v1649_v24 = vadd.f32 %v1648_v17, %v10674_v29  ;;  %v1650_v45 = vpop.f32.mrb[51].mxu1 }
 0x1b7   :  { %v978_v25 = vadd.f32 %v977_v14, %v10682_v33  ;;  %v1651_v63 = vadd.f32 %v1650_v45, %v10678_v30  ;;  %v8785_v14 = vld [vmem:[#allocation4 + $0x140] sm:$0xff]  }
 0x1b8   :  { %1240 = vmatmul.mubr.bf16.gmra.mrb[156].mxu0 %v8784_v1  ;;  %1913 = vmatmul.mubr.bf16.gmra.mrb[156].mxu1 %v8784_v1  ;;  %v10908_v2 = vpack.c.bf16 %v976_v19, %v972_v18  ;;  %v10910_v26 = vpack.c.bf16 %v1649_v24, %v1645_v13 }
 0x1b9   :  { %1249 = vmatprep.mubr.bf16.mxu0 %v14015_v44  ;;  %1922 = vmatprep.mubr.bf16.mxu1 %v14015_v44  ;;  %v10914_v0 = vpack.c.bf16 %v978_v25, %v974_v15  ;;  %v10916_v3 = vpack.c.bf16 %v1651_v63, %v1647_v16 }
 0x1ba   :  { %14018 = vst [vmem:[#allocation29_spill] sm:$0xff] %v10908_v2  ;;  %14019 = vst [vmem:[#allocation30_spill] sm:$0xff] %v10910_v26 }
 0x1bb   :  { %14020 = vst [vmem:[#allocation31_spill] sm:$0xff] %v10914_v0  ;;  %14021 = vst [vmem:[#allocation32_spill] sm:$0xff] %v10916_v3  ;;  %v981_v17 = vpop.f32.mrb[52].mxu0  ;;  %v1654_v39 = vpop.f32.mrb[52].mxu1  ;;  %v8816_v0 = vld [vmem:[#allocation9 + $0xe0] ss:$16 sps:$4 sm:$0xff]  }
 0x1bc   :  { %v983_v4 = vpop.f32.mrb[53].mxu0  ;;  %v1655_v45 = vadd.f32 %v1654_v39, %v10674_v29  ;;  %v1656_v54 = vpop.f32.mrb[53].mxu1  ;;  %v982_v19 = vadd.f32 %v981_v17, %v10680_v31  ;;  %v8814_v39 = vld [vmem:[#allocation9 + $0xe4] ss:$16 sps:$4 sm:$0xff]  }
 0x1bd   :  { %v985_v1 = vpop.f32.mrb[54].mxu0  ;;  %v1657_v18 = vadd.f32 %v1656_v54, %v10678_v30  ;;  %v1658_v13 = vpop.f32.mrb[54].mxu1  ;;  %v984_v16 = vadd.f32 %v983_v4, %v10682_v33  ;;  %2916 = vmatprep.subr.bf16.mxu0 %v8814_v39 }
 0x1be   :  { %v986_v24 = vadd.f32 %v985_v1, %v10680_v31  ;;  %v987_v26 = vpop.f32.mrb[55].mxu0  ;;  %v1659_v15 = vadd.f32 %v1658_v13, %v10674_v29  ;;  %v1660_v63 = vpop.f32.mrb[55].mxu1  ;;  %2917 = vmatpush1.bf16.msra.mxu0 %v8816_v0 }
 0x1bf   :  { %v988_v25 = vadd.f32 %v987_v26, %v10682_v33  ;;  %v1661_v3 = vadd.f32 %v1660_v63, %v10678_v30 }
 0x1c0   :  { %1250 = vmatmul.mubr.bf16.gmra.mrb[160].mxu0 %v8785_v14  ;;  %1923 = vmatmul.mubr.bf16.gmra.mrb[160].mxu1 %v8785_v14  ;;  %v10926_v54 = vpack.c.bf16 %v986_v24, %v982_v19  ;;  %v10928_v2 = vpack.c.bf16 %v1659_v15, %v1655_v45  ;;  %v8791_v14 = vld [vmem:[#allocation4 + $0x148] sm:$0xff]   ;;  %v10139_v24 = vld [vmem:[#allocation9 + $0x4] ss:$16 sps:$4 sm:$0xff]  }
 0x1c1   :  { %1259 = vmatprep.mubr.bf16.mxu0 %v14015_v44  ;;  %1932 = vmatprep.mubr.bf16.mxu1 %v14015_v44  ;;  %v10932_v17 = vpack.c.bf16 %v988_v25, %v984_v16  ;;  %v10934_v1 = vpack.c.bf16 %v1661_v3, %v1657_v18 }
 0x1c2   :  { %14022 = vst [vmem:[#allocation33_spill] sm:$0xff] %v10926_v54  ;;  %14023 = vst [vmem:[#allocation34_spill] sm:$0xff] %v10928_v2  ;;  %3587 = vmatprep.subr.bf16.mxu0 %v10139_v24  ;;  %v8820_v24 = vld [vmem:[#allocation9 + $0xe8] ss:$16 sps:$4 sm:$0xff]  }
 0x1c3   :  { %14024 = vst [vmem:[#allocation35_spill] sm:$0xff] %v10932_v17  ;;  %14025 = vst [vmem:[#allocation36_spill] sm:$0xff] %v10934_v1  ;;  %v991_v4 = vpop.f32.mrb[56].mxu0  ;;  %v1664_v26 = vpop.f32.mrb[56].mxu1  ;;  %v8817_v17 = vld [vmem:[#allocation9 + $0xec] ss:$16 sps:$4 sm:$0xff]  }
 0x1c4   :  { %v993_v13 = vpop.f32.mrb[57].mxu0  ;;  %v1665_v63 = vadd.f32 %v1664_v26, %v10674_v29  ;;  %v1666_v19 = vpop.f32.mrb[57].mxu1  ;;  %v992_v16 = vadd.f32 %v991_v4, %v10680_v31  ;;  %3029 = vmatprep.subr.bf16.mxu1 %v8817_v17 }
 0x1c5   :  { %v995_v45 = vpop.f32.mrb[58].mxu0  ;;  %v1667_v15 = vadd.f32 %v1666_v19, %v10678_v30  ;;  %v1668_v2 = vpop.f32.mrb[58].mxu1  ;;  %v994_v0 = vadd.f32 %v993_v13, %v10682_v33  ;;  %3030 = vmatpush1.bf16.msra.mxu1 %v8820_v24 }
 0x1c6   :  { %v996_v3 = vadd.f32 %v995_v45, %v10680_v31  ;;  %v997_v18 = vpop.f32.mrb[59].mxu0  ;;  %v1669_v25 = vadd.f32 %v1668_v2, %v10674_v29  ;;  %v1670_v39 = vpop.f32.mrb[59].mxu1 }
 0x1c7   :  { %v998_v1 = vadd.f32 %v997_v18, %v10682_v33  ;;  %v1671_v26 = vadd.f32 %v1670_v39, %v10678_v30  ;;  %v8793_v39 = vld [vmem:[#allocation4 + $0x150] sm:$0xff]  }
 0x1c8   :  { %1260 = vmatmul.mubr.bf16.gmra.mrb[164].mxu0 %v8791_v14  ;;  %1933 = vmatmul.mubr.bf16.gmra.mrb[164].mxu1 %v8791_v14  ;;  %v10944_v19 = vpack.c.bf16 %v996_v3, %v992_v16  ;;  %v10946_v54 = vpack.c.bf16 %v1669_v25, %v1665_v63  ;;  %v10140_v3 = vld [vmem:[#allocation9 + $0xc] ss:$16 sps:$4 sm:$0xff]  }
 0x1c9   :  { %1269 = vmatprep.mubr.bf16.mxu0 %v14015_v44  ;;  %1942 = vmatprep.mubr.bf16.mxu1 %v14015_v44  ;;  %v10950_v2 = vpack.c.bf16 %v998_v1, %v994_v0  ;;  %v10952_v4 = vpack.c.bf16 %v1671_v26, %v1667_v15 }
 0x1ca   :  { %14026 = vst [vmem:[#allocation37_spill] sm:$0xff] %v10944_v19  ;;  %14027 = vst [vmem:[#allocation38_spill] sm:$0xff] %v10946_v54  ;;  %3700 = vmatprep.subr.bf16.mxu1 %v10140_v3 }
 0x1cb   :  { %14028 = vst [vmem:[#allocation39_spill] sm:$0xff] %v10950_v2  ;;  %14029 = vst [vmem:[#allocation40_spill] sm:$0xff] %v10952_v4  ;;  %v1001_v13 = vpop.f32.mrb[60].mxu0  ;;  %v1674_v45 = vpop.f32.mrb[60].mxu1 }
 0x1cc   :  { %v1003_v18 = vpop.f32.mrb[61].mxu0  ;;  %v1675_v14 = vadd.f32 %v1674_v45, %v10674_v29  ;;  %v1676_v16 = vpop.f32.mrb[61].mxu1  ;;  %v1002_v1 = vadd.f32 %v1001_v13, %v10680_v31 }
 0x1cd   :  { %v1005_v63 = vpop.f32.mrb[62].mxu0  ;;  %v1677_v25 = vadd.f32 %v1676_v16, %v10678_v30  ;;  %v1678_v54 = vpop.f32.mrb[62].mxu1  ;;  %v1004_v24 = vadd.f32 %v1003_v18, %v10682_v33 }
 0x1ce   :  { %v1006_v15 = vadd.f32 %v1005_v63, %v10680_v31  ;;  %v1007_v0 = vpop.f32.mrb[63].mxu0  ;;  %v1679_v17 = vadd.f32 %v1678_v54, %v10674_v29  ;;  %v1680_v26 = vpop.f32.mrb[63].mxu1 }
 0x1cf   :  { %v1008_v4 = vadd.f32 %v1007_v0, %v10682_v33  ;;  %v1681_v45 = vadd.f32 %v1680_v26, %v10678_v30  ;;  %v8794_v0 = vld [vmem:[#allocation4 + $0x158] sm:$0xff]  }
 0x1d0   :  { %1270 = vmatmul.mubr.bf16.gmra.mrb[168].mxu0 %v8793_v39  ;;  %1943 = vmatmul.mubr.bf16.gmra.mrb[168].mxu1 %v8793_v39  ;;  %v10962_v3 = vpack.c.bf16 %v1006_v15, %v1002_v1  ;;  %v10964_v16 = vpack.c.bf16 %v1679_v17, %v1675_v14 }
 0x1d1   :  { %1279 = vmatprep.mubr.bf16.mxu0 %v14015_v44  ;;  %1952 = vmatprep.mubr.bf16.mxu1 %v14015_v44  ;;  %v10968_v13 = vpack.c.bf16 %v1008_v4, %v1004_v24  ;;  %v10970_v54 = vpack.c.bf16 %v1681_v45, %v1677_v25 }
 0x1d2   :  { %14030 = vst [vmem:[#allocation41_spill] sm:$0xff] %v10962_v3  ;;  %14031 = vst [vmem:[#allocation42_spill] sm:$0xff] %v10964_v16 }
 0x1d3   :  { %14032 = vst [vmem:[#allocation43_spill] sm:$0xff] %v10968_v13  ;;  %14033 = vst [vmem:[#allocation44_spill] sm:$0xff] %v10970_v54  ;;  %v1011_v63 = vpop.f32.mrb[64].mxu0  ;;  %v1684_v18 = vpop.f32.mrb[64].mxu1 }
 0x1d4   :  { %v1013_v2 = vpop.f32.mrb[65].mxu0  ;;  %v1685_v26 = vadd.f32 %v1684_v18, %v10674_v29  ;;  %v1686_v19 = vpop.f32.mrb[65].mxu1  ;;  %v1012_v15 = vadd.f32 %v1011_v63, %v10680_v31 }
 0x1d5   :  { %v1015_v39 = vpop.f32.mrb[66].mxu0  ;;  %v1687_v1 = vadd.f32 %v1686_v19, %v10678_v30  ;;  %v1688_v14 = vpop.f32.mrb[66].mxu1  ;;  %v1014_v24 = vadd.f32 %v1013_v2, %v10682_v33 }
 0x1d6   :  { %v1016_v17 = vadd.f32 %v1015_v39, %v10680_v31  ;;  %v1017_v16 = vpop.f32.mrb[67].mxu0  ;;  %v1689_v4 = vadd.f32 %v1688_v14, %v10674_v29  ;;  %v1690_v25 = vpop.f32.mrb[67].mxu1 }
 0x1d7   :  { %v1018_v45 = vadd.f32 %v1017_v16, %v10682_v33  ;;  %v1691_v54 = vadd.f32 %v1690_v25, %v10678_v30  ;;  %v8795_v16 = vld [vmem:[#allocation4 + $0x160] sm:$0xff]  }
 0x1d8   :  { %1280 = vmatmul.mubr.bf16.gmra.mrb[172].mxu0 %v8794_v0  ;;  %1953 = vmatmul.mubr.bf16.gmra.mrb[172].mxu1 %v8794_v0  ;;  %v10980_v18 = vpack.c.bf16 %v1016_v17, %v1012_v15  ;;  %v10982_v19 = vpack.c.bf16 %v1689_v4, %v1685_v26 }
 0x1d9   :  { %1289 = vmatprep.mubr.bf16.mxu0 %v14015_v44  ;;  %1962 = vmatprep.mubr.bf16.mxu1 %v14015_v44  ;;  %v10986_v63 = vpack.c.bf16 %v1018_v45, %v1014_v24  ;;  %v10988_v39 = vpack.c.bf16 %v1691_v54, %v1687_v1 }
 0x1da   :  { %14034 = vst [vmem:[#allocation45_spill] sm:$0xff] %v10980_v18  ;;  %14035 = vst [vmem:[#allocation46_spill] sm:$0xff] %v10982_v19 }
 0x1db   :  { %14036 = vst [vmem:[#allocation47_spill] sm:$0xff] %v10986_v63  ;;  %14037 = vst [vmem:[#allocation48_spill] sm:$0xff] %v10988_v39  ;;  %v1021_v14 = vpop.f32.mrb[68].mxu0  ;;  %v1694_v2 = vpop.f32.mrb[68].mxu1 }
 0x1dc   :  { %v1023_v13 = vpop.f32.mrb[69].mxu0  ;;  %v1695_v25 = vadd.f32 %v1694_v2, %v10674_v29  ;;  %v1696_v3 = vpop.f32.mrb[69].mxu1  ;;  %v1022_v17 = vadd.f32 %v1021_v14, %v10680_v31 }
 0x1dd   :  { %v1025_v0 = vpop.f32.mrb[70].mxu0  ;;  %v1697_v15 = vadd.f32 %v1696_v3, %v10678_v30  ;;  %v1698_v26 = vpop.f32.mrb[70].mxu1  ;;  %v1024_v1 = vadd.f32 %v1023_v13, %v10682_v33 }
 0x1de   :  { %v1026_v4 = vadd.f32 %v1025_v0, %v10680_v31  ;;  %v1027_v19 = vpop.f32.mrb[71].mxu0  ;;  %v1699_v24 = vadd.f32 %v1698_v26, %v10674_v29  ;;  %v1700_v54 = vpop.f32.mrb[71].mxu1 }
 0x1df   :  { %v1028_v45 = vadd.f32 %v1027_v19, %v10682_v33  ;;  %v1701_v39 = vadd.f32 %v1700_v54, %v10678_v30  ;;  %v8796_v19 = vld [vmem:[#allocation4 + $0x168] sm:$0xff]  }
 0x1e0   :  { %1290 = vmatmul.mubr.bf16.gmra.mrb[176].mxu0 %v8795_v16  ;;  %1963 = vmatmul.mubr.bf16.gmra.mrb[176].mxu1 %v8795_v16  ;;  %v10998_v2 = vpack.c.bf16 %v1026_v4, %v1022_v17  ;;  %v11000_v3 = vpack.c.bf16 %v1699_v24, %v1695_v25 }
 0x1e1   :  { %1299 = vmatprep.mubr.bf16.mxu0 %v14015_v44  ;;  %1972 = vmatprep.mubr.bf16.mxu1 %v14015_v44  ;;  %v11004_v14 = vpack.c.bf16 %v1028_v45, %v1024_v1  ;;  %v11006_v0 = vpack.c.bf16 %v1701_v39, %v1697_v15 }
 0x1e2   :  { %14038 = vst [vmem:[#allocation49_spill] sm:$0xff] %v10998_v2  ;;  %14039 = vst [vmem:[#allocation50_spill] sm:$0xff] %v11000_v3 }
 0x1e3   :  { %14040 = vst [vmem:[#allocation51_spill] sm:$0xff] %v11004_v14  ;;  %14041 = vst [vmem:[#allocation52_spill] sm:$0xff] %v11006_v0  ;;  %v1031_v26 = vpop.f32.mrb[72].mxu0  ;;  %v1704_v13 = vpop.f32.mrb[72].mxu1 }
 0x1e4   :  { %v1033_v63 = vpop.f32.mrb[73].mxu0  ;;  %v1705_v54 = vadd.f32 %v1704_v13, %v10674_v29  ;;  %v1706_v18 = vpop.f32.mrb[73].mxu1  ;;  %v1032_v4 = vadd.f32 %v1031_v26, %v10680_v31 }
 0x1e5   :  { %v1035_v16 = vpop.f32.mrb[74].mxu0  ;;  %v1707_v17 = vadd.f32 %v1706_v18, %v10678_v30  ;;  %v1708_v25 = vpop.f32.mrb[74].mxu1  ;;  %v1034_v15 = vadd.f32 %v1033_v63, %v10682_v33 }
 0x1e6   :  { %v1036_v24 = vadd.f32 %v1035_v16, %v10680_v31  ;;  %v1037_v3 = vpop.f32.mrb[75].mxu0  ;;  %v1709_v1 = vadd.f32 %v1708_v25, %v10674_v29  ;;  %v1710_v39 = vpop.f32.mrb[75].mxu1 }
 0x1e7   :  { %v1038_v45 = vadd.f32 %v1037_v3, %v10682_v33  ;;  %v1711_v0 = vadd.f32 %v1710_v39, %v10678_v30  ;;  %v8797_v3 = vld [vmem:[#allocation4 + $0x170] sm:$0xff]  }
 0x1e8   :  { %1300 = vmatmul.mubr.bf16.gmra.mrb[180].mxu0 %v8796_v19  ;;  %1973 = vmatmul.mubr.bf16.gmra.mrb[180].mxu1 %v8796_v19  ;;  %v11016_v13 = vpack.c.bf16 %v1036_v24, %v1032_v4  ;;  %v11018_v18 = vpack.c.bf16 %v1709_v1, %v1705_v54 }
 0x1e9   :  { %1309 = vmatprep.mubr.bf16.mxu0 %v14015_v44  ;;  %1982 = vmatprep.mubr.bf16.mxu1 %v14015_v44  ;;  %v11022_v26 = vpack.c.bf16 %v1038_v45, %v1034_v15  ;;  %v11024_v16 = vpack.c.bf16 %v1711_v0, %v1707_v17 }
 0x1ea   :  { %14042 = vst [vmem:[#allocation53_spill] sm:$0xff] %v11016_v13  ;;  %14043 = vst [vmem:[#allocation54_spill] sm:$0xff] %v11018_v18 }
 0x1eb   :  { %14044 = vst [vmem:[#allocation55_spill] sm:$0xff] %v11022_v26  ;;  %14045 = vst [vmem:[#allocation56_spill] sm:$0xff] %v11024_v16  ;;  %v1041_v25 = vpop.f32.mrb[76].mxu0  ;;  %v1714_v63 = vpop.f32.mrb[76].mxu1 }
 0x1ec   :  { %v1043_v14 = vpop.f32.mrb[77].mxu0  ;;  %v1715_v39 = vadd.f32 %v1714_v63, %v10674_v29  ;;  %v1716_v2 = vpop.f32.mrb[77].mxu1  ;;  %v1042_v24 = vadd.f32 %v1041_v25, %v10680_v31 }
 0x1ed   :  { %v1045_v19 = vpop.f32.mrb[78].mxu0  ;;  %v1717_v4 = vadd.f32 %v1716_v2, %v10678_v30  ;;  %v1718_v54 = vpop.f32.mrb[78].mxu1  ;;  %v1044_v17 = vadd.f32 %v1043_v14, %v10682_v33 }
 0x1ee   :  { %v1046_v1 = vadd.f32 %v1045_v19, %v10680_v31  ;;  %v1047_v18 = vpop.f32.mrb[79].mxu0  ;;  %v1719_v15 = vadd.f32 %v1718_v54, %v10674_v29  ;;  %v1720_v0 = vpop.f32.mrb[79].mxu1 }
 0x1ef   :  { %v1048_v45 = vadd.f32 %v1047_v18, %v10682_v33  ;;  %v1721_v16 = vadd.f32 %v1720_v0, %v10678_v30  ;;  %v8798_v18 = vld [vmem:[#allocation4 + $0x178] sm:$0xff]  }
 0x1f0   :  { %1310 = vmatmul.mubr.bf16.gmra.mrb[184].mxu0 %v8797_v3  ;;  %1983 = vmatmul.mubr.bf16.gmra.mrb[184].mxu1 %v8797_v3  ;;  %v11034_v63 = vpack.c.bf16 %v1046_v1, %v1042_v24  ;;  %v11036_v2 = vpack.c.bf16 %v1719_v15, %v1715_v39 }
 0x1f1   :  { %1319 = vmatprep.mubr.bf16.mxu0 %v14015_v44  ;;  %1992 = vmatprep.mubr.bf16.mxu1 %v14015_v44  ;;  %v11040_v25 = vpack.c.bf16 %v1048_v45, %v1044_v17  ;;  %v11042_v19 = vpack.c.bf16 %v1721_v16, %v1717_v4 }
 0x1f2   :  { %14046 = vst [vmem:[#allocation57_spill] sm:$0xff] %v11034_v63  ;;  %14047 = vst [vmem:[#allocation58_spill] sm:$0xff] %v11036_v2 }
 0x1f3   :  { %14048 = vst [vmem:[#allocation59_spill] sm:$0xff] %v11040_v25  ;;  %14049 = vst [vmem:[#allocation60_spill] sm:$0xff] %v11042_v19  ;;  %v1051_v54 = vpop.f32.mrb[80].mxu0  ;;  %v1724_v14 = vpop.f32.mrb[80].mxu1 }
 0x1f4   :  { %v1053_v26 = vpop.f32.mrb[81].mxu0  ;;  %v1725_v0 = vadd.f32 %v1724_v14, %v10674_v29  ;;  %v1726_v13 = vpop.f32.mrb[81].mxu1  ;;  %v1052_v1 = vadd.f32 %v1051_v54, %v10680_v31 }
 0x1f5   :  { %v1055_v3 = vpop.f32.mrb[82].mxu0  ;;  %v1727_v24 = vadd.f32 %v1726_v13, %v10678_v30  ;;  %v1728_v39 = vpop.f32.mrb[82].mxu1  ;;  %v1054_v4 = vadd.f32 %v1053_v26, %v10682_v33 }
 0x1f6   :  { %v1056_v15 = vadd.f32 %v1055_v3, %v10680_v31  ;;  %v1057_v2 = vpop.f32.mrb[83].mxu0  ;;  %v1729_v17 = vadd.f32 %v1728_v39, %v10674_v29  ;;  %v1730_v16 = vpop.f32.mrb[83].mxu1 }
 0x1f7   :  { %v1058_v45 = vadd.f32 %v1057_v2, %v10682_v33  ;;  %v1731_v19 = vadd.f32 %v1730_v16, %v10678_v30  ;;  %v8799_v2 = vld [vmem:[#allocation4 + $0x180] sm:$0xff]  }
 0x1f8   :  { %1320 = vmatmul.mubr.bf16.gmra.mrb[188].mxu0 %v8798_v18  ;;  %1993 = vmatmul.mubr.bf16.gmra.mrb[188].mxu1 %v8798_v18  ;;  %v11052_v14 = vpack.c.bf16 %v1056_v15, %v1052_v1  ;;  %v11054_v13 = vpack.c.bf16 %v1729_v17, %v1725_v0 }
 0x1f9   :  { %1329 = vmatprep.mubr.bf16.mxu0 %v14015_v44  ;;  %2002 = vmatprep.mubr.bf16.mxu1 %v14015_v44  ;;  %v11058_v54 = vpack.c.bf16 %v1058_v45, %v1054_v4  ;;  %v11060_v3 = vpack.c.bf16 %v1731_v19, %v1727_v24 }
 0x1fa   :  { %14050 = vst [vmem:[#allocation61_spill] sm:$0xff] %v11052_v14  ;;  %14051 = vst [vmem:[#allocation62_spill] sm:$0xff] %v11054_v13 }
 0x1fb   :  { %14052 = vst [vmem:[#allocation63_spill] sm:$0xff] %v11058_v54  ;;  %14053 = vst [vmem:[#allocation64_spill] sm:$0xff] %v11060_v3  ;;  %v1061_v39 = vpop.f32.mrb[84].mxu0  ;;  %v1734_v26 = vpop.f32.mrb[84].mxu1 }
 0x1fc   :  { %v1063_v25 = vpop.f32.mrb[85].mxu0  ;;  %v1735_v16 = vadd.f32 %v1734_v26, %v10674_v29  ;;  %v1736_v63 = vpop.f32.mrb[85].mxu1  ;;  %v1062_v15 = vadd.f32 %v1061_v39, %v10680_v31 }
 0x1fd   :  { %v1065_v18 = vpop.f32.mrb[86].mxu0  ;;  %v1737_v1 = vadd.f32 %v1736_v63, %v10678_v30  ;;  %v1738_v0 = vpop.f32.mrb[86].mxu1  ;;  %v1064_v24 = vadd.f32 %v1063_v25, %v10682_v33 }
 0x1fe   :  { %v1066_v17 = vadd.f32 %v1065_v18, %v10680_v31  ;;  %v1067_v13 = vpop.f32.mrb[87].mxu0  ;;  %v1739_v4 = vadd.f32 %v1738_v0, %v10674_v29  ;;  %v1740_v19 = vpop.f32.mrb[87].mxu1 }
 0x1ff   :  { %v1068_v45 = vadd.f32 %v1067_v13, %v10682_v33  ;;  %v1741_v3 = vadd.f32 %v1740_v19, %v10678_v30  ;;  %v8805_v13 = vld [vmem:[#allocation4 + $0x188] sm:$0xff]  }
 0x200   :  { %1330 = vmatmul.mubr.bf16.gmra.mrb[192].mxu0 %v8799_v2  ;;  %2003 = vmatmul.mubr.bf16.gmra.mrb[192].mxu1 %v8799_v2  ;;  %v11070_v26 = vpack.c.bf16 %v1066_v17, %v1062_v15  ;;  %v11072_v63 = vpack.c.bf16 %v1739_v4, %v1735_v16 }
 0x201   :  { %1339 = vmatprep.mubr.bf16.mxu0 %v14015_v44  ;;  %2012 = vmatprep.mubr.bf16.mxu1 %v14015_v44  ;;  %v11076_v39 = vpack.c.bf16 %v1068_v45, %v1064_v24  ;;  %v11078_v18 = vpack.c.bf16 %v1741_v3, %v1737_v1 }
 0x202   :  { %14054 = vst [vmem:[#allocation65_spill] sm:$0xff] %v11070_v26  ;;  %14055 = vst [vmem:[#allocation66_spill] sm:$0xff] %v11072_v63 }
 0x203   :  { %14056 = vst [vmem:[#allocation67_spill] sm:$0xff] %v11076_v39  ;;  %14057 = vst [vmem:[#allocation68_spill] sm:$0xff] %v11078_v18  ;;  %v1071_v0 = vpop.f32.mrb[88].mxu0  ;;  %v1744_v25 = vpop.f32.mrb[88].mxu1 }
 0x204   :  { %v1073_v54 = vpop.f32.mrb[89].mxu0  ;;  %v1745_v19 = vadd.f32 %v1744_v25, %v10674_v29  ;;  %v1746_v14 = vpop.f32.mrb[89].mxu1  ;;  %v1072_v17 = vadd.f32 %v1071_v0, %v10680_v31 }
 0x205   :  { %v1075_v2 = vpop.f32.mrb[90].mxu0  ;;  %v1747_v15 = vadd.f32 %v1746_v14, %v10678_v30  ;;  %v1748_v16 = vpop.f32.mrb[90].mxu1  ;;  %v1074_v1 = vadd.f32 %v1073_v54, %v10682_v33 }
 0x206   :  { %v1076_v4 = vadd.f32 %v1075_v2, %v10680_v31  ;;  %v1077_v63 = vpop.f32.mrb[91].mxu0  ;;  %v1749_v24 = vadd.f32 %v1748_v16, %v10674_v29  ;;  %v1750_v3 = vpop.f32.mrb[91].mxu1 }
 0x207   :  { %v1078_v45 = vadd.f32 %v1077_v63, %v10682_v33  ;;  %v1751_v18 = vadd.f32 %v1750_v3, %v10678_v30  ;;  %v8807_v63 = vld [vmem:[#allocation4 + $0x190] sm:$0xff]  }
 0x208   :  { %1340 = vmatmul.mubr.bf16.gmra.mrb[196].mxu0 %v8805_v13  ;;  %2013 = vmatmul.mubr.bf16.gmra.mrb[196].mxu1 %v8805_v13  ;;  %v11088_v25 = vpack.c.bf16 %v1076_v4, %v1072_v17  ;;  %v11090_v14 = vpack.c.bf16 %v1749_v24, %v1745_v19 }
 0x209   :  { %1349 = vmatprep.mubr.bf16.mxu0 %v14015_v44  ;;  %2022 = vmatprep.mubr.bf16.mxu1 %v14015_v44  ;;  %v11094_v0 = vpack.c.bf16 %v1078_v45, %v1074_v1  ;;  %v11096_v2 = vpack.c.bf16 %v1751_v18, %v1747_v15 }
 0x20a   :  { %14058 = vst [vmem:[#allocation69_spill] sm:$0xff] %v11088_v25  ;;  %14059 = vst [vmem:[#allocation70_spill] sm:$0xff] %v11090_v14 }
 0x20b   :  { %14060 = vst [vmem:[#allocation71_spill] sm:$0xff] %v11094_v0  ;;  %14061 = vst [vmem:[#allocation72_spill] sm:$0xff] %v11096_v2  ;;  %v1081_v16 = vpop.f32.mrb[92].mxu0  ;;  %v1754_v54 = vpop.f32.mrb[92].mxu1 }
 0x20c   :  { %v1083_v39 = vpop.f32.mrb[93].mxu0  ;;  %v1755_v3 = vadd.f32 %v1754_v54, %v10674_v29  ;;  %v1756_v26 = vpop.f32.mrb[93].mxu1  ;;  %v1082_v4 = vadd.f32 %v1081_v16, %v10680_v31 }
 0x20d   :  { %v1085_v13 = vpop.f32.mrb[94].mxu0  ;;  %v1757_v17 = vadd.f32 %v1756_v26, %v10678_v30  ;;  %v1758_v19 = vpop.f32.mrb[94].mxu1  ;;  %v1084_v15 = vadd.f32 %v1083_v39, %v10682_v33 }
 0x20e   :  { %v1086_v24 = vadd.f32 %v1085_v13, %v10680_v31  ;;  %v1087_v14 = vpop.f32.mrb[95].mxu0  ;;  %v1759_v1 = vadd.f32 %v1758_v19, %v10674_v29  ;;  %v1760_v18 = vpop.f32.mrb[95].mxu1 }
 0x20f   :  { %v1088_v45 = vadd.f32 %v1087_v14, %v10682_v33  ;;  %v1761_v2 = vadd.f32 %v1760_v18, %v10678_v30  ;;  %v8808_v14 = vld [vmem:[#allocation4 + $0x198] sm:$0xff]  }
 0x210   :  { %1350 = vmatmul.mubr.bf16.gmra.mrb[200].mxu0 %v8807_v63  ;;  %2023 = vmatmul.mubr.bf16.gmra.mrb[200].mxu1 %v8807_v63  ;;  %v11106_v54 = vpack.c.bf16 %v1086_v24, %v1082_v4  ;;  %v11108_v26 = vpack.c.bf16 %v1759_v1, %v1755_v3 }
 0x211   :  { %1359 = vmatprep.mubr.bf16.mxu0 %v14015_v44  ;;  %2032 = vmatprep.mubr.bf16.mxu1 %v14015_v44  ;;  %v11112_v16 = vpack.c.bf16 %v1088_v45, %v1084_v15  ;;  %v11114_v13 = vpack.c.bf16 %v1761_v2, %v1757_v17 }
 0x212   :  { %14062 = vst [vmem:[#allocation73_spill] sm:$0xff] %v11106_v54  ;;  %14063 = vst [vmem:[#allocation74_spill] sm:$0xff] %v11108_v26 }
 0x213   :  { %14064 = vst [vmem:[#allocation75_spill] sm:$0xff] %v11112_v16  ;;  %14065 = vst [vmem:[#allocation76_spill] sm:$0xff] %v11114_v13  ;;  %v1091_v19 = vpop.f32.mrb[96].mxu0  ;;  %v1764_v39 = vpop.f32.mrb[96].mxu1 }
 0x214   :  { %v1093_v0 = vpop.f32.mrb[97].mxu0  ;;  %v1765_v18 = vadd.f32 %v1764_v39, %v10674_v29  ;;  %v1766_v25 = vpop.f32.mrb[97].mxu1  ;;  %v1092_v24 = vadd.f32 %v1091_v19, %v10680_v31 }
 0x215   :  { %v1095_v63 = vpop.f32.mrb[98].mxu0  ;;  %v1767_v4 = vadd.f32 %v1766_v25, %v10678_v30  ;;  %v1768_v3 = vpop.f32.mrb[98].mxu1  ;;  %v1094_v17 = vadd.f32 %v1093_v0, %v10682_v33 }
 0x216   :  { %v1096_v1 = vadd.f32 %v1095_v63, %v10680_v31  ;;  %v1097_v26 = vpop.f32.mrb[99].mxu0  ;;  %v1769_v15 = vadd.f32 %v1768_v3, %v10674_v29  ;;  %v1770_v2 = vpop.f32.mrb[99].mxu1 }
 0x217   :  { %v1098_v45 = vadd.f32 %v1097_v26, %v10682_v33  ;;  %v1771_v13 = vadd.f32 %v1770_v2, %v10678_v30  ;;  %v8809_v26 = vld [vmem:[#allocation4 + $0x1a0] sm:$0xff]  }
 0x218   :  { %1360 = vmatmul.mubr.bf16.gmra.mrb[204].mxu0 %v8808_v14  ;;  %2033 = vmatmul.mubr.bf16.gmra.mrb[204].mxu1 %v8808_v14  ;;  %v11124_v39 = vpack.c.bf16 %v1096_v1, %v1092_v24  ;;  %v11126_v25 = vpack.c.bf16 %v1769_v15, %v1765_v18 }
 0x219   :  { %1369 = vmatprep.mubr.bf16.mxu0 %v14015_v44  ;;  %2042 = vmatprep.mubr.bf16.mxu1 %v14015_v44  ;;  %v11130_v19 = vpack.c.bf16 %v1098_v45, %v1094_v17  ;;  %v11132_v63 = vpack.c.bf16 %v1771_v13, %v1767_v4 }
 0x21a   :  { %14066 = vst [vmem:[#allocation77_spill] sm:$0xff] %v11124_v39  ;;  %14067 = vst [vmem:[#allocation78_spill] sm:$0xff] %v11126_v25 }
 0x21b   :  { %14068 = vst [vmem:[#allocation79_spill] sm:$0xff] %v11130_v19  ;;  %14069 = vst [vmem:[#allocation80_spill] sm:$0xff] %v11132_v63  ;;  %v1101_v3 = vpop.f32.mrb[100].mxu0  ;;  %v1774_v0 = vpop.f32.mrb[100].mxu1 }
 0x21c   :  { %v1103_v16 = vpop.f32.mrb[101].mxu0  ;;  %v1775_v2 = vadd.f32 %v1774_v0, %v10674_v29  ;;  %v1776_v54 = vpop.f32.mrb[101].mxu1  ;;  %v1102_v1 = vadd.f32 %v1101_v3, %v10680_v31 }
 0x21d   :  { %v1105_v14 = vpop.f32.mrb[102].mxu0  ;;  %v1777_v24 = vadd.f32 %v1776_v54, %v10678_v30  ;;  %v1778_v18 = vpop.f32.mrb[102].mxu1  ;;  %v1104_v4 = vadd.f32 %v1103_v16, %v10682_v33 }
 0x21e   :  { %v1106_v15 = vadd.f32 %v1105_v14, %v10680_v31  ;;  %v1107_v25 = vpop.f32.mrb[103].mxu0  ;;  %v1779_v17 = vadd.f32 %v1778_v18, %v10674_v29  ;;  %v1780_v13 = vpop.f32.mrb[103].mxu1 }
 0x21f   :  { %v1108_v45 = vadd.f32 %v1107_v25, %v10682_v33  ;;  %v1781_v63 = vadd.f32 %v1780_v13, %v10678_v30  ;;  %v8810_v25 = vld [vmem:[#allocation4 + $0x1a8] sm:$0xff]  }
 0x220   :  { %1370 = vmatmul.mubr.bf16.gmra.mrb[208].mxu0 %v8809_v26  ;;  %2043 = vmatmul.mubr.bf16.gmra.mrb[208].mxu1 %v8809_v26  ;;  %v11142_v0 = vpack.c.bf16 %v1106_v15, %v1102_v1  ;;  %v11144_v54 = vpack.c.bf16 %v1779_v17, %v1775_v2 }
 0x221   :  { %1379 = vmatprep.mubr.bf16.mxu0 %v14015_v44  ;;  %2052 = vmatprep.mubr.bf16.mxu1 %v14015_v44  ;;  %v11148_v3 = vpack.c.bf16 %v1108_v45, %v1104_v4  ;;  %v11150_v14 = vpack.c.bf16 %v1781_v63, %v1777_v24 }
 0x222   :  { %14070 = vst [vmem:[#allocation81_spill] sm:$0xff] %v11142_v0  ;;  %14071 = vst [vmem:[#allocation82_spill] sm:$0xff] %v11144_v54 }
 0x223   :  { %14072 = vst [vmem:[#allocation83_spill] sm:$0xff] %v11148_v3  ;;  %14073 = vst [vmem:[#allocation84_spill] sm:$0xff] %v11150_v14  ;;  %v1111_v18 = vpop.f32.mrb[104].mxu0  ;;  %v1784_v16 = vpop.f32.mrb[104].mxu1 }
 0x224   :  { %v1113_v19 = vpop.f32.mrb[105].mxu0  ;;  %v1785_v13 = vadd.f32 %v1784_v16, %v10674_v29  ;;  %v1786_v39 = vpop.f32.mrb[105].mxu1  ;;  %v1112_v15 = vadd.f32 %v1111_v18, %v10680_v31 }
 0x225   :  { %v1115_v26 = vpop.f32.mrb[106].mxu0  ;;  %v1787_v1 = vadd.f32 %v1786_v39, %v10678_v30  ;;  %v1788_v2 = vpop.f32.mrb[106].mxu1  ;;  %v1114_v24 = vadd.f32 %v1113_v19, %v10682_v33 }
 0x226   :  { %v1116_v17 = vadd.f32 %v1115_v26, %v10680_v31  ;;  %v1117_v54 = vpop.f32.mrb[107].mxu0  ;;  %v1789_v4 = vadd.f32 %v1788_v2, %v10674_v29  ;;  %v1790_v63 = vpop.f32.mrb[107].mxu1 }
 0x227   :  { %v1118_v45 = vadd.f32 %v1117_v54, %v10682_v33  ;;  %v1791_v14 = vadd.f32 %v1790_v63, %v10678_v30  ;;  %v8811_v54 = vld [vmem:[#allocation4 + $0x1b0] sm:$0xff]  }
 0x228   :  { %1380 = vmatmul.mubr.bf16.gmra.mrb[212].mxu0 %v8810_v25  ;;  %2053 = vmatmul.mubr.bf16.gmra.mrb[212].mxu1 %v8810_v25  ;;  %v11160_v16 = vpack.c.bf16 %v1116_v17, %v1112_v15  ;;  %v11162_v39 = vpack.c.bf16 %v1789_v4, %v1785_v13 }
 0x229   :  { %1389 = vmatprep.mubr.bf16.mxu0 %v14015_v44  ;;  %2062 = vmatprep.mubr.bf16.mxu1 %v14015_v44  ;;  %v11166_v18 = vpack.c.bf16 %v1118_v45, %v1114_v24  ;;  %v11168_v26 = vpack.c.bf16 %v1791_v14, %v1787_v1 }
 0x22a   :  { %14074 = vst [vmem:[#allocation85_spill] sm:$0xff] %v11160_v16  ;;  %14075 = vst [vmem:[#allocation86_spill] sm:$0xff] %v11162_v39 }
 0x22b   :  { %14076 = vst [vmem:[#allocation87_spill] sm:$0xff] %v11166_v18  ;;  %14077 = vst [vmem:[#allocation88_spill] sm:$0xff] %v11168_v26  ;;  %v1121_v2 = vpop.f32.mrb[108].mxu0  ;;  %v1794_v19 = vpop.f32.mrb[108].mxu1 }
 0x22c   :  { %v1123_v3 = vpop.f32.mrb[109].mxu0  ;;  %v1795_v63 = vadd.f32 %v1794_v19, %v10674_v29  ;;  %v1796_v0 = vpop.f32.mrb[109].mxu1  ;;  %v1122_v17 = vadd.f32 %v1121_v2, %v10680_v31 }
 0x22d   :  { %v1125_v25 = vpop.f32.mrb[110].mxu0  ;;  %v1797_v15 = vadd.f32 %v1796_v0, %v10678_v30  ;;  %v1798_v13 = vpop.f32.mrb[110].mxu1  ;;  %v1124_v1 = vadd.f32 %v1123_v3, %v10682_v33 }
 0x22e   :  { %v1126_v4 = vadd.f32 %v1125_v25, %v10680_v31  ;;  %v1127_v39 = vpop.f32.mrb[111].mxu0  ;;  %v1799_v24 = vadd.f32 %v1798_v13, %v10674_v29  ;;  %v1800_v14 = vpop.f32.mrb[111].mxu1 }
 0x22f   :  { %v1128_v45 = vadd.f32 %v1127_v39, %v10682_v33  ;;  %v1801_v26 = vadd.f32 %v1800_v14, %v10678_v30  ;;  %v8812_v39 = vld [vmem:[#allocation4 + $0x1b8] sm:$0xff]  }
 0x230   :  { %1390 = vmatmul.mubr.bf16.gmra.mrb[216].mxu0 %v8811_v54  ;;  %2063 = vmatmul.mubr.bf16.gmra.mrb[216].mxu1 %v8811_v54  ;;  %v11178_v19 = vpack.c.bf16 %v1126_v4, %v1122_v17  ;;  %v11180_v0 = vpack.c.bf16 %v1799_v24, %v1795_v63 }
 0x231   :  { %1399 = vmatprep.mubr.bf16.mxu0 %v14015_v44  ;;  %2072 = vmatprep.mubr.bf16.mxu1 %v14015_v44  ;;  %v11184_v2 = vpack.c.bf16 %v1128_v45, %v1124_v1  ;;  %v11186_v25 = vpack.c.bf16 %v1801_v26, %v1797_v15 }
 0x232   :  { %14078 = vst [vmem:[#allocation89_spill] sm:$0xff] %v11178_v19  ;;  %14079 = vst [vmem:[#allocation90_spill] sm:$0xff] %v11180_v0 }
 0x233   :  { %14080 = vst [vmem:[#allocation91_spill] sm:$0xff] %v11184_v2  ;;  %14081 = vst [vmem:[#allocation92_spill] sm:$0xff] %v11186_v25  ;;  %v1131_v13 = vpop.f32.mrb[112].mxu0  ;;  %v1804_v3 = vpop.f32.mrb[112].mxu1 }
 0x234   :  { %v1133_v18 = vpop.f32.mrb[113].mxu0  ;;  %v1805_v14 = vadd.f32 %v1804_v3, %v10674_v29  ;;  %v1806_v16 = vpop.f32.mrb[113].mxu1  ;;  %v1132_v4 = vadd.f32 %v1131_v13, %v10680_v31 }
 0x235   :  { %v1135_v54 = vpop.f32.mrb[114].mxu0  ;;  %v1807_v17 = vadd.f32 %v1806_v16, %v10678_v30  ;;  %v1808_v63 = vpop.f32.mrb[114].mxu1  ;;  %v1134_v15 = vadd.f32 %v1133_v18, %v10682_v33 }
 0x236   :  { %v1136_v24 = vadd.f32 %v1135_v54, %v10680_v31  ;;  %v1137_v0 = vpop.f32.mrb[115].mxu0  ;;  %v1809_v1 = vadd.f32 %v1808_v63, %v10674_v29  ;;  %v1810_v26 = vpop.f32.mrb[115].mxu1 }
 0x237   :  { %v1138_v45 = vadd.f32 %v1137_v0, %v10682_v33  ;;  %v1811_v25 = vadd.f32 %v1810_v26, %v10678_v30  ;;  %v8813_v0 = vld [vmem:[#allocation4 + $0x1c0] sm:$0xff]  }
 0x238   :  { %1400 = vmatmul.mubr.bf16.gmra.mrb[220].mxu0 %v8812_v39  ;;  %2073 = vmatmul.mubr.bf16.gmra.mrb[220].mxu1 %v8812_v39  ;;  %v11196_v3 = vpack.c.bf16 %v1136_v24, %v1132_v4  ;;  %v11198_v16 = vpack.c.bf16 %v1809_v1, %v1805_v14 }
 0x239   :  { %1409 = vmatprep.mubr.bf16.mxu0 %v14015_v44  ;;  %2082 = vmatprep.mubr.bf16.mxu1 %v14015_v44  ;;  %v11202_v13 = vpack.c.bf16 %v1138_v45, %v1134_v15  ;;  %v11204_v54 = vpack.c.bf16 %v1811_v25, %v1807_v17 }
 0x23a   :  { %14082 = vst [vmem:[#allocation93_spill] sm:$0xff] %v11196_v3  ;;  %14083 = vst [vmem:[#allocation94_spill] sm:$0xff] %v11198_v16 }
 0x23b   :  { %14084 = vst [vmem:[#allocation95_spill] sm:$0xff] %v11202_v13  ;;  %14085 = vst [vmem:[#allocation96_spill] sm:$0xff] %v11204_v54  ;;  %v1141_v63 = vpop.f32.mrb[116].mxu0  ;;  %v1814_v18 = vpop.f32.mrb[116].mxu1 }
 0x23c   :  { %v1143_v2 = vpop.f32.mrb[117].mxu0  ;;  %v1815_v26 = vadd.f32 %v1814_v18, %v10674_v29  ;;  %v1816_v19 = vpop.f32.mrb[117].mxu1  ;;  %v1142_v24 = vadd.f32 %v1141_v63, %v10680_v31 }
 0x23d   :  { %v1145_v39 = vpop.f32.mrb[118].mxu0  ;;  %v1817_v4 = vadd.f32 %v1816_v19, %v10678_v30  ;;  %v1818_v14 = vpop.f32.mrb[118].mxu1  ;;  %v1144_v17 = vadd.f32 %v1143_v2, %v10682_v33 }
 0x23e   :  { %v1146_v1 = vadd.f32 %v1145_v39, %v10680_v31  ;;  %v1147_v16 = vpop.f32.mrb[119].mxu0  ;;  %v1819_v15 = vadd.f32 %v1818_v14, %v10674_v29  ;;  %v1820_v25 = vpop.f32.mrb[119].mxu1 }
 0x23f   :  { %v1148_v45 = vadd.f32 %v1147_v16, %v10682_v33  ;;  %v1821_v54 = vadd.f32 %v1820_v25, %v10678_v30  ;;  %v8819_v16 = vld [vmem:[#allocation4 + $0x1c8] sm:$0xff]  }
 0x240   :  { %1410 = vmatmul.mubr.bf16.gmra.mrb[224].mxu0 %v8813_v0  ;;  %2083 = vmatmul.mubr.bf16.gmra.mrb[224].mxu1 %v8813_v0  ;;  %v11214_v18 = vpack.c.bf16 %v1146_v1, %v1142_v24  ;;  %v11216_v19 = vpack.c.bf16 %v1819_v15, %v1815_v26 }
 0x241   :  { %1419 = vmatprep.mubr.bf16.mxu0 %v14015_v44  ;;  %2092 = vmatprep.mubr.bf16.mxu1 %v14015_v44  ;;  %v11220_v63 = vpack.c.bf16 %v1148_v45, %v1144_v17  ;;  %v11222_v39 = vpack.c.bf16 %v1821_v54, %v1817_v4 }
 0x242   :  { %14086 = vst [vmem:[#allocation97_spill] sm:$0xff] %v11214_v18  ;;  %14087 = vst [vmem:[#allocation98_spill] sm:$0xff] %v11216_v19 }
 0x243   :  { %14088 = vst [vmem:[#allocation99_spill] sm:$0xff] %v11220_v63  ;;  %14089 = vst [vmem:[#allocation100_spill] sm:$0xff] %v11222_v39  ;;  %v1151_v14 = vpop.f32.mrb[120].mxu0  ;;  %v1824_v2 = vpop.f32.mrb[120].mxu1 }
 0x244   :  { %v1153_v13 = vpop.f32.mrb[121].mxu0  ;;  %v1825_v25 = vadd.f32 %v1824_v2, %v10674_v29  ;;  %v1826_v3 = vpop.f32.mrb[121].mxu1  ;;  %v1152_v1 = vadd.f32 %v1151_v14, %v10680_v31 }
 0x245   :  { %v1155_v0 = vpop.f32.mrb[122].mxu0  ;;  %v1827_v24 = vadd.f32 %v1826_v3, %v10678_v30  ;;  %v1828_v26 = vpop.f32.mrb[122].mxu1  ;;  %v1154_v4 = vadd.f32 %v1153_v13, %v10682_v33 }
 0x246   :  { %v1156_v15 = vadd.f32 %v1155_v0, %v10680_v31  ;;  %v1157_v19 = vpop.f32.mrb[123].mxu0  ;;  %v1829_v17 = vadd.f32 %v1828_v26, %v10674_v29  ;;  %v1830_v54 = vpop.f32.mrb[123].mxu1 }
 0x247   :  { %v1158_v45 = vadd.f32 %v1157_v19, %v10682_v33  ;;  %v1831_v39 = vadd.f32 %v1830_v54, %v10678_v30  ;;  %v8821_v19 = vld [vmem:[#allocation4 + $0x1d0] sm:$0xff]  }
 0x248   :  { %1420 = vmatmul.mubr.bf16.gmra.mrb[228].mxu0 %v8819_v16  ;;  %2093 = vmatmul.mubr.bf16.gmra.mrb[228].mxu1 %v8819_v16  ;;  %v11232_v2 = vpack.c.bf16 %v1156_v15, %v1152_v1  ;;  %v11234_v3 = vpack.c.bf16 %v1829_v17, %v1825_v25 }
 0x249   :  { %1429 = vmatprep.mubr.bf16.mxu0 %v14015_v44  ;;  %2102 = vmatprep.mubr.bf16.mxu1 %v14015_v44  ;;  %v11238_v14 = vpack.c.bf16 %v1158_v45, %v1154_v4  ;;  %v11240_v0 = vpack.c.bf16 %v1831_v39, %v1827_v24 }
 0x24a   :  { %14090 = vst [vmem:[#allocation101_spill] sm:$0xff] %v11232_v2  ;;  %14091 = vst [vmem:[#allocation102_spill] sm:$0xff] %v11234_v3 }
 0x24b   :  { %14092 = vst [vmem:[#allocation103_spill] sm:$0xff] %v11238_v14  ;;  %14093 = vst [vmem:[#allocation104_spill] sm:$0xff] %v11240_v0  ;;  %v1161_v26 = vpop.f32.mrb[124].mxu0  ;;  %v1834_v13 = vpop.f32.mrb[124].mxu1 }
 0x24c   :  { %v1163_v63 = vpop.f32.mrb[125].mxu0  ;;  %v1835_v54 = vadd.f32 %v1834_v13, %v10674_v29  ;;  %v1836_v18 = vpop.f32.mrb[125].mxu1  ;;  %v1162_v15 = vadd.f32 %v1161_v26, %v10680_v31 }
 0x24d   :  { %v1165_v16 = vpop.f32.mrb[126].mxu0  ;;  %v1837_v1 = vadd.f32 %v1836_v18, %v10678_v30  ;;  %v1838_v25 = vpop.f32.mrb[126].mxu1  ;;  %v1164_v24 = vadd.f32 %v1163_v63, %v10682_v33 }
 0x24e   :  { %v1166_v17 = vadd.f32 %v1165_v16, %v10680_v31  ;;  %v1167_v3 = vpop.f32.mrb[127].mxu0  ;;  %v1839_v4 = vadd.f32 %v1838_v25, %v10674_v29  ;;  %v1840_v39 = vpop.f32.mrb[127].mxu1 }
 0x24f   :  { %v1168_v45 = vadd.f32 %v1167_v3, %v10682_v33  ;;  %v1841_v0 = vadd.f32 %v1840_v39, %v10678_v30  ;;  %v8822_v3 = vld [vmem:[#allocation4 + $0x1d8] sm:$0xff]  }
 0x250   :  { %1430 = vmatmul.mubr.bf16.gmra.mrb[232].mxu0 %v8821_v19  ;;  %2103 = vmatmul.mubr.bf16.gmra.mrb[232].mxu1 %v8821_v19  ;;  %v11250_v13 = vpack.c.bf16 %v1166_v17, %v1162_v15  ;;  %v11252_v18 = vpack.c.bf16 %v1839_v4, %v1835_v54 }
 0x251   :  { %1439 = vmatprep.mubr.bf16.mxu0 %v14015_v44  ;;  %2112 = vmatprep.mubr.bf16.mxu1 %v14015_v44  ;;  %v11256_v26 = vpack.c.bf16 %v1168_v45, %v1164_v24  ;;  %v11258_v16 = vpack.c.bf16 %v1841_v0, %v1837_v1 }
 0x252   :  { %14094 = vst [vmem:[#allocation105_spill] sm:$0xff] %v11250_v13  ;;  %14095 = vst [vmem:[#allocation106_spill] sm:$0xff] %v11252_v18 }
 0x253   :  { %14096 = vst [vmem:[#allocation107_spill] sm:$0xff] %v11256_v26  ;;  %14097 = vst [vmem:[#allocation108_spill] sm:$0xff] %v11258_v16  ;;  %v1171_v25 = vpop.f32.mrb[128].mxu0  ;;  %v1844_v63 = vpop.f32.mrb[128].mxu1 }
 0x254   :  { %v1173_v14 = vpop.f32.mrb[129].mxu0  ;;  %v1845_v39 = vadd.f32 %v1844_v63, %v10674_v29  ;;  %v1846_v2 = vpop.f32.mrb[129].mxu1  ;;  %v1172_v17 = vadd.f32 %v1171_v25, %v10680_v31 }
 0x255   :  { %v1175_v19 = vpop.f32.mrb[130].mxu0  ;;  %v1847_v15 = vadd.f32 %v1846_v2, %v10678_v30  ;;  %v1848_v54 = vpop.f32.mrb[130].mxu1  ;;  %v1174_v1 = vadd.f32 %v1173_v14, %v10682_v33 }
 0x256   :  { %v1176_v4 = vadd.f32 %v1175_v19, %v10680_v31  ;;  %v1177_v18 = vpop.f32.mrb[131].mxu0  ;;  %v1849_v24 = vadd.f32 %v1848_v54, %v10674_v29  ;;  %v1850_v0 = vpop.f32.mrb[131].mxu1 }
 0x257   :  { %v1178_v45 = vadd.f32 %v1177_v18, %v10682_v33  ;;  %v1851_v16 = vadd.f32 %v1850_v0, %v10678_v30  ;;  %v8823_v18 = vld [vmem:[#allocation4 + $0x1e0] sm:$0xff]  }
 0x258   :  { %1440 = vmatmul.mubr.bf16.gmra.mrb[236].mxu0 %v8822_v3  ;;  %2113 = vmatmul.mubr.bf16.gmra.mrb[236].mxu1 %v8822_v3  ;;  %v11268_v63 = vpack.c.bf16 %v1176_v4, %v1172_v17  ;;  %v11270_v2 = vpack.c.bf16 %v1849_v24, %v1845_v39 }
 0x259   :  { %1449 = vmatprep.mubr.bf16.mxu0 %v14015_v44  ;;  %2122 = vmatprep.mubr.bf16.mxu1 %v14015_v44  ;;  %v11274_v25 = vpack.c.bf16 %v1178_v45, %v1174_v1  ;;  %v11276_v19 = vpack.c.bf16 %v1851_v16, %v1847_v15 }
 0x25a   :  { %14098 = vst [vmem:[#allocation109_spill] sm:$0xff] %v11268_v63  ;;  %14099 = vst [vmem:[#allocation110_spill] sm:$0xff] %v11270_v2 }
 0x25b   :  { %14100 = vst [vmem:[#allocation111_spill] sm:$0xff] %v11274_v25  ;;  %14101 = vst [vmem:[#allocation112_spill] sm:$0xff] %v11276_v19  ;;  %v1181_v54 = vpop.f32.mrb[132].mxu0  ;;  %v1854_v14 = vpop.f32.mrb[132].mxu1 }
 0x25c   :  { %v1183_v26 = vpop.f32.mrb[133].mxu0  ;;  %v1855_v0 = vadd.f32 %v1854_v14, %v10674_v29  ;;  %v1856_v13 = vpop.f32.mrb[133].mxu1  ;;  %v1182_v4 = vadd.f32 %v1181_v54, %v10680_v31 }
 0x25d   :  { %v1185_v3 = vpop.f32.mrb[134].mxu0  ;;  %v1857_v17 = vadd.f32 %v1856_v13, %v10678_v30  ;;  %v1858_v39 = vpop.f32.mrb[134].mxu1  ;;  %v1184_v15 = vadd.f32 %v1183_v26, %v10682_v33 }
 0x25e   :  { %v1186_v24 = vadd.f32 %v1185_v3, %v10680_v31  ;;  %v1187_v2 = vpop.f32.mrb[135].mxu0  ;;  %v1859_v1 = vadd.f32 %v1858_v39, %v10674_v29  ;;  %v1860_v16 = vpop.f32.mrb[135].mxu1 }
 0x25f   :  { %v1188_v45 = vadd.f32 %v1187_v2, %v10682_v33  ;;  %v1861_v19 = vadd.f32 %v1860_v16, %v10678_v30  ;;  %v8824_v2 = vld [vmem:[#allocation4 + $0x1e8] sm:$0xff]  }
 0x260   :  { %1450 = vmatmul.mubr.bf16.gmra.mrb[240].mxu0 %v8823_v18  ;;  %2123 = vmatmul.mubr.bf16.gmra.mrb[240].mxu1 %v8823_v18  ;;  %v11286_v14 = vpack.c.bf16 %v1186_v24, %v1182_v4  ;;  %v11288_v13 = vpack.c.bf16 %v1859_v1, %v1855_v0 }
 0x261   :  { %1459 = vmatprep.mubr.bf16.mxu0 %v14015_v44  ;;  %2132 = vmatprep.mubr.bf16.mxu1 %v14015_v44  ;;  %v11292_v54 = vpack.c.bf16 %v1188_v45, %v1184_v15  ;;  %v11294_v3 = vpack.c.bf16 %v1861_v19, %v1857_v17 }
 0x262   :  { %14102 = vst [vmem:[#allocation113_spill] sm:$0xff] %v11286_v14  ;;  %14103 = vst [vmem:[#allocation114_spill] sm:$0xff] %v11288_v13 }
 0x263   :  { %14104 = vst [vmem:[#allocation115_spill] sm:$0xff] %v11292_v54  ;;  %14105 = vst [vmem:[#allocation116_spill] sm:$0xff] %v11294_v3  ;;  %v1191_v39 = vpop.f32.mrb[136].mxu0  ;;  %v1864_v26 = vpop.f32.mrb[136].mxu1 }
 0x264   :  { %v1193_v25 = vpop.f32.mrb[137].mxu0  ;;  %v1865_v16 = vadd.f32 %v1864_v26, %v10674_v29  ;;  %v1866_v63 = vpop.f32.mrb[137].mxu1  ;;  %v1192_v24 = vadd.f32 %v1191_v39, %v10680_v31 }
 0x265   :  { %v1195_v18 = vpop.f32.mrb[138].mxu0  ;;  %v1867_v4 = vadd.f32 %v1866_v63, %v10678_v30  ;;  %v1868_v0 = vpop.f32.mrb[138].mxu1  ;;  %v1194_v17 = vadd.f32 %v1193_v25, %v10682_v33 }
 0x266   :  { %v1196_v1 = vadd.f32 %v1195_v18, %v10680_v31  ;;  %v1197_v13 = vpop.f32.mrb[139].mxu0  ;;  %v1869_v15 = vadd.f32 %v1868_v0, %v10674_v29  ;;  %v1870_v19 = vpop.f32.mrb[139].mxu1 }
 0x267   :  { %v1198_v45 = vadd.f32 %v1197_v13, %v10682_v33  ;;  %v1871_v3 = vadd.f32 %v1870_v19, %v10678_v30  ;;  %v8825_v13 = vld [vmem:[#allocation4 + $0x1f0] sm:$0xff]  }
 0x268   :  { %1460 = vmatmul.mubr.bf16.gmra.mrb[244].mxu0 %v8824_v2  ;;  %2133 = vmatmul.mubr.bf16.gmra.mrb[244].mxu1 %v8824_v2  ;;  %v11304_v26 = vpack.c.bf16 %v1196_v1, %v1192_v24  ;;  %v11306_v63 = vpack.c.bf16 %v1869_v15, %v1865_v16 }
 0x269   :  { %1469 = vmatprep.mubr.bf16.mxu0 %v14015_v44  ;;  %2142 = vmatprep.mubr.bf16.mxu1 %v14015_v44  ;;  %v11310_v39 = vpack.c.bf16 %v1198_v45, %v1194_v17  ;;  %v11312_v18 = vpack.c.bf16 %v1871_v3, %v1867_v4 }
 0x26a   :  { %14106 = vst [vmem:[#allocation117_spill] sm:$0xff] %v11304_v26  ;;  %14107 = vst [vmem:[#allocation118_spill] sm:$0xff] %v11306_v63 }
 0x26b   :  { %14108 = vst [vmem:[#allocation119_spill] sm:$0xff] %v11310_v39  ;;  %14109 = vst [vmem:[#allocation120_spill] sm:$0xff] %v11312_v18  ;;  %v1201_v0 = vpop.f32.mrb[140].mxu0  ;;  %v1874_v25 = vpop.f32.mrb[140].mxu1 }
 0x26c   :  { %v1203_v54 = vpop.f32.mrb[141].mxu0  ;;  %v1875_v19 = vadd.f32 %v1874_v25, %v10674_v29  ;;  %v1876_v14 = vpop.f32.mrb[141].mxu1  ;;  %v1202_v1 = vadd.f32 %v1201_v0, %v10680_v31 }
 0x26d   :  { %v1205_v2 = vpop.f32.mrb[142].mxu0  ;;  %v1877_v24 = vadd.f32 %v1876_v14, %v10678_v30  ;;  %v1878_v16 = vpop.f32.mrb[142].mxu1  ;;  %v1204_v4 = vadd.f32 %v1203_v54, %v10682_v33 }
 0x26e   :  { %v1206_v15 = vadd.f32 %v1205_v2, %v10680_v31  ;;  %v1207_v63 = vpop.f32.mrb[143].mxu0  ;;  %v1879_v17 = vadd.f32 %v1878_v16, %v10674_v29  ;;  %v1880_v3 = vpop.f32.mrb[143].mxu1 }
 0x26f   :  { %v1208_v45 = vadd.f32 %v1207_v63, %v10682_v33  ;;  %v1881_v18 = vadd.f32 %v1880_v3, %v10678_v30  ;;  %v8826_v63 = vld [vmem:[#allocation4 + $0x1f8] sm:$0xff]  }
 0x270   :  { %1470 = vmatmul.mubr.bf16.gmra.mrb[248].mxu0 %v8825_v13  ;;  %2143 = vmatmul.mubr.bf16.gmra.mrb[248].mxu1 %v8825_v13  ;;  %v11322_v25 = vpack.c.bf16 %v1206_v15, %v1202_v1  ;;  %v11324_v14 = vpack.c.bf16 %v1879_v17, %v1875_v19 }
 0x271   :  { %1479 = vmatprep.mubr.bf16.mxu0 %v14015_v44  ;;  %2152 = vmatprep.mubr.bf16.mxu1 %v14015_v44  ;;  %v11328_v0 = vpack.c.bf16 %v1208_v45, %v1204_v4  ;;  %v11330_v2 = vpack.c.bf16 %v1881_v18, %v1877_v24 }
 0x272   :  { %14110 = vst [vmem:[#allocation121_spill] sm:$0xff] %v11322_v25  ;;  %14111 = vst [vmem:[#allocation122_spill] sm:$0xff] %v11324_v14 }
 0x273   :  { %14112 = vst [vmem:[#allocation123_spill] sm:$0xff] %v11328_v0  ;;  %14113 = vst [vmem:[#allocation124_spill] sm:$0xff] %v11330_v2  ;;  %v1211_v16 = vpop.f32.mrb[144].mxu0  ;;  %v1884_v54 = vpop.f32.mrb[144].mxu1 }
 0x274   :  { %v1213_v39 = vpop.f32.mrb[145].mxu0  ;;  %v1885_v3 = vadd.f32 %v1884_v54, %v10674_v29  ;;  %v1886_v26 = vpop.f32.mrb[145].mxu1  ;;  %v1212_v15 = vadd.f32 %v1211_v16, %v10680_v31 }
 0x275   :  { %v1215_v13 = vpop.f32.mrb[146].mxu0  ;;  %v1887_v1 = vadd.f32 %v1886_v26, %v10678_v30  ;;  %v1888_v19 = vpop.f32.mrb[146].mxu1  ;;  %v1214_v24 = vadd.f32 %v1213_v39, %v10682_v33 }
 0x276   :  { %v1216_v17 = vadd.f32 %v1215_v13, %v10680_v31  ;;  %v1217_v14 = vpop.f32.mrb[147].mxu0  ;;  %v1889_v4 = vadd.f32 %v1888_v19, %v10674_v29  ;;  %v1890_v18 = vpop.f32.mrb[147].mxu1 }
 0x277   :  { %v1218_v45 = vadd.f32 %v1217_v14, %v10682_v33  ;;  %v1891_v2 = vadd.f32 %v1890_v18, %v10678_v30 }
 0x278   :  { %1480 = vmatmul.mubr.bf16.gmra.mrb[252].mxu0 %v8826_v63  ;;  %2153 = vmatmul.mubr.bf16.gmra.mrb[252].mxu1 %v8826_v63  ;;  %v11340_v54 = vpack.c.bf16 %v1216_v17, %v1212_v15  ;;  %v11342_v26 = vpack.c.bf16 %v1889_v4, %v1885_v3 }
 0x279   :  { %2934 = vmatprep.mubr.bf16.mxu0 %v14015_v44  ;;  %3047 = vmatprep.mubr.bf16.mxu1 %v14015_v44  ;;  %v11346_v16 = vpack.c.bf16 %v1218_v45, %v1214_v24  ;;  %v11348_v13 = vpack.c.bf16 %v1891_v2, %v1887_v1 }
 0x27a   :  { %14114 = vst [vmem:[#allocation125_spill] sm:$0xff] %v11340_v54  ;;  %14115 = vst [vmem:[#allocation126_spill] sm:$0xff] %v11342_v26  ;;  %v10148_v26 = vld [vmem:[#allocation9 + $0x4c] ss:$16 sps:$4 sm:$0xff]  }
 0x27b   :  { %14116 = vst [vmem:[#allocation127_spill] sm:$0xff] %v11346_v16  ;;  %14117 = vst [vmem:[#allocation128_spill] sm:$0xff] %v11348_v13  ;;  %v1221_v19 = vpop.f32.mrb[148].mxu0  ;;  %v1894_v39 = vpop.f32.mrb[148].mxu1  ;;  %v10143_v16 = vld [vmem:[#allocation9 + $0x24] ss:$16 sps:$4 sm:$0xff]  }
 0x27c   :  { %v1223_v0 = vpop.f32.mrb[149].mxu0  ;;  %v1895_v14 = vadd.f32 %v1894_v39, %v10674_v29  ;;  %v1896_v18 = vpop.f32.mrb[149].mxu1  ;;  %v1222_v3 = vadd.f32 %v1221_v19, %v10680_v31 }
 0x27d   :  { %v1225_v25 = vpop.f32.mrb[150].mxu0  ;;  %v1897_v63 = vadd.f32 %v1896_v18, %v10678_v30  ;;  %v1898_v15 = vpop.f32.mrb[150].mxu1  ;;  %v1224_v2 = vadd.f32 %v1223_v0, %v10682_v33  ;;  %v10141_v0 = vld [vmem:[#allocation9] ss:$16 sps:$4 sm:$0xff]  }
 0x27e   :  { %v1226_v17 = vadd.f32 %v1225_v25, %v10680_v31  ;;  %v1227_v4 = vpop.f32.mrb[151].mxu0  ;;  %v1899_v24 = vadd.f32 %v1898_v15, %v10674_v29  ;;  %v1900_v45 = vpop.f32.mrb[151].mxu1  ;;  %v10142_v15 = vld [vmem:[#allocation9 + $0x8] ss:$16 sps:$4 sm:$0xff]  }
 0x27f   :  { %v1228_v1 = vadd.f32 %v1227_v4, %v10682_v33  ;;  %v1901_v13 = vadd.f32 %v1900_v45, %v10678_v30 }
 0x280   :  { %2935 = vmatmul.mubr.bf16.vlgmr.msra.gmra.mrb[0].mxu0 %v14015_v44  ;;  %3048 = vmatmul.mubr.bf16.vlgmr.msra.gmra.mrb[0].mxu1 %v14015_v44  ;;  %v11360_v39 = vpack.c.bf16 %v1226_v17, %v1222_v3  ;;  %v11362_v18 = vpack.c.bf16 %v1899_v24, %v1895_v14  ;;  %v10144_v3 = vld [vmem:[#allocation9 + $0x2c] ss:$16 sps:$4 sm:$0xff]  }
 0x281   :  { %2944 = vmatprep.mubr.bf16.mxu0 %v14015_v44  ;;  %3057 = vmatprep.mubr.bf16.mxu1 %v14015_v44  ;;  %v11366_v25 = vpack.c.bf16 %v1228_v1, %v1224_v2  ;;  %v11368_v19 = vpack.c.bf16 %v1901_v13, %v1897_v63 }
 0x282   :  { %14118 = vst [vmem:[#allocation129_spill] sm:$0xff] %v11360_v39  ;;  %14119 = vst [vmem:[#allocation130_spill] sm:$0xff] %v11362_v18  ;;  %3588 = vmatpush1.bf16.msra.mxu0 %v10141_v0  ;;  %3701 = vmatpush1.bf16.msra.mxu1 %v10142_v15 }
 0x283   :  { %14120 = vst [vmem:[#allocation131_spill] sm:$0xff] %v11366_v25  ;;  %14121 = vst [vmem:[#allocation132_spill] sm:$0xff] %v11368_v19  ;;  %v1231_v4 = vpop.f32.mrb[152].mxu0  ;;  %v1904_v45 = vpop.f32.mrb[152].mxu1  ;;  %3589 = vmatprep.subr.bf16.mxu0 %v10143_v16  ;;  %3702 = vmatprep.subr.bf16.mxu1 %v10144_v3  ;;  %v10145_v25 = vld [vmem:[#allocation9 + $0x20] ss:$16 sps:$4 sm:$0xff]  }
 0x284   :  { %v1233_v14 = vpop.f32.mrb[153].mxu0  ;;  %v1905_v17 = vadd.f32 %v1904_v45, %v10674_v29  ;;  %v1906_v24 = vpop.f32.mrb[153].mxu1  ;;  %v1232_v13 = vadd.f32 %v1231_v4, %v10680_v31  ;;  %v10146_v16 = vld [vmem:[#allocation9 + $0x28] ss:$16 sps:$4 sm:$0xff]  }
 0x285   :  { %v1235_v18 = vpop.f32.mrb[154].mxu0  ;;  %v1907_v2 = vadd.f32 %v1906_v24, %v10678_v30  ;;  %v1908_v1 = vpop.f32.mrb[154].mxu1  ;;  %v1234_v3 = vadd.f32 %v1233_v14, %v10682_v33  ;;  %v10147_v24 = vld [vmem:[#allocation9 + $0x44] ss:$16 sps:$4 sm:$0xff]  }
 0x286   :  { %v1236_v63 = vadd.f32 %v1235_v18, %v10680_v31  ;;  %v1237_v0 = vpop.f32.mrb[155].mxu0  ;;  %v1909_v15 = vadd.f32 %v1908_v1, %v10674_v29  ;;  %v1910_v19 = vpop.f32.mrb[155].mxu1  ;;  %3590 = vmatpush1.bf16.msra.mxu0 %v10145_v25  ;;  %3703 = vmatpush1.bf16.msra.mxu1 %v10146_v16  ;;  %v10150_v1 = vld [vmem:[#allocation9 + $0x48] ss:$16 sps:$4 sm:$0xff]   ;;  %v10151_v16 = vld [vmem:[#allocation9 + $0x64] ss:$16 sps:$4 sm:$0xff]  }
 0x287   :  { %v1238_v45 = vadd.f32 %v1237_v0, %v10682_v33  ;;  %v1911_v39 = vadd.f32 %v1910_v19, %v10678_v30  ;;  %3591 = vmatprep.subr.bf16.mxu0 %v10147_v24  ;;  %3704 = vmatprep.subr.bf16.mxu1 %v10148_v26  ;;  %v10149_v19 = vld [vmem:[#allocation9 + $0x40] ss:$16 sps:$4 sm:$0xff]  }
 0x288   :  { %2945 = vmatmul.mubr.bf16.gmra.mrb[4].mxu0 %v14015_v44  ;;  %3058 = vmatmul.mubr.bf16.gmra.mrb[4].mxu1 %v14015_v44  ;;  %v11380_v18 = vpack.c.bf16 %v1236_v63, %v1232_v13  ;;  %v11382_v4 = vpack.c.bf16 %v1909_v15, %v1905_v17  ;;  %v10152_v13 = vld [vmem:[#allocation9 + $0x6c] ss:$16 sps:$4 sm:$0xff]  }
 0x289   :  { %2954 = vmatprep.mubr.bf16.mxu0 %v14015_v44  ;;  %3067 = vmatprep.mubr.bf16.mxu1 %v14015_v44  ;;  %v11386_v25 = vpack.c.bf16 %v1238_v45, %v1234_v3  ;;  %v11388_v14 = vpack.c.bf16 %v1911_v39, %v1907_v2 }
 0x28a   :  { %14122 = vst [vmem:[#allocation133_spill] sm:$0xff] %v11380_v18  ;;  %14123 = vst [vmem:[#allocation134_spill] sm:$0xff] %v11382_v4  ;;  %3592 = vmatpush1.bf16.msra.mxu0 %v10149_v19  ;;  %3705 = vmatpush1.bf16.msra.mxu1 %v10150_v1  ;;  %v10156_v18 = vld [vmem:[#allocation9 + $0x8c] ss:$16 sps:$4 sm:$0xff]  }
 0x28b   :  { %14124 = vst [vmem:[#allocation135_spill] sm:$0xff] %v11386_v25  ;;  %14125 = vst [vmem:[#allocation136_spill] sm:$0xff] %v11388_v14  ;;  %v1241_v26 = vpop.f32.mrb[156].mxu0  ;;  %v1914_v0 = vpop.f32.mrb[156].mxu1  ;;  %3593 = vmatprep.subr.bf16.mxu0 %v10151_v16  ;;  %3706 = vmatprep.subr.bf16.mxu1 %v10152_v13  ;;  %v10153_v25 = vld [vmem:[#allocation9 + $0x60] ss:$16 sps:$4 sm:$0xff]  }
 0x28c   :  { %v1243_v17 = vpop.f32.mrb[157].mxu0  ;;  %v1915_v63 = vadd.f32 %v1914_v0, %v10674_v29  ;;  %v1916_v15 = vpop.f32.mrb[157].mxu1  ;;  %v1242_v39 = vadd.f32 %v1241_v26, %v10680_v31  ;;  %v10154_v16 = vld [vmem:[#allocation9 + $0x68] ss:$16 sps:$4 sm:$0xff]  }
 0x28d   :  { %v1245_v24 = vpop.f32.mrb[158].mxu0  ;;  %v1917_v3 = vadd.f32 %v1916_v15, %v10678_v30  ;;  %v1918_v45 = vpop.f32.mrb[158].mxu1  ;;  %v1244_v13 = vadd.f32 %v1243_v17, %v10682_v33  ;;  %v10155_v15 = vld [vmem:[#allocation9 + $0x84] ss:$16 sps:$4 sm:$0xff]  }
 0x28e   :  { %v1246_v2 = vadd.f32 %v1245_v24, %v10680_v31  ;;  %v1247_v19 = vpop.f32.mrb[159].mxu0  ;;  %v1919_v1 = vadd.f32 %v1918_v45, %v10674_v29  ;;  %v1920_v14 = vpop.f32.mrb[159].mxu1  ;;  %3594 = vmatpush1.bf16.msra.mxu0 %v10153_v25  ;;  %3707 = vmatpush1.bf16.msra.mxu1 %v10154_v16  ;;  %v10158_v45 = vld [vmem:[#allocation9 + $0x88] ss:$16 sps:$4 sm:$0xff]   ;;  %v10159_v16 = vld [vmem:[#allocation9 + $0xa4] ss:$16 sps:$4 sm:$0xff]  }
 0x28f   :  { %v1248_v0 = vadd.f32 %v1247_v19, %v10682_v33  ;;  %v1921_v4 = vadd.f32 %v1920_v14, %v10678_v30  ;;  %3595 = vmatprep.subr.bf16.mxu0 %v10155_v15  ;;  %3708 = vmatprep.subr.bf16.mxu1 %v10156_v18  ;;  %v10157_v14 = vld [vmem:[#allocation9 + $0x80] ss:$16 sps:$4 sm:$0xff]  }
 0x290   :  { %2955 = vmatmul.mubr.bf16.gmra.mrb[8].mxu0 %v14015_v44  ;;  %3068 = vmatmul.mubr.bf16.gmra.mrb[8].mxu1 %v14015_v44  ;;  %v11400_v26 = vpack.c.bf16 %v1246_v2, %v1242_v39  ;;  %v11402_v24 = vpack.c.bf16 %v1919_v1, %v1915_v63  ;;  %v10160_v39 = vld [vmem:[#allocation9 + $0xac] ss:$16 sps:$4 sm:$0xff]  }
 0x291   :  { %2964 = vmatprep.mubr.bf16.mxu0 %v14015_v44  ;;  %3077 = vmatprep.mubr.bf16.mxu1 %v14015_v44  ;;  %v11406_v25 = vpack.c.bf16 %v1248_v0, %v1244_v13  ;;  %v11408_v17 = vpack.c.bf16 %v1921_v4, %v1917_v3 }
 0x292   :  { %14126 = vst [vmem:[#allocation137_spill] sm:$0xff] %v11400_v26  ;;  %14127 = vst [vmem:[#allocation138_spill] sm:$0xff] %v11402_v24  ;;  %3596 = vmatpush1.bf16.msra.mxu0 %v10157_v14  ;;  %3709 = vmatpush1.bf16.msra.mxu1 %v10158_v45  ;;  %v10164_v26 = vld [vmem:[#allocation9 + $0xcc] ss:$16 sps:$4 sm:$0xff]  }
 0x293   :  { %14128 = vst [vmem:[#allocation139_spill] sm:$0xff] %v11406_v25  ;;  %14129 = vst [vmem:[#allocation140_spill] sm:$0xff] %v11408_v17  ;;  %v1251_v18 = vpop.f32.mrb[160].mxu0  ;;  %v1924_v19 = vpop.f32.mrb[160].mxu1  ;;  %3597 = vmatprep.subr.bf16.mxu0 %v10159_v16  ;;  %3710 = vmatprep.subr.bf16.mxu1 %v10160_v39  ;;  %v10161_v25 = vld [vmem:[#allocation9 + $0xa0] ss:$16 sps:$4 sm:$0xff]  }
 0x294   :  { %v1253_v63 = vpop.f32.mrb[161].mxu0  ;;  %v1925_v2 = vadd.f32 %v1924_v19, %v10674_v29  ;;  %v1926_v1 = vpop.f32.mrb[161].mxu1  ;;  %v1252_v4 = vadd.f32 %v1251_v18, %v10680_v31  ;;  %v10162_v16 = vld [vmem:[#allocation9 + $0xa8] ss:$16 sps:$4 sm:$0xff]  }
 0x295   :  { %v1255_v15 = vpop.f32.mrb[162].mxu0  ;;  %v1927_v13 = vadd.f32 %v1926_v1, %v10678_v30  ;;  %v1928_v0 = vpop.f32.mrb[162].mxu1  ;;  %v1254_v39 = vadd.f32 %v1253_v63, %v10682_v33  ;;  %v10163_v1 = vld [vmem:[#allocation9 + $0xc4] ss:$16 sps:$4 sm:$0xff]  }
 0x296   :  { %v1256_v3 = vadd.f32 %v1255_v15, %v10680_v31  ;;  %v1257_v14 = vpop.f32.mrb[163].mxu0  ;;  %v1929_v45 = vadd.f32 %v1928_v0, %v10674_v29  ;;  %v1930_v17 = vpop.f32.mrb[163].mxu1  ;;  %3598 = vmatpush1.bf16.msra.mxu0 %v10161_v25  ;;  %3711 = vmatpush1.bf16.msra.mxu1 %v10162_v16  ;;  %v10166_v0 = vld [vmem:[#allocation9 + $0xc8] ss:$16 sps:$4 sm:$0xff]   ;;  %v10167_v16 = vld [vmem:[#allocation9 + $0xe4] ss:$16 sps:$4 sm:$0xff]  }
 0x297   :  { %v1258_v19 = vadd.f32 %v1257_v14, %v10682_v33  ;;  %v1931_v24 = vadd.f32 %v1930_v17, %v10678_v30  ;;  %3599 = vmatprep.subr.bf16.mxu0 %v10163_v1  ;;  %3712 = vmatprep.subr.bf16.mxu1 %v10164_v26  ;;  %v10165_v17 = vld [vmem:[#allocation9 + $0xc0] ss:$16 sps:$4 sm:$0xff]  }
 0x298   :  { %2965 = vmatmul.mubr.bf16.gmra.mrb[12].mxu0 %v14015_v44  ;;  %3078 = vmatmul.mubr.bf16.gmra.mrb[12].mxu1 %v14015_v44  ;;  %v11420_v18 = vpack.c.bf16 %v1256_v3, %v1252_v4  ;;  %v11422_v15 = vpack.c.bf16 %v1929_v45, %v1925_v2  ;;  %v10168_v4 = vld [vmem:[#allocation9 + $0xec] ss:$16 sps:$4 sm:$0xff]  }
 0x299   :  { %2974 = vmatprep.mubr.bf16.mxu0 %v14015_v44  ;;  %3087 = vmatprep.mubr.bf16.mxu1 %v14015_v44  ;;  %v11426_v25 = vpack.c.bf16 %v1258_v19, %v1254_v39  ;;  %v11428_v63 = vpack.c.bf16 %v1931_v24, %v1927_v13 }
 0x29a   :  { %14130 = vst [vmem:[#allocation141_spill] sm:$0xff] %v11420_v18  ;;  %14131 = vst [vmem:[#allocation142_spill] sm:$0xff] %v11422_v15  ;;  %3600 = vmatpush1.bf16.msra.mxu0 %v10165_v17  ;;  %3713 = vmatpush1.bf16.msra.mxu1 %v10166_v0  ;;  %v10172_v18 = vld [vmem:[#allocation9 + $0xc] ss:$16 sps:$4 sm:$0xff]  }
 0x29b   :  { %14132 = vst [vmem:[#allocation143_spill] sm:$0xff] %v11426_v25  ;;  %14133 = vst [vmem:[#allocation144_spill] sm:$0xff] %v11428_v63  ;;  %v1261_v26 = vpop.f32.mrb[164].mxu0  ;;  %v1934_v14 = vpop.f32.mrb[164].mxu1  ;;  %3601 = vmatprep.subr.bf16.mxu0 %v10167_v16  ;;  %3714 = vmatprep.subr.bf16.mxu1 %v10168_v4  ;;  %v10169_v25 = vld [vmem:[#allocation9 + $0xe0] ss:$16 sps:$4 sm:$0xff]  }
 0x29c   :  { %v1263_v2 = vpop.f32.mrb[165].mxu0  ;;  %v1935_v3 = vadd.f32 %v1934_v14, %v10674_v29  ;;  %v1936_v45 = vpop.f32.mrb[165].mxu1  ;;  %v1262_v24 = vadd.f32 %v1261_v26, %v10680_v31  ;;  %v10170_v16 = vld [vmem:[#allocation9 + $0xe8] ss:$16 sps:$4 sm:$0xff]  }
 0x29d   :  { %v1265_v1 = vpop.f32.mrb[166].mxu0  ;;  %v1937_v39 = vadd.f32 %v1936_v45, %v10678_v30  ;;  %v1938_v19 = vpop.f32.mrb[166].mxu1  ;;  %v1264_v4 = vadd.f32 %v1263_v2, %v10682_v33  ;;  %v10171_v45 = vld [vmem:[#allocation9 + $0x4] ss:$16 sps:$4 sm:$0xff]  }
 0x29e   :  { %v1266_v13 = vadd.f32 %v1265_v1, %v10680_v31  ;;  %v1267_v17 = vpop.f32.mrb[167].mxu0  ;;  %v1939_v0 = vadd.f32 %v1938_v19, %v10674_v29  ;;  %v1940_v63 = vpop.f32.mrb[167].mxu1  ;;  %3602 = vmatpush1.bf16.msra.mxu0 %v10169_v25  ;;  %3715 = vmatpush1.bf16.msra.mxu1 %v10170_v16 }
 0x29f   :  { %v1268_v14 = vadd.f32 %v1267_v17, %v10682_v33  ;;  %v1941_v15 = vadd.f32 %v1940_v63, %v10678_v30  ;;  %4272 = vmatprep.subr.bf16.mxu0 %v10171_v45  ;;  %4385 = vmatprep.subr.bf16.mxu1 %v10172_v18 }
 0x2a0   :  { %2975 = vmatmul.mubr.bf16.gmra.mrb[16].mxu0 %v14015_v44  ;;  %3088 = vmatmul.mubr.bf16.gmra.mrb[16].mxu1 %v14015_v44  ;;  %v11440_v26 = vpack.c.bf16 %v1266_v13, %v1262_v24  ;;  %v11442_v1 = vpack.c.bf16 %v1939_v0, %v1935_v3 }
 0x2a1   :  { %2984 = vmatprep.mubr.bf16.mxu0 %v14015_v44  ;;  %3097 = vmatprep.mubr.bf16.mxu1 %v14015_v44  ;;  %v11446_v25 = vpack.c.bf16 %v1268_v14, %v1264_v4  ;;  %v11448_v2 = vpack.c.bf16 %v1941_v15, %v1937_v39 }
 0x2a2   :  { %14134 = vst [vmem:[#allocation145_spill] sm:$0xff] %v11440_v26  ;;  %14135 = vst [vmem:[#allocation146_spill] sm:$0xff] %v11442_v1 }
 0x2a3   :  { %14136 = vst [vmem:[#allocation147_spill] sm:$0xff] %v11446_v25  ;;  %14137 = vst [vmem:[#allocation148_spill] sm:$0xff] %v11448_v2  ;;  %v1271_v63 = vpop.f32.mrb[168].mxu0  ;;  %v1944_v19 = vpop.f32.mrb[168].mxu1 }
 0x2a4   :  { %v1273_v17 = vpop.f32.mrb[169].mxu0  ;;  %v1945_v18 = vadd.f32 %v1944_v19, %v10674_v29  ;;  %v1946_v16 = vpop.f32.mrb[169].mxu1  ;;  %v1272_v3 = vadd.f32 %v1271_v63, %v10680_v31 }
 0x2a5   :  { %v1275_v45 = vpop.f32.mrb[170].mxu0  ;;  %v1947_v24 = vadd.f32 %v1946_v16, %v10678_v30  ;;  %v1948_v13 = vpop.f32.mrb[170].mxu1  ;;  %v1274_v15 = vadd.f32 %v1273_v17, %v10682_v33 }
 0x2a6   :  { %v1276_v0 = vadd.f32 %v1275_v45, %v10680_v31  ;;  %v1277_v1 = vpop.f32.mrb[171].mxu0  ;;  %v1949_v4 = vadd.f32 %v1948_v13, %v10674_v29  ;;  %v1950_v14 = vpop.f32.mrb[171].mxu1 }
 0x2a7   :  { %v1278_v39 = vadd.f32 %v1277_v1, %v10682_v33  ;;  %v1951_v2 = vadd.f32 %v1950_v14, %v10678_v30 }
 0x2a8   :  { %2985 = vmatmul.mubr.bf16.gmra.mrb[20].mxu0 %v14015_v44  ;;  %3098 = vmatmul.mubr.bf16.gmra.mrb[20].mxu1 %v14015_v44  ;;  %v11460_v19 = vpack.c.bf16 %v1276_v0, %v1272_v3  ;;  %v11462_v16 = vpack.c.bf16 %v1949_v4, %v1945_v18 }
 0x2a9   :  { %2994 = vmatprep.mubr.bf16.mxu0 %v14015_v44  ;;  %3107 = vmatprep.mubr.bf16.mxu1 %v14015_v44  ;;  %v11466_v63 = vpack.c.bf16 %v1278_v39, %v1274_v15  ;;  %v11468_v45 = vpack.c.bf16 %v1951_v2, %v1947_v24 }
 0x2aa   :  { %14138 = vst [vmem:[#allocation149_spill] sm:$0xff] %v11460_v19  ;;  %14139 = vst [vmem:[#allocation150_spill] sm:$0xff] %v11462_v16 }
 0x2ab   :  { %14140 = vst [vmem:[#allocation151_spill] sm:$0xff] %v11466_v63  ;;  %14141 = vst [vmem:[#allocation152_spill] sm:$0xff] %v11468_v45  ;;  %v1281_v17 = vpop.f32.mrb[172].mxu0  ;;  %v1954_v1 = vpop.f32.mrb[172].mxu1 }
 0x2ac   :  { %v1283_v13 = vpop.f32.mrb[173].mxu0  ;;  %v1955_v14 = vadd.f32 %v1954_v1, %v10674_v29  ;;  %v1956_v25 = vpop.f32.mrb[173].mxu1  ;;  %v1282_v18 = vadd.f32 %v1281_v17, %v10680_v31 }
 0x2ad   :  { %v1285_v26 = vpop.f32.mrb[174].mxu0  ;;  %v1957_v3 = vadd.f32 %v1956_v25, %v10678_v30  ;;  %v1958_v0 = vpop.f32.mrb[174].mxu1  ;;  %v1284_v2 = vadd.f32 %v1283_v13, %v10682_v33 }
 0x2ae   :  { %v1286_v4 = vadd.f32 %v1285_v26, %v10680_v31  ;;  %v1287_v16 = vpop.f32.mrb[175].mxu0  ;;  %v1959_v15 = vadd.f32 %v1958_v0, %v10674_v29  ;;  %v1960_v39 = vpop.f32.mrb[175].mxu1 }
 0x2af   :  { %v1288_v24 = vadd.f32 %v1287_v16, %v10682_v33  ;;  %v1961_v45 = vadd.f32 %v1960_v39, %v10678_v30 }
 0x2b0   :  { %2995 = vmatmul.mubr.bf16.gmra.mrb[24].mxu0 %v14015_v44  ;;  %3108 = vmatmul.mubr.bf16.gmra.mrb[24].mxu1 %v14015_v44  ;;  %v11480_v25 = vpack.c.bf16 %v1286_v4, %v1282_v18  ;;  %v11482_v1 = vpack.c.bf16 %v1959_v15, %v1955_v14 }
 0x2b1   :  { %3004 = vmatprep.mubr.bf16.mxu0 %v14015_v44  ;;  %3117 = vmatprep.mubr.bf16.mxu1 %v14015_v44  ;;  %v11486_v26 = vpack.c.bf16 %v1288_v24, %v1284_v2  ;;  %v11488_v17 = vpack.c.bf16 %v1961_v45, %v1957_v3 }
 0x2b2   :  { %14142 = vst [vmem:[#allocation153_spill] sm:$0xff] %v11480_v25  ;;  %14143 = vst [vmem:[#allocation154_spill] sm:$0xff] %v11482_v1 }
 0x2b3   :  { %14144 = vst [vmem:[#allocation155_spill] sm:$0xff] %v11486_v26  ;;  %14145 = vst [vmem:[#allocation156_spill] sm:$0xff] %v11488_v17  ;;  %v1291_v13 = vpop.f32.mrb[176].mxu0  ;;  %v1964_v16 = vpop.f32.mrb[176].mxu1 }
 0x2b4   :  { %v1293_v0 = vpop.f32.mrb[177].mxu0  ;;  %v1965_v39 = vadd.f32 %v1964_v16, %v10674_v29  ;;  %v1966_v63 = vpop.f32.mrb[177].mxu1  ;;  %v1292_v14 = vadd.f32 %v1291_v13, %v10680_v31 }
 0x2b5   :  { %v1295_v19 = vpop.f32.mrb[178].mxu0  ;;  %v1967_v18 = vadd.f32 %v1966_v63, %v10678_v30  ;;  %v1968_v4 = vpop.f32.mrb[178].mxu1  ;;  %v1294_v45 = vadd.f32 %v1293_v0, %v10682_v33 }
 0x2b6   :  { %v1296_v15 = vadd.f32 %v1295_v19, %v10680_v31  ;;  %v1297_v1 = vpop.f32.mrb[179].mxu0  ;;  %v1969_v2 = vadd.f32 %v1968_v4, %v10674_v29  ;;  %v1970_v24 = vpop.f32.mrb[179].mxu1 }
 0x2b7   :  { %v1298_v3 = vadd.f32 %v1297_v1, %v10682_v33  ;;  %v1971_v17 = vadd.f32 %v1970_v24, %v10678_v30 }
 0x2b8   :  { %3005 = vmatmul.mubr.bf16.gmra.mrb[28].mxu0 %v14015_v44  ;;  %3118 = vmatmul.mubr.bf16.gmra.mrb[28].mxu1 %v14015_v44  ;;  %v11500_v63 = vpack.c.bf16 %v1296_v15, %v1292_v14  ;;  %v11502_v16 = vpack.c.bf16 %v1969_v2, %v1965_v39 }
 0x2b9   :  { %3619 = vmatprep.mubr.bf16.mxu0 %v14015_v44  ;;  %3732 = vmatprep.mubr.bf16.mxu1 %v14015_v44  ;;  %v11506_v19 = vpack.c.bf16 %v1298_v3, %v1294_v45  ;;  %v11508_v13 = vpack.c.bf16 %v1971_v17, %v1967_v18 }
 0x2ba   :  { %14146 = vst [vmem:[#allocation157_spill] sm:$0xff] %v11500_v63  ;;  %14147 = vst [vmem:[#allocation158_spill] sm:$0xff] %v11502_v16 }
 0x2bb   :  { %14148 = vst [vmem:[#allocation159_spill] sm:$0xff] %v11506_v19  ;;  %14149 = vst [vmem:[#allocation160_spill] sm:$0xff] %v11508_v13  ;;  %v1301_v0 = vpop.f32.mrb[180].mxu0  ;;  %v1974_v1 = vpop.f32.mrb[180].mxu1 }
 0x2bc   :  { %v1303_v4 = vpop.f32.mrb[181].mxu0  ;;  %v1975_v24 = vadd.f32 %v1974_v1, %v10674_v29  ;;  %v1976_v26 = vpop.f32.mrb[181].mxu1  ;;  %v1302_v39 = vadd.f32 %v1301_v0, %v10680_v31 }
 0x2bd   :  { %v1305_v25 = vpop.f32.mrb[182].mxu0  ;;  %v1977_v14 = vadd.f32 %v1976_v26, %v10678_v30  ;;  %v1978_v15 = vpop.f32.mrb[182].mxu1  ;;  %v1304_v17 = vadd.f32 %v1303_v4, %v10682_v33 }
 0x2be   :  { %v1306_v2 = vadd.f32 %v1305_v25, %v10680_v31  ;;  %v1307_v16 = vpop.f32.mrb[183].mxu0  ;;  %v1979_v45 = vadd.f32 %v1978_v15, %v10674_v29  ;;  %v1980_v3 = vpop.f32.mrb[183].mxu1 }
 0x2bf   :  { %v1308_v18 = vadd.f32 %v1307_v16, %v10682_v33  ;;  %v1981_v13 = vadd.f32 %v1980_v3, %v10678_v30 }
 0x2c0   :  { %v11518_v1 = vpack.c.bf16 %v1306_v2, %v1302_v39  ;;  %v11520_v19 = vpack.c.bf16 %v1979_v45, %v1975_v24 }
 0x2c1   :  { %v11522_v26 = vpack.c.bf16 %v1308_v18, %v1304_v17  ;;  %v11524_v63 = vpack.c.bf16 %v1981_v13, %v1977_v14 }
 0x2c2   :  { %14150 = vst [vmem:[#allocation161_spill] sm:$0xff] %v11518_v1  ;;  %14151 = vst [vmem:[#allocation162_spill] sm:$0xff] %v11520_v19 }
 0x2c3   :  { %14152 = vst [vmem:[#allocation163_spill] sm:$0xff] %v11522_v26  ;;  %14153 = vst [vmem:[#allocation164_spill] sm:$0xff] %v11524_v63  ;;  %v1311_v0 = vpop.f32.mrb[184].mxu0  ;;  %v1984_v25 = vpop.f32.mrb[184].mxu1 }
 0x2c4   :  { %v1313_v54 = vpop.f32.mrb[185].mxu0  ;;  %v1985_v15 = vadd.f32 %v1984_v25, %v10674_v29  ;;  %v1986_v43 = vpop.f32.mrb[185].mxu1  ;;  %v1312_v3 = vadd.f32 %v1311_v0, %v10680_v31 }
 0x2c5   :  { %v1315_v42 = vpop.f32.mrb[186].mxu0  ;;  %v1987_v4 = vadd.f32 %v1986_v43, %v10678_v30  ;;  %v1988_v16 = vpop.f32.mrb[186].mxu1  ;;  %v1314_v13 = vadd.f32 %v1313_v54, %v10682_v33 }
 0x2c6   :  { %v1316_v39 = vadd.f32 %v1315_v42, %v10680_v31  ;;  %v1317_v24 = vpop.f32.mrb[187].mxu0  ;;  %v1989_v2 = vadd.f32 %v1988_v16, %v10674_v29  ;;  %v1990_v45 = vpop.f32.mrb[187].mxu1 }
 0x2c7   :  { %v1318_v14 = vadd.f32 %v1317_v24, %v10682_v33  ;;  %v1991_v17 = vadd.f32 %v1990_v45, %v10678_v30 }
 0x2c8   :  { %v11534_v18 = vpack.c.bf16 %v1316_v39, %v1312_v3  ;;  %v11536_v25 = vpack.c.bf16 %v1989_v2, %v1985_v15 }
 0x2c9   :  { %v11538_v43 = vpack.c.bf16 %v1318_v14, %v1314_v13  ;;  %v11540_v63 = vpack.c.bf16 %v1991_v17, %v1987_v4 }
 0x2ca   :  { %14154 = vst [vmem:[#allocation165_spill] sm:$0xff] %v11534_v18  ;;  %14155 = vst [vmem:[#allocation166_spill] sm:$0xff] %v11536_v25 }
 0x2cb   :  { %14156 = vst [vmem:[#allocation167_spill] sm:$0xff] %v11538_v43  ;;  %14157 = vst [vmem:[#allocation168_spill] sm:$0xff] %v11540_v63  ;;  %v1321_v0 = vpop.f32.mrb[188].mxu0  ;;  %v1994_v42 = vpop.f32.mrb[188].mxu1 }
 0x2cc   :  { %v1323_v26 = vpop.f32.mrb[189].mxu0  ;;  %v1995_v16 = vadd.f32 %v1994_v42, %v10674_v29  ;;  %v1996_v19 = vpop.f32.mrb[189].mxu1  ;;  %v1322_v45 = vadd.f32 %v1321_v0, %v10680_v31 }
 0x2cd   :  { %v1325_v1 = vpop.f32.mrb[190].mxu0  ;;  %v1997_v54 = vadd.f32 %v1996_v19, %v10678_v30  ;;  %v1998_v24 = vpop.f32.mrb[190].mxu1  ;;  %v1324_v4 = vadd.f32 %v1323_v26, %v10682_v33 }
 0x2ce   :  { %v1326_v3 = vadd.f32 %v1325_v1, %v10680_v31  ;;  %v1327_v15 = vpop.f32.mrb[191].mxu0  ;;  %v1999_v39 = vadd.f32 %v1998_v24, %v10674_v29  ;;  %v2000_v2 = vpop.f32.mrb[191].mxu1 }
 0x2cf   :  { %v1328_v13 = vadd.f32 %v1327_v15, %v10682_v33  ;;  %v2001_v14 = vadd.f32 %v2000_v2, %v10678_v30 }
 0x2d0   :  { %v11550_v17 = vpack.c.bf16 %v1326_v3, %v1322_v45  ;;  %v11552_v42 = vpack.c.bf16 %v1999_v39, %v1995_v16 }
 0x2d1   :  { %v11554_v19 = vpack.c.bf16 %v1328_v13, %v1324_v4  ;;  %v11556_v63 = vpack.c.bf16 %v2001_v14, %v1997_v54 }
 0x2d2   :  { %14158 = vst [vmem:[#allocation169_spill] sm:$0xff] %v11550_v17  ;;  %14159 = vst [vmem:[#allocation170_spill] sm:$0xff] %v11552_v42 }
 0x2d3   :  { %14160 = vst [vmem:[#allocation171_spill] sm:$0xff] %v11554_v19  ;;  %14161 = vst [vmem:[#allocation172_spill] sm:$0xff] %v11556_v63  ;;  %v1331_v0 = vpop.f32.mrb[192].mxu0  ;;  %v2004_v1 = vpop.f32.mrb[192].mxu1 }
 0x2d4   :  { %v1333_v43 = vpop.f32.mrb[193].mxu0  ;;  %v2005_v24 = vadd.f32 %v2004_v1, %v10674_v29  ;;  %v2006_v25 = vpop.f32.mrb[193].mxu1  ;;  %v1332_v2 = vadd.f32 %v1331_v0, %v10680_v31 }
 0x2d5   :  { %v1335_v18 = vpop.f32.mrb[194].mxu0  ;;  %v2007_v26 = vadd.f32 %v2006_v25, %v10678_v30  ;;  %v2008_v15 = vpop.f32.mrb[194].mxu1  ;;  %v1334_v54 = vadd.f32 %v1333_v43, %v10682_v33 }
 0x2d6   :  { %v1336_v45 = vadd.f32 %v1335_v18, %v10680_v31  ;;  %v1337_v16 = vpop.f32.mrb[195].mxu0  ;;  %v2009_v3 = vadd.f32 %v2008_v15, %v10674_v29  ;;  %v2010_v39 = vpop.f32.mrb[195].mxu1 }
 0x2d7   :  { %v1338_v4 = vadd.f32 %v1337_v16, %v10682_v33  ;;  %v2011_v13 = vadd.f32 %v2010_v39, %v10678_v30 }
 0x2d8   :  { %v11566_v14 = vpack.c.bf16 %v1336_v45, %v1332_v2  ;;  %v11568_v1 = vpack.c.bf16 %v2009_v3, %v2005_v24 }
 0x2d9   :  { %v11570_v25 = vpack.c.bf16 %v1338_v4, %v1334_v54  ;;  %v11572_v63 = vpack.c.bf16 %v2011_v13, %v2007_v26 }
 0x2da   :  { %14162 = vst [vmem:[#allocation173_spill] sm:$0xff] %v11566_v14  ;;  %14163 = vst [vmem:[#allocation174_spill] sm:$0xff] %v11568_v1 }
 0x2db   :  { %14164 = vst [vmem:[#allocation175_spill] sm:$0xff] %v11570_v25  ;;  %14165 = vst [vmem:[#allocation176_spill] sm:$0xff] %v11572_v63  ;;  %v1341_v0 = vpop.f32.mrb[196].mxu0  ;;  %v2014_v18 = vpop.f32.mrb[196].mxu1 }
 0x2dc   :  { %v1343_v19 = vpop.f32.mrb[197].mxu0  ;;  %v2015_v15 = vadd.f32 %v2014_v18, %v10674_v29  ;;  %v2016_v42 = vpop.f32.mrb[197].mxu1  ;;  %v1342_v39 = vadd.f32 %v1341_v0, %v10680_v31 }
 0x2dd   :  { %v1345_v17 = vpop.f32.mrb[198].mxu0  ;;  %v2017_v43 = vadd.f32 %v2016_v42, %v10678_v30  ;;  %v2018_v16 = vpop.f32.mrb[198].mxu1  ;;  %v1344_v26 = vadd.f32 %v1343_v19, %v10682_v33 }
 0x2de   :  { %v1346_v2 = vadd.f32 %v1345_v17, %v10680_v31  ;;  %v1347_v24 = vpop.f32.mrb[199].mxu0  ;;  %v2019_v45 = vadd.f32 %v2018_v16, %v10674_v29  ;;  %v2020_v3 = vpop.f32.mrb[199].mxu1 }
 0x2df   :  { %v1348_v54 = vadd.f32 %v1347_v24, %v10682_v33  ;;  %v2021_v4 = vadd.f32 %v2020_v3, %v10678_v30 }
 0x2e0   :  { %v11582_v13 = vpack.c.bf16 %v1346_v2, %v1342_v39  ;;  %v11584_v18 = vpack.c.bf16 %v2019_v45, %v2015_v15 }
 0x2e1   :  { %v11586_v42 = vpack.c.bf16 %v1348_v54, %v1344_v26  ;;  %v11588_v63 = vpack.c.bf16 %v2021_v4, %v2017_v43 }
 0x2e2   :  { %14166 = vst [vmem:[#allocation177_spill] sm:$0xff] %v11582_v13  ;;  %14167 = vst [vmem:[#allocation178_spill] sm:$0xff] %v11584_v18 }
 0x2e3   :  { %14168 = vst [vmem:[#allocation179_spill] sm:$0xff] %v11586_v42  ;;  %14169 = vst [vmem:[#allocation180_spill] sm:$0xff] %v11588_v63  ;;  %v1351_v0 = vpop.f32.mrb[200].mxu0  ;;  %v2024_v17 = vpop.f32.mrb[200].mxu1 }
 0x2e4   :  { %v1353_v25 = vpop.f32.mrb[201].mxu0  ;;  %v2025_v16 = vadd.f32 %v2024_v17, %v10674_v29  ;;  %v2026_v1 = vpop.f32.mrb[201].mxu1  ;;  %v1352_v3 = vadd.f32 %v1351_v0, %v10680_v31 }
 0x2e5   :  { %v1355_v14 = vpop.f32.mrb[202].mxu0  ;;  %v2027_v19 = vadd.f32 %v2026_v1, %v10678_v30  ;;  %v2028_v24 = vpop.f32.mrb[202].mxu1  ;;  %v1354_v43 = vadd.f32 %v1353_v25, %v10682_v33 }
 0x2e6   :  { %v1356_v39 = vadd.f32 %v1355_v14, %v10680_v31  ;;  %v1357_v15 = vpop.f32.mrb[203].mxu0  ;;  %v2029_v2 = vadd.f32 %v2028_v24, %v10674_v29  ;;  %v2030_v45 = vpop.f32.mrb[203].mxu1 }
 0x2e7   :  { %v1358_v26 = vadd.f32 %v1357_v15, %v10682_v33  ;;  %v2031_v54 = vadd.f32 %v2030_v45, %v10678_v30 }
 0x2e8   :  { %v11598_v4 = vpack.c.bf16 %v1356_v39, %v1352_v3  ;;  %v11600_v17 = vpack.c.bf16 %v2029_v2, %v2025_v16 }
 0x2e9   :  { %v11602_v1 = vpack.c.bf16 %v1358_v26, %v1354_v43  ;;  %v11604_v63 = vpack.c.bf16 %v2031_v54, %v2027_v19 }
 0x2ea   :  { %14170 = vst [vmem:[#allocation181_spill] sm:$0xff] %v11598_v4  ;;  %14171 = vst [vmem:[#allocation182_spill] sm:$0xff] %v11600_v17 }
 0x2eb   :  { %14172 = vst [vmem:[#allocation183_spill] sm:$0xff] %v11602_v1  ;;  %14173 = vst [vmem:[#allocation184_spill] sm:$0xff] %v11604_v63  ;;  %v1361_v0 = vpop.f32.mrb[204].mxu0  ;;  %v2034_v14 = vpop.f32.mrb[204].mxu1 }
 0x2ec   :  { %v1363_v42 = vpop.f32.mrb[205].mxu0  ;;  %v2035_v24 = vadd.f32 %v2034_v14, %v10674_v29  ;;  %v2036_v18 = vpop.f32.mrb[205].mxu1  ;;  %v1362_v45 = vadd.f32 %v1361_v0, %v10680_v31 }
 0x2ed   :  { %v1365_v13 = vpop.f32.mrb[206].mxu0  ;;  %v2037_v25 = vadd.f32 %v2036_v18, %v10678_v30  ;;  %v2038_v15 = vpop.f32.mrb[206].mxu1  ;;  %v1364_v19 = vadd.f32 %v1363_v42, %v10682_v33 }
 0x2ee   :  { %v1366_v3 = vadd.f32 %v1365_v13, %v10680_v31  ;;  %v1367_v16 = vpop.f32.mrb[207].mxu0  ;;  %v2039_v39 = vadd.f32 %v2038_v15, %v10674_v29  ;;  %v2040_v2 = vpop.f32.mrb[207].mxu1 }
 0x2ef   :  { %v1368_v43 = vadd.f32 %v1367_v16, %v10682_v33  ;;  %v2041_v26 = vadd.f32 %v2040_v2, %v10678_v30 }
 0x2f0   :  { %v11614_v54 = vpack.c.bf16 %v1366_v3, %v1362_v45  ;;  %v11616_v14 = vpack.c.bf16 %v2039_v39, %v2035_v24 }
 0x2f1   :  { %v11618_v18 = vpack.c.bf16 %v1368_v43, %v1364_v19  ;;  %v11620_v63 = vpack.c.bf16 %v2041_v26, %v2037_v25 }
 0x2f2   :  { %14174 = vst [vmem:[#allocation185_spill] sm:$0xff] %v11614_v54  ;;  %14175 = vst [vmem:[#allocation186_spill] sm:$0xff] %v11616_v14 }
 0x2f3   :  { %14176 = vst [vmem:[#allocation187_spill] sm:$0xff] %v11618_v18  ;;  %14177 = vst [vmem:[#allocation188_spill] sm:$0xff] %v11620_v63  ;;  %v1371_v0 = vpop.f32.mrb[208].mxu0  ;;  %v2044_v13 = vpop.f32.mrb[208].mxu1 }
 0x2f4   :  { %v1373_v1 = vpop.f32.mrb[209].mxu0  ;;  %v2045_v15 = vadd.f32 %v2044_v13, %v10674_v29  ;;  %v2046_v17 = vpop.f32.mrb[209].mxu1  ;;  %v1372_v2 = vadd.f32 %v1371_v0, %v10680_v31 }
 0x2f5   :  { %v1375_v4 = vpop.f32.mrb[210].mxu0  ;;  %v2047_v42 = vadd.f32 %v2046_v17, %v10678_v30  ;;  %v2048_v16 = vpop.f32.mrb[210].mxu1  ;;  %v1374_v25 = vadd.f32 %v1373_v1, %v10682_v33 }
 0x2f6   :  { %v1376_v45 = vadd.f32 %v1375_v4, %v10680_v31  ;;  %v1377_v24 = vpop.f32.mrb[211].mxu0  ;;  %v2049_v3 = vadd.f32 %v2048_v16, %v10674_v29  ;;  %v2050_v39 = vpop.f32.mrb[211].mxu1 }
 0x2f7   :  { %v1378_v19 = vadd.f32 %v1377_v24, %v10682_v33  ;;  %v2051_v43 = vadd.f32 %v2050_v39, %v10678_v30 }
 0x2f8   :  { %v11630_v26 = vpack.c.bf16 %v1376_v45, %v1372_v2  ;;  %v11632_v13 = vpack.c.bf16 %v2049_v3, %v2045_v15 }
 0x2f9   :  { %v11634_v17 = vpack.c.bf16 %v1378_v19, %v1374_v25  ;;  %v11636_v63 = vpack.c.bf16 %v2051_v43, %v2047_v42 }
 0x2fa   :  { %14178 = vst [vmem:[#allocation189_spill] sm:$0xff] %v11630_v26  ;;  %14179 = vst [vmem:[#allocation190_spill] sm:$0xff] %v11632_v13 }
 0x2fb   :  { %14180 = vst [vmem:[#allocation191_spill] sm:$0xff] %v11634_v17  ;;  %14181 = vst [vmem:[#allocation192_spill] sm:$0xff] %v11636_v63  ;;  %v1381_v0 = vpop.f32.mrb[212].mxu0  ;;  %v2054_v4 = vpop.f32.mrb[212].mxu1 }
 0x2fc   :  { %v1383_v18 = vpop.f32.mrb[213].mxu0  ;;  %v2055_v16 = vadd.f32 %v2054_v4, %v10674_v29  ;;  %v2056_v14 = vpop.f32.mrb[213].mxu1  ;;  %v1382_v39 = vadd.f32 %v1381_v0, %v10680_v31 }
 0x2fd   :  { %v1385_v54 = vpop.f32.mrb[214].mxu0  ;;  %v2057_v1 = vadd.f32 %v2056_v14, %v10678_v30  ;;  %v2058_v24 = vpop.f32.mrb[214].mxu1  ;;  %v1384_v42 = vadd.f32 %v1383_v18, %v10682_v33 }
 0x2fe   :  { %v1386_v2 = vadd.f32 %v1385_v54, %v10680_v31  ;;  %v1387_v15 = vpop.f32.mrb[215].mxu0  ;;  %v2059_v45 = vadd.f32 %v2058_v24, %v10674_v29  ;;  %v2060_v3 = vpop.f32.mrb[215].mxu1 }
 0x2ff   :  { %v1388_v25 = vadd.f32 %v1387_v15, %v10682_v33  ;;  %v2061_v19 = vadd.f32 %v2060_v3, %v10678_v30 }
 0x300   :  { %v11646_v43 = vpack.c.bf16 %v1386_v2, %v1382_v39  ;;  %v11648_v4 = vpack.c.bf16 %v2059_v45, %v2055_v16 }
 0x301   :  { %v11650_v14 = vpack.c.bf16 %v1388_v25, %v1384_v42  ;;  %v11652_v63 = vpack.c.bf16 %v2061_v19, %v2057_v1 }
 0x302   :  { %14182 = vst [vmem:[#allocation193_spill] sm:$0xff] %v11646_v43  ;;  %14183 = vst [vmem:[#allocation194_spill] sm:$0xff] %v11648_v4 }
 0x303   :  { %14184 = vst [vmem:[#allocation195_spill] sm:$0xff] %v11650_v14  ;;  %14185 = vst [vmem:[#allocation196_spill] sm:$0xff] %v11652_v63  ;;  %v1391_v0 = vpop.f32.mrb[216].mxu0  ;;  %v2064_v54 = vpop.f32.mrb[216].mxu1 }
 0x304   :  { %v1393_v17 = vpop.f32.mrb[217].mxu0  ;;  %v2065_v24 = vadd.f32 %v2064_v54, %v10674_v29  ;;  %v2066_v13 = vpop.f32.mrb[217].mxu1  ;;  %v1392_v3 = vadd.f32 %v1391_v0, %v10680_v31 }
 0x305   :  { %v1395_v26 = vpop.f32.mrb[218].mxu0  ;;  %v2067_v18 = vadd.f32 %v2066_v13, %v10678_v30  ;;  %v2068_v15 = vpop.f32.mrb[218].mxu1  ;;  %v1394_v1 = vadd.f32 %v1393_v17, %v10682_v33 }
 0x306   :  { %v1396_v39 = vadd.f32 %v1395_v26, %v10680_v31  ;;  %v1397_v16 = vpop.f32.mrb[219].mxu0  ;;  %v2069_v2 = vadd.f32 %v2068_v15, %v10674_v29  ;;  %v2070_v45 = vpop.f32.mrb[219].mxu1 }
 0x307   :  { %v1398_v42 = vadd.f32 %v1397_v16, %v10682_v33  ;;  %v2071_v25 = vadd.f32 %v2070_v45, %v10678_v30 }
 0x308   :  { %v11662_v19 = vpack.c.bf16 %v1396_v39, %v1392_v3  ;;  %v11664_v54 = vpack.c.bf16 %v2069_v2, %v2065_v24 }
 0x309   :  { %v11666_v13 = vpack.c.bf16 %v1398_v42, %v1394_v1  ;;  %v11668_v63 = vpack.c.bf16 %v2071_v25, %v2067_v18 }
 0x30a   :  { %14186 = vst [vmem:[#allocation197_spill] sm:$0xff] %v11662_v19  ;;  %14187 = vst [vmem:[#allocation198_spill] sm:$0xff] %v11664_v54 }
 0x30b   :  { %14188 = vst [vmem:[#allocation199_spill] sm:$0xff] %v11666_v13  ;;  %14189 = vst [vmem:[#allocation200_spill] sm:$0xff] %v11668_v63  ;;  %v1401_v0 = vpop.f32.mrb[220].mxu0  ;;  %v2074_v26 = vpop.f32.mrb[220].mxu1 }
 0x30c   :  { %v1403_v14 = vpop.f32.mrb[221].mxu0  ;;  %v2075_v15 = vadd.f32 %v2074_v26, %v10674_v29  ;;  %v2076_v4 = vpop.f32.mrb[221].mxu1  ;;  %v1402_v45 = vadd.f32 %v1401_v0, %v10680_v31 }
 0x30d   :  { %v1405_v43 = vpop.f32.mrb[222].mxu0  ;;  %v2077_v17 = vadd.f32 %v2076_v4, %v10678_v30  ;;  %v2078_v16 = vpop.f32.mrb[222].mxu1  ;;  %v1404_v18 = vadd.f32 %v1403_v14, %v10682_v33 }
 0x30e   :  { %v1406_v3 = vadd.f32 %v1405_v43, %v10680_v31  ;;  %v1407_v24 = vpop.f32.mrb[223].mxu0  ;;  %v2079_v39 = vadd.f32 %v2078_v16, %v10674_v29  ;;  %v2080_v2 = vpop.f32.mrb[223].mxu1 }
 0x30f   :  { %v1408_v1 = vadd.f32 %v1407_v24, %v10682_v33  ;;  %v2081_v42 = vadd.f32 %v2080_v2, %v10678_v30 }
 0x310   :  { %v11678_v25 = vpack.c.bf16 %v1406_v3, %v1402_v45  ;;  %v11680_v26 = vpack.c.bf16 %v2079_v39, %v2075_v15 }
 0x311   :  { %v11682_v4 = vpack.c.bf16 %v1408_v1, %v1404_v18  ;;  %v11684_v63 = vpack.c.bf16 %v2081_v42, %v2077_v17 }
 0x312   :  { %14190 = vst [vmem:[#allocation201_spill] sm:$0xff] %v11678_v25  ;;  %14191 = vst [vmem:[#allocation202_spill] sm:$0xff] %v11680_v26 }
 0x313   :  { %14192 = vst [vmem:[#allocation203_spill] sm:$0xff] %v11682_v4  ;;  %14193 = vst [vmem:[#allocation204_spill] sm:$0xff] %v11684_v63  ;;  %v1411_v0 = vpop.f32.mrb[224].mxu0  ;;  %v2084_v43 = vpop.f32.mrb[224].mxu1 }
 0x314   :  { %v1413_v13 = vpop.f32.mrb[225].mxu0  ;;  %v2085_v16 = vadd.f32 %v2084_v43, %v10674_v29  ;;  %v2086_v54 = vpop.f32.mrb[225].mxu1  ;;  %v1412_v2 = vadd.f32 %v1411_v0, %v10680_v31 }
 0x315   :  { %v1415_v19 = vpop.f32.mrb[226].mxu0  ;;  %v2087_v14 = vadd.f32 %v2086_v54, %v10678_v30  ;;  %v2088_v24 = vpop.f32.mrb[226].mxu1  ;;  %v1414_v17 = vadd.f32 %v1413_v13, %v10682_v33 }
 0x316   :  { %v1416_v45 = vadd.f32 %v1415_v19, %v10680_v31  ;;  %v1417_v15 = vpop.f32.mrb[227].mxu0  ;;  %v2089_v3 = vadd.f32 %v2088_v24, %v10674_v29  ;;  %v2090_v39 = vpop.f32.mrb[227].mxu1 }
 0x317   :  { %v1418_v18 = vadd.f32 %v1417_v15, %v10682_v33  ;;  %v2091_v1 = vadd.f32 %v2090_v39, %v10678_v30 }
 0x318   :  { %v11694_v42 = vpack.c.bf16 %v1416_v45, %v1412_v2  ;;  %v11696_v43 = vpack.c.bf16 %v2089_v3, %v2085_v16 }
 0x319   :  { %v11698_v54 = vpack.c.bf16 %v1418_v18, %v1414_v17  ;;  %v11700_v63 = vpack.c.bf16 %v2091_v1, %v2087_v14 }
 0x31a   :  { %14194 = vst [vmem:[#allocation205_spill] sm:$0xff] %v11694_v42  ;;  %14195 = vst [vmem:[#allocation206_spill] sm:$0xff] %v11696_v43 }
 0x31b   :  { %14196 = vst [vmem:[#allocation207_spill] sm:$0xff] %v11698_v54  ;;  %14197 = vst [vmem:[#allocation208_spill] sm:$0xff] %v11700_v63  ;;  %v1421_v0 = vpop.f32.mrb[228].mxu0  ;;  %v2094_v19 = vpop.f32.mrb[228].mxu1 }
 0x31c   :  { %v1423_v4 = vpop.f32.mrb[229].mxu0  ;;  %v2095_v24 = vadd.f32 %v2094_v19, %v10674_v29  ;;  %v2096_v26 = vpop.f32.mrb[229].mxu1  ;;  %v1422_v39 = vadd.f32 %v1421_v0, %v10680_v31 }
 0x31d   :  { %v1425_v25 = vpop.f32.mrb[230].mxu0  ;;  %v2097_v13 = vadd.f32 %v2096_v26, %v10678_v30  ;;  %v2098_v15 = vpop.f32.mrb[230].mxu1  ;;  %v1424_v14 = vadd.f32 %v1423_v4, %v10682_v33 }
 0x31e   :  { %v1426_v2 = vadd.f32 %v1425_v25, %v10680_v31  ;;  %v1427_v16 = vpop.f32.mrb[231].mxu0  ;;  %v2099_v45 = vadd.f32 %v2098_v15, %v10674_v29  ;;  %v2100_v3 = vpop.f32.mrb[231].mxu1 }
 0x31f   :  { %v1428_v17 = vadd.f32 %v1427_v16, %v10682_v33  ;;  %v2101_v18 = vadd.f32 %v2100_v3, %v10678_v30 }
 0x320   :  { %v11710_v1 = vpack.c.bf16 %v1426_v2, %v1422_v39  ;;  %v11712_v19 = vpack.c.bf16 %v2099_v45, %v2095_v24 }
 0x321   :  { %v11714_v26 = vpack.c.bf16 %v1428_v17, %v1424_v14  ;;  %v11716_v63 = vpack.c.bf16 %v2101_v18, %v2097_v13 }
 0x322   :  { %14198 = vst [vmem:[#allocation209_spill] sm:$0xff] %v11710_v1  ;;  %14199 = vst [vmem:[#allocation210_spill] sm:$0xff] %v11712_v19 }
 0x323   :  { %14200 = vst [vmem:[#allocation211_spill] sm:$0xff] %v11714_v26  ;;  %14201 = vst [vmem:[#allocation212_spill] sm:$0xff] %v11716_v63  ;;  %v1431_v0 = vpop.f32.mrb[232].mxu0  ;;  %v2104_v25 = vpop.f32.mrb[232].mxu1 }
 0x324   :  { %v1433_v54 = vpop.f32.mrb[233].mxu0  ;;  %v2105_v15 = vadd.f32 %v2104_v25, %v10674_v29  ;;  %v2106_v43 = vpop.f32.mrb[233].mxu1  ;;  %v1432_v3 = vadd.f32 %v1431_v0, %v10680_v31 }
 0x325   :  { %v1435_v42 = vpop.f32.mrb[234].mxu0  ;;  %v2107_v4 = vadd.f32 %v2106_v43, %v10678_v30  ;;  %v2108_v16 = vpop.f32.mrb[234].mxu1  ;;  %v1434_v13 = vadd.f32 %v1433_v54, %v10682_v33 }
 0x326   :  { %v1436_v39 = vadd.f32 %v1435_v42, %v10680_v31  ;;  %v1437_v24 = vpop.f32.mrb[235].mxu0  ;;  %v2109_v2 = vadd.f32 %v2108_v16, %v10674_v29  ;;  %v2110_v45 = vpop.f32.mrb[235].mxu1 }
 0x327   :  { %v1438_v14 = vadd.f32 %v1437_v24, %v10682_v33  ;;  %v2111_v17 = vadd.f32 %v2110_v45, %v10678_v30 }
 0x328   :  { %v11726_v18 = vpack.c.bf16 %v1436_v39, %v1432_v3  ;;  %v11728_v25 = vpack.c.bf16 %v2109_v2, %v2105_v15 }
 0x329   :  { %v11730_v43 = vpack.c.bf16 %v1438_v14, %v1434_v13  ;;  %v11732_v63 = vpack.c.bf16 %v2111_v17, %v2107_v4 }
 0x32a   :  { %14202 = vst [vmem:[#allocation213_spill] sm:$0xff] %v11726_v18  ;;  %14203 = vst [vmem:[#allocation214_spill] sm:$0xff] %v11728_v25 }
 0x32b   :  { %14204 = vst [vmem:[#allocation215_spill] sm:$0xff] %v11730_v43  ;;  %14205 = vst [vmem:[#allocation216_spill] sm:$0xff] %v11732_v63  ;;  %v1441_v0 = vpop.f32.mrb[236].mxu0  ;;  %v2114_v42 = vpop.f32.mrb[236].mxu1 }
 0x32c   :  { %v1443_v26 = vpop.f32.mrb[237].mxu0  ;;  %v2115_v16 = vadd.f32 %v2114_v42, %v10674_v29  ;;  %v2116_v19 = vpop.f32.mrb[237].mxu1  ;;  %v1442_v45 = vadd.f32 %v1441_v0, %v10680_v31 }
 0x32d   :  { %v1445_v1 = vpop.f32.mrb[238].mxu0  ;;  %v2117_v54 = vadd.f32 %v2116_v19, %v10678_v30  ;;  %v2118_v24 = vpop.f32.mrb[238].mxu1  ;;  %v1444_v4 = vadd.f32 %v1443_v26, %v10682_v33 }
 0x32e   :  { %v1446_v3 = vadd.f32 %v1445_v1, %v10680_v31  ;;  %v1447_v15 = vpop.f32.mrb[239].mxu0  ;;  %v2119_v39 = vadd.f32 %v2118_v24, %v10674_v29  ;;  %v2120_v2 = vpop.f32.mrb[239].mxu1 }
 0x32f   :  { %v1448_v13 = vadd.f32 %v1447_v15, %v10682_v33  ;;  %v2121_v14 = vadd.f32 %v2120_v2, %v10678_v30 }
 0x330   :  { %v11742_v17 = vpack.c.bf16 %v1446_v3, %v1442_v45  ;;  %v11744_v42 = vpack.c.bf16 %v2119_v39, %v2115_v16 }
 0x331   :  { %v11746_v19 = vpack.c.bf16 %v1448_v13, %v1444_v4  ;;  %v11748_v63 = vpack.c.bf16 %v2121_v14, %v2117_v54 }
 0x332   :  { %14206 = vst [vmem:[#allocation217_spill] sm:$0xff] %v11742_v17  ;;  %14207 = vst [vmem:[#allocation218_spill] sm:$0xff] %v11744_v42 }
 0x333   :  { %14208 = vst [vmem:[#allocation219_spill] sm:$0xff] %v11746_v19  ;;  %14209 = vst [vmem:[#allocation220_spill] sm:$0xff] %v11748_v63  ;;  %v1451_v0 = vpop.f32.mrb[240].mxu0  ;;  %v2124_v1 = vpop.f32.mrb[240].mxu1 }
 0x334   :  { %v1453_v43 = vpop.f32.mrb[241].mxu0  ;;  %v2125_v24 = vadd.f32 %v2124_v1, %v10674_v29  ;;  %v2126_v25 = vpop.f32.mrb[241].mxu1  ;;  %v1452_v2 = vadd.f32 %v1451_v0, %v10680_v31 }
 0x335   :  { %v1455_v18 = vpop.f32.mrb[242].mxu0  ;;  %v2127_v26 = vadd.f32 %v2126_v25, %v10678_v30  ;;  %v2128_v15 = vpop.f32.mrb[242].mxu1  ;;  %v1454_v54 = vadd.f32 %v1453_v43, %v10682_v33 }
 0x336   :  { %v1456_v45 = vadd.f32 %v1455_v18, %v10680_v31  ;;  %v1457_v16 = vpop.f32.mrb[243].mxu0  ;;  %v2129_v3 = vadd.f32 %v2128_v15, %v10674_v29  ;;  %v2130_v39 = vpop.f32.mrb[243].mxu1 }
 0x337   :  { %v1458_v4 = vadd.f32 %v1457_v16, %v10682_v33  ;;  %v2131_v13 = vadd.f32 %v2130_v39, %v10678_v30 }
 0x338   :  { %v11758_v14 = vpack.c.bf16 %v1456_v45, %v1452_v2  ;;  %v11760_v1 = vpack.c.bf16 %v2129_v3, %v2125_v24 }
 0x339   :  { %v11762_v25 = vpack.c.bf16 %v1458_v4, %v1454_v54  ;;  %v11764_v63 = vpack.c.bf16 %v2131_v13, %v2127_v26 }
 0x33a   :  { %14210 = vst [vmem:[#allocation221_spill] sm:$0xff] %v11758_v14  ;;  %14211 = vst [vmem:[#allocation222_spill] sm:$0xff] %v11760_v1 }
 0x33b   :  { %14212 = vst [vmem:[#allocation223_spill] sm:$0xff] %v11762_v25  ;;  %14213 = vst [vmem:[#allocation224_spill] sm:$0xff] %v11764_v63  ;;  %v1461_v0 = vpop.f32.mrb[244].mxu0  ;;  %v2134_v18 = vpop.f32.mrb[244].mxu1 }
 0x33c   :  { %v1463_v19 = vpop.f32.mrb[245].mxu0  ;;  %v2135_v15 = vadd.f32 %v2134_v18, %v10674_v29  ;;  %v2136_v42 = vpop.f32.mrb[245].mxu1  ;;  %v1462_v39 = vadd.f32 %v1461_v0, %v10680_v31 }
 0x33d   :  { %v1465_v17 = vpop.f32.mrb[246].mxu0  ;;  %v2137_v43 = vadd.f32 %v2136_v42, %v10678_v30  ;;  %v2138_v16 = vpop.f32.mrb[246].mxu1  ;;  %v1464_v26 = vadd.f32 %v1463_v19, %v10682_v33 }
 0x33e   :  { %v1466_v2 = vadd.f32 %v1465_v17, %v10680_v31  ;;  %v1467_v24 = vpop.f32.mrb[247].mxu0  ;;  %v2139_v45 = vadd.f32 %v2138_v16, %v10674_v29  ;;  %v2140_v3 = vpop.f32.mrb[247].mxu1 }
 0x33f   :  { %v1468_v54 = vadd.f32 %v1467_v24, %v10682_v33  ;;  %v2141_v4 = vadd.f32 %v2140_v3, %v10678_v30 }
 0x340   :  { %v11774_v13 = vpack.c.bf16 %v2139_v45, %v2135_v15  ;;  %v11776_v18 = vpack.c.bf16 %v1466_v2, %v1462_v39 }
 0x341   :  { %v11778_v42 = vpack.c.bf16 %v1468_v54, %v1464_v26  ;;  %v11780_v63 = vpack.c.bf16 %v2141_v4, %v2137_v43  ;;  %v3128_v4 = vunpack.c.l.bf16 %v10692_v50 }
 0x342   :  { %14214 = vst [vmem:[#allocation225_spill] sm:$0xff] %v11774_v13  ;;  %14215 = vst [vmem:[#allocation226_spill] sm:$0xff] %v11776_v18 }
 0x343   :  { %14216 = vst [vmem:[#allocation227_spill] sm:$0xff] %v11778_v42  ;;  %14217 = vst [vmem:[#allocation228_spill] sm:$0xff] %v11780_v63  ;;  %v1471_v0 = vpop.f32.mrb[248].mxu0  ;;  %v2144_v17 = vpop.f32.mrb[248].mxu1 }
 0x344   :  { %v1473_v25 = vpop.f32.mrb[249].mxu0  ;;  %v2145_v16 = vadd.f32 %v2144_v17, %v10674_v29  ;;  %v2146_v1 = vpop.f32.mrb[249].mxu1  ;;  %v1472_v3 = vadd.f32 %v1471_v0, %v10680_v31  ;;  %v3130_v17 = vunpack.c.l.bf16 %v10694_v51 }
 0x345   :  { %v1475_v14 = vpop.f32.mrb[250].mxu0  ;;  %v2147_v19 = vadd.f32 %v2146_v1, %v10678_v30  ;;  %v2148_v24 = vpop.f32.mrb[250].mxu1  ;;  %v1474_v43 = vadd.f32 %v1473_v25, %v10682_v33 }
 0x346   :  { %v1476_v15 = vadd.f32 %v1475_v14, %v10680_v31  ;;  %v1477_v39 = vpop.f32.mrb[251].mxu0  ;;  %v2149_v2 = vadd.f32 %v2148_v24, %v10674_v29  ;;  %v2150_v45 = vpop.f32.mrb[251].mxu1  ;;  %v3129_v14 = vunpack.c.l.bf16 %v10698_v52  ;;  %v3145_v24 = vunpack.c.l.bf16 %v10734_v35 }
 0x347   :  { %v1478_v26 = vadd.f32 %v1477_v39, %v10682_v33  ;;  %v2151_v54 = vadd.f32 %v2150_v45, %v10678_v30  ;;  %v3131_v39 = vunpack.c.l.bf16 %v10700_v53 }
 0x348   :  { %v11793_v63 = vpack.c.bf16 %v2149_v2, %v2145_v16  ;;  %v11795_v0 = vpack.c.bf16 %v1476_v15, %v1472_v3 }
 0x349   :  { %v11799_v42 = vpack.c.bf16 %v1478_v26, %v1474_v43  ;;  %v11801_v25 = vpack.c.bf16 %v2151_v54, %v2147_v19 }
 0x34a   :  { %14218 = vst [vmem:[#allocation229_spill] sm:$0xff] %v11793_v63  ;;  %14219 = vst [vmem:[#allocation230_spill] sm:$0xff] %v11795_v0 }
 0x34b   :  { %14220 = vst [vmem:[#allocation231_spill] sm:$0xff] %v11799_v42  ;;  %14221 = vst [vmem:[#allocation232_spill] sm:$0xff] %v11801_v25  ;;  %v1481_v16 = vpop.f32.mrb[252].mxu0  ;;  %v2154_v2 = vpop.f32.mrb[252].mxu1 }
 0x34c   :  { %v1483_v19 = vpop.f32.mrb[253].mxu0  ;;  %v2155_v26 = vadd.f32 %v2154_v2, %v10674_v29  ;;  %v2156_v54 = vpop.f32.mrb[253].mxu1  ;;  %v1482_v0 = vadd.f32 %v1481_v16, %v10680_v31 }
 0x34d   :  { %v1485_v25 = vpop.f32.mrb[254].mxu0  ;;  %v2157_v42 = vadd.f32 %v2156_v54, %v10678_v30  ;;  %v2158_v3 = vpop.f32.mrb[254].mxu1  ;;  %v1484_v13 = vadd.f32 %v1483_v19, %v10682_v33 }
 0x34e   :  { %v1486_v2 = vadd.f32 %v1485_v25, %v10680_v31  ;;  %v1487_v63 = vpop.f32.mrb[255].mxu0  ;;  %v2159_v45 = vadd.f32 %v2158_v3, %v10674_v29  ;;  %v2160_v18 = vpop.f32.mrb[255].mxu1  ;;  %v14226_v25 = vunpack.c.h.bf16 %v10692_v50 }
 0x34f   :  { %v1488_v54 = vadd.f32 %v1487_v63, %v10682_v33  ;;  %v2161_v15 = vadd.f32 %v2160_v18, %v10678_v30 }
 0x350   :  { %v11829_v41 = vpack.c.bf16 %v1486_v2, %v1482_v0  ;;  %v11831_v31 = vpack.c.bf16 %v2159_v45, %v2155_v26 }
 0x351   :  { %v11835_v3 = vpack.c.bf16 %v1488_v54, %v1484_v13  ;;  %v11837_v19 = vpack.c.bf16 %v2161_v15, %v2157_v42 }
 0x352   :  { %14222 = vst [vmem:[#allocation233_spill] sm:$0xff] %v11829_v41  ;;  %14223 = vst [vmem:[#allocation234_spill] sm:$0xff] %v11831_v31 }
 0x353   :  { %14224 = vst [vmem:[#allocation235_spill] sm:$0xff] %v11835_v3  ;;  %14225 = vst [vmem:[#allocation236_spill] sm:$0xff] %v11837_v19  ;;  %v2936_v0 = vpop.f32.mrb[0].mxu0  ;;  %v3049_v2 = vpop.f32.mrb[0].mxu1 }
 0x354   :  { %v3192_v42 = vadd.f32 %v3128_v4, %v2936_v0  ;;  %v3194_v15 = vadd.f32 %v3130_v17, %v3049_v2  ;;  %v2938_v54 = vpop.f32.mrb[1].mxu0  ;;  %v3051_v30 = vpop.f32.mrb[1].mxu1  ;;  %v14227_v4 = vunpack.c.h.bf16 %v10694_v51 }
 0x355   :  { %v3193_v29 = vadd.f32 %v3129_v14, %v2938_v54  ;;  %v3195_v18 = vadd.f32 %v3131_v39, %v3051_v30  ;;  %v2940_v16 = vpop.f32.mrb[2].mxu0  ;;  %v3053_v1 = vpop.f32.mrb[2].mxu1  ;;  %v14228_v14 = vunpack.c.h.bf16 %v10698_v52  ;;  %v14229_v30 = vunpack.c.h.bf16 %v10700_v53 }
 0x356   :  { %v3256_v43 = vmul.f32 0.5, %v3192_v42  ;;  %v3196_v13 = vadd.f32 %v14226_v25, %v2940_v16  ;;  %v3198_v17 = vadd.f32 %v14227_v4, %v3053_v1  ;;  %v2942_v0 = vpop.f32.mrb[3].mxu0  ;;  %v3055_v2 = vpop.f32.mrb[3].mxu1  ;;  %v14233_v53 = vunpack.c.l.bf16 %v10718_v11 }
 0x357   :  { %v3320_v63 = vmul.f32 0.5, %v3193_v29  ;;  %v3197_v39 = vadd.f32 %v14228_v14, %v2942_v0  ;;  %v3199_v54 = vadd.f32 %v14229_v30, %v3055_v2  ;;  %v3400_v42 = vmul.f32 0.5, %v3195_v18 }
 0x358   :  { %8827 = vtanh.f32 %v3256_v43  ;;  %v3257_v50 = vmul.f32 0.5, %v3196_v13  ;;  %v14230_v0 = vunpack.c.l.bf16 %v10710_v8 }
 0x359   :  { %8829 = vtanh.f32 %v3320_v63  ;;  %v3321_v51 = vmul.f32 0.5, %v3197_v39  ;;  %v3401_v4 = vmul.f32 0.5, %v3199_v54  ;;  %v14232_v54 = vunpack.c.l.bf16 %v10716_v10 }
 0x35a   :  { %8831 = vtanh.f32 %v3194_v15  ;;  %v14231_v15 = vunpack.c.l.bf16 %v10712_v9 }
 0x35b   :  { %8833 = vtanh.f32 %v3257_v50  ;;  %v2946_v43 = vpop.f32.mrb[4].mxu0  ;;  %v3059_v18 = vpop.f32.mrb[4].mxu1 }
 0x35c   :  { %8835 = vtanh.f32 %v3400_v42  ;;  %v3200_v2 = vadd.f32 %v14230_v0, %v2946_v43  ;;  %v3202_v14 = vadd.f32 %v14231_v15, %v3059_v18  ;;  %v2948_v39 = vpop.f32.mrb[5].mxu0  ;;  %v3061_v30 = vpop.f32.mrb[5].mxu1  ;;  %v14234_v0 = vunpack.c.h.bf16 %v10710_v8 }
 0x35d   :  { %8837 = vtanh.f32 %v3321_v51  ;;  %v3201_v50 = vadd.f32 %v14232_v54, %v2948_v39  ;;  %v3203_v13 = vadd.f32 %v14233_v53, %v3061_v30  ;;  %v2950_v52 = vpop.f32.mrb[6].mxu0  ;;  %v3063_v63 = vpop.f32.mrb[6].mxu1  ;;  %v14235_v15 = vunpack.c.h.bf16 %v10712_v9 }
 0x35e   :  { %8839 = vtanh.f32 %v3198_v17  ;;  %v3258_v43 = vmul.f32 0.5, %v3200_v2  ;;  %v3204_v18 = vadd.f32 %v14234_v0, %v2950_v52  ;;  %v2952_v29 = vpop.f32.mrb[7].mxu0  ;;  %v3065_v51 = vpop.f32.mrb[7].mxu1  ;;  %v14236_v39 = vunpack.c.h.bf16 %v10716_v10 }
 0x35f   :  { %v3206_v25 = vadd.f32 %v14235_v15, %v3063_v63  ;;  %8841 = vtanh.f32 %v3401_v4  ;;  %v3322_v1 = vmul.f32 0.5, %v3201_v50  ;;  %v14237_v17 = vunpack.c.h.bf16 %v10718_v11 }
 0x360   :  { %v3205_v54 = vadd.f32 %v14236_v39, %v2952_v29  ;;  %8843 = vtanh.f32 %v3258_v43  ;;  %v3259_v30 = vmul.f32 0.5, %v3204_v18  ;;  %v3402_v50 = vmul.f32 0.5, %v3203_v13 }
 0x361   :  { %v3207_v2 = vadd.f32 %v14237_v17, %v3065_v51  ;;  %8845 = vtanh.f32 %v3322_v1  ;;  %v14238_v13 = vunpack.c.l.bf16 %v10728_v32  ;;  %v14239_v63 = vunpack.c.l.bf16 %v10730_v34 }
 0x362   :  { %v3323_v52 = vmul.f32 0.5, %v3205_v54  ;;  %v8828_v4 = vpop.eup %8827  ;;  %8847 = vtanh.f32 %v3259_v30 }
 0x363   :  { %v8830_v0 = vpop.eup %8829  ;;  %v3288_v18 = vmul.f32 0.5, %v8828_v4  ;;  %v2956_v11 = vpop.f32.mrb[8].mxu0  ;;  %8849 = vtanh.f32 %v3202_v14  ;;  %v3403_v16 = vmul.f32 0.5, %v3207_v2 }
 0x364   :  { %v3069_v15 = vpop.f32.mrb[8].mxu1  ;;  %v8832_v39 = vpop.eup %8831  ;;  %v3352_v54 = vmul.f32 0.5, %v8830_v0  ;;  %v3208_v17 = vadd.f32 %v14238_v13, %v2956_v11  ;;  %8851 = vtanh.f32 %v3323_v52 }
 0x365   :  { %v3210_v29 = vadd.f32 %v14239_v63, %v3069_v15  ;;  %v2958_v8 = vpop.f32.mrb[9].mxu0  ;;  %v3071_v43 = vpop.f32.mrb[9].mxu1  ;;  %v3304_v4 = vadd.f32 0.5, %v3288_v18  ;;  %8853 = vtanh.f32 %v3402_v50  ;;  %v14241_v50 = vunpack.c.h.bf16 %v10728_v32 }
 0x366   :  { %v8834_v10 = vpop.eup %8833  ;;  %v3209_v30 = vadd.f32 %v3145_v24, %v2958_v8  ;;  %v2960_v1 = vpop.f32.mrb[10].mxu0  ;;  %v3368_v14 = vadd.f32 0.5, %v3352_v54  ;;  %v3260_v11 = vmul.f32 0.5, %v3208_v17  ;;  %8855 = vtanh.f32 %v3206_v25 }
 0x367   :  { %v3073_v9 = vpop.f32.mrb[10].mxu1  ;;  %v8836_v0 = vpop.eup %8835  ;;  %v3289_v53 = vmul.f32 0.5, %v8834_v10  ;;  %v3464_v15 = vmul.f32 0.0, %v3304_v4  ;;  %v14240_v54 = vunpack.c.l.bf16 %v10736_v36  ;;  %v3212_v17 = vadd.f32 %v14241_v50, %v2960_v1 }
 0x368   :  { %v2962_v13 = vpop.f32.mrb[11].mxu0  ;;  %v3075_v42 = vpop.f32.mrb[11].mxu1  ;;  %v3324_v18 = vmul.f32 0.5, %v3209_v30  ;;  %v3480_v26 = vmul.f32 %v8832_v39, %v3368_v14  ;;  %8857 = vtanh.f32 %v3260_v11  ;;  %v3432_v45 = vmul.f32 0.5, %v8836_v0 }
 0x369   :  { %v8838_v63 = vpop.eup %8837  ;;  %v3305_v33 = vadd.f32 0.5, %v3289_v53  ;;  %v3211_v10 = vadd.f32 %v14240_v54, %v3071_v43  ;;  %v14242_v4 = vunpack.c.h.bf16 %v10730_v34  ;;  %v3261_v0 = vmul.f32 0.5, %v3212_v17 }
 0x36a   :  { %v8840_v52 = vpop.eup %8839  ;;  %v3353_v24 = vmul.f32 0.5, %v8838_v63  ;;  %8859 = vtanh.f32 %v3324_v18  ;;  %v11907_v19 = vadd.f32 %v3480_v26, %v3464_v15  ;;  %v14243_v32 = vunpack.c.h.bf16 %v10734_v35 }
 0x36b   :  { %v8842_v8 = vpop.eup %8841  ;;  %v3465_v25 = vmul.f32 0.0, %v3305_v33  ;;  %v3214_v39 = vadd.f32 %v14242_v4, %v3073_v9  ;;  %8861 = vtanh.f32 %v3403_v16  ;;  %v3404_v14 = vmul.f32 0.5, %v3211_v10  ;;  %v2966_v11 = vpop.f32.mrb[12].mxu0 }
 0x36c   :  { %v8844_v51 = vpop.eup %8843  ;;  %v3369_v2 = vadd.f32 0.5, %v3353_v24  ;;  %v3079_v63 = vpop.f32.mrb[12].mxu1  ;;  %8863 = vtanh.f32 %v3210_v29  ;;  %v3213_v1 = vadd.f32 %v14243_v32, %v2962_v13  ;;  %v3433_v34 = vmul.f32 0.5, %v8842_v8 }
 0x36d   :  { %v8846_v53 = vpop.eup %8845  ;;  %v3290_v30 = vmul.f32 0.5, %v8844_v51  ;;  %v2968_v26 = vpop.f32.mrb[13].mxu0  ;;  %8865 = vtanh.f32 %v11907_v19  ;;  %v14244_v51 = vunpack.c.h.bf16 %v10736_v36 }
 0x36e   :  { %v3481_v18 = vmul.f32 %v8840_v52, %v3369_v2  ;;  %v3354_v43 = vmul.f32 0.5, %v8846_v53  ;;  %v3081_v15 = vpop.f32.mrb[13].mxu1  ;;  %v8848_v33 = vpop.eup %8847  ;;  %8867 = vtanh.f32 %v3261_v0  ;;  %v3448_v2 = vadd.f32 0.5, %v3432_v45 }
 0x36f   :  { %v3306_v9 = vadd.f32 0.5, %v3290_v30  ;;  %v3215_v16 = vadd.f32 %v14244_v51, %v3075_v42  ;;  %v2970_v24 = vpop.f32.mrb[14].mxu0  ;;  %v11916_v54 = vpop.f32.mrb[14].mxu1  ;;  %v3291_v50 = vmul.f32 0.5, %v8848_v33  ;;  %8869 = vtanh.f32 %v3404_v14 }
 0x370   :  { %v8850_v10 = vpop.eup %8849  ;;  %v11918_v52 = vadd.f32 %v3481_v18, %v3465_v25  ;;  %v3370_v29 = vadd.f32 0.5, %v3354_v43  ;;  %v2972_v35 = vpop.f32.mrb[15].mxu0  ;;  %v3325_v8 = vmul.f32 0.5, %v3213_v1  ;;  %v3449_v51 = vadd.f32 0.5, %v3433_v34 }
 0x371   :  { %v3085_v13 = vpop.f32.mrb[15].mxu1  ;;  %v8852_v17 = vpop.eup %8851  ;;  %v3466_v4 = vmul.f32 0.0, %v3306_v9  ;;  %v3307_v42 = vadd.f32 0.5, %v3291_v50  ;;  %v3405_v25 = vmul.f32 0.5, %v3215_v16  ;;  %v14245_v18 = vunpack.c.l.bf16 %v10746_v58 }
 0x372   :  { %v8854_v53 = vpop.eup %8853  ;;  %8871 = vtanh.f32 %v11918_v52  ;;  %v3482_v36 = vmul.f32 %v8850_v10, %v3370_v29  ;;  %v3355_v30 = vmul.f32 0.5, %v8852_v17  ;;  %v14247_v14 = vunpack.c.l.bf16 %v10748_v59 }
 0x373   :  { %v8856_v32 = vpop.eup %8855  ;;  %8873 = vtanh.f32 %v3325_v8  ;;  %v3216_v0 = vadd.f32 %v14245_v18, %v2966_v11  ;;  %v3467_v45 = vmul.f32 0.0, %v3307_v42  ;;  %v3434_v31 = vmul.f32 0.5, %v8854_v53  ;;  %v2976_v50 = vpop.f32.mrb[16].mxu0 }
 0x374   :  { %v8858_v43 = vpop.eup %8857  ;;  %v11923_v33 = vadd.f32 %v3482_v36, %v3466_v4  ;;  %v3371_v9 = vadd.f32 0.5, %v3355_v30  ;;  %v3218_v1 = vadd.f32 %v14247_v14, %v3079_v63  ;;  %8875 = vtanh.f32 %v3214_v39  ;;  %v3089_v34 = vpop.f32.mrb[16].mxu1 }
 0x375   :  { %v8860_v3 = vpop.eup %8859  ;;  %v3292_v10 = vmul.f32 0.5, %v8858_v43  ;;  %v3262_v29 = vmul.f32 0.5, %v3216_v0  ;;  %v14248_v11 = vunpack.c.l.bf16 %v10752_v60  ;;  %v2978_v8 = vpop.f32.mrb[17].mxu0  ;;  %v14249_v63 = vunpack.c.l.bf16 %v10754_v61 }
 0x376   :  { %14246 = vst [vmem:[#allocation237_spill] sm:$0xff] %v11923_v33  ;;  %8877 = vtanh.f32 %v11923_v33  ;;  %v3483_v16 = vmul.f32 %v8856_v32, %v3371_v9  ;;  %v3356_v17 = vmul.f32 0.5, %v8860_v3  ;;  %v11930_v36 = vpop.f32.mrb[17].mxu1  ;;  %v8862_v42 = vpop.eup %8861  ;;  %v14250_v39 = vunpack.c.h.bf16 %v10746_v58 }
 0x377   :  { %v3217_v4 = vadd.f32 %v14248_v11, %v2968_v26  ;;  %v3308_v30 = vadd.f32 0.5, %v3292_v10  ;;  %8879 = vtanh.f32 %v3262_v29  ;;  %v3219_v53 = vadd.f32 %v14249_v63, %v3081_v15  ;;  %v2980_v0 = vpop.f32.mrb[18].mxu0  ;;  %v11936_v43 = vpop.f32.mrb[18].mxu1 }
 0x378   :  { %v3220_v18 = vadd.f32 %v14250_v39, %v2970_v24  ;;  %v8864_v32 = vpop.eup %8863  ;;  %v11938_v3 = vadd.f32 %v3483_v16, %v3467_v45  ;;  %v3372_v9 = vadd.f32 0.5, %v3356_v17  ;;  %8881 = vtanh.f32 %v3405_v25  ;;  %v11940_v14 = vpop.f32.mrb[19].mxu0 }
 0x379   :  { %v3326_v26 = vmul.f32 0.5, %v3217_v4  ;;  %v11942_v11 = vpop.f32.mrb[19].mxu1  ;;  %v8866_v10 = vpop.eup %8865  ;;  %v3468_v29 = vmul.f32 0.0, %v3308_v30  ;;  %8883 = vtanh.f32 %v3218_v1  ;;  %v3406_v15 = vmul.f32 0.5, %v3219_v53 }
 0x37a   :  { %v3263_v63 = vmul.f32 0.5, %v3220_v18  ;;  %v8868_v58 = vpop.eup %8867  ;;  %8885 = vtanh.f32 %v11938_v3  ;;  %v3435_v24 = vmul.f32 0.5, %v8862_v42  ;;  %v3484_v39 = vmul.f32 %v8864_v32, %v3372_v9 }
 0x37b   :  { %v14251_v45 = vunpack.c.h.bf16 %v10748_v59  ;;  %v11948_v25 = vpop.eup %8869  ;;  %v3293_v17 = vmul.f32 0.5, %v8868_v58  ;;  %8887 = vtanh.f32 %v3326_v26  ;;  %v14252_v4 = vunpack.c.h.bf16 %v10752_v60  ;;  %v2986_v26 = vpop.f32.mrb[20].mxu0 }
 0x37c   :  { %v14253_v1 = vunpack.c.h.bf16 %v10754_v61  ;;  %v8872_v53 = vpop.eup %8871  ;;  %v3528_v18 = vmul.f32 %v8866_v10, %v3448_v2  ;;  %v11954_v33 = vadd.f32 %v3484_v39, %v3468_v29  ;;  %8889 = vtanh.f32 %v3406_v15 }
 0x37d   :  { %v3222_v16 = vadd.f32 %v14251_v45, %v11916_v54  ;;  %v3221_v41 = vadd.f32 %v14252_v4, %v2972_v35  ;;  %v14255_v42 = vunpack.c.l.bf16 %v10764_v20  ;;  %v8874_v59 = vpop.eup %8873  ;;  %v3529_v54 = vmul.f32 %v8872_v53, %v3449_v51  ;;  %v11958_v45 = vpop.f32.mrb[20].mxu1 }
 0x37e   :  { %v3223_v30 = vadd.f32 %v14253_v1, %v3085_v13  ;;  %14254 = vst [vmem:[#allocation238_spill] sm:$0xff] %v11954_v33  ;;  %v3309_v9 = vadd.f32 0.5, %v3293_v17  ;;  %8891 = vtanh.f32 %v3263_v63  ;;  %v3357_v60 = vmul.f32 0.5, %v8874_v59  ;;  %v11961_v13 = vpop.f32.mrb[21].mxu0  ;;  %v11963_v2 = vpop.f32.mrb[21].mxu1 }
 0x37f   :  { %v3224_v32 = vadd.f32 %v14255_v42, %v2976_v50  ;;  %v3327_v58 = vmul.f32 0.5, %v3221_v41  ;;  %8893 = vtanh.f32 %v11954_v33  ;;  %v8876_v10 = vpop.eup %8875  ;;  %v3579_v29 = vpack.c.bf16 %v3529_v54, %v3528_v18  ;;  %v11967_v41 = vpop.f32.mrb[22].mxu0  ;;  %v10190_v33 = vld [vmem:[#allocation9 + $0x88] ss:$16 sps:$4 sm:$0xff]  }
 0x380   :  { %v3407_v61 = vmul.f32 0.5, %v3223_v30  ;;  %v3450_v50 = vadd.f32 0.5, %v3434_v31  ;;  %8895 = vtanh.f32 %v3222_v16  ;;  %v14256_v51 = vunpack.c.l.bf16 %v10766_v21  ;;  %v11969_v63 = vpop.f32.mrb[22].mxu1  ;;  %v8878_v39 = vpop.eup %8877 }
 0x381   :  { %v3264_v35 = vmul.f32 0.5, %v3224_v32  ;;  %v3469_v17 = vmul.f32 0.0, %v3309_v9  ;;  %v3373_v4 = vadd.f32 0.5, %v3357_v60  ;;  %8897 = vtanh.f32 %v3327_v58  ;;  %v11973_v53 = vpop.f32.mrb[23].mxu0  ;;  %v11975_v42 = vpop.f32.mrb[23].mxu1  ;;  %3620 = vmatmul.mubr.bf16.vlgmr.msra.gmra.mrb[32].mxu0 %v3579_v29  ;;  %3733 = vmatmul.mubr.bf16.vlgmr.msra.gmra.mrb[32].mxu1 %v3579_v29 }
 0x382   :  { %v3226_v15 = vadd.f32 %v14256_v51, %v3089_v34  ;;  %v14257_v1 = vunpack.c.l.bf16 %v10770_v22  ;;  %v8880_v31 = vpop.eup %8879  ;;  %v3451_v16 = vadd.f32 0.5, %v3435_v24  ;;  %8899 = vtanh.f32 %v3407_v61  ;;  %3629 = vmatprep.mubr.bf16.mxu0 %v14015_v44  ;;  %3742 = vmatprep.mubr.bf16.mxu1 %v14015_v44 }
 0x383   :  { %v14258_v34 = vunpack.c.l.bf16 %v10772_v23  ;;  %v14259_v32 = vunpack.c.h.bf16 %v10764_v20  ;;  %v8882_v54 = vpop.eup %8881  ;;  %v3530_v9 = vmul.f32 %v8878_v39, %v3450_v50  ;;  %v3485_v58 = vmul.f32 %v8876_v10, %v3373_v4  ;;  %v10174_v20 = vld [vmem:[#allocation9 + $0x8] ss:$16 sps:$4 sm:$0xff]  }
 0x384   :  { %v3225_v30 = vadd.f32 %v14257_v1, %v2978_v8  ;;  %v3294_v8 = vmul.f32 0.5, %v8880_v31  ;;  %8901 = vtanh.f32 %v3264_v35  ;;  %v8884_v24 = vpop.eup %8883  ;;  %4386 = vmatpush1.bf16.msra.mxu1 %v10174_v20  ;;  %v14261_v35 = vunpack.c.h.bf16 %v10766_v21  ;;  %v10176_v1 = vld [vmem:[#allocation9 + $0x2c] ss:$16 sps:$4 sm:$0xff]   ;;  %v11997_v21 = vpop.f32.mrb[24].mxu0 }
 0x385   :  { %v3227_v18 = vadd.f32 %v14258_v34, %v11930_v36  ;;  %v3228_v59 = vadd.f32 %v14259_v32, %v2980_v0  ;;  %8903 = vtanh.f32 %v3226_v15  ;;  %v10173_v36 = vld [vmem:[#allocation9] ss:$16 sps:$4 sm:$0xff]   ;;  %v8886_v0 = vpop.eup %8885  ;;  %v11984_v29 = vadd.f32 %v3485_v58, %v3469_v17  ;;  %v10175_v15 = vld [vmem:[#allocation9 + $0x24] ss:$16 sps:$4 sm:$0xff]   ;;  %4387 = vmatprep.subr.bf16.mxu1 %v10176_v1  ;;  %v12004_v58 = vpop.f32.mrb[25].mxu0 }
 0x386   :  { %v3328_v60 = vmul.f32 0.5, %v3225_v30  ;;  %4273 = vmatpush1.bf16.msra.mxu0 %v10173_v36  ;;  %v3310_v50 = vadd.f32 0.5, %v3294_v8  ;;  %v3230_v10 = vadd.f32 %v14261_v35, %v11936_v43  ;;  %v14262_v39 = vunpack.c.h.bf16 %v10770_v22  ;;  %v8888_v30 = vpop.eup %8887  ;;  %v11999_v43 = vpop.f32.mrb[24].mxu1  ;;  %v10178_v35 = vld [vmem:[#allocation9 + $0x28] ss:$16 sps:$4 sm:$0xff]  }
 0x387   :  { %v3408_v61 = vmul.f32 0.5, %v3227_v18  ;;  %v3265_v51 = vmul.f32 0.5, %v3228_v59  ;;  %14260 = vst [vmem:[#allocation239_spill] sm:$0xff] %v11984_v29  ;;  %4274 = vmatprep.subr.bf16.mxu0 %v10175_v15  ;;  %v3531_v31 = vmul.f32 %v8886_v0, %v3451_v16  ;;  %v14263_v17 = vunpack.c.h.bf16 %v10772_v23  ;;  %v12001_v22 = vpop.eup %8889  ;;  %v12006_v16 = vpop.f32.mrb[25].mxu1  ;;  %v10177_v0 = vld [vmem:[#allocation9 + $0x20] ss:$16 sps:$4 sm:$0xff]  }
 0x388   :  { %v3229_v4 = vadd.f32 %v14262_v39, %v11940_v14  ;;  %8905 = vtanh.f32 %v3328_v60  ;;  %v14264_v18 = vunpack.c.l.bf16 %v10782_v55  ;;  %v3358_v14 = vmul.f32 0.5, %v8888_v30  ;;  %v12009_v36 = vpop.f32.mrb[26].mxu0  ;;  %v12011_v20 = vpop.f32.mrb[26].mxu1  ;;  %4388 = vmatpush1.bf16.msra.mxu1 %v10178_v35 }
 0x389   :  { %v3231_v34 = vadd.f32 %v14263_v17, %v11942_v11  ;;  %8907 = vtanh.f32 %v11984_v29  ;;  %v8892_v11 = vpop.eup %8891  ;;  %v3580_v8 = vpack.c.bf16 %v3531_v31, %v3530_v9  ;;  %v3470_v60 = vmul.f32 0.0, %v3310_v50  ;;  %v12015_v30 = vpop.f32.mrb[27].mxu0  ;;  %v10180_v50 = vld [vmem:[#allocation9 + $0x4c] ss:$16 sps:$4 sm:$0xff]   ;;  %v10189_v29 = vld [vmem:[#allocation9 + $0x80] ss:$16 sps:$4 sm:$0xff]  }
 0x38a   :  { %v3232_v32 = vadd.f32 %v14264_v18, %v2986_v26  ;;  %v3329_v59 = vmul.f32 0.5, %v3229_v4  ;;  %8909 = vtanh.f32 %v3408_v61  ;;  %4275 = vmatpush1.bf16.msra.mxu0 %v10177_v0  ;;  %v12013_v39 = vpop.eup %8893  ;;  %v3374_v4 = vadd.f32 0.5, %v3358_v14  ;;  %v12017_v9 = vpop.f32.mrb[27].mxu1  ;;  %v10179_v61 = vld [vmem:[#allocation9 + $0x44] ss:$16 sps:$4 sm:$0xff]   ;;  %4389 = vmatprep.subr.bf16.mxu1 %v10180_v50 }
 0x38b   :  { %v3409_v26 = vmul.f32 0.5, %v3231_v34  ;;  %v3295_v15 = vmul.f32 0.5, %v8892_v11  ;;  %8911 = vtanh.f32 %v3265_v51  ;;  %4276 = vmatprep.subr.bf16.mxu0 %v10179_v61  ;;  %v8896_v31 = vpop.eup %8895  ;;  %v3436_v17 = vmul.f32 0.5, %v11948_v25  ;;  %3630 = vmatmul.mubr.bf16.gmra.mrb[36].mxu0 %v3580_v8  ;;  %v10183_v50 = vld [vmem:[#allocation9 + $0x64] ss:$16 sps:$4 sm:$0xff]  }
 0x38c   :  { %v3266_v1 = vmul.f32 0.5, %v3232_v32  ;;  %v3437_v34 = vmul.f32 0.5, %v8882_v54  ;;  %8913 = vtanh.f32 %v3230_v10  ;;  %v14265_v18 = vunpack.c.l.bf16 %v10784_v56  ;;  %3743 = vmatmul.mubr.bf16.gmra.mrb[36].mxu1 %v3580_v8  ;;  %v8898_v51 = vpop.eup %8897  ;;  %3639 = vmatprep.mubr.bf16.mxu0 %v14015_v44  ;;  %v10181_v8 = vld [vmem:[#allocation9 + $0x40] ss:$16 sps:$4 sm:$0xff]  }
 0x38d   :  { %v3486_v32 = vmul.f32 %v8884_v24, %v3374_v4  ;;  %v3311_v11 = vadd.f32 0.5, %v3295_v15  ;;  %8915 = vtanh.f32 %v3329_v59  ;;  %v14266_v0 = vunpack.c.l.bf16 %v10788_v57  ;;  %3752 = vmatprep.mubr.bf16.mxu1 %v14015_v44  ;;  %v12028_v25 = vpop.eup %8899  ;;  %v10182_v4 = vld [vmem:[#allocation9 + $0x48] ss:$16 sps:$4 sm:$0xff]  }
 0x38e   :  { %v3234_v14 = vadd.f32 %v14265_v18, %v11958_v45  ;;  %v3359_v54 = vmul.f32 0.5, %v8898_v51  ;;  %8917 = vtanh.f32 %v3409_v26  ;;  %v14267_v45 = vunpack.c.l.bf16 %v10790_v62  ;;  %4277 = vmatpush1.bf16.msra.mxu0 %v10181_v8  ;;  %4390 = vmatpush1.bf16.msra.mxu1 %v10182_v4  ;;  %v10184_v18 = vld [vmem:[#allocation9 + $0x6c] ss:$16 sps:$4 sm:$0xff]  }
 0x38f   :  { %v3233_v35 = vadd.f32 %v14266_v0, %v11961_v13  ;;  %v14268_v24 = vunpack.c.h.bf16 %v10782_v55  ;;  %v8902_v13 = vpop.eup %8901  ;;  %v12036_v15 = vadd.f32 %v3486_v32, %v3470_v60  ;;  %8919 = vtanh.f32 %v3266_v1  ;;  %4278 = vmatprep.subr.bf16.mxu0 %v10183_v50  ;;  %4391 = vmatprep.subr.bf16.mxu1 %v10184_v18 }
 0x390   :  { %v3235_v10 = vadd.f32 %v14267_v45, %v11963_v2  ;;  %v8904_v2 = vpop.eup %8903  ;;  %v3471_v51 = vmul.f32 0.0, %v3311_v11  ;;  %v3375_v55 = vadd.f32 0.5, %v3359_v54  ;;  %v12040_v45 = vpop.f32.mrb[28].mxu0  ;;  %v3452_v60 = vadd.f32 0.5, %v3436_v17  ;;  %v10185_v17 = vld [vmem:[#allocation9 + $0x60] ss:$16 sps:$4 sm:$0xff]  }
 0x391   :  { %v3236_v59 = vadd.f32 %v14268_v24, %v11967_v41  ;;  %14269 = vst [vmem:[#allocation240_spill] sm:$0xff] %v12036_v15  ;;  %v3296_v41 = vmul.f32 0.5, %v8902_v13  ;;  %v3330_v0 = vmul.f32 0.5, %v3233_v35  ;;  %v12042_v24 = vpop.f32.mrb[28].mxu1  ;;  %v3453_v32 = vadd.f32 0.5, %v3437_v34  ;;  %v12045_v8 = vpop.f32.mrb[29].mxu0 }
 0x392   :  { %8921 = vtanh.f32 %v12036_v15  ;;  %v12047_v4 = vpop.f32.mrb[29].mxu1  ;;  %v8906_v50 = vpop.eup %8905  ;;  %v3487_v18 = vmul.f32 %v8896_v31, %v3375_v55  ;;  %v14270_v11 = vunpack.c.h.bf16 %v10784_v56  ;;  %4279 = vmatpush1.bf16.msra.mxu0 %v10185_v17  ;;  %v10186_v34 = vld [vmem:[#allocation9 + $0x68] ss:$16 sps:$4 sm:$0xff]   ;;  %v14271_v31 = vunpack.c.h.bf16 %v10788_v57  ;;  %v10188_v17 = vld [vmem:[#allocation9 + $0x8c] ss:$16 sps:$4 sm:$0xff]  }
 0x393   :  { %v3267_v1 = vmul.f32 0.5, %v3236_v59  ;;  %v3312_v23 = vadd.f32 0.5, %v3296_v41  ;;  %8923 = vtanh.f32 %v3330_v0  ;;  %v12052_v54 = vpop.f32.mrb[30].mxu0  ;;  %v12054_v13 = vpop.f32.mrb[30].mxu1  ;;  %4392 = vmatpush1.bf16.msra.mxu1 %v10186_v34  ;;  %v3360_v26 = vmul.f32 0.5, %v8906_v50 }
 0x394   :  { %v3238_v35 = vadd.f32 %v14270_v11, %v11969_v63  ;;  %v8908_v59 = vpop.eup %8907  ;;  %8925 = vtanh.f32 %v3234_v14  ;;  %v3237_v55 = vadd.f32 %v14271_v31, %v11973_v53  ;;  %v14272_v41 = vunpack.c.h.bf16 %v10790_v62  ;;  %v12064_v63 = vpop.f32.mrb[31].mxu0  ;;  %v10187_v11 = vld [vmem:[#allocation9 + $0x84] ss:$16 sps:$4 sm:$0xff]   ;;  %4393 = vmatprep.subr.bf16.mxu1 %v10188_v17 }
 0x395   :  { %v12066_v0 = vpop.f32.mrb[31].mxu1  ;;  %4280 = vmatprep.subr.bf16.mxu0 %v10187_v11  ;;  %v12068_v34 = vpop.eup %8909  ;;  %v3532_v14 = vmul.f32 %v12013_v39, %v3452_v60  ;;  %v3533_v50 = vmul.f32 %v8908_v59, %v3453_v32  ;;  %v12071_v57 = vadd.f32 %v3487_v18, %v3471_v51  ;;  %8927 = vtanh.f32 %v3267_v1  ;;  %v10192_v32 = vld [vmem:[#allocation9 + $0xac] ss:$16 sps:$4 sm:$0xff]  }
 0x396   :  { %v12062_v56 = vadd.f32 %v14272_v41, %v11975_v42  ;;  %v8912_v53 = vpop.eup %8911  ;;  %v3472_v62 = vmul.f32 0.0, %v3312_v23  ;;  %v3376_v42 = vadd.f32 0.5, %v3360_v26  ;;  %v3410_v31 = vmul.f32 0.5, %v3235_v10  ;;  %4281 = vmatpush1.bf16.msra.mxu0 %v10189_v29  ;;  %v10191_v26 = vld [vmem:[#allocation9 + $0xa4] ss:$16 sps:$4 sm:$0xff]  }
 0x397   :  { %v3331_v41 = vmul.f32 0.5, %v3237_v55  ;;  %v8914_v61 = vpop.eup %8913  ;;  %v3581_v15 = vpack.c.bf16 %v3533_v50, %v3532_v14  ;;  %8929 = vtanh.f32 %v12071_v57  ;;  %v3297_v11 = vmul.f32 0.5, %v8912_v53  ;;  %4394 = vmatpush1.bf16.msra.mxu1 %v10190_v33  ;;  %4282 = vmatprep.subr.bf16.mxu0 %v10191_v26 }
 0x398   :  { %v3189_v17 = vunpack.c.h.bf16 %v10824_v7  ;;  %v8916_v39 = vpop.eup %8915  ;;  %v3438_v51 = vmul.f32 0.5, %v12001_v22  ;;  %v3488_v60 = vmul.f32 %v8904_v2, %v3376_v42  ;;  %v14273_v23 = vunpack.c.l.bf16 %v10800_v27  ;;  %4395 = vmatprep.subr.bf16.mxu1 %v10192_v32 }
 0x399   :  { %8931 = vtanh.f32 %v3331_v41  ;;  %v12079_v1 = vpop.eup %8917  ;;  %v3439_v18 = vmul.f32 0.5, %v12028_v25  ;;  %v3313_v29 = vadd.f32 0.5, %v3297_v11  ;;  %v3361_v59 = vmul.f32 0.5, %v8916_v39  ;;  %3640 = vmatmul.mubr.bf16.gmra.mrb[40].mxu0 %v3581_v15  ;;  %3753 = vmatmul.mubr.bf16.gmra.mrb[40].mxu1 %v3581_v15  ;;  %v10194_v15 = vld [vmem:[#allocation9 + $0xa8] ss:$16 sps:$4 sm:$0xff]  }
 0x39a   :  { %v3240_v10 = vadd.f32 %v14273_v23, %v11997_v21  ;;  %v14274_v33 = vunpack.c.l.bf16 %v10802_v28  ;;  %v8920_v2 = vpop.eup %8919  ;;  %v12085_v55 = vadd.f32 %v3488_v60, %v3472_v62  ;;  %8933 = vtanh.f32 %v3410_v31  ;;  %3649 = vmatprep.mubr.bf16.mxu0 %v14015_v44  ;;  %3762 = vmatprep.mubr.bf16.mxu1 %v14015_v44  ;;  %v10195_v39 = vld [vmem:[#allocation9 + $0xc4] ss:$16 sps:$4 sm:$0xff]   ;;  %v10196_v60 = vld [vmem:[#allocation9 + $0xcc] ss:$16 sps:$4 sm:$0xff]  }
 0x39b   :  { %v14275_v14 = vunpack.c.l.bf16 %v10806_v37  ;;  %v3473_v25 = vmul.f32 0.0, %v3313_v29  ;;  %v3377_v53 = vadd.f32 0.5, %v3361_v59  ;;  %v3298_v42 = vmul.f32 0.5, %v8920_v2  ;;  %4396 = vmatpush1.bf16.msra.mxu1 %v10194_v15 }
 0x39c   :  { %v3242_v22 = vadd.f32 %v14274_v33, %v11999_v43  ;;  %v3268_v21 = vmul.f32 0.5, %v3240_v10  ;;  %8935 = vtanh.f32 %v3238_v35  ;;  %v10193_v43 = vld [vmem:[#allocation9 + $0xa0] ss:$16 sps:$4 sm:$0xff]   ;;  %v8922_v62 = vpop.eup %8921  ;;  %v3454_v41 = vadd.f32 0.5, %v3438_v51  ;;  %4397 = vmatprep.subr.bf16.mxu1 %v10196_v60 }
 0x39d   :  { %v3241_v50 = vadd.f32 %v14275_v14, %v12004_v58  ;;  %4283 = vmatpush1.bf16.msra.mxu0 %v10193_v43  ;;  %v14276_v11 = vunpack.c.l.bf16 %v10808_v38  ;;  %v8924_v23 = vpop.eup %8923  ;;  %v3455_v10 = vadd.f32 0.5, %v3439_v18  ;;  %v3489_v26 = vmul.f32 %v8914_v61, %v3377_v53  ;;  %v10198_v14 = vld [vmem:[#allocation9 + $0xc8] ss:$16 sps:$4 sm:$0xff]  }
 0x39e   :  { %8937 = vtanh.f32 %v3242_v22  ;;  %4284 = vmatprep.subr.bf16.mxu0 %v10195_v39  ;;  %v3314_v35 = vadd.f32 0.5, %v3298_v42  ;;  %v8926_v32 = vpop.eup %8925  ;;  %v3362_v29 = vmul.f32 0.5, %v8924_v23  ;;  %v3411_v59 = vmul.f32 0.5, %v12062_v56 }
 0x39f   :  { %v3332_v31 = vmul.f32 0.5, %v3241_v50  ;;  %v3243_v58 = vadd.f32 %v14276_v11, %v12006_v16  ;;  %8939 = vtanh.f32 %v3268_v21  ;;  %v14277_v51 = vunpack.c.h.bf16 %v10800_v27  ;;  %v8928_v22 = vpop.eup %8927  ;;  %v10197_v21 = vld [vmem:[#allocation9 + $0xc0] ss:$16 sps:$4 sm:$0xff]   ;;  %4398 = vmatpush1.bf16.msra.mxu1 %v10198_v14  ;;  %v10199_v27 = vld [vmem:[#allocation9 + $0xe4] ss:$16 sps:$4 sm:$0xff]  }
 0x3a0   :  { %v3534_v16 = vmul.f32 %v8922_v62, %v3454_v41  ;;  %v12100_v2 = vadd.f32 %v3489_v26, %v3473_v25  ;;  %v14278_v61 = vunpack.c.h.bf16 %v10802_v28  ;;  %v3474_v56 = vmul.f32 0.0, %v3314_v35  ;;  %v10201_v35 = vld [vmem:[#allocation9 + $0xe0] ss:$16 sps:$4 sm:$0xff]  }
 0x3a1   :  { %8941 = vtanh.f32 %v3332_v31  ;;  %v3244_v33 = vadd.f32 %v14277_v51, %v12009_v36  ;;  %4285 = vmatpush1.bf16.msra.mxu0 %v10197_v21  ;;  %v3378_v50 = vadd.f32 0.5, %v3362_v29  ;;  %v3299_v53 = vmul.f32 0.5, %v8928_v22  ;;  %v10200_v36 = vld [vmem:[#allocation9 + $0xec] ss:$16 sps:$4 sm:$0xff]   ;;  %v8930_v43 = vpop.eup %8929 }
 0x3a2   :  { %8943 = vtanh.f32 %v12085_v55  ;;  %v3246_v18 = vadd.f32 %v14278_v61, %v12011_v20  ;;  %4286 = vmatprep.subr.bf16.mxu0 %v10199_v27  ;;  %4399 = vmatprep.subr.bf16.mxu1 %v10200_v36  ;;  %v3412_v25 = vmul.f32 0.5, %v3243_v58  ;;  %v14279_v28 = vunpack.c.h.bf16 %v10806_v37  ;;  %v10202_v58 = vld [vmem:[#allocation9 + $0xe8] ss:$16 sps:$4 sm:$0xff]  }
 0x3a3   :  { %v3269_v42 = vmul.f32 0.5, %v3244_v33  ;;  %8945 = vtanh.f32 %v12100_v2  ;;  %v14280_v15 = vunpack.c.h.bf16 %v10808_v38  ;;  %v8932_v41 = vpop.eup %8931  ;;  %v3535_v31 = vmul.f32 %v8930_v43, %v3455_v10  ;;  %4400 = vmatpush1.bf16.msra.mxu1 %v10202_v58  ;;  %v10203_v10 = vld [vmem:[#allocation9 + $0x4] ss:$16 sps:$4 sm:$0xff]  }
 0x3a4   :  { %v3245_v20 = vadd.f32 %v14279_v28, %v12015_v30  ;;  %v3490_v11 = vmul.f32 %v8926_v32, %v3378_v50  ;;  %v3315_v39 = vadd.f32 0.5, %v3299_v53  ;;  %v3440_v60 = vmul.f32 0.5, %v12068_v34  ;;  %v8934_v37 = vpop.eup %8933  ;;  %v10204_v32 = vld [vmem:[#allocation9 + $0xc] ss:$16 sps:$4 sm:$0xff]  }
 0x3a5   :  { %v3247_v62 = vadd.f32 %v14280_v15, %v12017_v9  ;;  %8947 = vtanh.f32 %v3269_v42  ;;  %v3363_v23 = vmul.f32 0.5, %v8932_v41  ;;  %4287 = vmatpush1.bf16.msra.mxu0 %v10201_v35  ;;  %v3582_v30 = vpack.c.bf16 %v3535_v31, %v3534_v16  ;;  %5070 = vmatprep.subr.bf16.mxu1 %v10204_v32 }
 0x3a6   :  { %8949 = vtanh.f32 %v3411_v59  ;;  %v3333_v26 = vmul.f32 0.5, %v3245_v20  ;;  %v3441_v29 = vmul.f32 0.5, %v12079_v1  ;;  %v12114_v38 = vadd.f32 %v3490_v11, %v3474_v56  ;;  %4957 = vmatprep.subr.bf16.mxu0 %v10203_v10  ;;  %v8936_v51 = vpop.eup %8935 }
 0x3a7   :  { %v3475_v9 = vmul.f32 0.0, %v3315_v39  ;;  %v3379_v34 = vadd.f32 0.5, %v3363_v23  ;;  %v14281_v59 = vunpack.c.l.bf16 %v10818_v5  ;;  %v14282_v22 = vunpack.c.l.bf16 %v10820_v6  ;;  %3650 = vmatmul.mubr.bf16.gmra.mrb[44].mxu0 %v3582_v30  ;;  %3763 = vmatmul.mubr.bf16.gmra.mrb[44].mxu1 %v3582_v30 }
 0x3a8   :  { %8951 = vtanh.f32 %v3333_v26  ;;  %v8938_v61 = vpop.eup %8937  ;;  %v14283_v1 = vunpack.c.l.bf16 %v10824_v7  ;;  %v14284_v14 = vunpack.c.l.bf16 %v10826_v12  ;;  %v3191_v50 = vunpack.c.h.bf16 %v10826_v12  ;;  %3659 = vmatprep.mubr.bf16.mxu0 %v14015_v44  ;;  %3772 = vmatprep.mubr.bf16.mxu1 %v14015_v44 }
 0x3a9   :  { %v3248_v33 = vadd.f32 %v14281_v59, %v12040_v45  ;;  %v3250_v16 = vadd.f32 %v14282_v22, %v12042_v24  ;;  %8953 = vtanh.f32 %v3412_v25  ;;  %v8940_v45 = vpop.eup %8939  ;;  %v3456_v53 = vadd.f32 0.5, %v3440_v60 }
 0x3aa   :  { %v3249_v21 = vadd.f32 %v14283_v1, %v12045_v8  ;;  %v12128_v56 = vadd.f32 %v14284_v14, %v12047_v4  ;;  %v3491_v42 = vmul.f32 %v8936_v51, %v3379_v34  ;;  %8955 = vtanh.f32 %v3246_v18 }
 0x3ab   :  { %v3270_v24 = vmul.f32 0.5, %v3248_v33  ;;  %v8942_v27 = vpop.eup %8941  ;;  %v3457_v8 = vadd.f32 0.5, %v3441_v29  ;;  %8957 = vtanh.f32 %v12114_v38  ;;  %v3300_v36 = vmul.f32 0.5, %v8940_v45 }
 0x3ac   :  { %v3334_v4 = vmul.f32 0.5, %v3249_v21  ;;  %v8944_v43 = vpop.eup %8943  ;;  %v12134_v25 = vadd.f32 %v3491_v42, %v3475_v9  ;;  %v3364_v12 = vmul.f32 0.5, %v8942_v27  ;;  %v14285_v28 = vunpack.c.h.bf16 %v10818_v5 }
 0x3ad   :  { %8959 = vtanh.f32 %v3270_v24  ;;  %v3316_v20 = vadd.f32 0.5, %v3300_v36  ;;  %v14286_v15 = vunpack.c.h.bf16 %v10820_v6  ;;  %v3253_v31 = vadd.f32 %v3189_v17, %v12064_v63  ;;  %v8946_v11 = vpop.eup %8945 }
 0x3ae   :  { %v3252_v18 = vadd.f32 %v14285_v28, %v12052_v54  ;;  %8961 = vtanh.f32 %v3334_v4  ;;  %v3380_v39 = vadd.f32 0.5, %v3364_v12  ;;  %v3413_v60 = vmul.f32 0.5, %v3247_v62 }
 0x3af   :  { %v3254_v41 = vadd.f32 %v14286_v15, %v12054_v13  ;;  %8963 = vtanh.f32 %v12134_v25  ;;  %v8948_v26 = vpop.eup %8947  ;;  %v3536_v35 = vmul.f32 %v8944_v43, %v3456_v53  ;;  %v3537_v5 = vmul.f32 %v8946_v11, %v3457_v8 }
 0x3b0   :  { %v3271_v23 = vmul.f32 0.5, %v3252_v18  ;;  %v3476_v54 = vmul.f32 0.0, %v3316_v20  ;;  %v3335_v58 = vmul.f32 0.5, %v3253_v31  ;;  %v8950_v30 = vpop.eup %8949  ;;  %v3492_v29 = vmul.f32 %v8938_v61, %v3380_v39 }
 0x3b1   :  { %v3301_v9 = vmul.f32 0.5, %v8948_v26  ;;  %v3583_v6 = vpack.c.bf16 %v3537_v5, %v3536_v35  ;;  %v3255_v7 = vadd.f32 %v3191_v50, %v12066_v0  ;;  %v3442_v63 = vmul.f32 0.5, %v8934_v37 }
 0x3b2   :  { %8965 = vtanh.f32 %v3271_v23  ;;  %v8952_v13 = vpop.eup %8951  ;;  %v12147_v17 = vadd.f32 %v3492_v29, %v3476_v54  ;;  %v3443_v32 = vmul.f32 0.5, %v8950_v30  ;;  %v3414_v53 = vmul.f32 0.5, %v12128_v56 }
 0x3b3   :  { %8967 = vtanh.f32 %v3250_v16  ;;  %v3317_v10 = vadd.f32 0.5, %v3301_v9  ;;  %v8954_v62 = vpop.eup %8953  ;;  %v3365_v51 = vmul.f32 0.5, %v8952_v13  ;;  %3660 = vmatmul.mubr.bf16.gmra.mrb[48].mxu0 %v3583_v6  ;;  %3773 = vmatmul.mubr.bf16.gmra.mrb[48].mxu1 %v3583_v6  ;;  %v3458_v37 = vadd.f32 0.5, %v3442_v63 }
 0x3b4   :  { %8969 = vtanh.f32 %v3335_v58  ;;  %v8956_v34 = vpop.eup %8955  ;;  %3669 = vmatprep.mubr.bf16.mxu0 %v14015_v44  ;;  %3782 = vmatprep.mubr.bf16.mxu1 %v14015_v44  ;;  %v3459_v61 = vadd.f32 0.5, %v3443_v32  ;;  %v3415_v42 = vmul.f32 0.5, %v3255_v7  ;;  %v3444_v26 = vmul.f32 0.5, %v8954_v62 }
 0x3b5   :  { %8971 = vtanh.f32 %v3413_v60  ;;  %v8958_v59 = vpop.eup %8957  ;;  %v3477_v33 = vmul.f32 0.0, %v3317_v10  ;;  %v3381_v0 = vadd.f32 0.5, %v3365_v51 }
 0x3b6   :  { %8973 = vtanh.f32 %v3254_v41  ;;  %v3538_v50 = vmul.f32 %v8958_v59, %v3458_v37  ;;  %v3460_v30 = vadd.f32 0.5, %v3444_v26 }
 0x3b7   :  { %v8960_v22 = vpop.eup %8959  ;;  %v3493_v1 = vmul.f32 %v8956_v34, %v3381_v0  ;;  %8975 = vtanh.f32 %v12147_v17 }
 0x3b8   :  { %v8962_v16 = vpop.eup %8961  ;;  %v3302_v21 = vmul.f32 0.5, %v8960_v22 }
 0x3b9   :  { %v8964_v14 = vpop.eup %8963  ;;  %v3366_v45 = vmul.f32 0.5, %v8962_v16  ;;  %v12153_v27 = vadd.f32 %v3493_v1, %v3477_v33  ;;  %v3813_v16 = vunpack.c.l.bf16 %v10836_v46  ;;  %v3814_v1 = vunpack.c.l.bf16 %v10842_v48 }
 0x3ba   :  { %v3539_v24 = vmul.f32 %v8964_v14, %v3459_v61  ;;  %v3318_v8 = vadd.f32 0.5, %v3302_v21  ;;  %v3815_v61 = vunpack.c.l.bf16 %v10838_v47  ;;  %v3817_v21 = vunpack.c.h.bf16 %v10836_v46 }
 0x3bb   :  { %v3382_v4 = vadd.f32 0.5, %v3366_v45  ;;  %8977 = vtanh.f32 %v12153_v27  ;;  %v3819_v14 = vunpack.c.h.bf16 %v10838_v47  ;;  %v3818_v45 = vunpack.c.h.bf16 %v10842_v48 }
 0x3bc   :  { %v8966_v36 = vpop.eup %8965  ;;  %v3584_v12 = vpack.c.bf16 %v3539_v24, %v3538_v50  ;;  %v3478_v28 = vmul.f32 0.0, %v3318_v8  ;;  %8979 = vtanh.f32 %v3414_v53  ;;  %v3816_v50 = vunpack.c.l.bf16 %v10844_v49  ;;  %v14287_v24 = vld [vmem:[#allocation18_spill] sm:$0xff] }
 0x3bd   :  { %v8968_v43 = vpop.eup %8967  ;;  %v3303_v18 = vmul.f32 0.5, %v8966_v36  ;;  %8981 = vtanh.f32 %v3415_v42  ;;  %v3820_v53 = vunpack.c.h.bf16 %v10844_v49  ;;  %v3821_v42 = vunpack.c.l.bf16 %v10854_v40  ;;  %v14288_v36 = vld [vmem:[#allocation19_spill] sm:$0xff] }
 0x3be   :  { %v8970_v20 = vpop.eup %8969  ;;  %v3494_v15 = vmul.f32 %v8968_v43, %v3382_v4  ;;  %3670 = vmatmul.mubr.bf16.gmra.mrb[52].mxu0 %v3584_v12  ;;  %3783 = vmatmul.mubr.bf16.gmra.mrb[52].mxu1 %v3584_v12  ;;  %v3823_v8 = vunpack.c.l.bf16 %v14287_v24  ;;  %v3822_v4 = vunpack.c.l.bf16 %v14288_v36  ;;  %v3825_v43 = vunpack.c.h.bf16 %v10854_v40 }
 0x3bf   :  { %v8972_v41 = vpop.eup %8971  ;;  %v3319_v56 = vadd.f32 0.5, %v3303_v18  ;;  %v3367_v31 = vmul.f32 0.5, %v8970_v20  ;;  %3679 = vmatprep.mubr.bf16.mxu0 %v14015_v44  ;;  %3792 = vmatprep.mubr.bf16.mxu1 %v14015_v44  ;;  %v3827_v12 = vunpack.c.h.bf16 %v14287_v24  ;;  %v3826_v47 = vunpack.c.h.bf16 %v14288_v36  ;;  %v14290_v20 = vld [vmem:[#allocation21_spill] sm:$0xff]  ;;  %v14304_v36 = vld [vmem:[#allocation35_spill] sm:$0xff] }
 0x3c0   :  { %v12156_v11 = vadd.f32 %v3494_v15, %v3478_v28  ;;  %v8974_v23 = vpop.eup %8973  ;;  %v3445_v35 = vmul.f32 0.5, %v8972_v41  ;;  %v14289_v28 = vld [vmem:[#allocation20_spill] sm:$0xff]  ;;  %v3829_v48 = vunpack.c.l.bf16 %v14290_v20  ;;  %v14291_v41 = vld [vmem:[#allocation22_spill] sm:$0xff] }
 0x3c1   :  { %v3479_v39 = vmul.f32 0.0, %v3319_v56  ;;  %v3383_v60 = vadd.f32 0.5, %v3367_v31  ;;  %v8976_v54 = vpop.eup %8975  ;;  %v3824_v46 = vunpack.c.l.bf16 %v14289_v28  ;;  %v3828_v18 = vunpack.c.h.bf16 %v14289_v28  ;;  %v14292_v31 = vld [vmem:[#allocation23_spill] sm:$0xff] }
 0x3c2   :  { %8983 = vtanh.f32 %v12156_v11  ;;  %v3461_v29 = vadd.f32 0.5, %v3445_v35  ;;  %v3540_v7 = vmul.f32 %v8976_v54, %v3460_v30  ;;  %v3831_v56 = vunpack.c.l.bf16 %v14291_v41  ;;  %v14293_v30 = vld [vmem:[#allocation24_spill] sm:$0xff]  ;;  %v14308_v28 = vld [vmem:[#allocation39_spill] sm:$0xff] }
 0x3c3   :  { %v3495_v5 = vmul.f32 %v8974_v23, %v3383_v60  ;;  %v3833_v60 = vunpack.c.h.bf16 %v14290_v20  ;;  %v3835_v23 = vunpack.c.h.bf16 %v14291_v41 }
 0x3c5   :  { %v12161_v58 = vadd.f32 %v3495_v5, %v3479_v39  ;;  %v8978_v9 = vpop.eup %8977  ;;  %v3830_v39 = vunpack.c.l.bf16 %v14292_v31 }
 0x3c6   :  { %v8980_v6 = vpop.eup %8979  ;;  %v3541_v13 = vmul.f32 %v8978_v9, %v3461_v29  ;;  %v3832_v29 = vunpack.c.l.bf16 %v14293_v30 }
 0x3c7   :  { %8985 = vtanh.f32 %v12161_v58  ;;  %v8982_v63 = vpop.eup %8981  ;;  %v3446_v32 = vmul.f32 0.5, %v8980_v6 }
 0x3c8   :  { %v3585_v10 = vpack.c.bf16 %v3541_v13, %v3540_v7  ;;  %v3447_v51 = vmul.f32 0.5, %v8982_v63 }
 0x3c9   :  { %v3462_v34 = vadd.f32 0.5, %v3446_v32  ;;  %v14294_v32 = vld [vmem:[#allocation25_spill] sm:$0xff] }
 0x3ca   :  { %3680 = vmatmul.mubr.bf16.gmra.mrb[56].mxu0 %v3585_v10  ;;  %3793 = vmatmul.mubr.bf16.gmra.mrb[56].mxu1 %v3585_v10  ;;  %v3463_v59 = vadd.f32 0.5, %v3447_v51 }
 0x3cb   :  { %3689 = vmatprep.mubr.bf16.mxu0 %v14015_v44  ;;  %3802 = vmatprep.mubr.bf16.mxu1 %v14015_v44 }
 0x3cc   :  { %v8984_v62 = vpop.eup %8983 }
 0x3cd   :  { %v3542_v0 = vmul.f32 %v8984_v62, %v3462_v34 }
 0x3d1   :  { %v8986_v33 = vpop.eup %8985 }
 0x3d2   :  { %v3543_v22 = vmul.f32 %v8986_v33, %v3463_v59 }
 0x3d4   :  { %v3586_v37 = vpack.c.bf16 %v3543_v22, %v3542_v0  ;;  %v14295_v22 = vld [vmem:[#allocation26_spill] sm:$0xff] }
 0x3d6   :  { %3690 = vmatmul.mubr.bf16.gmra.mrb[60].mxu0 %v3586_v37  ;;  %3803 = vmatmul.mubr.bf16.gmra.mrb[60].mxu1 %v3586_v37 }
 0x3d7   :  { %4304 = vmatprep.mubr.bf16.mxu0 %v14015_v44  ;;  %4417 = vmatprep.mubr.bf16.mxu1 %v14015_v44 }
 0x454   :  { %v3621_v15 = vpop.f32.mrb[32].mxu0  ;;  %v3734_v49 = vpop.f32.mrb[32].mxu1 }
 0x455   :  { %v3877_v26 = vadd.f32 %v3813_v16, %v3621_v15  ;;  %v3879_v35 = vadd.f32 %v3815_v61, %v3734_v49  ;;  %v3623_v5 = vpop.f32.mrb[33].mxu0  ;;  %v3736_v54 = vpop.f32.mrb[33].mxu1 }
 0x456   :  { %v3878_v6 = vadd.f32 %v3814_v1, %v3623_v5  ;;  %v3880_v7 = vadd.f32 %v3816_v50, %v3736_v54  ;;  %v3625_v13 = vpop.f32.mrb[34].mxu0  ;;  %v3738_v63 = vpop.f32.mrb[34].mxu1  ;;  %v14296_v50 = vld [vmem:[#allocation27_spill] sm:$0xff]  ;;  %v14301_v54 = vld [vmem:[#allocation32_spill] sm:$0xff] }
 0x457   :  { %v3941_v62 = vmul.f32 0.5, %v3877_v26  ;;  %v3881_v34 = vadd.f32 %v3817_v21, %v3625_v13  ;;  %v3883_v59 = vadd.f32 %v3819_v14, %v3738_v63  ;;  %v3627_v33 = vpop.f32.mrb[35].mxu0  ;;  %v3740_v0 = vpop.f32.mrb[35].mxu1  ;;  %v14297_v26 = vld [vmem:[#allocation28_spill] sm:$0xff]  ;;  %v14298_v63 = vld [vmem:[#allocation29_spill] sm:$0xff] }
 0x458   :  { %v4005_v16 = vmul.f32 0.5, %v3878_v6  ;;  %v3882_v61 = vadd.f32 %v3818_v45, %v3627_v33  ;;  %v3884_v15 = vadd.f32 %v3820_v53, %v3740_v0  ;;  %v14299_v45 = vld [vmem:[#allocation30_spill] sm:$0xff]  ;;  %v14300_v0 = vld [vmem:[#allocation31_spill] sm:$0xff]  ;;  %v4085_v9 = vmul.f32 0.5, %v3880_v7 }
 0x459   :  { %8987 = vtanh.f32 %v3941_v62  ;;  %v3942_v1 = vmul.f32 0.5, %v3881_v34 }
 0x45a   :  { %8989 = vtanh.f32 %v4005_v16  ;;  %v4006_v51 = vmul.f32 0.5, %v3882_v61  ;;  %v3851_v61 = vunpack.c.h.bf16 %v14299_v45 }
 0x45b   :  { %8991 = vtanh.f32 %v3942_v1 }
 0x45c   :  { %8993 = vtanh.f32 %v3879_v35 }
 0x45d   :  { %8995 = vtanh.f32 %v4006_v51 }
 0x45e   :  { %v3631_v62 = vpop.f32.mrb[36].mxu0  ;;  %8997 = vtanh.f32 %v3883_v59 }
 0x45f   :  { %v3744_v34 = vpop.f32.mrb[36].mxu1  ;;  %v3885_v21 = vadd.f32 %v3821_v42, %v3631_v62  ;;  %v3633_v5 = vpop.f32.mrb[37].mxu0 }
 0x460   :  { %v3887_v14 = vadd.f32 %v3823_v8, %v3744_v34  ;;  %v3746_v13 = vpop.f32.mrb[37].mxu1  ;;  %v3886_v53 = vadd.f32 %v3822_v4, %v3633_v5  ;;  %v3635_v33 = vpop.f32.mrb[38].mxu0 }
 0x461   :  { %v3888_v37 = vadd.f32 %v3824_v46, %v3746_v13  ;;  %v3748_v1 = vpop.f32.mrb[38].mxu1  ;;  %v3943_v49 = vmul.f32 0.5, %v3885_v21  ;;  %v3889_v16 = vadd.f32 %v3825_v43, %v3635_v33  ;;  %v3637_v8 = vpop.f32.mrb[39].mxu0  ;;  %v14302_v46 = vld [vmem:[#allocation33_spill] sm:$0xff]  ;;  %v14303_v21 = vld [vmem:[#allocation34_spill] sm:$0xff]  ;;  %v4086_v13 = vmul.f32 0.5, %v3884_v15 }
 0x462   :  { %v3891_v42 = vadd.f32 %v3827_v12, %v3748_v1  ;;  %v3750_v35 = vpop.f32.mrb[39].mxu1  ;;  %v4007_v62 = vmul.f32 0.5, %v3886_v53  ;;  %v3890_v4 = vadd.f32 %v3826_v47, %v3637_v8  ;;  %v14305_v53 = vld [vmem:[#allocation36_spill] sm:$0xff]  ;;  %v14306_v8 = vld [vmem:[#allocation37_spill] sm:$0xff] }
 0x463   :  { %8999 = vtanh.f32 %v3943_v49  ;;  %v3944_v5 = vmul.f32 0.5, %v3889_v16  ;;  %v3892_v7 = vadd.f32 %v3828_v18, %v3750_v35  ;;  %v8988_v59 = vpop.eup %8987  ;;  %v4087_v16 = vmul.f32 0.5, %v3888_v37 }
 0x464   :  { %9001 = vtanh.f32 %v4007_v62  ;;  %v4008_v43 = vmul.f32 0.5, %v3890_v4  ;;  %v8990_v49 = vpop.eup %8989  ;;  %v3973_v34 = vmul.f32 0.5, %v8988_v59 }
 0x465   :  { %9003 = vtanh.f32 %v4085_v9  ;;  %v4037_v18 = vmul.f32 0.5, %v8990_v49  ;;  %v8992_v62 = vpop.eup %8991  ;;  %v14307_v9 = vld [vmem:[#allocation38_spill] sm:$0xff]  ;;  %v4088_v49 = vmul.f32 0.5, %v3892_v7 }
 0x466   :  { %9005 = vtanh.f32 %v3944_v5  ;;  %v3989_v4 = vadd.f32 0.5, %v3973_v34  ;;  %v8994_v24 = vpop.eup %8993  ;;  %v3974_v59 = vmul.f32 0.5, %v8992_v62 }
 0x467   :  { %9007 = vtanh.f32 %v3887_v14  ;;  %v4053_v33 = vadd.f32 0.5, %v4037_v18  ;;  %v8996_v5 = vpop.eup %8995 }
 0x468   :  { %9009 = vtanh.f32 %v4008_v43  ;;  %v4149_v14 = vmul.f32 %v3989_v4, %v11907_v19  ;;  %v3990_v47 = vadd.f32 0.5, %v3974_v59  ;;  %v4038_v15 = vmul.f32 0.5, %v8996_v5 }
 0x469   :  { %9011 = vtanh.f32 %v4086_v13  ;;  %v4165_v43 = vmul.f32 %v8994_v24, %v4053_v33  ;;  %v8998_v13 = vpop.eup %8997 }
 0x46a   :  { %9013 = vtanh.f32 %v4087_v16 }
 0x46b   :  { %9015 = vtanh.f32 %v3891_v42  ;;  %v12238_v4 = vadd.f32 %v4165_v43, %v4149_v14 }
 0x46c   :  { %v3641_v1 = vpop.f32.mrb[40].mxu0  ;;  %v3754_v35 = vpop.f32.mrb[40].mxu1  ;;  %9017 = vtanh.f32 %v4088_v49 }
 0x46d   :  { %v3893_v12 = vadd.f32 %v3829_v48, %v3641_v1  ;;  %v3643_v18 = vpop.f32.mrb[41].mxu0  ;;  %v3756_v62 = vpop.f32.mrb[41].mxu1  ;;  %v3895_v37 = vadd.f32 %v3831_v56, %v3754_v35  ;;  %v4150_v48 = vmul.f32 %v3990_v47, %v11918_v52  ;;  %v4054_v1 = vadd.f32 0.5, %v4038_v15  ;;  %v14309_v35 = vld [vmem:[#allocation40_spill] sm:$0xff] }
 0x46e   :  { %v3894_v19 = vadd.f32 %v3830_v39, %v3643_v18  ;;  %v3896_v7 = vadd.f32 %v3832_v29, %v3756_v62  ;;  %v3645_v16 = vpop.f32.mrb[42].mxu0  ;;  %v3758_v24 = vpop.f32.mrb[42].mxu1  ;;  %9019 = vtanh.f32 %v12238_v4  ;;  %v14310_v39 = vld [vmem:[#allocation237_spill] sm:$0xff] }
 0x46f   :  { %v9000_v33 = vpop.eup %8999  ;;  %v3945_v59 = vmul.f32 0.5, %v3893_v12  ;;  %v3647_v5 = vpop.f32.mrb[43].mxu0  ;;  %v4166_v29 = vmul.f32 %v8998_v13, %v4054_v1  ;;  %v3897_v52 = vadd.f32 %v3833_v60, %v3645_v16 }
 0x470   :  { %v3760_v42 = vpop.f32.mrb[43].mxu1  ;;  %v9002_v34 = vpop.eup %9001  ;;  %v3975_v40 = vmul.f32 0.5, %v9000_v33  ;;  %v4009_v56 = vmul.f32 0.5, %v3894_v19 }
 0x471   :  { %v9004_v18 = vpop.eup %9003  ;;  %v4039_v62 = vmul.f32 0.5, %v9002_v34  ;;  %9021 = vtanh.f32 %v3945_v59  ;;  %v12247_v15 = vadd.f32 %v4166_v29, %v4150_v48  ;;  %v4089_v34 = vmul.f32 0.5, %v3896_v7 }
 0x472   :  { %v9006_v43 = vpop.eup %9005  ;;  %v3991_v51 = vadd.f32 0.5, %v3975_v40  ;;  %9023 = vtanh.f32 %v4009_v56  ;;  %v3946_v1 = vmul.f32 0.5, %v3897_v52  ;;  %v4117_v59 = vmul.f32 0.5, %v9004_v18  ;;  %v14313_v18 = vld [vmem:[#allocation41_spill] sm:$0xff] }
 0x473   :  { %v9008_v47 = vpop.eup %9007  ;;  %v4055_v49 = vadd.f32 0.5, %v4039_v62  ;;  %v3976_v19 = vmul.f32 0.5, %v9006_v43  ;;  %9025 = vtanh.f32 %v3895_v37  ;;  %v3899_v48 = vadd.f32 %v3835_v23, %v3758_v24  ;;  %v14314_v24 = vld [vmem:[#allocation42_spill] sm:$0xff] }
 0x474   :  { %v9010_v33 = vpop.eup %9009  ;;  %v4151_v13 = vmul.f32 %v3991_v51, %v14310_v39  ;;  %9027 = vtanh.f32 %v12247_v15  ;;  %v14311_v56 = vunpack.c.h.bf16 %v14292_v31  ;;  %v14312_v7 = vunpack.c.h.bf16 %v14293_v30 }
 0x475   :  { %v9012_v14 = vpop.eup %9011  ;;  %v4167_v40 = vmul.f32 %v9008_v47, %v4055_v49  ;;  %v3992_v20 = vadd.f32 0.5, %v3976_v19  ;;  %v4040_v60 = vmul.f32 0.5, %v9010_v33  ;;  %9029 = vtanh.f32 %v3946_v1 }
 0x476   :  { %v9014_v16 = vpop.eup %9013  ;;  %v3898_v29 = vadd.f32 %v14311_v56, %v3647_v5  ;;  %v3900_v39 = vadd.f32 %v14312_v7, %v3760_v42  ;;  %v4118_v52 = vmul.f32 0.5, %v9012_v14  ;;  %9031 = vtanh.f32 %v4089_v34 }
 0x477   :  { %v12255_v62 = vadd.f32 %v4167_v40, %v4151_v13  ;;  %v4152_v51 = vmul.f32 %v3992_v20, %v11938_v3  ;;  %v4056_v37 = vadd.f32 0.5, %v4040_v60  ;;  %v9016_v43 = vpop.eup %9015  ;;  %9033 = vtanh.f32 %v3899_v48 }
 0x478   :  { %v4010_v47 = vmul.f32 0.5, %v3898_v29  ;;  %v4090_v41 = vmul.f32 0.5, %v3900_v39  ;;  %v9018_v33 = vpop.eup %9017  ;;  %v4133_v13 = vadd.f32 0.5, %v4117_v59  ;;  %v14315_v3 = vunpack.c.l.bf16 %v14294_v32 }
 0x479   :  { %v4168_v19 = vmul.f32 %v9016_v43, %v4056_v37  ;;  %v14316_v42 = vunpack.c.l.bf16 %v14295_v22  ;;  %v9020_v40 = vpop.eup %9019  ;;  %v14317_v60 = vunpack.c.l.bf16 %v14296_v50  ;;  %v14318_v56 = vunpack.c.l.bf16 %v14297_v26 }
 0x47a   :  { %v3651_v23 = vpop.f32.mrb[44].mxu0  ;;  %v3764_v31 = vpop.f32.mrb[44].mxu1  ;;  %9035 = vtanh.f32 %v4010_v47  ;;  %v4134_v39 = vadd.f32 0.5, %v4118_v52  ;;  %v14319_v47 = vunpack.c.h.bf16 %v14294_v32 }
 0x47b   :  { %v3901_v30 = vadd.f32 %v14315_v3, %v3651_v23  ;;  %v3903_v14 = vadd.f32 %v14316_v42, %v3764_v31  ;;  %v3653_v34 = vpop.f32.mrb[45].mxu0  ;;  %v3766_v1 = vpop.f32.mrb[45].mxu1  ;;  %9037 = vtanh.f32 %v12255_v62  ;;  %v12267_v20 = vadd.f32 %v4168_v19, %v4152_v51 }
 0x47c   :  { %v3902_v48 = vadd.f32 %v14317_v60, %v3653_v34  ;;  %v3904_v59 = vadd.f32 %v14318_v56, %v3766_v1  ;;  %v3655_v29 = vpop.f32.mrb[46].mxu0  ;;  %v3768_v37 = vpop.f32.mrb[46].mxu1  ;;  %9039 = vtanh.f32 %v4090_v41  ;;  %v4119_v51 = vmul.f32 0.5, %v9014_v16 }
 0x47d   :  { %v9022_v7 = vpop.eup %9021  ;;  %v3947_v43 = vmul.f32 0.5, %v3901_v30  ;;  %v3905_v23 = vadd.f32 %v14319_v47, %v3655_v29  ;;  %v3657_v31 = vpop.f32.mrb[47].mxu0  ;;  %9041 = vtanh.f32 %v12267_v20  ;;  %v14320_v56 = vunpack.c.h.bf16 %v14295_v22 }
 0x47e   :  { %v3770_v3 = vpop.f32.mrb[47].mxu1  ;;  %v9024_v42 = vpop.eup %9023  ;;  %v3977_v19 = vmul.f32 0.5, %v9022_v7  ;;  %v4011_v34 = vmul.f32 0.5, %v3902_v48  ;;  %v4091_v32 = vmul.f32 0.5, %v3904_v59  ;;  %v14321_v29 = vunpack.c.h.bf16 %v14296_v50 }
 0x47f   :  { %v9026_v60 = vpop.eup %9025  ;;  %v4041_v5 = vmul.f32 0.5, %v9024_v42  ;;  %9043 = vtanh.f32 %v3947_v43  ;;  %v3948_v1 = vmul.f32 0.5, %v3905_v23  ;;  %v3907_v52 = vadd.f32 %v14320_v56, %v3768_v37  ;;  %v14323_v43 = vld [vmem:[#allocation238_spill] sm:$0xff] }
 0x480   :  { %v9028_v41 = vpop.eup %9027  ;;  %v3993_v30 = vadd.f32 0.5, %v3977_v19  ;;  %9045 = vtanh.f32 %v4011_v34  ;;  %v3906_v47 = vadd.f32 %v14321_v29, %v3657_v31  ;;  %v4213_v16 = vmul.f32 %v9020_v40, %v4133_v13 }
 0x481   :  { %v9030_v49 = vpop.eup %9029  ;;  %v4214_v12 = vmul.f32 %v9028_v41, %v4134_v39  ;;  %v4057_v10 = vadd.f32 0.5, %v4041_v5  ;;  %v14322_v48 = vunpack.c.h.bf16 %v14297_v26  ;;  %v4120_v42 = vmul.f32 0.5, %v9018_v33 }
 0x482   :  { %v4153_v23 = vmul.f32 %v3993_v30, %v14323_v43  ;;  %v3978_v6 = vmul.f32 0.5, %v9030_v49  ;;  %9047 = vtanh.f32 %v3948_v1  ;;  %v12283_v22 = vpop.eup %9031  ;;  %v4012_v59 = vmul.f32 0.5, %v3906_v47  ;;  %v14326_v47 = vld [vmem:[#allocation239_spill] sm:$0xff] }
 0x483   :  { %v3908_v7 = vadd.f32 %v14322_v48, %v3770_v3  ;;  %v4264_v37 = vpack.c.bf16 %v4214_v12, %v4213_v16  ;;  %v4169_v19 = vmul.f32 %v9026_v60, %v4057_v10  ;;  %9049 = vtanh.f32 %v3903_v14  ;;  %v9034_v50 = vpop.eup %9033 }
 0x484   :  { %v3994_v31 = vadd.f32 0.5, %v3978_v6  ;;  %9051 = vtanh.f32 %v4091_v32  ;;  %v3873_v26 = vunpack.c.h.bf16 %v14313_v18  ;;  %v9036_v39 = vpop.eup %9035  ;;  %v14324_v49 = vunpack.c.l.bf16 %v14298_v63 }
 0x485   :  { %v4092_v13 = vmul.f32 0.5, %v3908_v7  ;;  %v12286_v33 = vadd.f32 %v4169_v19, %v4153_v23  ;;  %9053 = vtanh.f32 %v4012_v59  ;;  %4305 = vmatmul.mubr.bf16.vlgmr.msra.gmra.mrb[64].mxu0 %v4264_v37  ;;  %4418 = vmatmul.mubr.bf16.vlgmr.msra.gmra.mrb[64].mxu1 %v4264_v37  ;;  %v3875_v10 = vunpack.c.h.bf16 %v14314_v24  ;;  %v9038_v6 = vpop.eup %9037  ;;  %v10205_v23 = vld [vmem:[#allocation9] ss:$16 sps:$4 sm:$0xff]   ;;  %v10206_v37 = vld [vmem:[#allocation9 + $0x8] ss:$16 sps:$4 sm:$0xff]  }
 0x486   :  { %v3661_v40 = vpop.f32.mrb[48].mxu0  ;;  %v3774_v5 = vpop.f32.mrb[48].mxu1  ;;  %v4135_v14 = vadd.f32 0.5, %v4119_v51  ;;  %v4136_v60 = vadd.f32 0.5, %v4120_v42  ;;  %v4042_v1 = vmul.f32 0.5, %v9036_v39  ;;  %v14325_v56 = vunpack.c.l.bf16 %v14299_v45  ;;  %4314 = vmatprep.mubr.bf16.mxu0 %v14015_v44  ;;  %4427 = vmatprep.mubr.bf16.mxu1 %v14015_v44 }
 0x487   :  { %v3909_v3 = vadd.f32 %v14324_v49, %v3661_v40  ;;  %v3663_v34 = vpop.f32.mrb[49].mxu0  ;;  %v3776_v12 = vpop.f32.mrb[49].mxu1  ;;  %v4154_v16 = vmul.f32 %v3994_v31, %v14326_v47  ;;  %9055 = vtanh.f32 %v3907_v52  ;;  %v14327_v7 = vunpack.c.l.bf16 %v14300_v0  ;;  %4958 = vmatpush1.bf16.msra.mxu0 %v10205_v23  ;;  %5071 = vmatpush1.bf16.msra.mxu1 %v10206_v37  ;;  %v10207_v52 = vld [vmem:[#allocation9 + $0x24] ss:$16 sps:$4 sm:$0xff]   ;;  %v10208_v49 = vld [vmem:[#allocation9 + $0x2c] ss:$16 sps:$4 sm:$0xff]  }
 0x488   :  { %v12293_v41 = vadd.f32 %v14325_v56, %v3774_v5  ;;  %v3665_v30 = vpop.f32.mrb[50].mxu0  ;;  %v3778_v32 = vpop.f32.mrb[50].mxu1  ;;  %v4058_v59 = vadd.f32 0.5, %v4042_v1  ;;  %9057 = vtanh.f32 %v4092_v13  ;;  %v14328_v40 = vunpack.c.l.bf16 %v14301_v54  ;;  %4959 = vmatprep.subr.bf16.mxu0 %v10207_v52  ;;  %5072 = vmatprep.subr.bf16.mxu1 %v10208_v49 }
 0x489   :  { %v9040_v29 = vpop.eup %9039  ;;  %v3949_v48 = vmul.f32 0.5, %v3909_v3  ;;  %v3910_v51 = vadd.f32 %v14327_v7, %v3663_v34  ;;  %v3667_v42 = vpop.f32.mrb[51].mxu0  ;;  %v14329_v39 = vunpack.c.h.bf16 %v14298_v63  ;;  %v4215_v34 = vmul.f32 %v9038_v6, %v4135_v14 }
 0x48a   :  { %v3780_v43 = vpop.f32.mrb[51].mxu1  ;;  %v9042_v19 = vpop.eup %9041  ;;  %v3912_v5 = vadd.f32 %v14328_v40, %v3776_v12  ;;  %v4170_v1 = vmul.f32 %v9034_v50, %v4058_v59  ;;  %v12307_v63 = vadd.f32 %v3851_v61, %v3778_v32  ;;  %v10210_v40 = vld [vmem:[#allocation9 + $0x28] ss:$16 sps:$4 sm:$0xff]   ;;  %v4121_v14 = vmul.f32 0.5, %v12283_v22 }
 0x48b   :  { %v3913_v31 = vadd.f32 %v14329_v39, %v3665_v30  ;;  %v9044_v3 = vpop.eup %9043  ;;  %v4216_v56 = vmul.f32 %v9042_v19, %v4136_v60  ;;  %9059 = vtanh.f32 %v3949_v48  ;;  %v4013_v47 = vmul.f32 0.5, %v3910_v51  ;;  %v10209_v30 = vld [vmem:[#allocation9 + $0x20] ss:$16 sps:$4 sm:$0xff]   ;;  %5073 = vmatpush1.bf16.msra.mxu1 %v10210_v40  ;;  %v10211_v51 = vld [vmem:[#allocation9 + $0x44] ss:$16 sps:$4 sm:$0xff]  }
 0x48c   :  { %v9046_v7 = vpop.eup %9045  ;;  %9061 = vtanh.f32 %v12286_v33  ;;  %v3979_v13 = vmul.f32 0.5, %v9044_v3  ;;  %4960 = vmatpush1.bf16.msra.mxu0 %v10209_v30  ;;  %v12310_v60 = vadd.f32 %v4170_v1, %v4154_v16  ;;  %v4122_v48 = vmul.f32 0.5, %v9040_v29  ;;  %v10212_v19 = vld [vmem:[#allocation9 + $0x4c] ss:$16 sps:$4 sm:$0xff]  }
 0x48d   :  { %v3950_v23 = vmul.f32 0.5, %v3913_v31  ;;  %v4265_v37 = vpack.c.bf16 %v4216_v56, %v4215_v34  ;;  %v4043_v12 = vmul.f32 0.5, %v9046_v7  ;;  %9063 = vtanh.f32 %v4013_v47  ;;  %v9048_v6 = vpop.eup %9047  ;;  %4961 = vmatprep.subr.bf16.mxu0 %v10211_v51  ;;  %5074 = vmatprep.subr.bf16.mxu1 %v10212_v19  ;;  %v14331_v22 = vld [vmem:[#allocation240_spill] sm:$0xff] }
 0x48e   :  { %v3995_v50 = vadd.f32 0.5, %v3979_v13  ;;  %v9050_v59 = vpop.eup %9049  ;;  %v3980_v45 = vmul.f32 0.5, %v9048_v6  ;;  %v14330_v61 = vunpack.c.h.bf16 %v14300_v0  ;;  %v4093_v29 = vmul.f32 0.5, %v3912_v5  ;;  %v10213_v13 = vld [vmem:[#allocation9 + $0x40] ss:$16 sps:$4 sm:$0xff]  }
 0x48f   :  { %v4059_v39 = vadd.f32 0.5, %v4043_v12  ;;  %9065 = vtanh.f32 %v3950_v23  ;;  %4315 = vmatmul.mubr.bf16.gmra.mrb[68].mxu0 %v4265_v37  ;;  %4428 = vmatmul.mubr.bf16.gmra.mrb[68].mxu1 %v4265_v37  ;;  %v9052_v31 = vpop.eup %9051  ;;  %v14332_v52 = vunpack.c.h.bf16 %v14301_v54  ;;  %v10214_v5 = vld [vmem:[#allocation9 + $0x48] ss:$16 sps:$4 sm:$0xff]   ;;  %v4137_v54 = vadd.f32 0.5, %v4121_v14 }
 0x490   :  { %v3914_v32 = vadd.f32 %v14330_v61, %v3667_v42  ;;  %9067 = vtanh.f32 %v12310_v60  ;;  %v4155_v16 = vmul.f32 %v3995_v50, %v14331_v22  ;;  %4324 = vmatprep.mubr.bf16.mxu0 %v14015_v44  ;;  %4437 = vmatprep.mubr.bf16.mxu1 %v14015_v44  ;;  %v9054_v56 = vpop.eup %9053  ;;  %v3996_v42 = vadd.f32 0.5, %v3980_v45  ;;  %v10215_v50 = vld [vmem:[#allocation9 + $0x64] ss:$16 sps:$4 sm:$0xff]  }
 0x491   :  { %v3916_v49 = vadd.f32 %v14332_v52, %v3780_v43  ;;  %v3671_v3 = vpop.f32.mrb[52].mxu0  ;;  %v3784_v34 = vpop.f32.mrb[52].mxu1  ;;  %v4171_v0 = vmul.f32 %v9050_v59, %v4059_v39  ;;  %9069 = vtanh.f32 %v12293_v41  ;;  %4962 = vmatpush1.bf16.msra.mxu0 %v10213_v13  ;;  %5075 = vmatpush1.bf16.msra.mxu1 %v10214_v5  ;;  %v4044_v43 = vmul.f32 0.5, %v9054_v56  ;;  %v10216_v41 = vld [vmem:[#allocation9 + $0x6c] ss:$16 sps:$4 sm:$0xff]  }
 0x492   :  { %v4014_v47 = vmul.f32 0.5, %v3914_v32  ;;  %v3673_v7 = vpop.f32.mrb[53].mxu0  ;;  %v3786_v1 = vpop.f32.mrb[53].mxu1  ;;  %v14333_v23 = vunpack.c.l.bf16 %v14302_v46  ;;  %v14334_v12 = vunpack.c.l.bf16 %v14303_v21  ;;  %4963 = vmatprep.subr.bf16.mxu0 %v10215_v50  ;;  %5076 = vmatprep.subr.bf16.mxu1 %v10216_v41  ;;  %v4138_v19 = vadd.f32 0.5, %v4122_v48 }
 0x493   :  { %v3675_v40 = vpop.f32.mrb[54].mxu0  ;;  %v3788_v6 = vpop.f32.mrb[54].mxu1  ;;  %v12327_v59 = vadd.f32 %v4171_v0, %v4155_v16  ;;  %v12329_v39 = vmul.f32 0.5, %v9052_v31  ;;  %v4156_v32 = vmul.f32 %v3996_v42, %v12071_v57  ;;  %v4060_v22 = vadd.f32 0.5, %v4044_v43  ;;  %v10217_v0 = vld [vmem:[#allocation9 + $0x60] ss:$16 sps:$4 sm:$0xff]  }
 0x494   :  { %v3917_v37 = vadd.f32 %v14333_v23, %v3671_v3  ;;  %v12325_v30 = vadd.f32 %v14334_v12, %v3784_v34  ;;  %v9056_v51 = vpop.eup %9055  ;;  %9071 = vtanh.f32 %v4014_v47  ;;  %v3677_v14 = vpop.f32.mrb[55].mxu0  ;;  %v4094_v34 = vmul.f32 0.5, %v3916_v49  ;;  %v10218_v47 = vld [vmem:[#allocation9 + $0x68] ss:$16 sps:$4 sm:$0xff]   ;;  %v10219_v43 = vld [vmem:[#allocation9 + $0x84] ss:$16 sps:$4 sm:$0xff]  }
 0x495   :  { %v3790_v45 = vpop.f32.mrb[55].mxu1  ;;  %v9058_v61 = vpop.eup %9057  ;;  %9073 = vtanh.f32 %v4093_v29  ;;  %v14335_v56 = vunpack.c.l.bf16 %v14304_v36  ;;  %v14336_v16 = vunpack.c.l.bf16 %v14305_v53  ;;  %4964 = vmatpush1.bf16.msra.mxu0 %v10217_v0  ;;  %5077 = vmatpush1.bf16.msra.mxu1 %v10218_v47  ;;  %v4172_v5 = vmul.f32 %v9056_v51, %v4060_v22  ;;  %v10224_v0 = vld [vmem:[#allocation9 + $0xac] ss:$16 sps:$4 sm:$0xff]  }
 0x496   :  { %v3951_v52 = vmul.f32 0.5, %v3917_v37  ;;  %v9060_v3 = vpop.eup %9059  ;;  %9075 = vtanh.f32 %v12307_v63  ;;  %v14337_v29 = vunpack.c.h.bf16 %v14302_v46  ;;  %4965 = vmatprep.subr.bf16.mxu0 %v10219_v43  ;;  %v10220_v63 = vld [vmem:[#allocation9 + $0x8c] ss:$16 sps:$4 sm:$0xff]   ;;  %v14338_v23 = vunpack.c.h.bf16 %v14303_v21  ;;  %v10222_v21 = vld [vmem:[#allocation9 + $0x88] ss:$16 sps:$4 sm:$0xff]  }
 0x497   :  { %v3918_v48 = vadd.f32 %v14335_v56, %v3673_v7  ;;  %v3920_v31 = vadd.f32 %v14336_v16, %v3786_v1  ;;  %v9062_v13 = vpop.eup %9061  ;;  %v3981_v57 = vmul.f32 0.5, %v9060_v3  ;;  %5078 = vmatprep.subr.bf16.mxu1 %v10220_v63  ;;  %v4124_v7 = vmul.f32 0.5, %v9058_v61  ;;  %v10221_v61 = vld [vmem:[#allocation9 + $0x80] ss:$16 sps:$4 sm:$0xff]   ;;  %v14342_v63 = vld [vmem:[#allocation44_spill] sm:$0xff] }
 0x498   :  { %9077 = vtanh.f32 %v3951_v52  ;;  %v3921_v42 = vadd.f32 %v14337_v29, %v3675_v40  ;;  %v9064_v49 = vpop.eup %9063  ;;  %v12342_v37 = vadd.f32 %v14338_v23, %v3788_v6  ;;  %v12344_v12 = vadd.f32 %v4172_v5, %v4156_v32  ;;  %v14341_v5 = vld [vmem:[#allocation43_spill] sm:$0xff] }
 0x499   :  { %9079 = vtanh.f32 %v12327_v59  ;;  %v4015_v1 = vmul.f32 0.5, %v3918_v48  ;;  %v3997_v50 = vadd.f32 0.5, %v3981_v57  ;;  %v4045_v41 = vmul.f32 0.5, %v9064_v49  ;;  %v9066_v46 = vpop.eup %9065  ;;  %4966 = vmatpush1.bf16.msra.mxu0 %v10221_v61  ;;  %5079 = vmatpush1.bf16.msra.mxu1 %v10222_v21  ;;  %v10225_v23 = vld [vmem:[#allocation9 + $0xa0] ss:$16 sps:$4 sm:$0xff]  }
 0x49a   :  { %v3952_v51 = vmul.f32 0.5, %v3921_v42  ;;  %v4217_v40 = vmul.f32 %v9062_v13, %v4137_v54  ;;  %v14339_v22 = vunpack.c.h.bf16 %v14304_v36  ;;  %v14340_v3 = vunpack.c.h.bf16 %v14305_v53  ;;  %v9068_v6 = vpop.eup %9067  ;;  %v10223_v54 = vld [vmem:[#allocation9 + $0xa4] ss:$16 sps:$4 sm:$0xff]   ;;  %5080 = vmatprep.subr.bf16.mxu1 %v10224_v0 }
 0x49b   :  { %9081 = vtanh.f32 %v4015_v1  ;;  %v4157_v32 = vmul.f32 %v3997_v50, %v12085_v55  ;;  %v4061_v48 = vadd.f32 0.5, %v4045_v41  ;;  %v3982_v16 = vmul.f32 0.5, %v9066_v46  ;;  %4967 = vmatprep.subr.bf16.mxu0 %v10223_v54  ;;  %v9070_v36 = vpop.eup %9069 }
 0x49c   :  { %v3922_v52 = vadd.f32 %v14339_v22, %v3677_v14  ;;  %v12350_v56 = vadd.f32 %v14340_v3, %v3790_v45  ;;  %9083 = vtanh.f32 %v12344_v12  ;;  %v4218_v14 = vmul.f32 %v9068_v6, %v4138_v19  ;;  %v10226_v19 = vld [vmem:[#allocation9 + $0xa8] ss:$16 sps:$4 sm:$0xff]  }
 0x49d   :  { %9085 = vtanh.f32 %v4094_v34  ;;  %v4095_v53 = vmul.f32 0.5, %v3920_v31  ;;  %v4173_v47 = vmul.f32 %v9070_v36, %v4061_v48  ;;  %v3998_v13 = vadd.f32 0.5, %v3982_v16  ;;  %v3681_v55 = vpop.f32.mrb[56].mxu0  ;;  %v3794_v43 = vpop.f32.mrb[56].mxu1  ;;  %4968 = vmatpush1.bf16.msra.mxu0 %v10225_v23  ;;  %5081 = vmatpush1.bf16.msra.mxu1 %v10226_v19 }
 0x49e   :  { %v4016_v45 = vmul.f32 0.5, %v3922_v52  ;;  %9087 = vtanh.f32 %v3952_v51  ;;  %v3870_v57 = vunpack.c.l.bf16 %v14341_v5  ;;  %v9072_v29 = vpop.eup %9071  ;;  %v4266_v42 = vpack.c.bf16 %v4218_v14, %v4217_v40  ;;  %v3683_v51 = vpop.f32.mrb[57].mxu0  ;;  %v10228_v40 = vld [vmem:[#allocation9 + $0xcc] ss:$16 sps:$4 sm:$0xff]  }
 0x49f   :  { %9089 = vtanh.f32 %v12325_v30  ;;  %v3872_v49 = vunpack.c.l.bf16 %v14342_v63  ;;  %v3874_v1 = vunpack.c.h.bf16 %v14341_v5  ;;  %v9074_v34 = vpop.eup %9073  ;;  %v4139_v31 = vadd.f32 0.5, %v12329_v39  ;;  %v3796_v46 = vpop.f32.mrb[57].mxu1  ;;  %v10227_v30 = vld [vmem:[#allocation9 + $0xc4] ss:$16 sps:$4 sm:$0xff]   ;;  %5082 = vmatprep.subr.bf16.mxu1 %v10228_v40 }
 0x4a0   :  { %v12359_v50 = vadd.f32 %v4173_v47, %v4157_v32  ;;  %v4046_v41 = vmul.f32 0.5, %v9072_v29  ;;  %9091 = vtanh.f32 %v4016_v45  ;;  %4969 = vmatprep.subr.bf16.mxu0 %v10227_v30  ;;  %v9076_v22 = vpop.eup %9075  ;;  %v4140_v52 = vadd.f32 0.5, %v4124_v7  ;;  %v3685_v39 = vpop.f32.mrb[58].mxu0  ;;  %4325 = vmatmul.mubr.bf16.gmra.mrb[72].mxu0 %v4266_v42 }
 0x4a1   :  { %9093 = vtanh.f32 %v4095_v53  ;;  %v14343_v3 = vunpack.c.l.bf16 %v14306_v8  ;;  %v14344_v21 = vunpack.c.l.bf16 %v14307_v9  ;;  %v3798_v32 = vpop.f32.mrb[58].mxu1  ;;  %4438 = vmatmul.mubr.bf16.gmra.mrb[72].mxu1 %v4266_v42  ;;  %v4158_v16 = vmul.f32 %v3998_v13, %v12100_v2  ;;  %v3687_v36 = vpop.f32.mrb[59].mxu0  ;;  %4334 = vmatprep.mubr.bf16.mxu0 %v14015_v44  ;;  %v10229_v2 = vld [vmem:[#allocation9 + $0xc0] ss:$16 sps:$4 sm:$0xff]   ;;  %v10230_v13 = vld [vmem:[#allocation9 + $0xc8] ss:$16 sps:$4 sm:$0xff]  }
 0x4a2   :  { %v9078_v48 = vpop.eup %9077  ;;  %v4062_v54 = vadd.f32 0.5, %v4046_v41  ;;  %9095 = vtanh.f32 %v12342_v37  ;;  %v14345_v0 = vunpack.c.l.bf16 %v14308_v28  ;;  %v3800_v14 = vpop.f32.mrb[59].mxu1  ;;  %4447 = vmatprep.mubr.bf16.mxu1 %v14015_v44  ;;  %v4096_v47 = vmul.f32 0.5, %v12350_v56  ;;  %4970 = vmatpush1.bf16.msra.mxu0 %v10229_v2  ;;  %v10231_v41 = vld [vmem:[#allocation9 + $0xe4] ss:$16 sps:$4 sm:$0xff]  }
 0x4a3   :  { %v3925_v61 = vadd.f32 %v14343_v3, %v3681_v55  ;;  %v3927_v6 = vadd.f32 %v14344_v21, %v3794_v43  ;;  %v9080_v53 = vpop.eup %9079  ;;  %9097 = vtanh.f32 %v12359_v50  ;;  %v3983_v45 = vmul.f32 0.5, %v9078_v48  ;;  %5083 = vmatpush1.bf16.msra.mxu1 %v10230_v13  ;;  %4971 = vmatprep.subr.bf16.mxu0 %v10231_v41  ;;  %v10233_v2 = vld [vmem:[#allocation9 + $0xe0] ss:$16 sps:$4 sm:$0xff]  }
 0x4a4   :  { %v3926_v7 = vadd.f32 %v14345_v0, %v3683_v51  ;;  %v4174_v37 = vmul.f32 %v9076_v22, %v4062_v54  ;;  %v14346_v55 = vunpack.c.l.bf16 %v14309_v35  ;;  %v14347_v23 = vunpack.c.h.bf16 %v14306_v8  ;;  %v10232_v51 = vld [vmem:[#allocation9 + $0xec] ss:$16 sps:$4 sm:$0xff]  }
 0x4a5   :  { %v3953_v29 = vmul.f32 0.5, %v3925_v61  ;;  %5084 = vmatprep.subr.bf16.mxu1 %v10232_v51  ;;  %v9082_v30 = vpop.eup %9081  ;;  %v3999_v40 = vadd.f32 0.5, %v3983_v45  ;;  %v14348_v56 = vunpack.c.h.bf16 %v14307_v9  ;;  %v14349_v61 = vunpack.c.h.bf16 %v14308_v28  ;;  %v10234_v45 = vld [vmem:[#allocation9 + $0xe8] ss:$16 sps:$4 sm:$0xff]  }
 0x4a6   :  { %v4017_v42 = vmul.f32 0.5, %v3926_v7  ;;  %v3928_v43 = vadd.f32 %v14346_v55, %v3796_v46  ;;  %v3929_v19 = vadd.f32 %v14347_v23, %v3685_v39  ;;  %v9084_v21 = vpop.eup %9083  ;;  %v4125_v48 = vmul.f32 0.5, %v9074_v34  ;;  %4972 = vmatpush1.bf16.msra.mxu0 %v10233_v2 }
 0x4a7   :  { %9099 = vtanh.f32 %v3953_v29  ;;  %v3931_v3 = vadd.f32 %v14348_v56, %v3798_v32  ;;  %v3930_v22 = vadd.f32 %v14349_v61, %v3687_v36  ;;  %v12381_v54 = vadd.f32 %v4174_v37, %v4158_v16  ;;  %v9086_v8 = vpop.eup %9085  ;;  %5085 = vmatpush1.bf16.msra.mxu1 %v10234_v45  ;;  %v10235_v16 = vld [vmem:[#allocation9 + $0x4] ss:$16 sps:$4 sm:$0xff]   ;;  %v10236_v36 = vld [vmem:[#allocation9 + $0xc] ss:$16 sps:$4 sm:$0xff]  }
 0x4a8   :  { %v4047_v46 = vmul.f32 0.5, %v9082_v30  ;;  %9101 = vtanh.f32 %v4017_v42  ;;  %v4219_v39 = vmul.f32 %v9080_v53, %v4139_v31  ;;  %v4220_v0 = vmul.f32 %v9084_v21, %v4140_v52  ;;  %v9088_v9 = vpop.eup %9087  ;;  %5642 = vmatprep.subr.bf16.mxu0 %v10235_v16  ;;  %5755 = vmatprep.subr.bf16.mxu1 %v10236_v36 }
 0x4a9   :  { %9103 = vtanh.f32 %v4096_v47  ;;  %v3954_v7 = vmul.f32 0.5, %v3929_v19  ;;  %v4159_v28 = vmul.f32 %v3999_v40, %v12114_v38  ;;  %v4018_v34 = vmul.f32 0.5, %v3930_v22  ;;  %v9090_v29 = vpop.eup %9089  ;;  %v3691_v13 = vpop.f32.mrb[60].mxu0 }
 0x4aa   :  { %9105 = vtanh.f32 %v12381_v54  ;;  %v4063_v32 = vadd.f32 0.5, %v4047_v46  ;;  %v4267_v31 = vpack.c.bf16 %v4220_v0, %v4219_v39  ;;  %v3984_v52 = vmul.f32 0.5, %v9088_v9  ;;  %v3804_v37 = vpop.f32.mrb[60].mxu1  ;;  %v9092_v42 = vpop.eup %9091 }
 0x4ab   :  { %9107 = vtanh.f32 %v3927_v6  ;;  %v14350_v53 = vunpack.c.h.bf16 %v14309_v35  ;;  %v4097_v23 = vmul.f32 0.5, %v3928_v43  ;;  %v14351_v38 = vunpack.c.l.bf16 %v14313_v18  ;;  %v3693_v41 = vpop.f32.mrb[61].mxu0  ;;  %v3806_v51 = vpop.f32.mrb[61].mxu1 }
 0x4ac   :  { %v4175_v55 = vmul.f32 %v9090_v29, %v4063_v32  ;;  %9109 = vtanh.f32 %v3954_v7  ;;  %v12389_v30 = vpop.eup %9093  ;;  %v4126_v40 = vmul.f32 0.5, %v9086_v8  ;;  %v4000_v56 = vadd.f32 0.5, %v3984_v52  ;;  %v3695_v6 = vpop.f32.mrb[62].mxu0  ;;  %4335 = vmatmul.mubr.bf16.gmra.mrb[76].mxu0 %v4267_v31  ;;  %4448 = vmatmul.mubr.bf16.gmra.mrb[76].mxu1 %v4267_v31 }
 0x4ad   :  { %v3932_v47 = vadd.f32 %v14350_v53, %v3800_v14  ;;  %v3933_v19 = vadd.f32 %v14351_v38, %v3691_v13  ;;  %v4048_v61 = vmul.f32 0.5, %v9092_v42  ;;  %9111 = vtanh.f32 %v4018_v34  ;;  %v3808_v35 = vpop.f32.mrb[62].mxu1  ;;  %v9096_v14 = vpop.eup %9095  ;;  %4344 = vmatprep.mubr.bf16.mxu0 %v14015_v44  ;;  %4457 = vmatprep.mubr.bf16.mxu1 %v14015_v44 }
 0x4ae   :  { %v12391_v22 = vadd.f32 %v4175_v55, %v4159_v28  ;;  %v14352_v46 = vunpack.c.l.bf16 %v14314_v24  ;;  %v3697_v0 = vpop.f32.mrb[63].mxu0  ;;  %v3810_v7 = vpop.f32.mrb[63].mxu1  ;;  %v4160_v2 = vmul.f32 %v4000_v56, %v12134_v25  ;;  %9113 = vtanh.f32 %v3931_v3 }
 0x4af   :  { %v4098_v43 = vmul.f32 0.5, %v3932_v47  ;;  %v3955_v21 = vmul.f32 0.5, %v3933_v19  ;;  %v9098_v8 = vpop.eup %9097  ;;  %v4064_v45 = vadd.f32 0.5, %v4048_v61  ;;  %v3876_v9 = vunpack.c.h.bf16 %v14342_v63 }
 0x4b0   :  { %v3935_v39 = vadd.f32 %v14352_v46, %v3804_v37  ;;  %v4141_v28 = vadd.f32 0.5, %v4125_v48  ;;  %9115 = vtanh.f32 %v4097_v23  ;;  %v3934_v32 = vadd.f32 %v3870_v57, %v3693_v41 }
 0x4b1   :  { %v3936_v34 = vadd.f32 %v3872_v49, %v3806_v51  ;;  %v9100_v16 = vpop.eup %9099  ;;  %v4176_v36 = vmul.f32 %v9096_v14, %v4064_v45  ;;  %9117 = vtanh.f32 %v3955_v21  ;;  %v3937_v29 = vadd.f32 %v3873_v26, %v3695_v6 }
 0x4b2   :  { %v3939_v25 = vadd.f32 %v3875_v10, %v3808_v35  ;;  %v9102_v3 = vpop.eup %9101  ;;  %v4142_v31 = vadd.f32 0.5, %v4126_v40  ;;  %v3985_v52 = vmul.f32 0.5, %v9100_v16  ;;  %9119 = vtanh.f32 %v4098_v43 }
 0x4b3   :  { %v4019_v48 = vmul.f32 0.5, %v3934_v32  ;;  %v9104_v53 = vpop.eup %9103  ;;  %9121 = vtanh.f32 %v12391_v22  ;;  %v12408_v57 = vadd.f32 %v4176_v36, %v4160_v2  ;;  %v4049_v63 = vmul.f32 0.5, %v9102_v3 }
 0x4b4   :  { %v3956_v49 = vmul.f32 0.5, %v3937_v29  ;;  %v9106_v47 = vpop.eup %9105  ;;  %v4001_v13 = vadd.f32 0.5, %v3985_v52  ;;  %v3938_v18 = vadd.f32 %v3874_v1, %v3697_v0  ;;  %v3940_v24 = vadd.f32 %v3876_v9, %v3810_v7 }
 0x4b5   :  { %9123 = vtanh.f32 %v4019_v48  ;;  %v9108_v26 = vpop.eup %9107  ;;  %v4221_v10 = vmul.f32 %v9098_v8, %v4141_v28  ;;  %v4222_v37 = vmul.f32 %v9106_v47, %v4142_v31  ;;  %v4065_v42 = vadd.f32 0.5, %v4049_v63 }
 0x4b6   :  { %9125 = vtanh.f32 %v12408_v57  ;;  %v9110_v55 = vpop.eup %9109  ;;  %v4161_v23 = vmul.f32 %v4001_v13, %v12147_v17  ;;  %v4020_v38 = vmul.f32 0.5, %v3938_v18  ;;  %v4127_v1 = vmul.f32 0.5, %v12389_v30 }
 0x4b7   :  { %9127 = vtanh.f32 %v3935_v39  ;;  %v9112_v19 = vpop.eup %9111  ;;  %v4268_v41 = vpack.c.bf16 %v4222_v37, %v4221_v10  ;;  %v4177_v51 = vmul.f32 %v9108_v26, %v4065_v42  ;;  %v3986_v40 = vmul.f32 0.5, %v9110_v55 }
 0x4b8   :  { %9129 = vtanh.f32 %v3956_v49  ;;  %v4050_v56 = vmul.f32 0.5, %v9112_v19  ;;  %v9114_v5 = vpop.eup %9113  ;;  %v4128_v61 = vmul.f32 0.5, %v9104_v53  ;;  %v4143_v7 = vadd.f32 0.5, %v4127_v1 }
 0x4b9   :  { %9131 = vtanh.f32 %v4020_v38  ;;  %v12415_v6 = vadd.f32 %v4177_v51, %v4161_v23  ;;  %v4002_v35 = vadd.f32 0.5, %v3986_v40  ;;  %4345 = vmatmul.mubr.bf16.gmra.mrb[80].mxu0 %v4268_v41  ;;  %4458 = vmatmul.mubr.bf16.gmra.mrb[80].mxu1 %v4268_v41  ;;  %v4099_v28 = vmul.f32 0.5, %v3936_v34 }
 0x4ba   :  { %v9116_v14 = vpop.eup %9115  ;;  %v4066_v17 = vadd.f32 0.5, %v4050_v56  ;;  %4354 = vmatprep.mubr.bf16.mxu0 %v14015_v44  ;;  %4467 = vmatprep.mubr.bf16.mxu1 %v14015_v44  ;;  %9133 = vtanh.f32 %v3939_v25  ;;  %v4144_v8 = vadd.f32 0.5, %v4128_v61  ;;  %v4100_v36 = vmul.f32 0.5, %v3940_v24 }
 0x4bb   :  { %v9118_v43 = vpop.eup %9117  ;;  %v4162_v21 = vmul.f32 %v4002_v35, %v12153_v27  ;;  %9135 = vtanh.f32 %v12415_v6  ;;  %v4129_v13 = vmul.f32 0.5, %v9116_v14 }
 0x4bc   :  { %v9120_v46 = vpop.eup %9119  ;;  %v4178_v39 = vmul.f32 %v9114_v5, %v4066_v17  ;;  %v3987_v0 = vmul.f32 0.5, %v9118_v43 }
 0x4bd   :  { %v9122_v30 = vpop.eup %9121  ;;  %v4130_v18 = vmul.f32 0.5, %v9120_v46  ;;  %v4145_v55 = vadd.f32 0.5, %v4129_v13 }
 0x4be   :  { %v12421_v45 = vadd.f32 %v4178_v39, %v4162_v21  ;;  %v4003_v9 = vadd.f32 0.5, %v3987_v0  ;;  %v4223_v3 = vmul.f32 %v9122_v30, %v4143_v7  ;;  %v14353_v39 = vld [vmem:[#allocation45_spill] sm:$0xff]  ;;  %v14354_v30 = vld [vmem:[#allocation46_spill] sm:$0xff] }
 0x4bf   :  { %v9124_v2 = vpop.eup %9123  ;;  %v4146_v23 = vadd.f32 0.5, %v4130_v18  ;;  %v4498_v0 = vunpack.c.l.bf16 %v14353_v39  ;;  %v4500_v7 = vunpack.c.l.bf16 %v14354_v30 }
 0x4c0   :  { %v9126_v32 = vpop.eup %9125  ;;  %v4051_v16 = vmul.f32 0.5, %v9124_v2  ;;  %9137 = vtanh.f32 %v12421_v45  ;;  %v4163_v25 = vmul.f32 %v4003_v9, %v12156_v11  ;;  %v4502_v9 = vunpack.c.h.bf16 %v14353_v39 }
 0x4c1   :  { %v9128_v29 = vpop.eup %9127  ;;  %v4224_v27 = vmul.f32 %v9126_v32, %v4144_v8  ;;  %9139 = vtanh.f32 %v4099_v28  ;;  %v14355_v8 = vld [vmem:[#allocation47_spill] sm:$0xff]  ;;  %v4504_v28 = vunpack.c.h.bf16 %v14354_v30 }
 0x4c2   :  { %v9130_v31 = vpop.eup %9129  ;;  %v4067_v52 = vadd.f32 0.5, %v4051_v16  ;;  %9141 = vtanh.f32 %v4100_v36  ;;  %v4499_v2 = vunpack.c.l.bf16 %v14355_v8  ;;  %v14356_v36 = vld [vmem:[#allocation48_spill] sm:$0xff]  ;;  %v14363_v30 = vld [vmem:[#allocation55_spill] sm:$0xff] }
 0x4c3   :  { %v9132_v48 = vpop.eup %9131  ;;  %v4269_v53 = vpack.c.bf16 %v4224_v27, %v4223_v3  ;;  %v3988_v63 = vmul.f32 0.5, %v9130_v31  ;;  %v4503_v3 = vunpack.c.h.bf16 %v14355_v8  ;;  %v4505_v27 = vunpack.c.h.bf16 %v14356_v36  ;;  %v14357_v31 = vld [vmem:[#allocation49_spill] sm:$0xff]  ;;  %v14364_v8 = vld [vmem:[#allocation56_spill] sm:$0xff] }
 0x4c4   :  { %v4179_v49 = vmul.f32 %v9128_v29, %v4067_v52  ;;  %v4052_v47 = vmul.f32 0.5, %v9132_v48  ;;  %v9134_v11 = vpop.eup %9133  ;;  %v4501_v29 = vunpack.c.l.bf16 %v14356_v36 }
 0x4c5   :  { %v4004_v34 = vadd.f32 0.5, %v3988_v63  ;;  %4355 = vmatmul.mubr.bf16.gmra.mrb[84].mxu0 %v4269_v53  ;;  %4468 = vmatmul.mubr.bf16.gmra.mrb[84].mxu1 %v4269_v53  ;;  %v9136_v42 = vpop.eup %9135 }
 0x4c6   :  { %v12425_v24 = vadd.f32 %v4179_v49, %v4163_v25  ;;  %v4068_v26 = vadd.f32 0.5, %v4052_v47  ;;  %4364 = vmatprep.mubr.bf16.mxu0 %v14015_v44  ;;  %4477 = vmatprep.mubr.bf16.mxu1 %v14015_v44  ;;  %v4225_v41 = vmul.f32 %v9136_v42, %v4145_v55  ;;  %v4506_v25 = vunpack.c.l.bf16 %v14357_v31  ;;  %v14358_v49 = vld [vmem:[#allocation50_spill] sm:$0xff] }
 0x4c7   :  { %v4164_v10 = vmul.f32 %v4004_v34, %v12161_v58  ;;  %v4508_v47 = vunpack.c.l.bf16 %v14358_v49  ;;  %v4510_v34 = vunpack.c.h.bf16 %v14357_v31  ;;  %v4512_v42 = vunpack.c.h.bf16 %v14358_v49 }
 0x4c8   :  { %v4180_v37 = vmul.f32 %v9134_v11, %v4068_v26  ;;  %9143 = vtanh.f32 %v12425_v24 }
 0x4ca   :  { %v12431_v38 = vadd.f32 %v4180_v37, %v4164_v10  ;;  %v9138_v19 = vpop.eup %9137  ;;  %v14359_v10 = vld [vmem:[#allocation51_spill] sm:$0xff] }
 0x4cb   :  { %v4226_v51 = vmul.f32 %v9138_v19, %v4146_v23  ;;  %v9140_v40 = vpop.eup %9139  ;;  %v4507_v37 = vunpack.c.l.bf16 %v14359_v10 }
 0x4cc   :  { %9145 = vtanh.f32 %v12431_v38  ;;  %v9142_v56 = vpop.eup %9141  ;;  %v4131_v1 = vmul.f32 0.5, %v9140_v40  ;;  %v14360_v40 = vld [vmem:[#allocation52_spill] sm:$0xff] }
 0x4cd   :  { %v4270_v5 = vpack.c.bf16 %v4226_v51, %v4225_v41  ;;  %v4132_v58 = vmul.f32 0.5, %v9142_v56  ;;  %v4509_v56 = vunpack.c.l.bf16 %v14360_v40 }
 0x4ce   :  { %v4147_v35 = vadd.f32 0.5, %v4131_v1 }
 0x4cf   :  { %4365 = vmatmul.mubr.bf16.gmra.mrb[88].mxu0 %v4270_v5  ;;  %4478 = vmatmul.mubr.bf16.gmra.mrb[88].mxu1 %v4270_v5  ;;  %v4148_v14 = vadd.f32 0.5, %v4132_v58 }
 0x4d0   :  { %4374 = vmatprep.mubr.bf16.mxu0 %v14015_v44  ;;  %4487 = vmatprep.mubr.bf16.mxu1 %v14015_v44 }
 0x4d2   :  { %v9144_v61 = vpop.eup %9143 }
 0x4d3   :  { %v4227_v43 = vmul.f32 %v9144_v61, %v4147_v35  ;;  %v4511_v61 = vunpack.c.h.bf16 %v14359_v10 }
 0x4d6   :  { %v9146_v17 = vpop.eup %9145 }
 0x4d7   :  { %v4228_v21 = vmul.f32 %v9146_v17, %v4148_v14  ;;  %v4513_v14 = vunpack.c.h.bf16 %v14360_v40  ;;  %v14361_v17 = vld [vmem:[#allocation53_spill] sm:$0xff] }
 0x4d9   :  { %v4271_v46 = vpack.c.bf16 %v4228_v21, %v4227_v43  ;;  %v4514_v43 = vunpack.c.l.bf16 %v14361_v17 }
 0x4db   :  { %4375 = vmatmul.mubr.bf16.gmra.mrb[92].mxu0 %v4271_v46  ;;  %4488 = vmatmul.mubr.bf16.gmra.mrb[92].mxu1 %v4271_v46  ;;  %v14362_v46 = vld [vmem:[#allocation54_spill] sm:$0xff] }
 0x4dc   :  { %4989 = vmatprep.mubr.bf16.mxu0 %v14015_v44  ;;  %5102 = vmatprep.mubr.bf16.mxu1 %v14015_v44  ;;  %v4516_v39 = vunpack.c.l.bf16 %v14362_v46 }
 0x558   :  { %v4306_v32 = vpop.f32.mrb[64].mxu0  ;;  %v4419_v16 = vpop.f32.mrb[64].mxu1 }
 0x559   :  { %v4562_v52 = vadd.f32 %v4498_v0, %v4306_v32  ;;  %v4564_v48 = vadd.f32 %v4500_v7, %v4419_v16  ;;  %v4308_v53 = vpop.f32.mrb[65].mxu0  ;;  %v4421_v63 = vpop.f32.mrb[65].mxu1  ;;  %v4518_v0 = vunpack.c.h.bf16 %v14361_v17  ;;  %v4515_v7 = vunpack.c.l.bf16 %v14363_v30 }
 0x55a   :  { %v4563_v13 = vadd.f32 %v4499_v2, %v4308_v53  ;;  %v4565_v18 = vadd.f32 %v4501_v29, %v4421_v63  ;;  %v4310_v26 = vpop.f32.mrb[66].mxu0  ;;  %v4423_v11 = vpop.f32.mrb[66].mxu1  ;;  %v4517_v2 = vunpack.c.l.bf16 %v14364_v8  ;;  %v14365_v29 = vld [vmem:[#allocation57_spill] sm:$0xff]  ;;  %v14380_v17 = vunpack.c.h.bf16 %v14363_v30 }
 0x55b   :  { %v4626_v55 = vmul.f32 0.5, %v4562_v52  ;;  %v4566_v23 = vadd.f32 %v4502_v9, %v4310_v26  ;;  %v4568_v19 = vadd.f32 %v4504_v28, %v4423_v11  ;;  %v4312_v41 = vpop.f32.mrb[67].mxu0  ;;  %v4425_v51 = vpop.f32.mrb[67].mxu1 }
 0x55c   :  { %v4690_v5 = vmul.f32 0.5, %v4563_v13  ;;  %v4567_v1 = vadd.f32 %v4503_v3, %v4312_v41  ;;  %v4569_v58 = vadd.f32 %v4505_v27, %v4425_v51  ;;  %v14366_v27 = vld [vmem:[#allocation58_spill] sm:$0xff]  ;;  %v4770_v41 = vmul.f32 0.5, %v4565_v18 }
 0x55d   :  { %9147 = vtanh.f32 %v4626_v55  ;;  %v4627_v35 = vmul.f32 0.5, %v4566_v23 }
 0x55e   :  { %9149 = vtanh.f32 %v4690_v5  ;;  %v4691_v21 = vmul.f32 0.5, %v4567_v1 }
 0x55f   :  { %9151 = vtanh.f32 %v4627_v35 }
 0x560   :  { %9153 = vtanh.f32 %v4564_v48 }
 0x561   :  { %9155 = vtanh.f32 %v4691_v21 }
 0x562   :  { %v4316_v32 = vpop.f32.mrb[68].mxu0  ;;  %v4429_v16 = vpop.f32.mrb[68].mxu1  ;;  %9157 = vtanh.f32 %v4568_v19 }
 0x563   :  { %v4570_v52 = vadd.f32 %v4506_v25, %v4316_v32  ;;  %v4572_v53 = vadd.f32 %v4508_v47, %v4429_v16  ;;  %v4318_v63 = vpop.f32.mrb[69].mxu0  ;;  %v4431_v49 = vpop.f32.mrb[69].mxu1  ;;  %v14367_v47 = vld [vmem:[#allocation59_spill] sm:$0xff] }
 0x564   :  { %v4571_v26 = vadd.f32 %v4507_v37, %v4318_v63  ;;  %v4573_v11 = vadd.f32 %v4509_v56, %v4431_v49  ;;  %v4320_v10 = vpop.f32.mrb[70].mxu0  ;;  %v4433_v55 = vpop.f32.mrb[70].mxu1  ;;  %v14368_v37 = vld [vmem:[#allocation60_spill] sm:$0xff] }
 0x565   :  { %v4628_v51 = vmul.f32 0.5, %v4570_v52  ;;  %v4574_v40 = vadd.f32 %v4510_v34, %v4320_v10  ;;  %v4576_v5 = vadd.f32 %v4512_v42, %v4433_v55  ;;  %v4322_v1 = vpop.f32.mrb[71].mxu0  ;;  %v4435_v35 = vpop.f32.mrb[71].mxu1  ;;  %v4771_v42 = vmul.f32 0.5, %v4569_v58  ;;  %v14369_v52 = vld [vmem:[#allocation61_spill] sm:$0xff] }
 0x566   :  { %v4692_v25 = vmul.f32 0.5, %v4571_v26  ;;  %v4575_v48 = vadd.f32 %v4511_v61, %v4322_v1  ;;  %v4577_v21 = vadd.f32 %v4513_v14, %v4435_v35  ;;  %v14370_v26 = vld [vmem:[#allocation62_spill] sm:$0xff]  ;;  %v14371_v1 = vld [vmem:[#allocation63_spill] sm:$0xff]  ;;  %v14373_v14 = vld [vmem:[#allocation65_spill] sm:$0xff]  ;;  %v4772_v13 = vmul.f32 0.5, %v4573_v11 }
 0x567   :  { %9159 = vtanh.f32 %v4628_v51  ;;  %v4629_v16 = vmul.f32 0.5, %v4574_v40  ;;  %v9148_v34 = vpop.eup %9147 }
 0x568   :  { %9161 = vtanh.f32 %v4692_v25  ;;  %v4693_v63 = vmul.f32 0.5, %v4575_v48  ;;  %v9150_v10 = vpop.eup %9149  ;;  %v4658_v55 = vmul.f32 0.5, %v9148_v34  ;;  %v14372_v25 = vld [vmem:[#allocation64_spill] sm:$0xff] }
 0x569   :  { %9163 = vtanh.f32 %v4770_v41  ;;  %v4722_v40 = vmul.f32 0.5, %v9150_v10  ;;  %v9152_v18 = vpop.eup %9151  ;;  %v14374_v10 = vld [vmem:[#allocation66_spill] sm:$0xff] }
 0x56a   :  { %9165 = vtanh.f32 %v4629_v16  ;;  %v4674_v41 = vadd.f32 0.5, %v4658_v55  ;;  %v9154_v19 = vpop.eup %9153  ;;  %v4659_v16 = vmul.f32 0.5, %v9152_v18  ;;  %v14378_v18 = vld [vmem:[#allocation70_spill] sm:$0xff] }
 0x56b   :  { %9167 = vtanh.f32 %v4572_v53  ;;  %v4738_v34 = vadd.f32 0.5, %v4722_v40  ;;  %v9156_v51 = vpop.eup %9155  ;;  %v14375_v40 = vld [vmem:[#allocation67_spill] sm:$0xff] }
 0x56c   :  { %9169 = vtanh.f32 %v4693_v63  ;;  %v4834_v53 = vmul.f32 %v4674_v41, %v12238_v4  ;;  %v4675_v23 = vadd.f32 0.5, %v4659_v16  ;;  %v4723_v58 = vmul.f32 0.5, %v9156_v51  ;;  %v9158_v61 = vpop.eup %9157 }
 0x56d   :  { %9171 = vtanh.f32 %v4771_v42  ;;  %v4850_v63 = vmul.f32 %v9154_v19, %v4738_v34  ;;  %v14376_v42 = vld [vmem:[#allocation68_spill] sm:$0xff]  ;;  %v4773_v51 = vmul.f32 0.5, %v4577_v21 }
 0x56e   :  { %9173 = vtanh.f32 %v4576_v5  ;;  %v4835_v41 = vmul.f32 %v4675_v23, %v12247_v15  ;;  %v4739_v48 = vadd.f32 0.5, %v4723_v58  ;;  %v14377_v5 = vld [vmem:[#allocation69_spill] sm:$0xff] }
 0x56f   :  { %v12486_v4 = vadd.f32 %v4850_v63, %v4834_v53  ;;  %9175 = vtanh.f32 %v4772_v13 }
 0x570   :  { %v4851_v3 = vmul.f32 %v9158_v61, %v4739_v48 }
 0x571   :  { %v9160_v32 = vpop.eup %9159  ;;  %9177 = vtanh.f32 %v12486_v4 }
 0x572   :  { %v9162_v19 = vpop.eup %9161  ;;  %v4660_v34 = vmul.f32 0.5, %v9160_v32  ;;  %v12499_v48 = vadd.f32 %v4851_v3, %v4835_v41  ;;  %9179 = vtanh.f32 %v4773_v51 }
 0x573   :  { %v4326_v11 = vpop.f32.mrb[72].mxu0  ;;  %v9164_v56 = vpop.eup %9163  ;;  %v4724_v49 = vmul.f32 0.5, %v9162_v19 }
 0x574   :  { %v4439_v16 = vpop.f32.mrb[72].mxu1  ;;  %v4578_v53 = vadd.f32 %v4514_v43, %v4326_v11  ;;  %v4328_v15 = vpop.f32.mrb[73].mxu0  ;;  %v4676_v32 = vadd.f32 0.5, %v4660_v34  ;;  %9181 = vtanh.f32 %v12499_v48 }
 0x575   :  { %v4441_v23 = vpop.f32.mrb[73].mxu1  ;;  %v9166_v58 = vpop.eup %9165  ;;  %v4580_v21 = vadd.f32 %v4516_v39, %v4439_v16  ;;  %v4579_v63 = vadd.f32 %v4515_v7, %v4328_v15  ;;  %v4740_v13 = vadd.f32 0.5, %v4724_v49 }
 0x576   :  { %v4330_v31 = vpop.f32.mrb[74].mxu0  ;;  %v4443_v35 = vpop.f32.mrb[74].mxu1  ;;  %v4661_v19 = vmul.f32 0.5, %v9166_v58  ;;  %v4630_v43 = vmul.f32 0.5, %v4578_v53  ;;  %v4836_v28 = vmul.f32 %v4676_v32, %v12255_v62  ;;  %v4581_v3 = vadd.f32 %v4517_v2, %v4441_v23 }
 0x577   :  { %v9168_v61 = vpop.eup %9167  ;;  %v4332_v11 = vpop.f32.mrb[75].mxu0  ;;  %v4694_v34 = vmul.f32 0.5, %v4579_v63  ;;  %v4582_v49 = vadd.f32 %v4518_v0, %v4330_v31  ;;  %v4802_v32 = vmul.f32 0.5, %v9164_v56  ;;  %v14381_v2 = vunpack.c.h.bf16 %v14364_v8  ;;  %v14382_v31 = vld [vmem:[#allocation71_spill] sm:$0xff]  ;;  %v14383_v56 = vld [vmem:[#allocation72_spill] sm:$0xff] }
 0x578   :  { %v4445_v55 = vpop.f32.mrb[75].mxu1  ;;  %v9170_v36 = vpop.eup %9169  ;;  %v4852_v7 = vmul.f32 %v9168_v61, %v4740_v13  ;;  %v4677_v15 = vadd.f32 0.5, %v4661_v19  ;;  %9183 = vtanh.f32 %v4630_v43  ;;  %v4583_v0 = vadd.f32 %v14380_v17, %v4332_v11 }
 0x579   :  { %v9172_v16 = vpop.eup %9171  ;;  %v4725_v9 = vmul.f32 0.5, %v9170_v36  ;;  %9185 = vtanh.f32 %v4694_v34  ;;  %v4631_v61 = vmul.f32 0.5, %v4582_v49  ;;  %v14379_v36 = vunpack.c.h.bf16 %v14362_v46 }
 0x57a   :  { %v12509_v62 = vadd.f32 %v4852_v7, %v4836_v28  ;;  %v4837_v51 = vmul.f32 %v4677_v15, %v12267_v20  ;;  %v9174_v58 = vpop.eup %9173  ;;  %v4803_v63 = vmul.f32 0.5, %v9172_v16  ;;  %9187 = vtanh.f32 %v4580_v21 }
 0x57b   :  { %v4741_v53 = vadd.f32 0.5, %v4725_v9  ;;  %v4584_v13 = vadd.f32 %v14379_v36, %v4443_v35  ;;  %v4585_v28 = vadd.f32 %v14381_v2, %v4445_v55  ;;  %v4547_v23 = vunpack.c.l.bf16 %v14382_v31  ;;  %v9176_v46 = vpop.eup %9175 }
 0x57c   :  { %9189 = vtanh.f32 %v12509_v62  ;;  %v4774_v21 = vmul.f32 0.5, %v4581_v3  ;;  %v4695_v30 = vmul.f32 0.5, %v4583_v0  ;;  %v9178_v8 = vpop.eup %9177  ;;  %v4818_v55 = vadd.f32 0.5, %v4802_v32 }
 0x57d   :  { %v4853_v19 = vmul.f32 %v9174_v58, %v4741_v53  ;;  %9191 = vtanh.f32 %v4631_v61  ;;  %v4819_v7 = vadd.f32 0.5, %v4803_v63  ;;  %v14384_v15 = vunpack.c.l.bf16 %v14365_v29  ;;  %v9180_v34 = vpop.eup %9179 }
 0x57e   :  { %v14385_v53 = vunpack.c.l.bf16 %v14366_v27  ;;  %v14387_v61 = vunpack.c.l.bf16 %v14368_v37  ;;  %v14388_v0 = vunpack.c.h.bf16 %v14365_v29  ;;  %v9182_v39 = vpop.eup %9181  ;;  %v4804_v43 = vmul.f32 0.5, %v9176_v46 }
 0x57f   :  { %v4336_v20 = vpop.f32.mrb[76].mxu0  ;;  %v4449_v9 = vpop.f32.mrb[76].mxu1  ;;  %v12522_v35 = vadd.f32 %v4853_v19, %v4837_v51  ;;  %v14386_v51 = vunpack.c.l.bf16 %v14367_v47  ;;  %v4899_v29 = vmul.f32 %v9182_v39, %v4819_v7  ;;  %v4553_v39 = vunpack.c.h.bf16 %v14383_v56 }
 0x580   :  { %v4338_v11 = vpop.f32.mrb[77].mxu0  ;;  %v4451_v16 = vpop.f32.mrb[77].mxu1  ;;  %v4586_v49 = vadd.f32 %v14384_v15, %v4336_v20  ;;  %v4588_v58 = vadd.f32 %v14385_v53, %v4449_v9  ;;  %v14389_v9 = vunpack.c.h.bf16 %v14366_v27  ;;  %v14390_v53 = vunpack.c.h.bf16 %v14367_v47 }
 0x581   :  { %v4340_v36 = vpop.f32.mrb[78].mxu0  ;;  %v4453_v17 = vpop.f32.mrb[78].mxu1  ;;  %9193 = vtanh.f32 %v12522_v35  ;;  %v4587_v3 = vadd.f32 %v14386_v51, %v4338_v11  ;;  %v4589_v19 = vadd.f32 %v14387_v61, %v4451_v16  ;;  %v4898_v11 = vmul.f32 %v9178_v8, %v4818_v55 }
 0x582   :  { %v4590_v32 = vadd.f32 %v14388_v0, %v4340_v36  ;;  %v4342_v63 = vpop.f32.mrb[79].mxu0  ;;  %v4455_v2 = vpop.f32.mrb[79].mxu1  ;;  %9195 = vtanh.f32 %v4695_v30  ;;  %v4632_v20 = vmul.f32 0.5, %v4586_v49  ;;  %v12537_v15 = vadd.f32 %v14389_v9, %v4453_v17 }
 0x583   :  { %v4591_v41 = vadd.f32 %v14390_v53, %v4342_v63  ;;  %9197 = vtanh.f32 %v4774_v21  ;;  %v4775_v51 = vmul.f32 0.5, %v4585_v28  ;;  %v4696_v16 = vmul.f32 0.5, %v4587_v3  ;;  %v9184_v61 = vpop.eup %9183 }
 0x584   :  { %9199 = vtanh.f32 %v4632_v20  ;;  %v4633_v36 = vmul.f32 0.5, %v4590_v32  ;;  %v14391_v0 = vunpack.c.h.bf16 %v14368_v37  ;;  %v9186_v49 = vpop.eup %9185  ;;  %v4805_v27 = vmul.f32 0.5, %v9180_v34  ;;  %v14392_v37 = vld [vmem:[#allocation73_spill] sm:$0xff]  ;;  %v14393_v34 = vld [vmem:[#allocation74_spill] sm:$0xff] }
 0x585   :  { %v4662_v17 = vmul.f32 0.5, %v9184_v61  ;;  %9201 = vtanh.f32 %v4584_v13  ;;  %v4949_v9 = vpack.c.bf16 %v4899_v29, %v4898_v11  ;;  %v4726_v47 = vmul.f32 0.5, %v9186_v49  ;;  %v9188_v8 = vpop.eup %9187  ;;  %v10238_v61 = vld [vmem:[#allocation9 + $0x8] ss:$16 sps:$4 sm:$0xff]  }
 0x586   :  { %v4593_v30 = vadd.f32 %v14391_v0, %v4455_v2  ;;  %9203 = vtanh.f32 %v4696_v16  ;;  %v4697_v63 = vmul.f32 0.5, %v4591_v41  ;;  %v4776_v28 = vmul.f32 0.5, %v4589_v19  ;;  %v9190_v55 = vpop.eup %9189  ;;  %v10237_v16 = vld [vmem:[#allocation9] ss:$16 sps:$4 sm:$0xff]  }
 0x587   :  { %v4678_v21 = vadd.f32 0.5, %v4662_v17  ;;  %9205 = vtanh.f32 %v4775_v51  ;;  %v4742_v7 = vadd.f32 0.5, %v4726_v47  ;;  %4990 = vmatmul.mubr.bf16.vlgmr.msra.gmra.mrb[96].mxu0 %v4949_v9  ;;  %5103 = vmatmul.mubr.bf16.vlgmr.msra.gmra.mrb[96].mxu1 %v4949_v9  ;;  %v4554_v46 = vunpack.c.l.bf16 %v14392_v37  ;;  %v9192_v13 = vpop.eup %9191  ;;  %v10239_v17 = vld [vmem:[#allocation9 + $0x24] ss:$16 sps:$4 sm:$0xff]  }
 0x588   :  { %9207 = vtanh.f32 %v4633_v36  ;;  %v4556_v3 = vunpack.c.l.bf16 %v14393_v34  ;;  %v4820_v32 = vadd.f32 0.5, %v4804_v43  ;;  %v4821_v2 = vadd.f32 0.5, %v4805_v27  ;;  %4999 = vmatprep.mubr.bf16.mxu0 %v14015_v44  ;;  %5112 = vmatprep.mubr.bf16.mxu1 %v14015_v44 }
 0x589   :  { %v4838_v41 = vmul.f32 %v4678_v21, %v12286_v33  ;;  %9209 = vtanh.f32 %v4588_v58  ;;  %v4854_v19 = vmul.f32 %v9188_v8, %v4742_v7  ;;  %v4663_v20 = vmul.f32 0.5, %v9192_v13  ;;  %5643 = vmatpush1.bf16.msra.mxu0 %v10237_v16  ;;  %5756 = vmatpush1.bf16.msra.mxu1 %v10238_v61 }
 0x58a   :  { %9211 = vtanh.f32 %v4697_v63  ;;  %v4777_v53 = vmul.f32 0.5, %v4593_v30  ;;  %v4900_v43 = vmul.f32 %v9190_v55, %v4820_v32  ;;  %v14394_v33 = vunpack.c.l.bf16 %v14369_v52  ;;  %5644 = vmatprep.subr.bf16.mxu0 %v10239_v17  ;;  %v10240_v30 = vld [vmem:[#allocation9 + $0x2c] ss:$16 sps:$4 sm:$0xff]  }
 0x58b   :  { %v9194_v29 = vpop.eup %9193  ;;  %9213 = vtanh.f32 %v4776_v28  ;;  %v14395_v36 = vunpack.c.l.bf16 %v14370_v26  ;;  %5757 = vmatprep.subr.bf16.mxu1 %v10240_v30  ;;  %v12553_v63 = vadd.f32 %v4854_v19, %v4838_v41  ;;  %v4679_v8 = vadd.f32 0.5, %v4663_v20  ;;  %v10244_v30 = vld [vmem:[#allocation9 + $0x4c] ss:$16 sps:$4 sm:$0xff]  }
 0x58c   :  { %v4346_v11 = vpop.f32.mrb[80].mxu0  ;;  %v4459_v51 = vpop.f32.mrb[80].mxu1  ;;  %v4901_v47 = vmul.f32 %v9194_v29, %v4821_v2  ;;  %v14396_v21 = vunpack.c.l.bf16 %v14371_v1  ;;  %9215 = vtanh.f32 %v12537_v15  ;;  %v10241_v29 = vld [vmem:[#allocation9 + $0x20] ss:$16 sps:$4 sm:$0xff]  }
 0x58d   :  { %v4594_v58 = vadd.f32 %v14394_v33, %v4346_v11  ;;  %v4596_v0 = vadd.f32 %v14395_v36, %v4459_v51  ;;  %v4348_v49 = vpop.f32.mrb[81].mxu0  ;;  %v4461_v27 = vpop.f32.mrb[81].mxu1  ;;  %v14397_v51 = vunpack.c.l.bf16 %v14372_v25  ;;  %v4839_v19 = vmul.f32 %v4679_v8, %v12310_v60  ;;  %5645 = vmatpush1.bf16.msra.mxu0 %v10241_v29  ;;  %v10242_v36 = vld [vmem:[#allocation9 + $0x28] ss:$16 sps:$4 sm:$0xff]  }
 0x58e   :  { %v9196_v9 = vpop.eup %9195  ;;  %v4595_v28 = vadd.f32 %v14396_v21, %v4348_v49  ;;  %v4350_v55 = vpop.f32.mrb[82].mxu0  ;;  %v4950_v41 = vpack.c.bf16 %v4901_v47, %v4900_v43  ;;  %9217 = vtanh.f32 %v4777_v53  ;;  %5758 = vmatpush1.bf16.msra.mxu1 %v10242_v36  ;;  %v14398_v60 = vunpack.c.h.bf16 %v14369_v52 }
 0x58f   :  { %v4463_v7 = vpop.f32.mrb[82].mxu1  ;;  %v9198_v13 = vpop.eup %9197  ;;  %v4727_v32 = vmul.f32 0.5, %v9196_v9  ;;  %v4634_v11 = vmul.f32 0.5, %v4594_v58  ;;  %v12560_v16 = vadd.f32 %v14397_v51, %v4461_v27  ;;  %v10243_v27 = vld [vmem:[#allocation9 + $0x44] ss:$16 sps:$4 sm:$0xff]   ;;  %5759 = vmatprep.subr.bf16.mxu1 %v10244_v30  ;;  %v14399_v43 = vunpack.c.h.bf16 %v14370_v26 }
 0x590   :  { %v4352_v61 = vpop.f32.mrb[83].mxu0  ;;  %v4465_v33 = vpop.f32.mrb[83].mxu1  ;;  %v4698_v17 = vmul.f32 0.5, %v4595_v28  ;;  %5646 = vmatprep.subr.bf16.mxu0 %v10243_v27  ;;  %v4598_v53 = vadd.f32 %v14398_v60, %v4350_v55  ;;  %5000 = vmatmul.mubr.bf16.gmra.mrb[100].mxu0 %v4950_v41  ;;  %v4806_v52 = vmul.f32 0.5, %v9198_v13  ;;  %v14400_v55 = vunpack.c.h.bf16 %v14371_v1  ;;  %v10245_v51 = vld [vmem:[#allocation9 + $0x40] ss:$16 sps:$4 sm:$0xff]  }
 0x591   :  { %v9200_v2 = vpop.eup %9199  ;;  %v4743_v15 = vadd.f32 0.5, %v4727_v32  ;;  %9219 = vtanh.f32 %v4634_v11  ;;  %v12568_v47 = vadd.f32 %v14399_v43, %v4463_v7  ;;  %5113 = vmatmul.mubr.bf16.gmra.mrb[100].mxu1 %v4950_v41  ;;  %5009 = vmatprep.mubr.bf16.mxu0 %v14015_v44 }
 0x592   :  { %v9202_v49 = vpop.eup %9201  ;;  %v4664_v58 = vmul.f32 0.5, %v9200_v2  ;;  %9221 = vtanh.f32 %v4596_v0  ;;  %5122 = vmatprep.mubr.bf16.mxu1 %v14015_v44  ;;  %v4635_v26 = vmul.f32 0.5, %v4598_v53  ;;  %v4599_v7 = vadd.f32 %v14400_v55, %v4352_v61  ;;  %5647 = vmatpush1.bf16.msra.mxu0 %v10245_v51  ;;  %v10246_v2 = vld [vmem:[#allocation9 + $0x48] ss:$16 sps:$4 sm:$0xff]  }
 0x593   :  { %v9204_v9 = vpop.eup %9203  ;;  %v4855_v32 = vmul.f32 %v9202_v49, %v4743_v15  ;;  %9223 = vtanh.f32 %v4698_v17  ;;  %5760 = vmatpush1.bf16.msra.mxu1 %v10246_v2  ;;  %v10248_v17 = vld [vmem:[#allocation9 + $0x6c] ss:$16 sps:$4 sm:$0xff]   ;;  %v14401_v61 = vunpack.c.h.bf16 %v14372_v25  ;;  %v10250_v51 = vld [vmem:[#allocation9 + $0x68] ss:$16 sps:$4 sm:$0xff]  }
 0x594   :  { %v9206_v21 = vpop.eup %9205  ;;  %v4680_v28 = vadd.f32 0.5, %v4664_v58  ;;  %v4728_v11 = vmul.f32 0.5, %v9204_v9  ;;  %9225 = vtanh.f32 %v12553_v63  ;;  %v10247_v58 = vld [vmem:[#allocation9 + $0x64] ss:$16 sps:$4 sm:$0xff]   ;;  %5761 = vmatprep.subr.bf16.mxu1 %v10248_v17  ;;  %v4699_v1 = vmul.f32 0.5, %v4599_v7 }
 0x595   :  { %v9208_v0 = vpop.eup %9207  ;;  %v12576_v29 = vadd.f32 %v4855_v32, %v4839_v19  ;;  %5648 = vmatprep.subr.bf16.mxu0 %v10247_v58  ;;  %v4807_v27 = vmul.f32 0.5, %v9206_v21  ;;  %9227 = vtanh.f32 %v4635_v26  ;;  %v4601_v30 = vadd.f32 %v14401_v61, %v4465_v33  ;;  %v14403_v26 = vld [vmem:[#allocation75_spill] sm:$0xff]  ;;  %v14404_v7 = vld [vmem:[#allocation76_spill] sm:$0xff] }
 0x596   :  { %v9210_v41 = vpop.eup %9209  ;;  %v4840_v36 = vmul.f32 %v4680_v28, %v12327_v59  ;;  %v4744_v49 = vadd.f32 0.5, %v4728_v11  ;;  %v4665_v15 = vmul.f32 0.5, %v9208_v0  ;;  %v12582_v32 = vadd.f32 0.5, %v4806_v52  ;;  %v10249_v33 = vld [vmem:[#allocation9 + $0x60] ss:$16 sps:$4 sm:$0xff]  }
 0x597   :  { %v9212_v13 = vpop.eup %9211  ;;  %9229 = vtanh.f32 %v12576_v29  ;;  %v14402_v28 = vunpack.c.l.bf16 %v14373_v14  ;;  %v4555_v55 = vunpack.c.l.bf16 %v14403_v26  ;;  %5649 = vmatpush1.bf16.msra.mxu0 %v10249_v33  ;;  %5762 = vmatpush1.bf16.msra.mxu1 %v10250_v51  ;;  %v10251_v17 = vld [vmem:[#allocation9 + $0x84] ss:$16 sps:$4 sm:$0xff]   ;;  %v14405_v33 = vunpack.c.l.bf16 %v14374_v10 }
 0x598   :  { %v9214_v9 = vpop.eup %9213  ;;  %v4856_v19 = vmul.f32 %v9210_v41, %v4744_v49  ;;  %v4681_v60 = vadd.f32 0.5, %v4665_v15  ;;  %v4729_v53 = vmul.f32 0.5, %v9212_v13  ;;  %v4356_v59 = vpop.f32.mrb[84].mxu0  ;;  %9231 = vtanh.f32 %v4699_v1  ;;  %5650 = vmatprep.subr.bf16.mxu0 %v10251_v17  ;;  %v10252_v13 = vld [vmem:[#allocation9 + $0x8c] ss:$16 sps:$4 sm:$0xff]  }
 0x599   :  { %v4469_v43 = vpop.f32.mrb[84].mxu1  ;;  %v4602_v11 = vadd.f32 %v14402_v28, %v4356_v59  ;;  %v4358_v0 = vpop.f32.mrb[85].mxu0  ;;  %5763 = vmatprep.subr.bf16.mxu1 %v10252_v13  ;;  %v4778_v59 = vmul.f32 0.5, %v12560_v16  ;;  %9233 = vtanh.f32 %v12568_v47  ;;  %v14407_v16 = vunpack.c.l.bf16 %v14376_v42 }
 0x59a   :  { %v4471_v21 = vpop.f32.mrb[85].mxu1  ;;  %v9216_v2 = vpop.eup %9215  ;;  %v12588_v41 = vadd.f32 %v4856_v19, %v4840_v36  ;;  %v4841_v49 = vmul.f32 %v4681_v60, %v12344_v12  ;;  %v4745_v52 = vadd.f32 0.5, %v4729_v53  ;;  %v4604_v36 = vadd.f32 %v14405_v33, %v4469_v43  ;;  %v10253_v43 = vld [vmem:[#allocation9 + $0x80] ss:$16 sps:$4 sm:$0xff]   ;;  %v10254_v33 = vld [vmem:[#allocation9 + $0x88] ss:$16 sps:$4 sm:$0xff]  }
 0x59b   :  { %v4360_v15 = vpop.f32.mrb[86].mxu0  ;;  %v4473_v58 = vpop.f32.mrb[86].mxu1  ;;  %v4636_v28 = vmul.f32 0.5, %v4602_v11  ;;  %v4823_v60 = vadd.f32 0.5, %v4807_v27  ;;  %v14406_v53 = vunpack.c.l.bf16 %v14375_v40  ;;  %v4605_v47 = vadd.f32 %v14407_v16, %v4471_v21  ;;  %5651 = vmatpush1.bf16.msra.mxu0 %v10253_v43  ;;  %5764 = vmatpush1.bf16.msra.mxu1 %v10254_v33 }
 0x59c   :  { %v9218_v61 = vpop.eup %9217  ;;  %v4362_v19 = vpop.f32.mrb[87].mxu0  ;;  %9235 = vtanh.f32 %v12588_v41  ;;  %v4857_v1 = vmul.f32 %v9216_v2, %v4745_v52  ;;  %v14408_v11 = vunpack.c.h.bf16 %v14373_v14  ;;  %v4779_v2 = vmul.f32 0.5, %v4601_v30 }
 0x59d   :  { %v4475_v51 = vpop.f32.mrb[87].mxu1  ;;  %v9220_v12 = vpop.eup %9219  ;;  %v4603_v17 = vadd.f32 %v14406_v53, %v4358_v0  ;;  %9237 = vtanh.f32 %v4636_v28  ;;  %v14409_v0 = vunpack.c.h.bf16 %v14374_v10  ;;  %v10255_v28 = vld [vmem:[#allocation9 + $0xa4] ss:$16 sps:$4 sm:$0xff]  }
 0x59e   :  { %v9222_v13 = vpop.eup %9221  ;;  %v4666_v8 = vmul.f32 0.5, %v9220_v12  ;;  %v4606_v20 = vadd.f32 %v14408_v11, %v4360_v15  ;;  %v12602_v25 = vadd.f32 %v4857_v1, %v4841_v49  ;;  %5652 = vmatprep.subr.bf16.mxu0 %v10255_v28  ;;  %v10256_v12 = vld [vmem:[#allocation9 + $0xac] ss:$16 sps:$4 sm:$0xff]   ;;  %9239 = vtanh.f32 %v4778_v59 }
 0x59f   :  { %v9224_v27 = vpop.eup %9223  ;;  %v4700_v52 = vmul.f32 0.5, %v4603_v17  ;;  %v12606_v53 = vadd.f32 %v14409_v0, %v4473_v58  ;;  %5765 = vmatprep.subr.bf16.mxu1 %v10256_v12  ;;  %v4808_v11 = vmul.f32 0.5, %v9214_v9  ;;  %v14410_v49 = vunpack.c.h.bf16 %v14375_v40  ;;  %v10257_v0 = vld [vmem:[#allocation9 + $0xa0] ss:$16 sps:$4 sm:$0xff]   ;;  %v10259_v40 = vld [vmem:[#allocation9 + $0xc4] ss:$16 sps:$4 sm:$0xff]  }
 0x5a0   :  { %v9226_v21 = vpop.eup %9225  ;;  %v4682_v14 = vadd.f32 0.5, %v4666_v8  ;;  %v4730_v15 = vmul.f32 0.5, %v9224_v27  ;;  %v4637_v16 = vmul.f32 0.5, %v4606_v20  ;;  %9241 = vtanh.f32 %v12602_v25  ;;  %5653 = vmatpush1.bf16.msra.mxu0 %v10257_v0  ;;  %v10258_v8 = vld [vmem:[#allocation9 + $0xa8] ss:$16 sps:$4 sm:$0xff]  }
 0x5a1   :  { %v4607_v30 = vadd.f32 %v14410_v49, %v4362_v19  ;;  %v14411_v1 = vunpack.c.h.bf16 %v14376_v42  ;;  %v9228_v58 = vpop.eup %9227  ;;  %v4809_v17 = vmul.f32 0.5, %v9218_v61  ;;  %9243 = vtanh.f32 %v4700_v52  ;;  %5766 = vmatpush1.bf16.msra.mxu1 %v10258_v8  ;;  %5654 = vmatprep.subr.bf16.mxu0 %v10259_v40  ;;  %v10260_v19 = vld [vmem:[#allocation9 + $0xcc] ss:$16 sps:$4 sm:$0xff]  }
 0x5a2   :  { %v4842_v43 = vmul.f32 %v4682_v14, %v12359_v50  ;;  %v4746_v33 = vadd.f32 0.5, %v4730_v15  ;;  %v9230_v20 = vpop.eup %9229  ;;  %v4667_v9 = vmul.f32 0.5, %v9228_v58  ;;  %9245 = vtanh.f32 %v4779_v2  ;;  %5767 = vmatprep.subr.bf16.mxu1 %v10260_v19  ;;  %v4366_v50 = vpop.f32.mrb[88].mxu0  ;;  %v10263_v19 = vld [vmem:[#allocation9 + $0xe4] ss:$16 sps:$4 sm:$0xff]  }
 0x5a3   :  { %v4609_v10 = vadd.f32 %v14411_v1, %v4475_v51  ;;  %v4780_v59 = vmul.f32 0.5, %v4605_v47  ;;  %v4701_v27 = vmul.f32 0.5, %v4607_v30  ;;  %v4902_v42 = vmul.f32 %v9226_v21, %v12582_v32  ;;  %v4479_v52 = vpop.f32.mrb[88].mxu1  ;;  %v9232_v28 = vpop.eup %9231 }
 0x5a4   :  { %v4903_v61 = vmul.f32 %v9230_v20, %v4823_v60  ;;  %v4858_v51 = vmul.f32 %v9222_v13, %v4746_v33  ;;  %9247 = vtanh.f32 %v4637_v16  ;;  %v4683_v12 = vadd.f32 0.5, %v4667_v9  ;;  %v4368_v49 = vpop.f32.mrb[89].mxu0  ;;  %v4481_v30 = vpop.f32.mrb[89].mxu1  ;;  %v10261_v16 = vld [vmem:[#allocation9 + $0xc0] ss:$16 sps:$4 sm:$0xff]  }
 0x5a5   :  { %9249 = vtanh.f32 %v4604_v36  ;;  %v14412_v14 = vunpack.c.l.bf16 %v14377_v5  ;;  %v14413_v47 = vunpack.c.l.bf16 %v14378_v18  ;;  %v9234_v1 = vpop.eup %9233  ;;  %v4731_v60 = vmul.f32 0.5, %v9232_v28  ;;  %v4370_v13 = vpop.f32.mrb[90].mxu0  ;;  %5655 = vmatpush1.bf16.msra.mxu0 %v10261_v16  ;;  %v10262_v36 = vld [vmem:[#allocation9 + $0xc8] ss:$16 sps:$4 sm:$0xff]   ;;  %v10268_v16 = vld [vmem:[#allocation9 + $0xc] ss:$16 sps:$4 sm:$0xff]  }
 0x5a6   :  { %v4951_v58 = vpack.c.bf16 %v4903_v61, %v4902_v42  ;;  %v12621_v32 = vadd.f32 %v4858_v51, %v4842_v43  ;;  %9251 = vtanh.f32 %v4701_v27  ;;  %v4483_v21 = vpop.f32.mrb[90].mxu1  ;;  %5768 = vmatpush1.bf16.msra.mxu1 %v10262_v36  ;;  %v9236_v33 = vpop.eup %9235  ;;  %v4824_v0 = vadd.f32 0.5, %v4808_v11  ;;  %5656 = vmatprep.subr.bf16.mxu0 %v10263_v19  ;;  %v10264_v42 = vld [vmem:[#allocation9 + $0xec] ss:$16 sps:$4 sm:$0xff]  }
 0x5a7   :  { %v4610_v15 = vadd.f32 %v14412_v14, %v4366_v50  ;;  %v12619_v2 = vadd.f32 %v14413_v47, %v4479_v52  ;;  %v4825_v8 = vadd.f32 0.5, %v4809_v17  ;;  %9253 = vtanh.f32 %v4780_v59  ;;  %v4372_v9 = vpop.f32.mrb[91].mxu0  ;;  %v4485_v40 = vpop.f32.mrb[91].mxu1  ;;  %5769 = vmatprep.subr.bf16.mxu1 %v10264_v42 }
 0x5a8   :  { %v9238_v43 = vpop.eup %9237  ;;  %v4843_v27 = vmul.f32 %v4683_v12, %v12381_v54  ;;  %v4747_v61 = vadd.f32 0.5, %v4731_v60  ;;  %9255 = vtanh.f32 %v12606_v53  ;;  %v4611_v51 = vadd.f32 %v4547_v23, %v4368_v49  ;;  %5010 = vmatmul.mubr.bf16.gmra.mrb[104].mxu0 %v4951_v58  ;;  %5123 = vmatmul.mubr.bf16.gmra.mrb[104].mxu1 %v4951_v58  ;;  %v10265_v23 = vld [vmem:[#allocation9 + $0xe0] ss:$16 sps:$4 sm:$0xff]  }
 0x5a9   :  { %v4638_v20 = vmul.f32 0.5, %v4610_v15  ;;  %v4668_v11 = vmul.f32 0.5, %v9238_v43  ;;  %v4781_v17 = vmul.f32 0.5, %v4609_v10  ;;  %v14414_v59 = vunpack.c.l.bf16 %v14383_v56  ;;  %5019 = vmatprep.mubr.bf16.mxu0 %v14015_v44  ;;  %5132 = vmatprep.mubr.bf16.mxu1 %v14015_v44  ;;  %v9240_v52 = vpop.eup %9239  ;;  %v10266_v15 = vld [vmem:[#allocation9 + $0xe8] ss:$16 sps:$4 sm:$0xff]  }
 0x5aa   :  { %v4904_v54 = vmul.f32 %v9236_v33, %v4824_v0  ;;  %v4859_v28 = vmul.f32 %v9234_v1, %v4747_v61  ;;  %v4702_v12 = vmul.f32 0.5, %v4611_v51  ;;  %v14415_v53 = vunpack.c.h.bf16 %v14377_v5  ;;  %5657 = vmatpush1.bf16.msra.mxu0 %v10265_v23  ;;  %5770 = vmatpush1.bf16.msra.mxu1 %v10266_v15  ;;  %v9242_v10 = vpop.eup %9241  ;;  %v10267_v1 = vld [vmem:[#allocation9 + $0x4] ss:$16 sps:$4 sm:$0xff]  }
 0x5ab   :  { %9257 = vtanh.f32 %v4638_v20  ;;  %v4613_v50 = vadd.f32 %v14414_v59, %v4481_v30  ;;  %v4684_v47 = vadd.f32 0.5, %v4668_v11  ;;  %v14416_v49 = vunpack.c.h.bf16 %v14378_v18  ;;  %6327 = vmatprep.subr.bf16.mxu0 %v10267_v1  ;;  %6440 = vmatprep.subr.bf16.mxu1 %v10268_v16  ;;  %v9244_v5 = vpop.eup %9243 }
 0x5ac   :  { %v4614_v14 = vadd.f32 %v14415_v53, %v4370_v13  ;;  %9259 = vtanh.f32 %v12621_v32  ;;  %v14417_v58 = vunpack.c.h.bf16 %v14382_v31  ;;  %v4905_v13 = vmul.f32 %v9242_v10, %v4825_v8  ;;  %v9246_v0 = vpop.eup %9245 }
 0x5ad   :  { %v12636_v30 = vadd.f32 %v14416_v49, %v4483_v21  ;;  %v12640_v36 = vadd.f32 %v4859_v28, %v4843_v27  ;;  %9261 = vtanh.f32 %v4702_v12  ;;  %v4810_v20 = vmul.f32 0.5, %v9240_v52 }
 0x5ae   :  { %v4615_v60 = vadd.f32 %v14417_v58, %v4372_v9  ;;  %v4639_v33 = vmul.f32 0.5, %v4614_v14  ;;  %v4732_v19 = vmul.f32 0.5, %v9244_v5  ;;  %9263 = vtanh.f32 %v4781_v17  ;;  %v9248_v21 = vpop.eup %9247  ;;  %v4376_v51 = vpop.f32.mrb[92].mxu0 }
 0x5af   :  { %v4952_v42 = vpack.c.bf16 %v4905_v13, %v4904_v54  ;;  %9265 = vtanh.f32 %v12640_v36  ;;  %v4782_v31 = vmul.f32 0.5, %v4613_v50  ;;  %v4617_v9 = vadd.f32 %v4553_v39, %v4485_v40  ;;  %v9250_v43 = vpop.eup %9249  ;;  %v4489_v11 = vpop.f32.mrb[92].mxu1 }
 0x5b0   :  { %v4703_v18 = vmul.f32 0.5, %v4615_v60  ;;  %v4844_v8 = vmul.f32 %v4684_v47, %v12391_v22  ;;  %v4748_v27 = vadd.f32 0.5, %v4732_v19  ;;  %v4669_v61 = vmul.f32 0.5, %v9248_v21  ;;  %v9252_v59 = vpop.eup %9251  ;;  %v4378_v54 = vpop.f32.mrb[93].mxu0 }
 0x5b1   :  { %9267 = vtanh.f32 %v4639_v33  ;;  %v4811_v52 = vmul.f32 0.5, %v9246_v0  ;;  %v4618_v17 = vadd.f32 %v4554_v46, %v4376_v51  ;;  %v4491_v50 = vpop.f32.mrb[93].mxu1  ;;  %v4559_v56 = vunpack.c.h.bf16 %v14403_v26  ;;  %5020 = vmatmul.mubr.bf16.gmra.mrb[108].mxu0 %v4952_v42  ;;  %5133 = vmatmul.mubr.bf16.gmra.mrb[108].mxu1 %v4952_v42  ;;  %v12650_v39 = vpop.eup %9253 }
 0x5b2   :  { %9269 = vtanh.f32 %v12619_v2  ;;  %v4860_v22 = vmul.f32 %v9250_v43, %v4748_v27  ;;  %v4685_v40 = vadd.f32 0.5, %v4669_v61  ;;  %v4733_v28 = vmul.f32 0.5, %v9252_v59  ;;  %v4380_v12 = vpop.f32.mrb[94].mxu0  ;;  %v4493_v53 = vpop.f32.mrb[94].mxu1  ;;  %5029 = vmatprep.mubr.bf16.mxu0 %v14015_v44  ;;  %5142 = vmatprep.mubr.bf16.mxu1 %v14015_v44 }
 0x5b3   :  { %9271 = vtanh.f32 %v4703_v18  ;;  %v9256_v2 = vpop.eup %9255  ;;  %v4826_v46 = vadd.f32 0.5, %v4810_v20  ;;  %v4640_v14 = vmul.f32 0.5, %v4618_v17  ;;  %v4620_v23 = vadd.f32 %v4556_v3, %v4489_v11  ;;  %v4382_v15 = vpop.f32.mrb[95].mxu0 }
 0x5b4   :  { %v4495_v10 = vpop.f32.mrb[95].mxu1  ;;  %v4561_v47 = vunpack.c.h.bf16 %v14404_v7  ;;  %v12657_v58 = vadd.f32 %v4860_v22, %v4844_v8  ;;  %v4845_v60 = vmul.f32 %v4685_v40, %v12408_v57  ;;  %v4749_v1 = vadd.f32 0.5, %v4733_v28 }
 0x5b5   :  { %v9258_v49 = vpop.eup %9257  ;;  %9273 = vtanh.f32 %v4782_v31  ;;  %v4827_v16 = vadd.f32 0.5, %v4811_v52  ;;  %v4619_v13 = vadd.f32 %v4555_v55, %v4378_v54  ;;  %v14418_v3 = vunpack.c.l.bf16 %v14404_v7 }
 0x5b6   :  { %v4670_v5 = vmul.f32 0.5, %v9258_v49  ;;  %9275 = vtanh.f32 %v4640_v14  ;;  %v9260_v33 = vpop.eup %9259  ;;  %v4861_v0 = vmul.f32 %v9256_v2, %v4749_v1  ;;  %v14419_v19 = vunpack.c.h.bf16 %v14392_v37 }
 0x5b7   :  { %9277 = vtanh.f32 %v12636_v30  ;;  %v4621_v20 = vadd.f32 %v14418_v3, %v4491_v50  ;;  %v9262_v21 = vpop.eup %9261  ;;  %v4783_v42 = vmul.f32 0.5, %v4617_v9  ;;  %v4704_v31 = vmul.f32 0.5, %v4619_v13 }
 0x5b8   :  { %v4622_v18 = vadd.f32 %v14419_v19, %v4380_v12  ;;  %v4686_v57 = vadd.f32 0.5, %v4670_v5  ;;  %v14420_v43 = vunpack.c.h.bf16 %v14393_v34  ;;  %v9264_v27 = vpop.eup %9263  ;;  %9279 = vtanh.f32 %v12657_v58 }
 0x5b9   :  { %v12670_v26 = vadd.f32 %v4861_v0, %v4845_v60  ;;  %v4734_v55 = vmul.f32 0.5, %v9262_v21  ;;  %v9266_v61 = vpop.eup %9265  ;;  %v4906_v7 = vmul.f32 %v9260_v33, %v4826_v46  ;;  %9281 = vtanh.f32 %v4704_v31 }
 0x5ba   :  { %v4624_v8 = vadd.f32 %v14420_v43, %v4493_v53  ;;  %v4641_v30 = vmul.f32 0.5, %v4622_v18  ;;  %v4846_v51 = vmul.f32 %v4686_v57, %v12415_v6  ;;  %v4623_v37 = vadd.f32 %v4559_v56, %v4382_v15 }
 0x5bb   :  { %v9268_v11 = vpop.eup %9267  ;;  %v4907_v59 = vmul.f32 %v9266_v61, %v4827_v16  ;;  %9283 = vtanh.f32 %v12670_v26  ;;  %v4750_v9 = vadd.f32 0.5, %v4734_v55  ;;  %v4625_v34 = vadd.f32 %v4561_v47, %v4495_v10 }
 0x5bc   :  { %v9270_v52 = vpop.eup %9269  ;;  %v4671_v17 = vmul.f32 0.5, %v9268_v11  ;;  %9285 = vtanh.f32 %v4783_v42  ;;  %v4705_v54 = vmul.f32 0.5, %v4623_v37  ;;  %v4812_v2 = vmul.f32 0.5, %v12650_v39 }
 0x5bd   :  { %v9272_v50 = vpop.eup %9271  ;;  %v4953_v22 = vpack.c.bf16 %v4907_v59, %v4906_v7  ;;  %v4862_v40 = vmul.f32 %v9270_v52, %v4750_v9  ;;  %9287 = vtanh.f32 %v4641_v30  ;;  %v4813_v46 = vmul.f32 0.5, %v9264_v27 }
 0x5be   :  { %v4687_v28 = vadd.f32 0.5, %v4671_v17  ;;  %v4735_v12 = vmul.f32 0.5, %v9272_v50  ;;  %9289 = vtanh.f32 %v4620_v23  ;;  %v4828_v16 = vadd.f32 0.5, %v4812_v2 }
 0x5bf   :  { %v9274_v6 = vpop.eup %9273  ;;  %v12674_v53 = vadd.f32 %v4862_v40, %v4846_v51  ;;  %9291 = vtanh.f32 %v4705_v54  ;;  %5030 = vmatmul.mubr.bf16.gmra.mrb[112].mxu0 %v4953_v22  ;;  %5143 = vmatmul.mubr.bf16.gmra.mrb[112].mxu1 %v4953_v22  ;;  %v4829_v5 = vadd.f32 0.5, %v4813_v46  ;;  %v4784_v33 = vmul.f32 0.5, %v4621_v20 }
 0x5c0   :  { %v9276_v56 = vpop.eup %9275  ;;  %v4847_v14 = vmul.f32 %v4687_v28, %v12421_v45  ;;  %v4751_v15 = vadd.f32 0.5, %v4735_v12  ;;  %5039 = vmatprep.mubr.bf16.mxu0 %v14015_v44  ;;  %5152 = vmatprep.mubr.bf16.mxu1 %v14015_v44  ;;  %9293 = vtanh.f32 %v4624_v8  ;;  %v4785_v18 = vmul.f32 0.5, %v4625_v34 }
 0x5c1   :  { %v9278_v10 = vpop.eup %9277  ;;  %v4672_v47 = vmul.f32 0.5, %v9276_v56  ;;  %9295 = vtanh.f32 %v12674_v53  ;;  %v4814_v20 = vmul.f32 0.5, %v9274_v6 }
 0x5c2   :  { %v4863_v23 = vmul.f32 %v9278_v10, %v4751_v15  ;;  %v9280_v49 = vpop.eup %9279 }
 0x5c3   :  { %v4688_v60 = vadd.f32 0.5, %v4672_v47  ;;  %v9282_v1 = vpop.eup %9281  ;;  %v4908_v3 = vmul.f32 %v9280_v49, %v4828_v16  ;;  %v4830_v34 = vadd.f32 0.5, %v4814_v20 }
 0x5c4   :  { %v12681_v39 = vadd.f32 %v4863_v23, %v4847_v14  ;;  %v4736_v45 = vmul.f32 0.5, %v9282_v1  ;;  %v14421_v23 = vld [vmem:[#allocation77_spill] sm:$0xff] }
 0x5c5   :  { %v9284_v13 = vpop.eup %9283  ;;  %v4848_v57 = vmul.f32 %v4688_v60, %v12425_v24  ;;  %v5183_v49 = vunpack.c.l.bf16 %v14421_v23  ;;  %v14422_v60 = vld [vmem:[#allocation78_spill] sm:$0xff] }
 0x5c6   :  { %v9286_v0 = vpop.eup %9285  ;;  %v4909_v19 = vmul.f32 %v9284_v13, %v4829_v5  ;;  %9297 = vtanh.f32 %v12681_v39  ;;  %v4752_v42 = vadd.f32 0.5, %v4736_v45  ;;  %v5185_v1 = vunpack.c.l.bf16 %v14422_v60  ;;  %v14423_v13 = vld [vmem:[#allocation79_spill] sm:$0xff] }
 0x5c7   :  { %v9288_v21 = vpop.eup %9287  ;;  %9299 = vtanh.f32 %v4784_v33  ;;  %v4815_v7 = vmul.f32 0.5, %v9286_v0  ;;  %v5184_v45 = vunpack.c.l.bf16 %v14423_v13  ;;  %v14424_v33 = vld [vmem:[#allocation80_spill] sm:$0xff] }
 0x5c8   :  { %v9290_v31 = vpop.eup %9289  ;;  %v4954_v43 = vpack.c.bf16 %v4909_v19, %v4908_v3  ;;  %v4673_v8 = vmul.f32 0.5, %v9288_v21  ;;  %9301 = vtanh.f32 %v4785_v18  ;;  %v5186_v0 = vunpack.c.l.bf16 %v14424_v33 }
 0x5c9   :  { %v9292_v27 = vpop.eup %9291  ;;  %v4864_v55 = vmul.f32 %v9290_v31, %v4752_v42  ;;  %v4831_v52 = vadd.f32 0.5, %v4815_v7  ;;  %v5189_v42 = vunpack.c.h.bf16 %v14422_v60 }
 0x5ca   :  { %v4689_v30 = vadd.f32 0.5, %v4673_v8  ;;  %v4737_v61 = vmul.f32 0.5, %v9292_v27  ;;  %5040 = vmatmul.mubr.bf16.gmra.mrb[116].mxu0 %v4954_v43  ;;  %5153 = vmatmul.mubr.bf16.gmra.mrb[116].mxu1 %v4954_v43  ;;  %v9294_v11 = vpop.eup %9293 }
 0x5cb   :  { %v12685_v51 = vadd.f32 %v4864_v55, %v4848_v57  ;;  %5049 = vmatprep.mubr.bf16.mxu0 %v14015_v44  ;;  %5162 = vmatprep.mubr.bf16.mxu1 %v14015_v44  ;;  %v9296_v59 = vpop.eup %9295  ;;  %v5187_v57 = vunpack.c.h.bf16 %v14421_v23  ;;  %v5188_v55 = vunpack.c.h.bf16 %v14423_v13 }
 0x5cc   :  { %v4849_v24 = vmul.f32 %v4689_v30, %v12431_v38  ;;  %v4753_v37 = vadd.f32 0.5, %v4737_v61  ;;  %v4910_v50 = vmul.f32 %v9296_v59, %v4830_v34  ;;  %v5190_v30 = vunpack.c.h.bf16 %v14424_v33 }
 0x5cd   :  { %9303 = vtanh.f32 %v12685_v51 }
 0x5ce   :  { %v4865_v9 = vmul.f32 %v9294_v11, %v4753_v37 }
 0x5d0   :  { %v9298_v17 = vpop.eup %9297  ;;  %v12691_v54 = vadd.f32 %v4865_v9, %v4849_v24 }
 0x5d1   :  { %v4911_v22 = vmul.f32 %v9298_v17, %v4831_v52  ;;  %v9300_v40 = vpop.eup %9299  ;;  %v14425_v17 = vld [vmem:[#allocation81_spill] sm:$0xff] }
 0x5d2   :  { %9305 = vtanh.f32 %v12691_v54  ;;  %v9302_v12 = vpop.eup %9301  ;;  %v4816_v38 = vmul.f32 0.5, %v9300_v40 }
 0x5d3   :  { %v4955_v28 = vpack.c.bf16 %v4911_v22, %v4910_v50  ;;  %v4817_v6 = vmul.f32 0.5, %v9302_v12  ;;  %v5191_v50 = vunpack.c.l.bf16 %v14425_v17  ;;  %v14426_v22 = vld [vmem:[#allocation82_spill] sm:$0xff] }
 0x5d4   :  { %v4832_v2 = vadd.f32 0.5, %v4816_v38  ;;  %v5193_v40 = vunpack.c.l.bf16 %v14426_v22 }
 0x5d5   :  { %5050 = vmatmul.mubr.bf16.gmra.mrb[120].mxu0 %v4955_v28  ;;  %5163 = vmatmul.mubr.bf16.gmra.mrb[120].mxu1 %v4955_v28  ;;  %v4833_v46 = vadd.f32 0.5, %v4817_v6  ;;  %v5195_v28 = vunpack.c.h.bf16 %v14425_v17  ;;  %v14427_v6 = vld [vmem:[#allocation83_spill] sm:$0xff] }
 0x5d6   :  { %5059 = vmatprep.mubr.bf16.mxu0 %v14015_v44  ;;  %5172 = vmatprep.mubr.bf16.mxu1 %v14015_v44 }
 0x5d7   :  { %v9304_v56 = vpop.eup %9303 }
 0x5d8   :  { %v4912_v15 = vmul.f32 %v9304_v56, %v4832_v2  ;;  %v5192_v56 = vunpack.c.l.bf16 %v14427_v6  ;;  %v14428_v2 = vld [vmem:[#allocation84_spill] sm:$0xff] }
 0x5d9   :  { %v5198_v13 = vunpack.c.h.bf16 %v14428_v2 }
 0x5dc   :  { %v9306_v14 = vpop.eup %9305 }
 0x5dd   :  { %v4913_v10 = vmul.f32 %v9306_v14, %v4833_v46  ;;  %v5194_v46 = vunpack.c.l.bf16 %v14428_v2  ;;  %v5197_v14 = vunpack.c.h.bf16 %v14426_v22 }
 0x5df   :  { %v4956_v47 = vpack.c.bf16 %v4913_v10, %v4912_v15 }
 0x5e1   :  { %5060 = vmatmul.mubr.bf16.gmra.mrb[124].mxu0 %v4956_v47  ;;  %5173 = vmatmul.mubr.bf16.gmra.mrb[124].mxu1 %v4956_v47 }
 0x5e2   :  { %5674 = vmatprep.mubr.bf16.mxu0 %v14015_v44  ;;  %5787 = vmatprep.mubr.bf16.mxu1 %v14015_v44 }
 0x65a   :  { %v4991_v16 = vpop.f32.mrb[96].mxu0  ;;  %v5104_v5 = vpop.f32.mrb[96].mxu1 }
 0x65b   :  { %v5247_v3 = vadd.f32 %v5183_v49, %v4991_v16  ;;  %v5249_v19 = vadd.f32 %v5185_v1, %v5104_v5  ;;  %v4993_v18 = vpop.f32.mrb[97].mxu0  ;;  %v5106_v21 = vpop.f32.mrb[97].mxu1  ;;  %v5196_v49 = vunpack.c.h.bf16 %v14427_v6 }
 0x65c   :  { %v5248_v31 = vadd.f32 %v5184_v45, %v4993_v18  ;;  %v5250_v43 = vadd.f32 %v5186_v0, %v5106_v21  ;;  %v4995_v8 = vpop.f32.mrb[98].mxu0  ;;  %v5108_v27 = vpop.f32.mrb[98].mxu1 }
 0x65d   :  { %v5311_v61 = vmul.f32 0.5, %v5247_v3  ;;  %v5251_v20 = vadd.f32 %v5187_v57, %v4995_v8  ;;  %v5253_v7 = vadd.f32 %v5189_v42, %v5108_v27  ;;  %v4997_v24 = vpop.f32.mrb[99].mxu0  ;;  %v5110_v37 = vpop.f32.mrb[99].mxu1  ;;  %v14429_v42 = vld [vmem:[#allocation85_spill] sm:$0xff] }
 0x65e   :  { %v5375_v11 = vmul.f32 0.5, %v5248_v31  ;;  %v5252_v59 = vadd.f32 %v5188_v55, %v4997_v24  ;;  %v5254_v9 = vadd.f32 %v5190_v30, %v5110_v37  ;;  %v5455_v45 = vmul.f32 0.5, %v5250_v43  ;;  %v14430_v55 = vld [vmem:[#allocation86_spill] sm:$0xff] }
 0x65f   :  { %9307 = vtanh.f32 %v5311_v61  ;;  %v5312_v34 = vmul.f32 0.5, %v5251_v20  ;;  %v5199_v31 = vunpack.c.l.bf16 %v14429_v42  ;;  %v5201_v30 = vunpack.c.l.bf16 %v14430_v55 }
 0x660   :  { %9309 = vtanh.f32 %v5375_v11  ;;  %v5376_v52 = vmul.f32 0.5, %v5252_v59  ;;  %v5203_v20 = vunpack.c.h.bf16 %v14429_v42  ;;  %v5205_v43 = vunpack.c.h.bf16 %v14430_v55  ;;  %v14431_v11 = vld [vmem:[#allocation87_spill] sm:$0xff]  ;;  %v14432_v59 = vld [vmem:[#allocation88_spill] sm:$0xff] }
 0x661   :  { %9311 = vtanh.f32 %v5312_v34  ;;  %v5456_v37 = vmul.f32 0.5, %v5254_v9  ;;  %v5202_v34 = vunpack.c.l.bf16 %v14432_v59  ;;  %v5206_v22 = vunpack.c.h.bf16 %v14432_v59 }
 0x662   :  { %9313 = vtanh.f32 %v5249_v19 }
 0x663   :  { %v5001_v12 = vpop.f32.mrb[100].mxu0  ;;  %9315 = vtanh.f32 %v5376_v52 }
 0x664   :  { %v5114_v38 = vpop.f32.mrb[100].mxu1  ;;  %v5255_v15 = vadd.f32 %v5191_v50, %v5001_v12  ;;  %v5003_v47 = vpop.f32.mrb[101].mxu0  ;;  %9317 = vtanh.f32 %v5253_v7  ;;  %v5200_v7 = vunpack.c.l.bf16 %v14431_v11  ;;  %v5204_v50 = vunpack.c.h.bf16 %v14431_v11 }
 0x665   :  { %v5257_v10 = vadd.f32 %v5193_v40, %v5114_v38  ;;  %v5116_v23 = vpop.f32.mrb[101].mxu1  ;;  %v5256_v60 = vadd.f32 %v5192_v56, %v5003_v47  ;;  %v5005_v16 = vpop.f32.mrb[102].mxu0  ;;  %v14434_v38 = vld [vmem:[#allocation90_spill] sm:$0xff] }
 0x666   :  { %v5258_v1 = vadd.f32 %v5194_v46, %v5116_v23  ;;  %v5118_v5 = vpop.f32.mrb[102].mxu1  ;;  %v5313_v33 = vmul.f32 0.5, %v5255_v15  ;;  %v5259_v0 = vadd.f32 %v5195_v28, %v5005_v16  ;;  %v5007_v18 = vpop.f32.mrb[103].mxu0  ;;  %v14433_v28 = vld [vmem:[#allocation89_spill] sm:$0xff]  ;;  %v5209_v6 = vunpack.c.l.bf16 %v14434_v38  ;;  %v14435_v23 = vld [vmem:[#allocation91_spill] sm:$0xff]  ;;  %v14436_v16 = vld [vmem:[#allocation92_spill] sm:$0xff] }
 0x667   :  { %v5261_v3 = vadd.f32 %v5197_v14, %v5118_v5  ;;  %v5120_v21 = vpop.f32.mrb[103].mxu1  ;;  %v5377_v19 = vmul.f32 0.5, %v5256_v60  ;;  %v5260_v57 = vadd.f32 %v5196_v49, %v5007_v18  ;;  %v5207_v12 = vunpack.c.l.bf16 %v14433_v28 }
 0x668   :  { %9319 = vtanh.f32 %v5313_v33  ;;  %v5314_v8 = vmul.f32 0.5, %v5259_v0  ;;  %v5262_v27 = vadd.f32 %v5198_v13, %v5120_v21  ;;  %v5208_v49 = vunpack.c.l.bf16 %v14435_v23  ;;  %v14437_v21 = vld [vmem:[#allocation93_spill] sm:$0xff] }
 0x669   :  { %9321 = vtanh.f32 %v5377_v19  ;;  %v5378_v61 = vmul.f32 0.5, %v5260_v57  ;;  %v9308_v24 = vpop.eup %9307  ;;  %v5210_v5 = vunpack.c.l.bf16 %v14436_v16  ;;  %v14440_v19 = vld [vmem:[#allocation96_spill] sm:$0xff] }
 0x66a   :  { %9323 = vtanh.f32 %v5455_v45  ;;  %v9310_v52 = vpop.eup %9309  ;;  %v5343_v17 = vmul.f32 0.5, %v9308_v24 }
 0x66b   :  { %9325 = vtanh.f32 %v5314_v8  ;;  %v5407_v40 = vmul.f32 0.5, %v9310_v52  ;;  %v9312_v56 = vpop.eup %9311  ;;  %v5457_v8 = vmul.f32 0.5, %v5258_v1 }
 0x66c   :  { %9327 = vtanh.f32 %v5257_v10  ;;  %v5359_v2 = vadd.f32 0.5, %v5343_v17  ;;  %v9314_v14 = vpop.eup %9313  ;;  %v5344_v47 = vmul.f32 0.5, %v9312_v56 }
 0x66d   :  { %9329 = vtanh.f32 %v5378_v61  ;;  %v5423_v15 = vadd.f32 0.5, %v5407_v40  ;;  %v9316_v60 = vpop.eup %9315  ;;  %v14438_v61 = vld [vmem:[#allocation94_spill] sm:$0xff] }
 0x66e   :  { %9331 = vtanh.f32 %v5456_v37  ;;  %v5519_v10 = vmul.f32 %v5359_v2, %v12486_v4  ;;  %v5360_v0 = vadd.f32 0.5, %v5344_v47  ;;  %v5408_v18 = vmul.f32 0.5, %v9316_v60  ;;  %v9318_v57 = vpop.eup %9317  ;;  %v14439_v47 = vld [vmem:[#allocation95_spill] sm:$0xff] }
 0x66f   :  { %v5535_v33 = vmul.f32 %v9314_v14, %v5423_v15  ;;  %9333 = vtanh.f32 %v5261_v3  ;;  %v5458_v15 = vmul.f32 0.5, %v5262_v27 }
 0x670   :  { %v5520_v17 = vmul.f32 %v5360_v0, %v12499_v48  ;;  %v5424_v40 = vadd.f32 0.5, %v5408_v18  ;;  %9335 = vtanh.f32 %v5457_v8  ;;  %v14441_v48 = vld [vmem:[#allocation97_spill] sm:$0xff]  ;;  %v14442_v18 = vld [vmem:[#allocation98_spill] sm:$0xff] }
 0x671   :  { %v12734_v4 = vadd.f32 %v5535_v33, %v5519_v10 }
 0x672   :  { %v9320_v52 = vpop.eup %9319  ;;  %v5536_v45 = vmul.f32 %v9318_v57, %v5424_v40 }
 0x673   :  { %v9322_v2 = vpop.eup %9321  ;;  %v5345_v14 = vmul.f32 0.5, %v9320_v52  ;;  %9337 = vtanh.f32 %v12734_v4 }
 0x674   :  { %v9324_v3 = vpop.eup %9323  ;;  %v5409_v24 = vmul.f32 0.5, %v9322_v2  ;;  %v12745_v27 = vadd.f32 %v5536_v45, %v5520_v17  ;;  %9339 = vtanh.f32 %v5458_v15 }
 0x675   :  { %v9326_v33 = vpop.eup %9325  ;;  %v5361_v13 = vadd.f32 0.5, %v5345_v14 }
 0x676   :  { %v9328_v52 = vpop.eup %9327  ;;  %v5425_v1 = vadd.f32 0.5, %v5409_v24  ;;  %v5346_v60 = vmul.f32 0.5, %v9326_v33  ;;  %9341 = vtanh.f32 %v12745_v27  ;;  %v5487_v24 = vmul.f32 0.5, %v9324_v3 }
 0x677   :  { %v9330_v57 = vpop.eup %9329  ;;  %v5521_v40 = vmul.f32 %v5361_v13, %v12509_v62 }
 0x678   :  { %v9332_v0 = vpop.eup %9331  ;;  %v5537_v56 = vmul.f32 %v9328_v52, %v5425_v1  ;;  %v5362_v37 = vadd.f32 0.5, %v5346_v60  ;;  %v5410_v46 = vmul.f32 0.5, %v9330_v57 }
 0x679   :  { %v9334_v9 = vpop.eup %9333 }
 0x67a   :  { %v12757_v14 = vadd.f32 %v5537_v56, %v5521_v40  ;;  %v5522_v1 = vmul.f32 %v5362_v37, %v12522_v35  ;;  %v5426_v60 = vadd.f32 0.5, %v5410_v46  ;;  %v14443_v40 = vld [vmem:[#allocation99_spill] sm:$0xff] }
 0x67b   :  { %v5011_v2 = vpop.f32.mrb[104].mxu0  ;;  %v5124_v10 = vpop.f32.mrb[104].mxu1 }
 0x67c   :  { %v5013_v45 = vpop.f32.mrb[105].mxu0  ;;  %v5126_v17 = vpop.f32.mrb[105].mxu1  ;;  %v5263_v33 = vadd.f32 %v5199_v31, %v5011_v2  ;;  %v5265_v62 = vadd.f32 %v5201_v30, %v5124_v10  ;;  %v5488_v31 = vmul.f32 0.5, %v9332_v0 }
 0x67d   :  { %v5264_v13 = vadd.f32 %v5200_v7, %v5013_v45  ;;  %v5015_v15 = vpop.f32.mrb[106].mxu0  ;;  %v5128_v8 = vpop.f32.mrb[106].mxu1  ;;  %v5266_v52 = vadd.f32 %v5202_v34, %v5126_v17  ;;  %v5538_v7 = vmul.f32 %v9334_v9, %v5426_v60  ;;  %v5224_v9 = vunpack.c.l.bf16 %v14443_v40 }
 0x67e   :  { %v5017_v3 = vpop.f32.mrb[107].mxu0  ;;  %v5130_v57 = vpop.f32.mrb[107].mxu1  ;;  %v5315_v2 = vmul.f32 0.5, %v5263_v33  ;;  %9343 = vtanh.f32 %v5265_v62  ;;  %v5267_v56 = vadd.f32 %v5203_v20, %v5015_v15  ;;  %v5269_v35 = vadd.f32 %v5205_v43, %v5128_v8  ;;  %v14444_v33 = vld [vmem:[#allocation100_spill] sm:$0xff] }
 0x67f   :  { %v5379_v30 = vmul.f32 0.5, %v5264_v13  ;;  %9345 = vtanh.f32 %v12757_v14  ;;  %v5459_v10 = vmul.f32 0.5, %v5266_v52  ;;  %v5268_v34 = vadd.f32 %v5204_v50, %v5017_v3  ;;  %v9336_v45 = vpop.eup %9335 }
 0x680   :  { %9347 = vtanh.f32 %v5315_v2  ;;  %v5270_v46 = vadd.f32 %v5206_v22, %v5130_v57  ;;  %v12771_v37 = vadd.f32 %v5538_v7, %v5522_v1  ;;  %v5316_v0 = vmul.f32 0.5, %v5267_v56  ;;  %v9338_v11 = vpop.eup %9337 }
 0x681   :  { %9349 = vtanh.f32 %v5379_v30  ;;  %v5380_v42 = vmul.f32 0.5, %v5268_v34  ;;  %v5226_v55 = vunpack.c.l.bf16 %v14444_v33  ;;  %v5228_v43 = vunpack.c.h.bf16 %v14443_v40  ;;  %v9340_v13 = vpop.eup %9339 }
 0x682   :  { %9351 = vtanh.f32 %v5459_v10  ;;  %v5503_v50 = vadd.f32 0.5, %v5487_v24  ;;  %v5504_v15 = vadd.f32 0.5, %v5488_v31  ;;  %v9342_v3 = vpop.eup %9341  ;;  %v5460_v57 = vmul.f32 0.5, %v5270_v46 }
 0x683   :  { %9353 = vtanh.f32 %v12771_v37  ;;  %v14448_v46 = vunpack.c.h.bf16 %v14436_v16 }
 0x684   :  { %v5021_v20 = vpop.f32.mrb[108].mxu0  ;;  %v5134_v17 = vpop.f32.mrb[108].mxu1  ;;  %9355 = vtanh.f32 %v5316_v0  ;;  %v5583_v56 = vmul.f32 %v9338_v11, %v5503_v50  ;;  %v5584_v34 = vmul.f32 %v9342_v3, %v5504_v15  ;;  %v5489_v0 = vmul.f32 0.5, %v9336_v45  ;;  %v10278_v15 = vld [vmem:[#allocation9 + $0x64] ss:$16 sps:$4 sm:$0xff]  }
 0x685   :  { %v5271_v59 = vadd.f32 %v5207_v12, %v5021_v20  ;;  %v5273_v22 = vadd.f32 %v5209_v6, %v5134_v17  ;;  %v5023_v8 = vpop.f32.mrb[109].mxu0  ;;  %v5136_v62 = vpop.f32.mrb[109].mxu1  ;;  %v14445_v12 = vunpack.c.h.bf16 %v14433_v28  ;;  %v14446_v6 = vunpack.c.h.bf16 %v14434_v38 }
 0x686   :  { %v5272_v1 = vadd.f32 %v5208_v49, %v5023_v8  ;;  %v5274_v60 = vadd.f32 %v5210_v5, %v5136_v62  ;;  %v5025_v24 = vpop.f32.mrb[110].mxu0  ;;  %v5138_v52 = vpop.f32.mrb[110].mxu1  ;;  %9357 = vtanh.f32 %v5380_v42  ;;  %v14447_v5 = vunpack.c.h.bf16 %v14435_v23  ;;  %v14449_v42 = vld [vmem:[#allocation101_spill] sm:$0xff]  ;;  %v14450_v23 = vld [vmem:[#allocation102_spill] sm:$0xff] }
 0x687   :  { %v5317_v2 = vmul.f32 0.5, %v5271_v59  ;;  %v5275_v30 = vadd.f32 %v14445_v12, %v5025_v24  ;;  %v5277_v7 = vadd.f32 %v14446_v6, %v5138_v52  ;;  %v5027_v10 = vpop.f32.mrb[111].mxu0  ;;  %v5140_v31 = vpop.f32.mrb[111].mxu1  ;;  %9359 = vtanh.f32 %v5269_v35  ;;  %v14451_v52 = vld [vmem:[#allocation103_spill] sm:$0xff] }
 0x688   :  { %v5381_v49 = vmul.f32 0.5, %v5272_v1  ;;  %v5276_v20 = vadd.f32 %v14447_v5, %v5027_v10  ;;  %v5278_v17 = vadd.f32 %v14448_v46, %v5140_v31  ;;  %v9344_v59 = vpop.eup %9343  ;;  %v5634_v28 = vpack.c.bf16 %v5584_v34, %v5583_v56  ;;  %v10269_v6 = vld [vmem:[#allocation9] ss:$16 sps:$4 sm:$0xff]   ;;  %v10270_v10 = vld [vmem:[#allocation9 + $0x8] ss:$16 sps:$4 sm:$0xff]  }
 0x689   :  { %v5490_v8 = vmul.f32 0.5, %v9340_v13  ;;  %9361 = vtanh.f32 %v5317_v2  ;;  %v5318_v38 = vmul.f32 0.5, %v5275_v30  ;;  %v9346_v62 = vpop.eup %9345  ;;  %v5461_v24 = vmul.f32 0.5, %v5274_v60  ;;  %v14452_v34 = vld [vmem:[#allocation104_spill] sm:$0xff] }
 0x68a   :  { %9363 = vtanh.f32 %v5460_v57  ;;  %v5230_v11 = vunpack.c.h.bf16 %v14444_v33  ;;  %v5231_v50 = vunpack.c.l.bf16 %v14449_v42  ;;  %v9348_v45 = vpop.eup %9347  ;;  %v5382_v35 = vmul.f32 0.5, %v5276_v20  ;;  %5675 = vmatmul.mubr.bf16.vlgmr.msra.gmra.mrb[128].mxu0 %v5634_v28  ;;  %5788 = vmatmul.mubr.bf16.vlgmr.msra.gmra.mrb[128].mxu1 %v5634_v28  ;;  %v10271_v5 = vld [vmem:[#allocation9 + $0x24] ss:$16 sps:$4 sm:$0xff]   ;;  %v10272_v20 = vld [vmem:[#allocation9 + $0x2c] ss:$16 sps:$4 sm:$0xff]  }
 0x68b   :  { %9365 = vtanh.f32 %v5381_v49  ;;  %v5233_v16 = vunpack.c.l.bf16 %v14450_v23  ;;  %v9350_v1 = vpop.eup %9349  ;;  %v5347_v13 = vmul.f32 0.5, %v9348_v45  ;;  %5684 = vmatprep.mubr.bf16.mxu0 %v14015_v44  ;;  %5797 = vmatprep.mubr.bf16.mxu1 %v14015_v44  ;;  %v5505_v2 = vadd.f32 0.5, %v5489_v0  ;;  %v10279_v49 = vld [vmem:[#allocation9 + $0x48] ss:$16 sps:$4 sm:$0xff]  }
 0x68c   :  { %9367 = vtanh.f32 %v5273_v22  ;;  %v12801_v57 = vpop.eup %9351  ;;  %v5506_v12 = vadd.f32 0.5, %v5490_v8  ;;  %v5411_v30 = vmul.f32 0.5, %v9350_v1  ;;  %6328 = vmatpush1.bf16.msra.mxu0 %v10269_v6  ;;  %6441 = vmatpush1.bf16.msra.mxu1 %v10270_v10  ;;  %v5462_v56 = vmul.f32 0.5, %v5278_v17 }
 0x68d   :  { %9369 = vtanh.f32 %v5318_v38  ;;  %v9354_v31 = vpop.eup %9353  ;;  %v5363_v22 = vadd.f32 0.5, %v5347_v13  ;;  %6329 = vmatprep.subr.bf16.mxu0 %v10271_v5  ;;  %6442 = vmatprep.subr.bf16.mxu1 %v10272_v20  ;;  %v5585_v28 = vmul.f32 %v9346_v62, %v5505_v2  ;;  %v14453_v5 = vunpack.c.l.bf16 %v14437_v21 }
 0x68e   :  { %9371 = vtanh.f32 %v5461_v24  ;;  %v9356_v46 = vpop.eup %9355  ;;  %v5586_v0 = vmul.f32 %v9354_v31, %v5506_v12  ;;  %v5427_v8 = vadd.f32 0.5, %v5411_v30  ;;  %v14454_v20 = vunpack.c.l.bf16 %v14438_v61  ;;  %v10276_v24 = vld [vmem:[#allocation9 + $0x40] ss:$16 sps:$4 sm:$0xff]  }
 0x68f   :  { %9373 = vtanh.f32 %v5382_v35  ;;  %v5523_v38 = vmul.f32 %v5363_v22, %v12553_v63  ;;  %v5348_v45 = vmul.f32 0.5, %v9356_v46  ;;  %v10273_v35 = vld [vmem:[#allocation9 + $0x20] ss:$16 sps:$4 sm:$0xff]   ;;  %v14455_v31 = vunpack.c.l.bf16 %v14439_v47 }
 0x690   :  { %9375 = vtanh.f32 %v5277_v7  ;;  %v9358_v17 = vpop.eup %9357  ;;  %v5635_v13 = vpack.c.bf16 %v5586_v0, %v5585_v28  ;;  %v5539_v10 = vmul.f32 %v9344_v59, %v5427_v8  ;;  %6330 = vmatpush1.bf16.msra.mxu0 %v10273_v35  ;;  %v14456_v46 = vunpack.c.l.bf16 %v14440_v19  ;;  %v10274_v8 = vld [vmem:[#allocation9 + $0x44] ss:$16 sps:$4 sm:$0xff]  }
 0x691   :  { %v9360_v63 = vpop.eup %9359  ;;  %v5364_v30 = vadd.f32 0.5, %v5348_v45  ;;  %v5412_v7 = vmul.f32 0.5, %v9358_v17  ;;  %6331 = vmatprep.subr.bf16.mxu0 %v10274_v8  ;;  %9377 = vtanh.f32 %v5462_v56 }
 0x692   :  { %v5031_v1 = vpop.f32.mrb[112].mxu0  ;;  %v5144_v6 = vpop.f32.mrb[112].mxu1  ;;  %5685 = vmatmul.mubr.bf16.gmra.mrb[132].mxu0 %v5635_v13  ;;  %5798 = vmatmul.mubr.bf16.gmra.mrb[132].mxu1 %v5635_v13  ;;  %v14458_v13 = vld [vmem:[#allocation105_spill] sm:$0xff] }
 0x693   :  { %v5279_v60 = vadd.f32 %v14453_v5, %v5031_v1  ;;  %v5281_v62 = vadd.f32 %v14454_v20, %v5144_v6  ;;  %v5033_v2 = vpop.f32.mrb[113].mxu0  ;;  %v5146_v12 = vpop.f32.mrb[113].mxu1  ;;  %v10275_v1 = vld [vmem:[#allocation9 + $0x28] ss:$16 sps:$4 sm:$0xff]   ;;  %v12814_v5 = vadd.f32 %v5539_v10, %v5523_v38  ;;  %5694 = vmatprep.mubr.bf16.mxu0 %v14015_v44  ;;  %5807 = vmatprep.mubr.bf16.mxu1 %v14015_v44  ;;  %v5239_v10 = vunpack.c.l.bf16 %v14458_v13 }
 0x694   :  { %v5280_v22 = vadd.f32 %v14455_v31, %v5033_v2  ;;  %v5282_v28 = vadd.f32 %v14456_v46, %v5146_v12  ;;  %v5035_v59 = vpop.f32.mrb[114].mxu0  ;;  %v5148_v0 = vpop.f32.mrb[114].mxu1  ;;  %6443 = vmatpush1.bf16.msra.mxu1 %v10275_v1  ;;  %v5524_v12 = vmul.f32 %v5364_v30, %v12576_v29  ;;  %v5428_v31 = vadd.f32 0.5, %v5412_v7  ;;  %v14459_v1 = vld [vmem:[#allocation106_spill] sm:$0xff]  ;;  %6332 = vmatpush1.bf16.msra.mxu0 %v10276_v24 }
 0x695   :  { %v9362_v6 = vpop.eup %9361  ;;  %v5319_v20 = vmul.f32 0.5, %v5279_v60  ;;  %v5037_v35 = vpop.f32.mrb[115].mxu0  ;;  %9379 = vtanh.f32 %v12814_v5  ;;  %v14457_v60 = vunpack.c.h.bf16 %v14437_v21  ;;  %v10277_v29 = vld [vmem:[#allocation9 + $0x4c] ss:$16 sps:$4 sm:$0xff]   ;;  %6333 = vmatprep.subr.bf16.mxu0 %v10278_v15  ;;  %v5243_v17 = vunpack.c.h.bf16 %v14458_v13 }
 0x696   :  { %v5150_v45 = vpop.f32.mrb[115].mxu1  ;;  %v12817_v2 = vpop.eup %9363  ;;  %v5349_v46 = vmul.f32 0.5, %v9362_v6  ;;  %v5383_v8 = vmul.f32 0.5, %v5280_v22  ;;  %6444 = vmatprep.subr.bf16.mxu1 %v10277_v29  ;;  %v5540_v7 = vmul.f32 %v9360_v63, %v5428_v31  ;;  %v10280_v24 = vld [vmem:[#allocation9 + $0x6c] ss:$16 sps:$4 sm:$0xff]  }
 0x697   :  { %v9366_v38 = vpop.eup %9365  ;;  %v5283_v56 = vadd.f32 %v14457_v60, %v5035_v59  ;;  %9381 = vtanh.f32 %v5319_v20  ;;  %v14460_v59 = vunpack.c.h.bf16 %v14438_v61  ;;  %v14462_v61 = vunpack.c.h.bf16 %v14440_v19 }
 0x698   :  { %v9368_v30 = vpop.eup %9367  ;;  %v5365_v22 = vadd.f32 0.5, %v5349_v46  ;;  %v5413_v6 = vmul.f32 0.5, %v9366_v38  ;;  %6445 = vmatpush1.bf16.msra.mxu1 %v10279_v49  ;;  %9383 = vtanh.f32 %v5383_v8  ;;  %v12832_v63 = vadd.f32 %v5540_v7, %v5524_v12 }
 0x699   :  { %v9370_v3 = vpop.eup %9369  ;;  %v5320_v21 = vmul.f32 0.5, %v5283_v56  ;;  %v5285_v60 = vadd.f32 %v14460_v59, %v5148_v0  ;;  %6446 = vmatprep.subr.bf16.mxu1 %v10280_v24  ;;  %9385 = vtanh.f32 %v5281_v62  ;;  %v5463_v49 = vmul.f32 0.5, %v5282_v28  ;;  %v10281_v56 = vld [vmem:[#allocation9 + $0x60] ss:$16 sps:$4 sm:$0xff]  }
 0x69a   :  { %v12830_v29 = vpop.eup %9371  ;;  %v5525_v20 = vmul.f32 %v5365_v22, %v12588_v41  ;;  %v5429_v31 = vadd.f32 0.5, %v5413_v6  ;;  %v5350_v15 = vmul.f32 0.5, %v9370_v3  ;;  %v14461_v8 = vunpack.c.h.bf16 %v14439_v47  ;;  %6334 = vmatpush1.bf16.msra.mxu0 %v10281_v56  ;;  %v10282_v22 = vld [vmem:[#allocation9 + $0x84] ss:$16 sps:$4 sm:$0xff]   ;;  %v10283_v3 = vld [vmem:[#allocation9 + $0x68] ss:$16 sps:$4 sm:$0xff]  }
 0x69b   :  { %v9374_v46 = vpop.eup %9373  ;;  %v12839_v0 = vadd.f32 %v14462_v61, %v5150_v45  ;;  %9387 = vtanh.f32 %v12832_v63  ;;  %6335 = vmatprep.subr.bf16.mxu0 %v10282_v22  ;;  %v5245_v45 = vunpack.c.h.bf16 %v14459_v1  ;;  %v10284_v6 = vld [vmem:[#allocation9 + $0x8c] ss:$16 sps:$4 sm:$0xff]   ;;  %v5491_v24 = vmul.f32 0.5, %v12801_v57 }
 0x69c   :  { %v5284_v38 = vadd.f32 %v14461_v8, %v5037_v35  ;;  %v9376_v59 = vpop.eup %9375  ;;  %v5541_v12 = vmul.f32 %v9368_v30, %v5429_v31  ;;  %v5366_v7 = vadd.f32 0.5, %v5350_v15  ;;  %v5414_v41 = vmul.f32 0.5, %v9374_v46  ;;  %6447 = vmatpush1.bf16.msra.mxu1 %v10283_v3  ;;  %v14463_v35 = vld [vmem:[#allocation107_spill] sm:$0xff] }
 0x69d   :  { %9389 = vtanh.f32 %v5320_v21  ;;  %v5041_v47 = vpop.f32.mrb[116].mxu0  ;;  %v5154_v28 = vpop.f32.mrb[116].mxu1  ;;  %v5240_v19 = vunpack.c.l.bf16 %v14463_v35  ;;  %6448 = vmatprep.subr.bf16.mxu1 %v10284_v6  ;;  %v5492_v21 = vmul.f32 0.5, %v12817_v2  ;;  %v14465_v22 = vunpack.c.l.bf16 %v14442_v18  ;;  %v10286_v6 = vld [vmem:[#allocation9 + $0xa4] ss:$16 sps:$4 sm:$0xff]  }
 0x69e   :  { %v5384_v62 = vmul.f32 0.5, %v5284_v38  ;;  %v12845_v8 = vadd.f32 %v5541_v12, %v5525_v20  ;;  %v5526_v30 = vmul.f32 %v5366_v7, %v12602_v25  ;;  %v5430_v31 = vadd.f32 0.5, %v5414_v41  ;;  %v5043_v15 = vpop.f32.mrb[117].mxu0  ;;  %v5156_v46 = vpop.f32.mrb[117].mxu1  ;;  %v10285_v12 = vld [vmem:[#allocation9 + $0x80] ss:$16 sps:$4 sm:$0xff]  }
 0x69f   :  { %v12848_v61 = vpop.eup %9377  ;;  %v14464_v38 = vunpack.c.l.bf16 %v14441_v48  ;;  %v12855_v3 = vadd.f32 %v14465_v22, %v5154_v28  ;;  %v5045_v57 = vpop.f32.mrb[118].mxu0  ;;  %6336 = vmatpush1.bf16.msra.mxu0 %v10285_v12  ;;  %v5288_v7 = vadd.f32 %v5224_v9, %v5043_v15  ;;  %v5290_v2 = vadd.f32 %v5226_v55, %v5156_v46  ;;  %v10288_v9 = vld [vmem:[#allocation9 + $0xac] ss:$16 sps:$4 sm:$0xff]  }
 0x6a0   :  { %9391 = vtanh.f32 %v5384_v62  ;;  %v5158_v20 = vpop.f32.mrb[118].mxu1  ;;  %v5542_v25 = vmul.f32 %v9376_v59, %v5430_v31  ;;  %v5047_v41 = vpop.f32.mrb[119].mxu0  ;;  %6337 = vmatprep.subr.bf16.mxu0 %v10286_v6  ;;  %v14466_v22 = vunpack.c.h.bf16 %v14441_v48  ;;  %v14468_v46 = vld [vmem:[#allocation108_spill] sm:$0xff] }
 0x6a1   :  { %v5287_v56 = vadd.f32 %v14464_v38, %v5041_v47  ;;  %9393 = vtanh.f32 %v5463_v49  ;;  %v5160_v62 = vpop.f32.mrb[119].mxu1  ;;  %v10287_v47 = vld [vmem:[#allocation9 + $0x88] ss:$16 sps:$4 sm:$0xff]   ;;  %v9380_v28 = vpop.eup %9379  ;;  %v14467_v49 = vunpack.c.h.bf16 %v14442_v18  ;;  %v5385_v15 = vmul.f32 0.5, %v5288_v7 }
 0x6a2   :  { %6449 = vmatpush1.bf16.msra.mxu1 %v10287_v47  ;;  %9395 = vtanh.f32 %v5285_v60  ;;  %v5291_v12 = vadd.f32 %v14466_v22, %v5045_v57  ;;  %v9382_v31 = vpop.eup %9381  ;;  %v12868_v55 = vadd.f32 %v5542_v25, %v5526_v30  ;;  %v5242_v6 = vunpack.c.l.bf16 %v14468_v46  ;;  %v10289_v57 = vld [vmem:[#allocation9 + $0xa0] ss:$16 sps:$4 sm:$0xff]   ;;  %v10290_v25 = vld [vmem:[#allocation9 + $0xc4] ss:$16 sps:$4 sm:$0xff]   ;;  %v10291_v7 = vld [vmem:[#allocation9 + $0xa8] ss:$16 sps:$4 sm:$0xff]  }
 0x6a3   :  { %v5321_v38 = vmul.f32 0.5, %v5287_v56  ;;  %v12865_v59 = vadd.f32 %v14467_v49, %v5158_v20  ;;  %6450 = vmatprep.subr.bf16.mxu1 %v10288_v9  ;;  %9397 = vtanh.f32 %v12845_v8  ;;  %v9384_v47 = vpop.eup %9383  ;;  %v5507_v60 = vadd.f32 0.5, %v5491_v24  ;;  %6338 = vmatpush1.bf16.msra.mxu0 %v10289_v57  ;;  %v10292_v49 = vld [vmem:[#allocation9 + $0xcc] ss:$16 sps:$4 sm:$0xff]   ;;  %v10293_v57 = vld [vmem:[#allocation9 + $0xc0] ss:$16 sps:$4 sm:$0xff]  }
 0x6a4   :  { %v5351_v56 = vmul.f32 0.5, %v9382_v31  ;;  %v5322_v48 = vmul.f32 0.5, %v5291_v12  ;;  %v5415_v18 = vmul.f32 0.5, %v9384_v47  ;;  %v5292_v20 = vadd.f32 %v5228_v43, %v5047_v41  ;;  %6339 = vmatprep.subr.bf16.mxu0 %v10290_v25  ;;  %v9386_v24 = vpop.eup %9385  ;;  %v10296_v25 = vld [vmem:[#allocation9 + $0xec] ss:$16 sps:$4 sm:$0xff]  }
 0x6a5   :  { %9399 = vtanh.f32 %v5321_v38  ;;  %v12876_v30 = vadd.f32 %v5230_v11, %v5160_v62  ;;  %v5508_v22 = vadd.f32 0.5, %v5492_v21  ;;  %v5493_v38 = vmul.f32 0.5, %v12830_v29  ;;  %v9388_v9 = vpop.eup %9387 }
 0x6a6   :  { %9401 = vtanh.f32 %v12868_v55  ;;  %6451 = vmatpush1.bf16.msra.mxu1 %v10291_v7  ;;  %v5367_v12 = vadd.f32 0.5, %v5351_v56  ;;  %v5587_v31 = vmul.f32 %v9380_v28, %v5507_v60  ;;  %v5431_v40 = vadd.f32 0.5, %v5415_v18  ;;  %v10294_v60 = vld [vmem:[#allocation9 + $0xe4] ss:$16 sps:$4 sm:$0xff]  }
 0x6a7   :  { %9403 = vtanh.f32 %v5385_v15  ;;  %6452 = vmatprep.subr.bf16.mxu1 %v10292_v49  ;;  %v5464_v43 = vmul.f32 0.5, %v12839_v0  ;;  %v5386_v33 = vmul.f32 0.5, %v5292_v20  ;;  %v9390_v11 = vpop.eup %9389  ;;  %v5588_v41 = vmul.f32 %v9388_v9, %v5508_v22  ;;  %6340 = vmatpush1.bf16.msra.mxu0 %v10293_v57  ;;  %v10295_v0 = vld [vmem:[#allocation9 + $0xc8] ss:$16 sps:$4 sm:$0xff]  }
 0x6a8   :  { %v5527_v62 = vmul.f32 %v5367_v12, %v12621_v32  ;;  %v5465_v47 = vmul.f32 0.5, %v5290_v2  ;;  %9405 = vtanh.f32 %v5322_v48  ;;  %v5494_v29 = vmul.f32 0.5, %v12848_v61  ;;  %v5051_v56 = vpop.f32.mrb[120].mxu0  ;;  %v5164_v28 = vpop.f32.mrb[120].mxu1  ;;  %6341 = vmatprep.subr.bf16.mxu0 %v10294_v60 }
 0x6a9   :  { %v5543_v21 = vmul.f32 %v9386_v24, %v5431_v40  ;;  %v5352_v15 = vmul.f32 0.5, %v9390_v11  ;;  %9407 = vtanh.f32 %v12855_v3  ;;  %v5636_v20 = vpack.c.bf16 %v5588_v41, %v5587_v31  ;;  %v5053_v61 = vpop.f32.mrb[121].mxu0  ;;  %v5166_v48 = vpop.f32.mrb[121].mxu1 }
 0x6aa   :  { %6453 = vmatpush1.bf16.msra.mxu1 %v10295_v0  ;;  %v9392_v18 = vpop.eup %9391  ;;  %9409 = vtanh.f32 %v5386_v33  ;;  %v5295_v32 = vadd.f32 %v5231_v50, %v5051_v56  ;;  %v5297_v2 = vadd.f32 %v5233_v16, %v5164_v28  ;;  %v5055_v12 = vpop.f32.mrb[122].mxu0  ;;  %v5509_v31 = vadd.f32 0.5, %v5493_v38 }
 0x6ab   :  { %6454 = vmatprep.subr.bf16.mxu1 %v10296_v25  ;;  %v9394_v3 = vpop.eup %9393  ;;  %v12887_v7 = vadd.f32 %v5543_v21, %v5527_v62  ;;  %v5368_v24 = vadd.f32 0.5, %v5352_v15  ;;  %v5416_v22 = vmul.f32 0.5, %v9392_v18  ;;  %9411 = vtanh.f32 %v5464_v43  ;;  %v5168_v49 = vpop.f32.mrb[122].mxu1  ;;  %5695 = vmatmul.mubr.bf16.gmra.mrb[136].mxu0 %v5636_v20 }
 0x6ac   :  { %v9396_v9 = vpop.eup %9395  ;;  %9413 = vtanh.f32 %v5465_v47  ;;  %v5323_v40 = vmul.f32 0.5, %v5295_v32  ;;  %v14469_v50 = vunpack.c.l.bf16 %v14451_v52  ;;  %v5057_v16 = vpop.f32.mrb[123].mxu0  ;;  %5808 = vmatmul.mubr.bf16.gmra.mrb[136].mxu1 %v5636_v20  ;;  %v5510_v57 = vadd.f32 0.5, %v5494_v29  ;;  %5704 = vmatprep.mubr.bf16.mxu0 %v14015_v44  ;;  %v10297_v29 = vld [vmem:[#allocation9 + $0xe0] ss:$16 sps:$4 sm:$0xff]  }
 0x6ad   :  { %v5170_v11 = vpop.f32.mrb[123].mxu1  ;;  %v9398_v41 = vpop.eup %9397  ;;  %v5528_v62 = vmul.f32 %v5368_v24, %v12640_v36  ;;  %v5432_v21 = vadd.f32 0.5, %v5416_v22  ;;  %9415 = vtanh.f32 %v12865_v59  ;;  %5817 = vmatprep.mubr.bf16.mxu1 %v14015_v44  ;;  %v14470_v47 = vunpack.c.l.bf16 %v14452_v34  ;;  %6342 = vmatpush1.bf16.msra.mxu0 %v10297_v29  ;;  %v10298_v36 = vld [vmem:[#allocation9 + $0xe8] ss:$16 sps:$4 sm:$0xff]   ;;  %v10299_v32 = vld [vmem:[#allocation9 + $0x4] ss:$16 sps:$4 sm:$0xff]  }
 0x6ae   :  { %v5296_v33 = vadd.f32 %v14469_v50, %v5053_v61  ;;  %9417 = vtanh.f32 %v5323_v40  ;;  %v14471_v56 = vunpack.c.h.bf16 %v14449_v42  ;;  %6455 = vmatpush1.bf16.msra.mxu1 %v10298_v36  ;;  %v14472_v18 = vunpack.c.h.bf16 %v14450_v23  ;;  %7012 = vmatprep.subr.bf16.mxu0 %v10299_v32  ;;  %v10300_v61 = vld [vmem:[#allocation9 + $0xc] ss:$16 sps:$4 sm:$0xff]  }
 0x6af   :  { %v9400_v38 = vpop.eup %9399  ;;  %v12897_v15 = vadd.f32 %v14470_v47, %v5166_v48  ;;  %9419 = vtanh.f32 %v12887_v7  ;;  %v5544_v59 = vmul.f32 %v9396_v9, %v5432_v21  ;;  %7125 = vmatprep.subr.bf16.mxu1 %v10300_v61  ;;  %v5589_v25 = vmul.f32 %v9398_v41, %v5509_v31 }
 0x6b0   :  { %v5387_v43 = vmul.f32 0.5, %v5296_v33  ;;  %v5299_v28 = vadd.f32 %v14471_v56, %v5055_v12  ;;  %v9402_v60 = vpop.eup %9401  ;;  %v5353_v0 = vmul.f32 0.5, %v9400_v38  ;;  %v5301_v20 = vadd.f32 %v14472_v18, %v5168_v49 }
 0x6b1   :  { %v9404_v48 = vpop.eup %9403  ;;  %v5590_v42 = vmul.f32 %v9402_v60, %v5510_v57  ;;  %v12904_v22 = vadd.f32 %v5544_v59, %v5528_v62  ;;  %v5466_v50 = vmul.f32 0.5, %v12876_v30  ;;  %v5495_v21 = vmul.f32 0.5, %v9394_v3 }
 0x6b2   :  { %9421 = vtanh.f32 %v5387_v43  ;;  %v5324_v24 = vmul.f32 0.5, %v5299_v28  ;;  %v5369_v12 = vadd.f32 0.5, %v5353_v0  ;;  %v5417_v40 = vmul.f32 0.5, %v9404_v48  ;;  %v9406_v9 = vpop.eup %9405 }
 0x6b3   :  { %v5637_v33 = vpack.c.bf16 %v5590_v42, %v5589_v25  ;;  %9423 = vtanh.f32 %v5297_v2  ;;  %v14473_v23 = vunpack.c.h.bf16 %v14451_v52  ;;  %v9408_v38 = vpop.eup %9407  ;;  %v5354_v57 = vmul.f32 0.5, %v9406_v9 }
 0x6b4   :  { %9425 = vtanh.f32 %v12904_v22  ;;  %v5529_v31 = vmul.f32 %v5369_v12, %v12657_v58  ;;  %v5433_v41 = vadd.f32 0.5, %v5417_v40  ;;  %v9410_v62 = vpop.eup %9409  ;;  %v14474_v47 = vunpack.c.h.bf16 %v14452_v34  ;;  %v5061_v28 = vpop.f32.mrb[124].mxu0 }
 0x6b5   :  { %v5300_v49 = vadd.f32 %v14473_v23, %v5057_v16  ;;  %9427 = vtanh.f32 %v5324_v24  ;;  %v5244_v56 = vunpack.c.h.bf16 %v14463_v35  ;;  %5705 = vmatmul.mubr.bf16.gmra.mrb[140].mxu0 %v5637_v33  ;;  %5818 = vmatmul.mubr.bf16.gmra.mrb[140].mxu1 %v5637_v33  ;;  %v9412_v2 = vpop.eup %9411  ;;  %v5370_v3 = vadd.f32 0.5, %v5354_v57  ;;  %v5174_v29 = vpop.f32.mrb[124].mxu1 }
 0x6b6   :  { %v5302_v30 = vadd.f32 %v14474_v47, %v5170_v11  ;;  %v5545_v52 = vmul.f32 %v9408_v38, %v5433_v41  ;;  %v5418_v16 = vmul.f32 0.5, %v9410_v62  ;;  %9429 = vtanh.f32 %v5466_v50  ;;  %5714 = vmatprep.mubr.bf16.mxu0 %v14015_v44  ;;  %5827 = vmatprep.mubr.bf16.mxu1 %v14015_v44  ;;  %v9414_v58 = vpop.eup %9413  ;;  %v5063_v11 = vpop.f32.mrb[125].mxu0 }
 0x6b7   :  { %v5388_v43 = vmul.f32 0.5, %v5300_v49  ;;  %v5511_v36 = vadd.f32 0.5, %v5495_v21  ;;  %v5303_v34 = vadd.f32 %v5239_v10, %v5061_v28  ;;  %v5176_v60 = vpop.f32.mrb[125].mxu1  ;;  %v5246_v59 = vunpack.c.h.bf16 %v14468_v46  ;;  %v9416_v0 = vpop.eup %9415 }
 0x6b8   :  { %v12919_v18 = vadd.f32 %v5545_v52, %v5529_v31  ;;  %v5530_v32 = vmul.f32 %v5370_v3, %v12670_v26  ;;  %v5434_v61 = vadd.f32 0.5, %v5418_v16  ;;  %v14475_v48 = vunpack.c.l.bf16 %v14459_v1  ;;  %v5065_v42 = vpop.f32.mrb[126].mxu0  ;;  %v5178_v24 = vpop.f32.mrb[126].mxu1 }
 0x6b9   :  { %9431 = vtanh.f32 %v5388_v43  ;;  %v9418_v12 = vpop.eup %9417  ;;  %v5496_v40 = vmul.f32 0.5, %v9412_v2  ;;  %v5467_v50 = vmul.f32 0.5, %v12897_v15  ;;  %v5325_v10 = vmul.f32 0.5, %v5303_v34  ;;  %v5067_v9 = vpop.f32.mrb[127].mxu0 }
 0x6ba   :  { %v5305_v25 = vadd.f32 %v14475_v48, %v5174_v29  ;;  %9433 = vtanh.f32 %v5301_v20  ;;  %v5180_v33 = vpop.f32.mrb[127].mxu1  ;;  %v9420_v21 = vpop.eup %9419  ;;  %v5546_v23 = vmul.f32 %v9416_v0, %v5434_v61  ;;  %v5355_v49 = vmul.f32 0.5, %v9418_v12 }
 0x6bb   :  { %v5468_v38 = vmul.f32 0.5, %v5302_v30  ;;  %v5304_v26 = vadd.f32 %v5240_v19, %v5063_v11  ;;  %9435 = vtanh.f32 %v5325_v10  ;;  %v5306_v41 = vadd.f32 %v5242_v6, %v5176_v60 }
 0x6bc   :  { %v9422_v31 = vpop.eup %9421  ;;  %v5307_v57 = vadd.f32 %v5243_v17, %v5065_v42  ;;  %v5309_v15 = vadd.f32 %v5245_v45, %v5178_v24  ;;  %9437 = vtanh.f32 %v12919_v18  ;;  %v12934_v20 = vadd.f32 %v5546_v23, %v5530_v32 }
 0x6bd   :  { %v5371_v62 = vadd.f32 0.5, %v5355_v49  ;;  %v5419_v43 = vmul.f32 0.5, %v9422_v31  ;;  %v9424_v47 = vpop.eup %9423  ;;  %v5512_v35 = vadd.f32 0.5, %v5496_v40  ;;  %9439 = vtanh.f32 %v5467_v50 }
 0x6be   :  { %v5389_v19 = vmul.f32 0.5, %v5304_v26  ;;  %v5326_v30 = vmul.f32 0.5, %v5307_v57  ;;  %v9426_v2 = vpop.eup %9425  ;;  %v5591_v46 = vmul.f32 %v9420_v21, %v5511_v36  ;;  %9441 = vtanh.f32 %v12934_v20 }
 0x6bf   :  { %v5531_v17 = vmul.f32 %v5371_v62, %v12674_v53  ;;  %v5435_v13 = vadd.f32 0.5, %v5419_v43  ;;  %v9428_v1 = vpop.eup %9427  ;;  %v5592_v45 = vmul.f32 %v9426_v2, %v5512_v35  ;;  %v5308_v6 = vadd.f32 %v5244_v56, %v5067_v9 }
 0x6c0   :  { %9443 = vtanh.f32 %v5389_v19  ;;  %v5310_v52 = vadd.f32 %v5246_v59, %v5180_v33  ;;  %v9430_v3 = vpop.eup %9429  ;;  %v5356_v28 = vmul.f32 0.5, %v9428_v1  ;;  %v5497_v32 = vmul.f32 0.5, %v9414_v58 }
 0x6c1   :  { %v5547_v16 = vmul.f32 %v9424_v47, %v5435_v13  ;;  %9445 = vtanh.f32 %v5468_v38  ;;  %v5638_v34 = vpack.c.bf16 %v5592_v45, %v5591_v46  ;;  %v5390_v11 = vmul.f32 0.5, %v5308_v6 }
 0x6c2   :  { %9447 = vtanh.f32 %v5326_v30  ;;  %v5372_v36 = vadd.f32 0.5, %v5356_v28  ;;  %v5498_v61 = vmul.f32 0.5, %v9430_v3  ;;  %v5513_v50 = vadd.f32 0.5, %v5497_v32 }
 0x6c3   :  { %v9432_v29 = vpop.eup %9431  ;;  %v12938_v60 = vadd.f32 %v5547_v16, %v5531_v17  ;;  %9449 = vtanh.f32 %v5305_v25  ;;  %5715 = vmatmul.mubr.bf16.gmra.mrb[144].mxu0 %v5638_v34  ;;  %5828 = vmatmul.mubr.bf16.gmra.mrb[144].mxu1 %v5638_v34  ;;  %v5469_v23 = vmul.f32 0.5, %v5306_v41  ;;  %v5470_v26 = vmul.f32 0.5, %v5310_v52 }
 0x6c4   :  { %v5420_v0 = vmul.f32 0.5, %v9432_v29  ;;  %v9434_v53 = vpop.eup %9433  ;;  %9451 = vtanh.f32 %v5390_v11  ;;  %v5532_v56 = vmul.f32 %v5372_v36, %v12681_v39  ;;  %5724 = vmatprep.mubr.bf16.mxu0 %v14015_v44  ;;  %5837 = vmatprep.mubr.bf16.mxu1 %v14015_v44  ;;  %v5514_v25 = vadd.f32 0.5, %v5498_v61 }
 0x6c5   :  { %v9436_v48 = vpop.eup %9435  ;;  %9453 = vtanh.f32 %v5309_v15 }
 0x6c6   :  { %v5436_v59 = vadd.f32 0.5, %v5420_v0  ;;  %v9438_v42 = vpop.eup %9437  ;;  %v5357_v12 = vmul.f32 0.5, %v9436_v48  ;;  %9455 = vtanh.f32 %v12938_v60 }
 0x6c7   :  { %v9440_v40 = vpop.eup %9439  ;;  %v5593_v33 = vmul.f32 %v9438_v42, %v5513_v50  ;;  %v14477_v50 = vld [vmem:[#allocation110_spill] sm:$0xff] }
 0x6c8   :  { %v5548_v24 = vmul.f32 %v9434_v53, %v5436_v59  ;;  %v9442_v58 = vpop.eup %9441  ;;  %v5373_v9 = vadd.f32 0.5, %v5357_v12  ;;  %v5499_v41 = vmul.f32 0.5, %v9440_v40  ;;  %v14476_v12 = vld [vmem:[#allocation109_spill] sm:$0xff] }
 0x6c9   :  { %v5594_v21 = vmul.f32 %v9442_v58, %v5514_v25  ;;  %v5868_v40 = vunpack.c.l.bf16 %v14476_v12  ;;  %v5870_v25 = vunpack.c.l.bf16 %v14477_v50 }
 0x6ca   :  { %v12944_v10 = vadd.f32 %v5548_v24, %v5532_v56  ;;  %v9444_v39 = vpop.eup %9443  ;;  %v5533_v15 = vmul.f32 %v5373_v9, %v12685_v51  ;;  %v5515_v52 = vadd.f32 0.5, %v5499_v41 }
 0x6cb   :  { %v9446_v49 = vpop.eup %9445  ;;  %v5421_v38 = vmul.f32 0.5, %v9444_v39  ;;  %v5639_v57 = vpack.c.bf16 %v5594_v21, %v5593_v33  ;;  %v14478_v39 = vld [vmem:[#allocation111_spill] sm:$0xff]  ;;  %v14479_v21 = vld [vmem:[#allocation112_spill] sm:$0xff] }
 0x6cc   :  { %9457 = vtanh.f32 %v12944_v10  ;;  %v9448_v31 = vpop.eup %9447  ;;  %v5500_v46 = vmul.f32 0.5, %v9446_v49  ;;  %v5869_v33 = vunpack.c.l.bf16 %v14478_v39 }
 0x6cd   :  { %v9450_v62 = vpop.eup %9449  ;;  %v5437_v43 = vadd.f32 0.5, %v5421_v38  ;;  %v5358_v47 = vmul.f32 0.5, %v9448_v31  ;;  %9459 = vtanh.f32 %v5469_v23  ;;  %5725 = vmatmul.mubr.bf16.gmra.mrb[148].mxu0 %v5639_v57  ;;  %5838 = vmatmul.mubr.bf16.gmra.mrb[148].mxu1 %v5639_v57  ;;  %v5871_v23 = vunpack.c.l.bf16 %v14479_v21 }
 0x6ce   :  { %v9452_v35 = vpop.eup %9451  ;;  %9461 = vtanh.f32 %v5470_v26  ;;  %5734 = vmatprep.mubr.bf16.mxu0 %v14015_v44  ;;  %5847 = vmatprep.mubr.bf16.mxu1 %v14015_v44  ;;  %v5516_v3 = vadd.f32 0.5, %v5500_v46  ;;  %v5872_v57 = vunpack.c.h.bf16 %v14476_v12 }
 0x6cf   :  { %v5549_v19 = vmul.f32 %v9450_v62, %v5437_v43  ;;  %v5374_v30 = vadd.f32 0.5, %v5358_v47  ;;  %v5422_v2 = vmul.f32 0.5, %v9452_v35  ;;  %v9454_v1 = vpop.eup %9453  ;;  %v5874_v62 = vunpack.c.h.bf16 %v14477_v50 }
 0x6d0   :  { %v9456_v45 = vpop.eup %9455 }
 0x6d1   :  { %v12950_v17 = vadd.f32 %v5549_v19, %v5533_v15  ;;  %v5534_v51 = vmul.f32 %v5374_v30, %v12691_v54  ;;  %v5438_v13 = vadd.f32 0.5, %v5422_v2  ;;  %v5595_v29 = vmul.f32 %v9456_v45, %v5515_v52 }
 0x6d2   :  { %v5873_v19 = vunpack.c.h.bf16 %v14478_v39  ;;  %v5875_v30 = vunpack.c.h.bf16 %v14479_v21 }
 0x6d3   :  { %v5550_v6 = vmul.f32 %v9454_v1, %v5438_v13  ;;  %9463 = vtanh.f32 %v12950_v17 }
 0x6d5   :  { %v12954_v28 = vadd.f32 %v5550_v6, %v5534_v51 }
 0x6d6   :  { %v9458_v16 = vpop.eup %9457 }
 0x6d7   :  { %v5596_v34 = vmul.f32 %v9458_v16, %v5516_v3  ;;  %9465 = vtanh.f32 %v12954_v28  ;;  %v9460_v11 = vpop.eup %9459  ;;  %v14480_v16 = vld [vmem:[#allocation113_spill] sm:$0xff] }
 0x6d8   :  { %v9462_v0 = vpop.eup %9461  ;;  %v5501_v54 = vmul.f32 0.5, %v9460_v11 }
 0x6d9   :  { %v5640_v36 = vpack.c.bf16 %v5596_v34, %v5595_v29  ;;  %v5502_v53 = vmul.f32 0.5, %v9462_v0  ;;  %v5876_v29 = vunpack.c.l.bf16 %v14480_v16  ;;  %v14481_v34 = vld [vmem:[#allocation114_spill] sm:$0xff] }
 0x6da   :  { %v5517_v61 = vadd.f32 0.5, %v5501_v54  ;;  %v5878_v11 = vunpack.c.l.bf16 %v14481_v34  ;;  %v14482_v54 = vld [vmem:[#allocation115_spill] sm:$0xff]  ;;  %v5882_v12 = vunpack.c.h.bf16 %v14481_v34 }
 0x6db   :  { %5735 = vmatmul.mubr.bf16.gmra.mrb[152].mxu0 %v5640_v36  ;;  %5848 = vmatmul.mubr.bf16.gmra.mrb[152].mxu1 %v5640_v36  ;;  %v5518_v56 = vadd.f32 0.5, %v5502_v53  ;;  %v5877_v53 = vunpack.c.l.bf16 %v14482_v54 }
 0x6dc   :  { %5744 = vmatprep.mubr.bf16.mxu0 %v14015_v44  ;;  %5857 = vmatprep.mubr.bf16.mxu1 %v14015_v44 }
 0x6dd   :  { %v9464_v32 = vpop.eup %9463 }
 0x6de   :  { %v5597_v48 = vmul.f32 %v9464_v32, %v5517_v61  ;;  %v14483_v32 = vld [vmem:[#allocation116_spill] sm:$0xff] }
 0x6df   :  { %v5879_v61 = vunpack.c.l.bf16 %v14483_v32 }
 0x6e1   :  { %v9466_v59 = vpop.eup %9465 }
 0x6e2   :  { %v5598_v42 = vmul.f32 %v9466_v59, %v5518_v56  ;;  %v5880_v56 = vunpack.c.h.bf16 %v14480_v16 }
 0x6e4   :  { %v5641_v24 = vpack.c.bf16 %v5598_v42, %v5597_v48 }
 0x6e6   :  { %5745 = vmatmul.mubr.bf16.gmra.mrb[156].mxu0 %v5641_v24  ;;  %5858 = vmatmul.mubr.bf16.gmra.mrb[156].mxu1 %v5641_v24 }
 0x6e7   :  { %6359 = vmatprep.mubr.bf16.mxu0 %v14015_v44  ;;  %6472 = vmatprep.mubr.bf16.mxu1 %v14015_v44 }
 0x75d   :  { %v5676_v58 = vpop.f32.mrb[128].mxu0  ;;  %v5789_v9 = vpop.f32.mrb[128].mxu1 }
 0x75e   :  { %v5932_v49 = vadd.f32 %v5868_v40, %v5676_v58  ;;  %v5934_v38 = vadd.f32 %v5870_v25, %v5789_v9  ;;  %v5678_v26 = vpop.f32.mrb[129].mxu0  ;;  %v5791_v31 = vpop.f32.mrb[129].mxu1  ;;  %v5881_v9 = vunpack.c.h.bf16 %v14482_v54 }
 0x75f   :  { %v5933_v15 = vadd.f32 %v5869_v33, %v5678_v26  ;;  %v5935_v43 = vadd.f32 %v5871_v23, %v5791_v31  ;;  %v5680_v47 = vpop.f32.mrb[130].mxu0  ;;  %v5793_v35 = vpop.f32.mrb[130].mxu1 }
 0x760   :  { %v5996_v2 = vmul.f32 0.5, %v5932_v49  ;;  %v5936_v41 = vadd.f32 %v5872_v57, %v5680_v47  ;;  %v5938_v46 = vadd.f32 %v5874_v62, %v5793_v35  ;;  %v5682_v51 = vpop.f32.mrb[131].mxu0  ;;  %v5795_v13 = vpop.f32.mrb[131].mxu1 }
 0x761   :  { %v6060_v1 = vmul.f32 0.5, %v5933_v15  ;;  %v5937_v45 = vadd.f32 %v5873_v19, %v5682_v51  ;;  %v5939_v6 = vadd.f32 %v5875_v30, %v5795_v13  ;;  %v6140_v35 = vmul.f32 0.5, %v5935_v43 }
 0x762   :  { %9467 = vtanh.f32 %v5996_v2  ;;  %v5997_v52 = vmul.f32 0.5, %v5936_v41 }
 0x763   :  { %9469 = vtanh.f32 %v6060_v1  ;;  %v6061_v3 = vmul.f32 0.5, %v5937_v45  ;;  %v6141_v2 = vmul.f32 0.5, %v5939_v6  ;;  %v14484_v1 = vld [vmem:[#allocation117_spill] sm:$0xff]  ;;  %v14485_v45 = vld [vmem:[#allocation118_spill] sm:$0xff]  ;;  %v14486_v6 = vld [vmem:[#allocation119_spill] sm:$0xff] }
 0x764   :  { %9471 = vtanh.f32 %v5997_v52  ;;  %v5886_v52 = vunpack.c.l.bf16 %v14485_v45  ;;  %v5888_v34 = vunpack.c.h.bf16 %v14484_v1 }
 0x765   :  { %v5686_v36 = vpop.f32.mrb[132].mxu0  ;;  %v5799_v0 = vpop.f32.mrb[132].mxu1  ;;  %9473 = vtanh.f32 %v5934_v38  ;;  %v5883_v38 = vunpack.c.h.bf16 %v14483_v32 }
 0x766   :  { %v5940_v59 = vadd.f32 %v5876_v29, %v5686_v36  ;;  %v5942_v48 = vadd.f32 %v5878_v11, %v5799_v0  ;;  %v5688_v42 = vpop.f32.mrb[133].mxu0  ;;  %v5801_v24 = vpop.f32.mrb[133].mxu1  ;;  %9475 = vtanh.f32 %v6061_v3  ;;  %v5885_v36 = vunpack.c.l.bf16 %v14486_v6 }
 0x767   :  { %v5941_v40 = vadd.f32 %v5877_v53, %v5688_v42  ;;  %v5943_v50 = vadd.f32 %v5879_v61, %v5801_v24  ;;  %v5690_v25 = vpop.f32.mrb[134].mxu0  ;;  %v5803_v58 = vpop.f32.mrb[134].mxu1  ;;  %9477 = vtanh.f32 %v5938_v46  ;;  %v5884_v46 = vunpack.c.l.bf16 %v14484_v1 }
 0x768   :  { %v5998_v39 = vmul.f32 0.5, %v5940_v59  ;;  %v5944_v33 = vadd.f32 %v5880_v56, %v5690_v25  ;;  %v5946_v21 = vadd.f32 %v5882_v12, %v5803_v58  ;;  %v5692_v23 = vpop.f32.mrb[135].mxu0  ;;  %v5805_v49 = vpop.f32.mrb[135].mxu1  ;;  %v5890_v0 = vunpack.c.h.bf16 %v14485_v45 }
 0x769   :  { %v6062_v26 = vmul.f32 0.5, %v5941_v40  ;;  %v5945_v31 = vadd.f32 %v5881_v9, %v5692_v23  ;;  %v5947_v62 = vadd.f32 %v5883_v38, %v5805_v49  ;;  %v6142_v61 = vmul.f32 0.5, %v5943_v50  ;;  %v14489_v50 = vld [vmem:[#allocation122_spill] sm:$0xff] }
 0x76a   :  { %9479 = vtanh.f32 %v5998_v39  ;;  %v5999_v57 = vmul.f32 0.5, %v5944_v33  ;;  %v5889_v24 = vunpack.c.h.bf16 %v14486_v6  ;;  %v14488_v33 = vld [vmem:[#allocation121_spill] sm:$0xff]  ;;  %v5894_v49 = vunpack.c.l.bf16 %v14489_v50 }
 0x76b   :  { %9481 = vtanh.f32 %v6062_v26  ;;  %v6063_v15 = vmul.f32 0.5, %v5945_v31  ;;  %v6143_v59 = vmul.f32 0.5, %v5947_v62  ;;  %v5892_v23 = vunpack.c.l.bf16 %v14488_v33 }
 0x76c   :  { %v9468_v47 = vpop.eup %9467  ;;  %9483 = vtanh.f32 %v5999_v57  ;;  %v5898_v31 = vunpack.c.h.bf16 %v14489_v50 }
 0x76d   :  { %v9470_v19 = vpop.eup %9469  ;;  %v6028_v30 = vmul.f32 0.5, %v9468_v47  ;;  %9485 = vtanh.f32 %v5942_v48  ;;  %v14487_v48 = vld [vmem:[#allocation120_spill] sm:$0xff] }
 0x76e   :  { %v6092_v41 = vmul.f32 0.5, %v9470_v19  ;;  %v9472_v51 = vpop.eup %9471  ;;  %9487 = vtanh.f32 %v6063_v15  ;;  %v5887_v42 = vunpack.c.l.bf16 %v14487_v48  ;;  %v5891_v58 = vunpack.c.h.bf16 %v14487_v48  ;;  %v14491_v47 = vld [vmem:[#allocation124_spill] sm:$0xff] }
 0x76f   :  { %v6044_v13 = vadd.f32 0.5, %v6028_v30  ;;  %v9474_v3 = vpop.eup %9473  ;;  %9489 = vtanh.f32 %v6140_v35  ;;  %v6029_v29 = vmul.f32 0.5, %v9472_v51  ;;  %v5895_v35 = vunpack.c.l.bf16 %v14491_v47 }
 0x770   :  { %v6108_v16 = vadd.f32 0.5, %v6092_v41  ;;  %v9476_v43 = vpop.eup %9475  ;;  %9491 = vtanh.f32 %v6141_v2 }
 0x771   :  { %v6204_v11 = vmul.f32 %v6044_v13, %v12734_v4  ;;  %v6045_v53 = vadd.f32 0.5, %v6029_v29  ;;  %v6093_v32 = vmul.f32 0.5, %v9476_v43  ;;  %v9478_v56 = vpop.eup %9477  ;;  %9493 = vtanh.f32 %v5946_v21  ;;  %v14492_v29 = vld [vmem:[#allocation125_spill] sm:$0xff] }
 0x772   :  { %v6220_v54 = vmul.f32 %v9474_v3, %v6108_v16  ;;  %v5896_v21 = vunpack.c.h.bf16 %v14488_v33  ;;  %9495 = vtanh.f32 %v6142_v61  ;;  %v14495_v16 = vld [vmem:[#allocation128_spill] sm:$0xff] }
 0x773   :  { %v6205_v4 = vmul.f32 %v6045_v53, %v12745_v27  ;;  %v6109_v25 = vadd.f32 0.5, %v6093_v32  ;;  %9497 = vtanh.f32 %v6143_v59  ;;  %v14490_v27 = vld [vmem:[#allocation123_spill] sm:$0xff] }
 0x774   :  { %v9480_v12 = vpop.eup %9479  ;;  %v12985_v40 = vadd.f32 %v6220_v54, %v6204_v11  ;;  %v5893_v15 = vunpack.c.l.bf16 %v14490_v27 }
 0x775   :  { %v9482_v9 = vpop.eup %9481  ;;  %v6030_v39 = vmul.f32 0.5, %v9480_v12  ;;  %v6221_v38 = vmul.f32 %v9478_v56, %v6109_v25  ;;  %v14493_v12 = vld [vmem:[#allocation126_spill] sm:$0xff]  ;;  %v14494_v25 = vld [vmem:[#allocation127_spill] sm:$0xff] }
 0x776   :  { %v6094_v26 = vmul.f32 0.5, %v9482_v9  ;;  %v9484_v57 = vpop.eup %9483  ;;  %9499 = vtanh.f32 %v12985_v40 }
 0x777   :  { %v6046_v62 = vadd.f32 0.5, %v6030_v39  ;;  %v9486_v19 = vpop.eup %9485  ;;  %v12996_v30 = vadd.f32 %v6221_v38, %v6205_v4  ;;  %v6031_v41 = vmul.f32 0.5, %v9484_v57  ;;  %v5903_v39 = vunpack.c.l.bf16 %v14495_v16 }
 0x778   :  { %v6110_v2 = vadd.f32 0.5, %v6094_v26  ;;  %v9488_v51 = vpop.eup %9487 }
 0x779   :  { %v6206_v13 = vmul.f32 %v6046_v62, %v12757_v14  ;;  %v9490_v11 = vpop.eup %9489  ;;  %9501 = vtanh.f32 %v12996_v30  ;;  %v6047_v53 = vadd.f32 0.5, %v6031_v41  ;;  %v6095_v32 = vmul.f32 0.5, %v9488_v51 }
 0x77a   :  { %v6222_v54 = vmul.f32 %v9486_v19, %v6110_v2  ;;  %v9492_v61 = vpop.eup %9491 }
 0x77b   :  { %v6207_v26 = vmul.f32 %v6047_v53, %v12771_v37  ;;  %v6111_v57 = vadd.f32 0.5, %v6095_v32  ;;  %v9494_v41 = vpop.eup %9493  ;;  %v6173_v32 = vmul.f32 0.5, %v9492_v61 }
 0x77c   :  { %v13007_v38 = vadd.f32 %v6222_v54, %v6206_v13  ;;  %v6172_v13 = vmul.f32 0.5, %v9490_v11 }
 0x77d   :  { %v6223_v54 = vmul.f32 %v9494_v41, %v6111_v57 }
 0x77e   :  { %v5696_v56 = vpop.f32.mrb[136].mxu0  ;;  %9503 = vtanh.f32 %v13007_v38  ;;  %v6188_v45 = vadd.f32 0.5, %v6172_v13 }
 0x77f   :  { %v5809_v59 = vpop.f32.mrb[136].mxu1  ;;  %v5948_v62 = vadd.f32 %v5884_v46, %v5696_v56  ;;  %v5698_v19 = vpop.f32.mrb[137].mxu0 }
 0x780   :  { %v5811_v2 = vpop.f32.mrb[137].mxu1  ;;  %v5950_v51 = vadd.f32 %v5886_v52, %v5809_v59  ;;  %v5949_v4 = vadd.f32 %v5885_v36, %v5698_v19  ;;  %v5700_v43 = vpop.f32.mrb[138].mxu0 }
 0x781   :  { %v5951_v9 = vadd.f32 %v5887_v42, %v5811_v2  ;;  %v5813_v14 = vpop.f32.mrb[138].mxu1  ;;  %v6000_v3 = vmul.f32 0.5, %v5948_v62  ;;  %v5952_v37 = vadd.f32 %v5888_v34, %v5700_v43  ;;  %v5702_v53 = vpop.f32.mrb[139].mxu0  ;;  %v13020_v42 = vadd.f32 %v6223_v54, %v6207_v26 }
 0x782   :  { %v5815_v46 = vpop.f32.mrb[139].mxu1  ;;  %v6064_v56 = vmul.f32 0.5, %v5949_v4  ;;  %v5954_v52 = vadd.f32 %v5890_v0, %v5813_v14  ;;  %v9496_v36 = vpop.eup %9495  ;;  %v5953_v11 = vadd.f32 %v5889_v24, %v5702_v53  ;;  %v5905_v34 = vunpack.c.h.bf16 %v14494_v25  ;;  %v14496_v4 = vld [vmem:[#allocation129_spill] sm:$0xff] }
 0x783   :  { %9505 = vtanh.f32 %v6000_v3  ;;  %v6001_v59 = vmul.f32 0.5, %v5952_v37  ;;  %v9498_v57 = vpop.eup %9497  ;;  %v5955_v1 = vadd.f32 %v5891_v58, %v5815_v46  ;;  %v5907_v43 = vunpack.c.h.bf16 %v14495_v16 }
 0x784   :  { %9507 = vtanh.f32 %v6064_v56  ;;  %v9500_v61 = vpop.eup %9499  ;;  %v6065_v0 = vmul.f32 0.5, %v5953_v11  ;;  %v5908_v3 = vunpack.c.l.bf16 %v14496_v4  ;;  %v6189_v14 = vadd.f32 0.5, %v6173_v32 }
 0x785   :  { %9509 = vtanh.f32 %v13020_v42  ;;  %v6174_v26 = vmul.f32 0.5, %v9496_v36  ;;  %v6144_v6 = vmul.f32 0.5, %v5951_v9  ;;  %v9502_v19 = vpop.eup %9501  ;;  %v6175_v48 = vmul.f32 0.5, %v9498_v57 }
 0x786   :  { %9511 = vtanh.f32 %v5950_v51  ;;  %v6268_v54 = vmul.f32 %v9500_v61, %v6188_v45  ;;  %v6269_v37 = vmul.f32 %v9502_v19, %v6189_v14  ;;  %v6145_v11 = vmul.f32 0.5, %v5955_v1  ;;  %v10314_v14 = vld [vmem:[#allocation9 + $0x68] ss:$16 sps:$4 sm:$0xff]  }
 0x787   :  { %9513 = vtanh.f32 %v6001_v59  ;;  %v14498_v45 = vunpack.c.h.bf16 %v14491_v47 }
 0x788   :  { %v5706_v24 = vpop.f32.mrb[140].mxu0  ;;  %v5819_v62 = vpop.f32.mrb[140].mxu1  ;;  %9515 = vtanh.f32 %v6065_v0  ;;  %v6319_v59 = vpack.c.bf16 %v6269_v37, %v6268_v54  ;;  %v10302_v54 = vld [vmem:[#allocation9 + $0x8] ss:$16 sps:$4 sm:$0xff]  }
 0x789   :  { %v5956_v58 = vadd.f32 %v5892_v23, %v5706_v24  ;;  %v5958_v2 = vadd.f32 %v5894_v49, %v5819_v62  ;;  %v5708_v41 = vpop.f32.mrb[141].mxu0  ;;  %v5821_v13 = vpop.f32.mrb[141].mxu1  ;;  %9517 = vtanh.f32 %v6144_v6  ;;  %v14500_v24 = vld [vmem:[#allocation131_spill] sm:$0xff] }
 0x78a   :  { %v5957_v53 = vadd.f32 %v5893_v15, %v5708_v41  ;;  %v5959_v9 = vadd.f32 %v5895_v35, %v5821_v13  ;;  %v5710_v51 = vpop.f32.mrb[142].mxu0  ;;  %v5823_v46 = vpop.f32.mrb[142].mxu1  ;;  %v14497_v35 = vunpack.c.h.bf16 %v14490_v27  ;;  %6360 = vmatmul.mubr.bf16.vlgmr.msra.gmra.mrb[160].mxu0 %v6319_v59  ;;  %6473 = vmatmul.mubr.bf16.vlgmr.msra.gmra.mrb[160].mxu1 %v6319_v59  ;;  %v5909_v62 = vunpack.c.l.bf16 %v14500_v24  ;;  %v14501_v27 = vld [vmem:[#allocation132_spill] sm:$0xff]  ;;  %v10301_v13 = vld [vmem:[#allocation9] ss:$16 sps:$4 sm:$0xff]  }
 0x78b   :  { %v6002_v32 = vmul.f32 0.5, %v5956_v58  ;;  %v5960_v23 = vadd.f32 %v5896_v21, %v5710_v51  ;;  %v13042_v49 = vadd.f32 %v5898_v31, %v5823_v46  ;;  %v5712_v56 = vpop.f32.mrb[143].mxu0  ;;  %v5825_v36 = vpop.f32.mrb[143].mxu1  ;;  %v14499_v21 = vld [vmem:[#allocation130_spill] sm:$0xff]  ;;  %v5912_v31 = vunpack.c.h.bf16 %v14496_v4  ;;  %6369 = vmatprep.mubr.bf16.mxu0 %v14015_v44  ;;  %6482 = vmatprep.mubr.bf16.mxu1 %v14015_v44 }
 0x78c   :  { %v6066_v15 = vmul.f32 0.5, %v5957_v53  ;;  %v5961_v61 = vadd.f32 %v14497_v35, %v5712_v56  ;;  %v5963_v0 = vadd.f32 %v14498_v45, %v5825_v36  ;;  %v9504_v33 = vpop.eup %9503  ;;  %v5910_v50 = vunpack.c.l.bf16 %v14499_v21  ;;  %7013 = vmatpush1.bf16.msra.mxu0 %v10301_v13  ;;  %7126 = vmatpush1.bf16.msra.mxu1 %v10302_v54  ;;  %v14502_v45 = vld [vmem:[#allocation133_spill] sm:$0xff]  ;;  %v10306_v13 = vld [vmem:[#allocation9 + $0x28] ss:$16 sps:$4 sm:$0xff]  }
 0x78d   :  { %9519 = vtanh.f32 %v6002_v32  ;;  %v6003_v57 = vmul.f32 0.5, %v5960_v23  ;;  %v9506_v1 = vpop.eup %9505  ;;  %v5911_v19 = vunpack.c.l.bf16 %v14501_v27  ;;  %v6191_v58 = vadd.f32 0.5, %v6175_v48  ;;  %v10303_v32 = vld [vmem:[#allocation9 + $0x24] ss:$16 sps:$4 sm:$0xff]   ;;  %v10304_v23 = vld [vmem:[#allocation9 + $0x2c] ss:$16 sps:$4 sm:$0xff]  }
 0x78e   :  { %9521 = vtanh.f32 %v5954_v52  ;;  %v6067_v6 = vmul.f32 0.5, %v5961_v61  ;;  %v9508_v47 = vpop.eup %9507  ;;  %v6190_v52 = vadd.f32 0.5, %v6174_v26  ;;  %v6032_v41 = vmul.f32 0.5, %v9506_v1  ;;  %7014 = vmatprep.subr.bf16.mxu0 %v10303_v32  ;;  %7127 = vmatprep.subr.bf16.mxu1 %v10304_v23 }
 0x78f   :  { %9523 = vtanh.f32 %v6066_v15  ;;  %v9510_v37 = vpop.eup %9509  ;;  %v6096_v53 = vmul.f32 0.5, %v9508_v47  ;;  %v6146_v51 = vmul.f32 0.5, %v5959_v9  ;;  %v6147_v15 = vmul.f32 0.5, %v5963_v0  ;;  %v10305_v47 = vld [vmem:[#allocation9 + $0x20] ss:$16 sps:$4 sm:$0xff]  }
 0x790   :  { %9525 = vtanh.f32 %v6145_v11  ;;  %v9512_v56 = vpop.eup %9511  ;;  %v6270_v36 = vmul.f32 %v9504_v33, %v6190_v52  ;;  %v6271_v26 = vmul.f32 %v9510_v37, %v6191_v58  ;;  %v6048_v48 = vadd.f32 0.5, %v6032_v41  ;;  %7015 = vmatpush1.bf16.msra.mxu0 %v10305_v47  ;;  %7128 = vmatpush1.bf16.msra.mxu1 %v10306_v13  ;;  %v10307_v0 = vld [vmem:[#allocation9 + $0x44] ss:$16 sps:$4 sm:$0xff]   ;;  %v10308_v41 = vld [vmem:[#allocation9 + $0x4c] ss:$16 sps:$4 sm:$0xff]  }
 0x791   :  { %9527 = vtanh.f32 %v6003_v57  ;;  %v9514_v59 = vpop.eup %9513  ;;  %v6112_v11 = vadd.f32 0.5, %v6096_v53  ;;  %7016 = vmatprep.subr.bf16.mxu0 %v10307_v0  ;;  %7129 = vmatprep.subr.bf16.mxu1 %v10308_v41  ;;  %v10309_v0 = vld [vmem:[#allocation9 + $0x40] ss:$16 sps:$4 sm:$0xff]   ;;  %v10310_v41 = vld [vmem:[#allocation9 + $0x48] ss:$16 sps:$4 sm:$0xff]   ;;  %v14513_v4 = vunpack.c.h.bf16 %v14501_v27 }
 0x792   :  { %9529 = vtanh.f32 %v5958_v2  ;;  %v6320_v61 = vpack.c.bf16 %v6271_v26, %v6270_v36  ;;  %v6208_v9 = vmul.f32 %v6048_v48, %v12814_v5  ;;  %v6033_v57 = vmul.f32 0.5, %v9514_v59  ;;  %v9516_v33 = vpop.eup %9515  ;;  %v14503_v2 = vld [vmem:[#allocation134_spill] sm:$0xff] }
 0x793   :  { %9531 = vtanh.f32 %v6067_v6  ;;  %v6224_v52 = vmul.f32 %v9512_v56, %v6112_v11  ;;  %v9518_v54 = vpop.eup %9517  ;;  %v6097_v37 = vmul.f32 0.5, %v9516_v33  ;;  %v14504_v36 = vunpack.c.l.bf16 %v14492_v29  ;;  %v14507_v6 = vld [vmem:[#allocation135_spill] sm:$0xff] }
 0x794   :  { %9533 = vtanh.f32 %v6146_v51  ;;  %v6049_v5 = vadd.f32 0.5, %v6033_v57  ;;  %6370 = vmatmul.mubr.bf16.gmra.mrb[164].mxu0 %v6320_v61  ;;  %6483 = vmatmul.mubr.bf16.gmra.mrb[164].mxu1 %v6320_v61  ;;  %v14505_v48 = vunpack.c.l.bf16 %v14493_v12  ;;  %v6176_v1 = vmul.f32 0.5, %v9518_v54 }
 0x795   :  { %9535 = vtanh.f32 %v13042_v49  ;;  %v13063_v56 = vadd.f32 %v6224_v52, %v6208_v9  ;;  %6379 = vmatprep.mubr.bf16.mxu0 %v14015_v44  ;;  %6492 = vmatprep.mubr.bf16.mxu1 %v14015_v44  ;;  %v6113_v47 = vadd.f32 0.5, %v6097_v37  ;;  %v14509_v54 = vunpack.c.h.bf16 %v14492_v29 }
 0x796   :  { %v5716_v53 = vpop.f32.mrb[144].mxu0  ;;  %v5829_v32 = vpop.f32.mrb[144].mxu1  ;;  %9537 = vtanh.f32 %v6147_v15  ;;  %v6209_v61 = vmul.f32 %v6049_v5, %v12832_v63  ;;  %v14506_v15 = vunpack.c.l.bf16 %v14494_v25  ;;  %7017 = vmatpush1.bf16.msra.mxu0 %v10309_v0  ;;  %7130 = vmatpush1.bf16.msra.mxu1 %v10310_v41  ;;  %v14508_v5 = vld [vmem:[#allocation136_spill] sm:$0xff] }
 0x797   :  { %v9520_v51 = vpop.eup %9519  ;;  %v5964_v26 = vadd.f32 %v14504_v36, %v5716_v53  ;;  %v13069_v59 = vadd.f32 %v14505_v48, %v5829_v32  ;;  %v5718_v11 = vpop.f32.mrb[145].mxu0  ;;  %9539 = vtanh.f32 %v13063_v56  ;;  %v5923_v29 = vunpack.c.h.bf16 %v14508_v5 }
 0x798   :  { %v5831_v57 = vpop.f32.mrb[145].mxu1  ;;  %v9522_v49 = vpop.eup %9521  ;;  %v6034_v9 = vmul.f32 0.5, %v9520_v51  ;;  %v5965_v13 = vadd.f32 %v14506_v15, %v5718_v11  ;;  %v10311_v51 = vld [vmem:[#allocation9 + $0x64] ss:$16 sps:$4 sm:$0xff]   ;;  %v10312_v11 = vld [vmem:[#allocation9 + $0x6c] ss:$16 sps:$4 sm:$0xff]  }
 0x799   :  { %v5720_v33 = vpop.f32.mrb[146].mxu0  ;;  %v5833_v52 = vpop.f32.mrb[146].mxu1  ;;  %v6004_v32 = vmul.f32 0.5, %v5964_v26  ;;  %v5967_v36 = vadd.f32 %v5903_v39, %v5831_v57  ;;  %7018 = vmatprep.subr.bf16.mxu0 %v10311_v51  ;;  %7131 = vmatprep.subr.bf16.mxu1 %v10312_v11  ;;  %v6225_v0 = vmul.f32 %v9522_v49, %v6113_v47  ;;  %v5921_v57 = vunpack.c.h.bf16 %v14507_v6  ;;  %v10313_v11 = vld [vmem:[#allocation9 + $0x60] ss:$16 sps:$4 sm:$0xff]  }
 0x79a   :  { %v9524_v53 = vpop.eup %9523  ;;  %v5722_v48 = vpop.f32.mrb[147].mxu0  ;;  %v6050_v41 = vadd.f32 0.5, %v6034_v9  ;;  %v6068_v39 = vmul.f32 0.5, %v5965_v13  ;;  %7019 = vmatpush1.bf16.msra.mxu0 %v10313_v11  ;;  %7132 = vmatpush1.bf16.msra.mxu1 %v10314_v14  ;;  %v5968_v9 = vadd.f32 %v14509_v54, %v5720_v33  ;;  %v14510_v13 = vunpack.c.h.bf16 %v14493_v12  ;;  %v10319_v54 = vld [vmem:[#allocation9 + $0xa4] ss:$16 sps:$4 sm:$0xff]  }
 0x79b   :  { %v5835_v23 = vpop.f32.mrb[147].mxu1  ;;  %v9526_v15 = vpop.eup %9525  ;;  %v6098_v58 = vmul.f32 0.5, %v9524_v53  ;;  %9541 = vtanh.f32 %v6004_v32  ;;  %v13082_v63 = vadd.f32 %v6225_v0, %v6209_v61  ;;  %v6148_v47 = vmul.f32 0.5, %v5967_v36  ;;  %v10315_v32 = vld [vmem:[#allocation9 + $0x84] ss:$16 sps:$4 sm:$0xff]  }
 0x79c   :  { %v9528_v26 = vpop.eup %9527  ;;  %v6210_v37 = vmul.f32 %v6050_v41, %v12845_v8  ;;  %9543 = vtanh.f32 %v6068_v39  ;;  %v5970_v53 = vadd.f32 %v14510_v13, %v5833_v52  ;;  %7020 = vmatprep.subr.bf16.mxu0 %v10315_v32  ;;  %v10316_v61 = vld [vmem:[#allocation9 + $0x8c] ss:$16 sps:$4 sm:$0xff]   ;;  %v6177_v14 = vmul.f32 0.5, %v9526_v15 }
 0x79d   :  { %v9530_v35 = vpop.eup %9529  ;;  %v6114_v51 = vadd.f32 0.5, %v6098_v58  ;;  %v6035_v46 = vmul.f32 0.5, %v9528_v26  ;;  %7133 = vmatprep.subr.bf16.mxu1 %v10316_v61  ;;  %9545 = vtanh.f32 %v13082_v63  ;;  %v6005_v26 = vmul.f32 0.5, %v5968_v9 }
 0x79e   :  { %v9532_v49 = vpop.eup %9531  ;;  %v5969_v36 = vadd.f32 %v5905_v34, %v5722_v48  ;;  %9547 = vtanh.f32 %v13069_v59  ;;  %v5971_v34 = vadd.f32 %v5907_v43, %v5835_v23  ;;  %v6193_v61 = vadd.f32 0.5, %v6177_v14 }
 0x79f   :  { %v6226_v8 = vmul.f32 %v9530_v35, %v6114_v51  ;;  %v6051_v58 = vadd.f32 0.5, %v6035_v46  ;;  %v6099_v0 = vmul.f32 0.5, %v9532_v49  ;;  %v9534_v41 = vpop.eup %9533  ;;  %v10317_v46 = vld [vmem:[#allocation9 + $0x80] ss:$16 sps:$4 sm:$0xff]   ;;  %v10318_v51 = vld [vmem:[#allocation9 + $0x88] ss:$16 sps:$4 sm:$0xff]   ;;  %9549 = vtanh.f32 %v6005_v26 }
 0x7a0   :  { %v9536_v33 = vpop.eup %9535  ;;  %v5726_v11 = vpop.f32.mrb[148].mxu0  ;;  %7021 = vmatpush1.bf16.msra.mxu0 %v10317_v46  ;;  %7134 = vmatpush1.bf16.msra.mxu1 %v10318_v51  ;;  %v6192_v49 = vadd.f32 0.5, %v6176_v1  ;;  %v6069_v25 = vmul.f32 0.5, %v5969_v36  ;;  %9551 = vtanh.f32 %v6148_v47  ;;  %v6178_v47 = vmul.f32 0.5, %v9534_v41  ;;  %v10322_v26 = vld [vmem:[#allocation9 + $0xa8] ss:$16 sps:$4 sm:$0xff]  }
 0x7a1   :  { %v13093_v12 = vadd.f32 %v6226_v8, %v6210_v37  ;;  %v6211_v52 = vmul.f32 %v6051_v58, %v12868_v55  ;;  %v6115_v39 = vadd.f32 0.5, %v6099_v0  ;;  %v5839_v35 = vpop.f32.mrb[148].mxu1  ;;  %v9538_v15 = vpop.eup %9537  ;;  %7022 = vmatprep.subr.bf16.mxu0 %v10319_v54  ;;  %v10320_v55 = vld [vmem:[#allocation9 + $0xac] ss:$16 sps:$4 sm:$0xff]   ;;  %v5972_v9 = vadd.f32 %v5908_v3, %v5726_v11 }
 0x7a2   :  { %v5728_v48 = vpop.f32.mrb[149].mxu0  ;;  %v5841_v37 = vpop.f32.mrb[149].mxu1  ;;  %7135 = vmatprep.subr.bf16.mxu1 %v10320_v55  ;;  %v5974_v13 = vadd.f32 %v5910_v50, %v5839_v35  ;;  %9553 = vtanh.f32 %v6069_v25  ;;  %v10321_v50 = vld [vmem:[#allocation9 + $0xa0] ss:$16 sps:$4 sm:$0xff]   ;;  %v6179_v36 = vmul.f32 0.5, %v9538_v15  ;;  %v14512_v35 = vunpack.c.h.bf16 %v14500_v24 }
 0x7a3   :  { %v6227_v59 = vmul.f32 %v9536_v33, %v6115_v39  ;;  %v5730_v1 = vpop.f32.mrb[150].mxu0  ;;  %v5843_v32 = vpop.f32.mrb[150].mxu1  ;;  %v5973_v16 = vadd.f32 %v5909_v62, %v5728_v48  ;;  %v5975_v43 = vadd.f32 %v5911_v19, %v5841_v37  ;;  %9555 = vtanh.f32 %v13093_v12  ;;  %v10323_v33 = vld [vmem:[#allocation9 + $0xc4] ss:$16 sps:$4 sm:$0xff]   ;;  %v10324_v39 = vld [vmem:[#allocation9 + $0xcc] ss:$16 sps:$4 sm:$0xff]  }
 0x7a4   :  { %v5732_v23 = vpop.f32.mrb[151].mxu0  ;;  %v5845_v8 = vpop.f32.mrb[151].mxu1  ;;  %v6006_v0 = vmul.f32 0.5, %v5972_v9  ;;  %7023 = vmatpush1.bf16.msra.mxu0 %v10321_v50  ;;  %7136 = vmatpush1.bf16.msra.mxu1 %v10322_v26  ;;  %9557 = vtanh.f32 %v5970_v53  ;;  %v5976_v19 = vadd.f32 %v5912_v31, %v5730_v1  ;;  %v6149_v53 = vmul.f32 0.5, %v5971_v34  ;;  %v10325_v55 = vld [vmem:[#allocation9 + $0xc0] ss:$16 sps:$4 sm:$0xff]  }
 0x7a5   :  { %v9540_v58 = vpop.eup %9539  ;;  %v13108_v3 = vadd.f32 %v6227_v59, %v6211_v52  ;;  %v6070_v62 = vmul.f32 0.5, %v5973_v16  ;;  %7024 = vmatprep.subr.bf16.mxu0 %v10323_v33  ;;  %7137 = vmatprep.subr.bf16.mxu1 %v10324_v39  ;;  %v14511_v52 = vunpack.c.h.bf16 %v14499_v21  ;;  %v5977_v46 = vadd.f32 %v14512_v35, %v5732_v23  ;;  %v10326_v21 = vld [vmem:[#allocation9 + $0xc8] ss:$16 sps:$4 sm:$0xff]   ;;  %v10327_v1 = vld [vmem:[#allocation9 + $0xe4] ss:$16 sps:$4 sm:$0xff]  }
 0x7a6   :  { %v9542_v14 = vpop.eup %9541  ;;  %v6007_v15 = vmul.f32 0.5, %v5976_v19  ;;  %v5979_v31 = vadd.f32 %v14513_v4, %v5845_v8  ;;  %v6272_v59 = vmul.f32 %v9540_v58, %v6192_v49  ;;  %v6150_v24 = vmul.f32 0.5, %v5975_v43  ;;  %v10328_v34 = vld [vmem:[#allocation9 + $0xec] ss:$16 sps:$4 sm:$0xff]   ;;  %v10329_v33 = vld [vmem:[#allocation9 + $0xe0] ss:$16 sps:$4 sm:$0xff]  }
 0x7a7   :  { %9559 = vtanh.f32 %v13108_v3  ;;  %v6036_v41 = vmul.f32 0.5, %v9542_v14  ;;  %v13115_v11 = vadd.f32 %v14511_v52, %v5843_v32  ;;  %v9544_v51 = vpop.eup %9543  ;;  %v6071_v54 = vmul.f32 0.5, %v5977_v46  ;;  %v14514_v23 = vld [vmem:[#allocation137_spill] sm:$0xff]  ;;  %v14515_v14 = vld [vmem:[#allocation138_spill] sm:$0xff] }
 0x7a8   :  { %9561 = vtanh.f32 %v6006_v0  ;;  %v9546_v25 = vpop.eup %9545  ;;  %v6100_v37 = vmul.f32 0.5, %v9544_v51  ;;  %7025 = vmatpush1.bf16.msra.mxu0 %v10325_v55  ;;  %7138 = vmatpush1.bf16.msra.mxu1 %v10326_v21  ;;  %v5924_v8 = vunpack.c.l.bf16 %v14514_v23  ;;  %v6194_v26 = vadd.f32 0.5, %v6178_v47 }
 0x7a9   :  { %v6052_v48 = vadd.f32 0.5, %v6036_v41  ;;  %9563 = vtanh.f32 %v6070_v62  ;;  %v6273_v9 = vmul.f32 %v9546_v25, %v6193_v61  ;;  %7026 = vmatprep.subr.bf16.mxu0 %v10327_v1  ;;  %7139 = vmatprep.subr.bf16.mxu1 %v10328_v34  ;;  %v9548_v32 = vpop.eup %9547  ;;  %v5926_v49 = vunpack.c.l.bf16 %v14515_v14 }
 0x7aa   :  { %9565 = vtanh.f32 %v5974_v13  ;;  %v6116_v16 = vadd.f32 0.5, %v6100_v37  ;;  %v9550_v0 = vpop.eup %9549  ;;  %v6151_v58 = vmul.f32 0.5, %v5979_v31  ;;  %v6195_v41 = vadd.f32 0.5, %v6179_v36 }
 0x7ab   :  { %v6212_v27 = vmul.f32 %v6052_v48, %v12887_v7  ;;  %9567 = vtanh.f32 %v6007_v15  ;;  %v6321_v50 = vpack.c.bf16 %v6273_v9, %v6272_v59  ;;  %v13124_v61 = vpop.eup %9551  ;;  %v6037_v43 = vmul.f32 0.5, %v9550_v0  ;;  %v10330_v7 = vld [vmem:[#allocation9 + $0xe8] ss:$16 sps:$4 sm:$0xff]  }
 0x7ac   :  { %9569 = vtanh.f32 %v6149_v53  ;;  %v6228_v13 = vmul.f32 %v9548_v32, %v6116_v16  ;;  %7027 = vmatpush1.bf16.msra.mxu0 %v10329_v33  ;;  %7140 = vmatpush1.bf16.msra.mxu1 %v10330_v7  ;;  %v9554_v39 = vpop.eup %9553  ;;  %v14516_v47 = vunpack.c.l.bf16 %v14502_v45  ;;  %v14517_v35 = vunpack.c.l.bf16 %v14503_v2  ;;  %v10332_v16 = vld [vmem:[#allocation9 + $0xc] ss:$16 sps:$4 sm:$0xff]  }
 0x7ad   :  { %9571 = vtanh.f32 %v6071_v54  ;;  %6380 = vmatmul.mubr.bf16.gmra.mrb[168].mxu0 %v6321_v50  ;;  %6493 = vmatmul.mubr.bf16.gmra.mrb[168].mxu1 %v6321_v50  ;;  %v9556_v15 = vpop.eup %9555  ;;  %v6053_v31 = vadd.f32 0.5, %v6037_v43  ;;  %v6101_v25 = vmul.f32 0.5, %v9554_v39  ;;  %v14518_v48 = vunpack.c.l.bf16 %v14507_v6 }
 0x7ae   :  { %v5736_v62 = vpop.f32.mrb[152].mxu0  ;;  %v5849_v19 = vpop.f32.mrb[152].mxu1  ;;  %9573 = vtanh.f32 %v6150_v24  ;;  %v13130_v4 = vadd.f32 %v6228_v13, %v6212_v27  ;;  %6389 = vmatprep.mubr.bf16.mxu0 %v14015_v44  ;;  %6502 = vmatprep.mubr.bf16.mxu1 %v14015_v44  ;;  %v14519_v59 = vunpack.c.l.bf16 %v14508_v5  ;;  %v14520_v24 = vunpack.c.h.bf16 %v14502_v45  ;;  %v10331_v27 = vld [vmem:[#allocation9 + $0x4] ss:$16 sps:$4 sm:$0xff]  }
 0x7af   :  { %v5980_v52 = vadd.f32 %v14516_v47, %v5736_v62  ;;  %v5982_v46 = vadd.f32 %v14517_v35, %v5849_v19  ;;  %v5738_v51 = vpop.f32.mrb[153].mxu0  ;;  %v5851_v53 = vpop.f32.mrb[153].mxu1  ;;  %9575 = vtanh.f32 %v13115_v11  ;;  %7697 = vmatprep.subr.bf16.mxu0 %v10331_v27  ;;  %7810 = vmatprep.subr.bf16.mxu1 %v10332_v16  ;;  %v6213_v50 = vmul.f32 %v6053_v31, %v12904_v22 }
 0x7b0   :  { %v5981_v37 = vadd.f32 %v14518_v48, %v5738_v51  ;;  %v5740_v36 = vpop.f32.mrb[154].mxu0  ;;  %v5853_v54 = vpop.f32.mrb[154].mxu1  ;;  %v5983_v9 = vadd.f32 %v14519_v59, %v5851_v53  ;;  %v6117_v13 = vadd.f32 0.5, %v6101_v25  ;;  %9577 = vtanh.f32 %v6151_v58 }
 0x7b1   :  { %v9558_v55 = vpop.eup %9557  ;;  %v6008_v21 = vmul.f32 0.5, %v5980_v52  ;;  %v5984_v1 = vadd.f32 %v14520_v24, %v5740_v36  ;;  %v5742_v34 = vpop.f32.mrb[155].mxu0  ;;  %v5928_v11 = vunpack.c.h.bf16 %v14514_v23  ;;  %v6274_v62 = vmul.f32 %v9556_v15, %v6194_v26 }
 0x7b2   :  { %v5855_v32 = vpop.f32.mrb[155].mxu1  ;;  %v9560_v0 = vpop.eup %9559  ;;  %v6072_v33 = vmul.f32 0.5, %v5981_v37  ;;  %v6229_v7 = vmul.f32 %v9558_v55, %v6117_v13  ;;  %v14521_v22 = vunpack.c.h.bf16 %v14503_v2  ;;  %v5930_v15 = vunpack.c.h.bf16 %v14515_v14 }
 0x7b3   :  { %v9562_v43 = vpop.eup %9561  ;;  %v6275_v19 = vmul.f32 %v9560_v0, %v6195_v41  ;;  %9579 = vtanh.f32 %v6008_v21  ;;  %v6009_v47 = vmul.f32 0.5, %v5984_v1  ;;  %v5985_v48 = vadd.f32 %v5921_v57, %v5742_v34 }
 0x7b4   :  { %v9564_v45 = vpop.eup %9563  ;;  %v6038_v39 = vmul.f32 0.5, %v9562_v43  ;;  %9581 = vtanh.f32 %v5982_v46  ;;  %v13145_v53 = vadd.f32 %v14521_v22, %v5853_v54  ;;  %v13148_v26 = vadd.f32 %v6229_v7, %v6213_v50  ;;  %v14522_v54 = vld [vmem:[#allocation139_spill] sm:$0xff] }
 0x7b5   :  { %v9566_v52 = vpop.eup %9565  ;;  %v6322_v35 = vpack.c.bf16 %v6275_v19, %v6274_v62  ;;  %v6102_v51 = vmul.f32 0.5, %v9564_v45  ;;  %9583 = vtanh.f32 %v6072_v33  ;;  %v13157_v36 = vadd.f32 %v5923_v29, %v5855_v32 }
 0x7b6   :  { %v9568_v58 = vpop.eup %9567  ;;  %9585 = vtanh.f32 %v13130_v4  ;;  %v6054_v41 = vadd.f32 0.5, %v6038_v39  ;;  %v5925_v55 = vunpack.c.l.bf16 %v14522_v54  ;;  %v6152_v24 = vmul.f32 0.5, %v5983_v9 }
 0x7b7   :  { %v9570_v31 = vpop.eup %9569  ;;  %v6118_v25 = vadd.f32 0.5, %v6102_v51  ;;  %v6039_v46 = vmul.f32 0.5, %v9568_v58  ;;  %9587 = vtanh.f32 %v6009_v47  ;;  %6390 = vmatmul.mubr.bf16.gmra.mrb[172].mxu0 %v6322_v35  ;;  %6503 = vmatmul.mubr.bf16.gmra.mrb[172].mxu1 %v6322_v35  ;;  %v6073_v1 = vmul.f32 0.5, %v5985_v48 }
 0x7b8   :  { %v9572_v2 = vpop.eup %9571  ;;  %9589 = vtanh.f32 %v13148_v26  ;;  %v6214_v37 = vmul.f32 %v6054_v41, %v12919_v18  ;;  %6399 = vmatprep.mubr.bf16.mxu0 %v14015_v44  ;;  %6512 = vmatprep.mubr.bf16.mxu1 %v14015_v44  ;;  %v14523_v18 = vld [vmem:[#allocation140_spill] sm:$0xff]  ;;  %v5929_v5 = vunpack.c.h.bf16 %v14522_v54  ;;  %v6180_v33 = vmul.f32 0.5, %v13124_v61 }
 0x7b9   :  { %v13162_v21 = vpop.eup %9573  ;;  %v6230_v6 = vmul.f32 %v9566_v52, %v6118_v25  ;;  %v6055_v57 = vadd.f32 0.5, %v6039_v46  ;;  %v6103_v59 = vmul.f32 0.5, %v9572_v2  ;;  %v5746_v34 = vpop.f32.mrb[156].mxu0  ;;  %v5927_v16 = vunpack.c.l.bf16 %v14523_v18 }
 0x7ba   :  { %v5859_v27 = vpop.f32.mrb[156].mxu1  ;;  %v5931_v29 = vunpack.c.h.bf16 %v14523_v18  ;;  %v9576_v32 = vpop.eup %9575  ;;  %v5988_v43 = vadd.f32 %v5924_v8, %v5746_v34  ;;  %9591 = vtanh.f32 %v6073_v1  ;;  %v6181_v35 = vmul.f32 0.5, %v9570_v31 }
 0x7bb   :  { %v13167_v0 = vadd.f32 %v6230_v6, %v6214_v37  ;;  %v6215_v50 = vmul.f32 %v6055_v57, %v12934_v20  ;;  %v6119_v13 = vadd.f32 0.5, %v6103_v59  ;;  %v5748_v62 = vpop.f32.mrb[157].mxu0  ;;  %v5861_v9 = vpop.f32.mrb[157].mxu1  ;;  %v5990_v45 = vadd.f32 %v5926_v49, %v5859_v27 }
 0x7bc   :  { %v9578_v19 = vpop.eup %9577  ;;  %v5989_v7 = vadd.f32 %v5925_v55, %v5748_v62  ;;  %v5750_v39 = vpop.f32.mrb[158].mxu0  ;;  %9593 = vtanh.f32 %v6152_v24  ;;  %v6010_v20 = vmul.f32 0.5, %v5988_v43  ;;  %v5991_v61 = vadd.f32 %v5927_v16, %v5861_v9 }
 0x7bd   :  { %v5863_v47 = vpop.f32.mrb[158].mxu1  ;;  %v9580_v52 = vpop.eup %9579  ;;  %v6231_v51 = vmul.f32 %v9576_v32, %v6119_v13  ;;  %9595 = vtanh.f32 %v13167_v0  ;;  %v5992_v14 = vadd.f32 %v5928_v11, %v5750_v39  ;;  %v6196_v2 = vadd.f32 0.5, %v6180_v33 }
 0x7be   :  { %v5752_v22 = vpop.f32.mrb[159].mxu0  ;;  %v5865_v58 = vpop.f32.mrb[159].mxu1  ;;  %v6040_v41 = vmul.f32 0.5, %v9580_v52  ;;  %v6074_v25 = vmul.f32 0.5, %v5989_v7  ;;  %9597 = vtanh.f32 %v6010_v20  ;;  %v5994_v49 = vadd.f32 %v5930_v15, %v5863_v47 }
 0x7bf   :  { %v9582_v8 = vpop.eup %9581  ;;  %v13176_v48 = vadd.f32 %v6231_v51, %v6215_v50  ;;  %9599 = vtanh.f32 %v13145_v53  ;;  %v6197_v6 = vadd.f32 0.5, %v6181_v35  ;;  %v6011_v57 = vmul.f32 0.5, %v5992_v14 }
 0x7c0   :  { %v9584_v46 = vpop.eup %9583  ;;  %v6056_v37 = vadd.f32 0.5, %v6040_v41  ;;  %v5993_v59 = vadd.f32 %v5929_v5, %v5752_v22  ;;  %v6153_v15 = vmul.f32 0.5, %v13157_v36  ;;  %v5995_v53 = vadd.f32 %v5931_v29, %v5865_v58 }
 0x7c1   :  { %v9586_v31 = vpop.eup %9585  ;;  %v6104_v54 = vmul.f32 0.5, %v9584_v46  ;;  %9601 = vtanh.f32 %v13176_v48  ;;  %v6182_v5 = vmul.f32 0.5, %v13162_v21  ;;  %v6183_v43 = vmul.f32 0.5, %v9578_v19 }
 0x7c2   :  { %v9588_v55 = vpop.eup %9587  ;;  %v6216_v1 = vmul.f32 %v6056_v37, %v12938_v60  ;;  %9603 = vtanh.f32 %v6074_v25  ;;  %v6276_v23 = vmul.f32 %v9586_v31, %v6196_v2  ;;  %v6075_v18 = vmul.f32 0.5, %v5993_v59 }
 0x7c3   :  { %v9590_v24 = vpop.eup %9589  ;;  %v6120_v34 = vadd.f32 0.5, %v6104_v54  ;;  %v6041_v27 = vmul.f32 0.5, %v9588_v55  ;;  %9605 = vtanh.f32 %v6011_v57  ;;  %v6198_v21 = vadd.f32 0.5, %v6182_v5 }
 0x7c4   :  { %v6277_v11 = vmul.f32 %v9590_v24, %v6197_v6  ;;  %9607 = vtanh.f32 %v5990_v45  ;;  %v9592_v13 = vpop.eup %9591  ;;  %v6199_v19 = vadd.f32 0.5, %v6183_v43  ;;  %v6154_v58 = vmul.f32 0.5, %v5991_v61 }
 0x7c5   :  { %v6232_v16 = vmul.f32 %v9582_v8, %v6120_v34  ;;  %v6057_v50 = vadd.f32 0.5, %v6041_v27  ;;  %9609 = vtanh.f32 %v6075_v18  ;;  %v6105_v9 = vmul.f32 0.5, %v9592_v13 }
 0x7c6   :  { %v6323_v32 = vpack.c.bf16 %v6277_v11, %v6276_v23  ;;  %v9594_v60 = vpop.eup %9593  ;;  %9611 = vtanh.f32 %v6153_v15  ;;  %v6155_v25 = vmul.f32 0.5, %v5995_v53 }
 0x7c7   :  { %v13185_v62 = vadd.f32 %v6232_v16, %v6216_v1  ;;  %v9596_v36 = vpop.eup %9595  ;;  %v6217_v33 = vmul.f32 %v6057_v50, %v12944_v10  ;;  %v6121_v45 = vadd.f32 0.5, %v6105_v9  ;;  %9613 = vtanh.f32 %v5994_v49 }
 0x7c8   :  { %6400 = vmatmul.mubr.bf16.gmra.mrb[176].mxu0 %v6323_v32  ;;  %6513 = vmatmul.mubr.bf16.gmra.mrb[176].mxu1 %v6323_v32  ;;  %v9598_v29 = vpop.eup %9597  ;;  %v6278_v51 = vmul.f32 %v9596_v36, %v6198_v21  ;;  %v6184_v1 = vmul.f32 0.5, %v9594_v60  ;;  %v14524_v21 = vld [vmem:[#allocation141_spill] sm:$0xff] }
 0x7c9   :  { %6409 = vmatprep.mubr.bf16.mxu0 %v14015_v44  ;;  %6522 = vmatprep.mubr.bf16.mxu1 %v14015_v44  ;;  %v9600_v7 = vpop.eup %9599  ;;  %v6042_v39 = vmul.f32 0.5, %v9598_v29  ;;  %9615 = vtanh.f32 %v13185_v62 }
 0x7ca   :  { %v6233_v52 = vmul.f32 %v9600_v7, %v6121_v45  ;;  %v6200_v15 = vadd.f32 0.5, %v6184_v1 }
 0x7cb   :  { %v9602_v47 = vpop.eup %9601  ;;  %v6058_v22 = vadd.f32 0.5, %v6042_v39  ;;  %v14525_v39 = vld [vmem:[#allocation142_spill] sm:$0xff] }
 0x7cc   :  { %v9604_v35 = vpop.eup %9603  ;;  %v6279_v20 = vmul.f32 %v9602_v47, %v6199_v19  ;;  %v13191_v8 = vadd.f32 %v6233_v52, %v6217_v33  ;;  %v6553_v19 = vunpack.c.l.bf16 %v14524_v21  ;;  %v6555_v47 = vunpack.c.l.bf16 %v14525_v39 }
 0x7cd   :  { %v6106_v41 = vmul.f32 0.5, %v9604_v35  ;;  %v9606_v10 = vpop.eup %9605  ;;  %v6218_v49 = vmul.f32 %v6058_v22, %v12950_v17  ;;  %v14527_v22 = vld [vmem:[#allocation144_spill] sm:$0xff] }
 0x7ce   :  { %v6324_v46 = vpack.c.bf16 %v6279_v20, %v6278_v51  ;;  %v9608_v14 = vpop.eup %9607  ;;  %9617 = vtanh.f32 %v13191_v8  ;;  %v6043_v2 = vmul.f32 0.5, %v9606_v10  ;;  %v14526_v51 = vld [vmem:[#allocation143_spill] sm:$0xff] }
 0x7cf   :  { %v6122_v31 = vadd.f32 0.5, %v6106_v41  ;;  %v9610_v37 = vpop.eup %9609  ;;  %9619 = vtanh.f32 %v6154_v58  ;;  %v6554_v20 = vunpack.c.l.bf16 %v14526_v51  ;;  %v6556_v58 = vunpack.c.l.bf16 %v14527_v22 }
 0x7d0   :  { %6410 = vmatmul.mubr.bf16.gmra.mrb[180].mxu0 %v6324_v46  ;;  %6523 = vmatmul.mubr.bf16.gmra.mrb[180].mxu1 %v6324_v46  ;;  %v9612_v61 = vpop.eup %9611  ;;  %v6059_v55 = vadd.f32 0.5, %v6043_v2  ;;  %v6107_v6 = vmul.f32 0.5, %v9610_v37  ;;  %9621 = vtanh.f32 %v6155_v25 }
 0x7d1   :  { %v6234_v54 = vmul.f32 %v9608_v14, %v6122_v31  ;;  %6419 = vmatprep.mubr.bf16.mxu0 %v14015_v44  ;;  %6532 = vmatprep.mubr.bf16.mxu1 %v14015_v44  ;;  %v9614_v24 = vpop.eup %9613  ;;  %v6185_v34 = vmul.f32 0.5, %v9612_v61  ;;  %v6557_v14 = vunpack.c.h.bf16 %v14524_v21 }
 0x7d2   :  { %v6219_v59 = vmul.f32 %v6059_v55, %v12954_v28  ;;  %v6123_v17 = vadd.f32 0.5, %v6107_v6  ;;  %v6560_v55 = vunpack.c.h.bf16 %v14527_v22 }
 0x7d3   :  { %v13197_v57 = vadd.f32 %v6234_v54, %v6218_v49  ;;  %v9616_v23 = vpop.eup %9615  ;;  %v6201_v18 = vadd.f32 0.5, %v6185_v34  ;;  %v6559_v49 = vunpack.c.h.bf16 %v14525_v39  ;;  %v6558_v54 = vunpack.c.h.bf16 %v14526_v51 }
 0x7d4   :  { %v6235_v27 = vmul.f32 %v9614_v24, %v6123_v17  ;;  %v6280_v32 = vmul.f32 %v9616_v23, %v6200_v15 }
 0x7d5   :  { %9623 = vtanh.f32 %v13197_v57 }
 0x7d6   :  { %v13201_v11 = vadd.f32 %v6235_v27, %v6219_v59 }
 0x7d8   :  { %v9618_v16 = vpop.eup %9617  ;;  %9625 = vtanh.f32 %v13201_v11 }
 0x7d9   :  { %v9620_v53 = vpop.eup %9619  ;;  %v6281_v50 = vmul.f32 %v9618_v16, %v6201_v18  ;;  %v14528_v16 = vld [vmem:[#allocation145_spill] sm:$0xff] }
 0x7da   :  { %v9622_v13 = vpop.eup %9621  ;;  %v6186_v5 = vmul.f32 0.5, %v9620_v53  ;;  %v6561_v53 = vunpack.c.l.bf16 %v14528_v16 }
 0x7db   :  { %v6325_v28 = vpack.c.bf16 %v6281_v50, %v6280_v32  ;;  %v6187_v43 = vmul.f32 0.5, %v9622_v13  ;;  %v14529_v32 = vld [vmem:[#allocation146_spill] sm:$0xff] }
 0x7dc   :  { %v6202_v9 = vadd.f32 0.5, %v6186_v5  ;;  %v6563_v50 = vunpack.c.l.bf16 %v14529_v32  ;;  %v14530_v5 = vld [vmem:[#allocation147_spill] sm:$0xff]  ;;  %v6567_v21 = vunpack.c.h.bf16 %v14529_v32 }
 0x7dd   :  { %6420 = vmatmul.mubr.bf16.gmra.mrb[184].mxu0 %v6325_v28  ;;  %6533 = vmatmul.mubr.bf16.gmra.mrb[184].mxu1 %v6325_v28  ;;  %v6203_v36 = vadd.f32 0.5, %v6187_v43  ;;  %v6562_v43 = vunpack.c.l.bf16 %v14530_v5 }
 0x7de   :  { %6429 = vmatprep.mubr.bf16.mxu0 %v14015_v44  ;;  %6542 = vmatprep.mubr.bf16.mxu1 %v14015_v44 }
 0x7df   :  { %v9624_v60 = vpop.eup %9623 }
 0x7e0   :  { %v6282_v33 = vmul.f32 %v9624_v60, %v6202_v9  ;;  %v14531_v60 = vld [vmem:[#allocation148_spill] sm:$0xff] }
 0x7e1   :  { %v6564_v9 = vunpack.c.l.bf16 %v14531_v60 }
 0x7e2   :  { %v9626_v29 = vpop.eup %9625 }
 0x7e3   :  { %v6283_v45 = vmul.f32 %v9626_v29, %v6203_v36  ;;  %v6565_v36 = vunpack.c.h.bf16 %v14528_v16 }
 0x7e5   :  { %v6326_v7 = vpack.c.bf16 %v6283_v45, %v6282_v33 }
 0x7e7   :  { %6430 = vmatmul.mubr.bf16.gmra.mrb[188].mxu0 %v6326_v7  ;;  %6543 = vmatmul.mubr.bf16.gmra.mrb[188].mxu1 %v6326_v7 }
 0x7e8   :  { %7044 = vmatprep.mubr.bf16.mxu0 %v14015_v44  ;;  %7157 = vmatprep.mubr.bf16.mxu1 %v14015_v44 }
 0x85d   :  { %v6361_v52 = vpop.f32.mrb[160].mxu0  ;;  %v6474_v35 = vpop.f32.mrb[160].mxu1 }
 0x85e   :  { %v6617_v41 = vadd.f32 %v6553_v19, %v6361_v52  ;;  %v6619_v25 = vadd.f32 %v6555_v47, %v6474_v35  ;;  %v6363_v10 = vpop.f32.mrb[161].mxu0  ;;  %v6476_v46 = vpop.f32.mrb[161].mxu1  ;;  %v6566_v35 = vunpack.c.h.bf16 %v14530_v5 }
 0x85f   :  { %v6618_v31 = vadd.f32 %v6554_v20, %v6363_v10  ;;  %v6620_v2 = vadd.f32 %v6556_v58, %v6476_v46  ;;  %v6365_v37 = vpop.f32.mrb[162].mxu0  ;;  %v6478_v61 = vpop.f32.mrb[162].mxu1 }
 0x860   :  { %v6681_v6 = vmul.f32 0.5, %v6617_v41  ;;  %v6621_v59 = vadd.f32 %v6557_v14, %v6365_v37  ;;  %v6623_v17 = vadd.f32 %v6559_v49, %v6478_v61  ;;  %v6367_v24 = vpop.f32.mrb[163].mxu0  ;;  %v6480_v1 = vpop.f32.mrb[163].mxu1 }
 0x861   :  { %v6745_v34 = vmul.f32 0.5, %v6618_v31  ;;  %v6622_v27 = vadd.f32 %v6558_v54, %v6367_v24  ;;  %v6624_v23 = vadd.f32 %v6560_v55, %v6480_v1  ;;  %v6825_v61 = vmul.f32 0.5, %v6620_v2 }
 0x862   :  { %9627 = vtanh.f32 %v6681_v6  ;;  %v6682_v15 = vmul.f32 0.5, %v6621_v59 }
 0x863   :  { %9629 = vtanh.f32 %v6745_v34  ;;  %v6746_v18 = vmul.f32 0.5, %v6622_v27  ;;  %v6826_v6 = vmul.f32 0.5, %v6624_v23 }
 0x864   :  { %9631 = vtanh.f32 %v6682_v15 }
 0x865   :  { %9633 = vtanh.f32 %v6619_v25  ;;  %v6568_v25 = vunpack.c.h.bf16 %v14531_v60 }
 0x866   :  { %9635 = vtanh.f32 %v6746_v18 }
 0x867   :  { %v6371_v13 = vpop.f32.mrb[164].mxu0  ;;  %v6484_v28 = vpop.f32.mrb[164].mxu1  ;;  %9637 = vtanh.f32 %v6623_v17 }
 0x868   :  { %v6625_v29 = vadd.f32 %v6561_v53, %v6371_v13  ;;  %v6627_v33 = vadd.f32 %v6563_v50, %v6484_v28  ;;  %v6373_v45 = vpop.f32.mrb[165].mxu0  ;;  %v6486_v7 = vpop.f32.mrb[165].mxu1 }
 0x869   :  { %v6626_v19 = vadd.f32 %v6562_v43, %v6373_v45  ;;  %v6628_v39 = vadd.f32 %v6564_v9, %v6486_v7  ;;  %v6375_v47 = vpop.f32.mrb[166].mxu0  ;;  %v6488_v52 = vpop.f32.mrb[166].mxu1  ;;  %v14532_v45 = vld [vmem:[#allocation149_spill] sm:$0xff] }
 0x86a   :  { %v6683_v51 = vmul.f32 0.5, %v6625_v29  ;;  %v6629_v20 = vadd.f32 %v6565_v36, %v6375_v47  ;;  %v6631_v22 = vadd.f32 %v6567_v21, %v6488_v52  ;;  %v6377_v58 = vpop.f32.mrb[167].mxu0  ;;  %v6490_v41 = vpop.f32.mrb[167].mxu1  ;;  %v6569_v7 = vunpack.c.l.bf16 %v14532_v45  ;;  %v14533_v52 = vld [vmem:[#allocation150_spill] sm:$0xff] }
 0x86b   :  { %v6747_v10 = vmul.f32 0.5, %v6626_v19  ;;  %v6630_v46 = vadd.f32 %v6566_v35, %v6377_v58  ;;  %v6632_v49 = vadd.f32 %v6568_v25, %v6490_v41  ;;  %v6827_v32 = vmul.f32 0.5, %v6628_v39 }
 0x86c   :  { %9639 = vtanh.f32 %v6683_v51  ;;  %v6684_v14 = vmul.f32 0.5, %v6629_v20  ;;  %v9628_v37 = vpop.eup %9627  ;;  %v6573_v20 = vunpack.c.h.bf16 %v14532_v45 }
 0x86d   :  { %9641 = vtanh.f32 %v6747_v10  ;;  %v6748_v31 = vmul.f32 0.5, %v6630_v46  ;;  %v9630_v54 = vpop.eup %9629  ;;  %v6713_v55 = vmul.f32 0.5, %v9628_v37  ;;  %v6828_v9 = vmul.f32 0.5, %v6632_v49 }
 0x86e   :  { %9643 = vtanh.f32 %v6684_v14  ;;  %v6777_v59 = vmul.f32 0.5, %v9630_v54  ;;  %v9632_v24 = vpop.eup %9631  ;;  %v14534_v14 = vld [vmem:[#allocation151_spill] sm:$0xff] }
 0x86f   :  { %9645 = vtanh.f32 %v6627_v33  ;;  %v6729_v1 = vadd.f32 0.5, %v6713_v55  ;;  %v9634_v34 = vpop.eup %9633  ;;  %v6714_v27 = vmul.f32 0.5, %v9632_v24  ;;  %v6570_v49 = vunpack.c.l.bf16 %v14534_v14 }
 0x870   :  { %9647 = vtanh.f32 %v6748_v31  ;;  %v6793_v17 = vadd.f32 0.5, %v6777_v59  ;;  %v9636_v15 = vpop.eup %9635  ;;  %v14535_v31 = vld [vmem:[#allocation152_spill] sm:$0xff] }
 0x871   :  { %9649 = vtanh.f32 %v6825_v61  ;;  %v6889_v18 = vmul.f32 %v6729_v1, %v12985_v40  ;;  %v6730_v53 = vadd.f32 0.5, %v6714_v27  ;;  %v6778_v2 = vmul.f32 0.5, %v9636_v15  ;;  %v9638_v50 = vpop.eup %9637  ;;  %v14536_v1 = vld [vmem:[#allocation153_spill] sm:$0xff] }
 0x872   :  { %9651 = vtanh.f32 %v6826_v6  ;;  %v6905_v16 = vmul.f32 %v9634_v34, %v6793_v17  ;;  %v6572_v37 = vunpack.c.l.bf16 %v14535_v31  ;;  %v6574_v61 = vunpack.c.h.bf16 %v14534_v14 }
 0x873   :  { %9653 = vtanh.f32 %v6631_v22  ;;  %v6890_v28 = vmul.f32 %v6730_v53, %v12996_v30  ;;  %v6794_v5 = vadd.f32 0.5, %v6778_v2  ;;  %v6571_v30 = vunpack.c.l.bf16 %v14533_v52  ;;  %v14537_v53 = vld [vmem:[#allocation154_spill] sm:$0xff] }
 0x874   :  { %v13225_v13 = vadd.f32 %v6905_v16, %v6889_v18  ;;  %9655 = vtanh.f32 %v6827_v32  ;;  %v6575_v22 = vunpack.c.h.bf16 %v14533_v52  ;;  %v6577_v34 = vunpack.c.l.bf16 %v14536_v1 }
 0x875   :  { %v6906_v36 = vmul.f32 %v9638_v50, %v6794_v5  ;;  %v6579_v2 = vunpack.c.l.bf16 %v14537_v53  ;;  %v6581_v32 = vunpack.c.h.bf16 %v14536_v1 }
 0x876   :  { %v9640_v23 = vpop.eup %9639  ;;  %9657 = vtanh.f32 %v13225_v13 }
 0x877   :  { %v9642_v43 = vpop.eup %9641  ;;  %v6715_v60 = vmul.f32 0.5, %v9640_v23  ;;  %v13230_v19 = vadd.f32 %v6906_v36, %v6890_v28  ;;  %9659 = vtanh.f32 %v6828_v9 }
 0x878   :  { %v6779_v29 = vmul.f32 0.5, %v9642_v43  ;;  %v9644_v40 = vpop.eup %9643 }
 0x879   :  { %v6731_v33 = vadd.f32 0.5, %v6715_v60  ;;  %v9646_v21 = vpop.eup %9645  ;;  %v6716_v47 = vmul.f32 0.5, %v9644_v40  ;;  %9661 = vtanh.f32 %v13230_v19 }
 0x87a   :  { %v6795_v39 = vadd.f32 0.5, %v6779_v29  ;;  %v9648_v35 = vpop.eup %9647 }
 0x87b   :  { %v6891_v51 = vmul.f32 %v6731_v33, %v13007_v38  ;;  %v9650_v58 = vpop.eup %9649  ;;  %v6732_v25 = vadd.f32 0.5, %v6716_v47  ;;  %v6780_v10 = vmul.f32 0.5, %v9648_v35  ;;  %v6576_v38 = vunpack.c.h.bf16 %v14535_v31 }
 0x87c   :  { %v6907_v41 = vmul.f32 %v9646_v21, %v6795_v39  ;;  %v9652_v46 = vpop.eup %9651  ;;  %v6857_v50 = vmul.f32 0.5, %v9650_v58  ;;  %v6583_v35 = vunpack.c.h.bf16 %v14537_v53  ;;  %v14539_v58 = vld [vmem:[#allocation156_spill] sm:$0xff] }
 0x87d   :  { %v6892_v55 = vmul.f32 %v6732_v25, %v13020_v42  ;;  %v6796_v6 = vadd.f32 0.5, %v6780_v10  ;;  %v9654_v17 = vpop.eup %9653  ;;  %v6858_v60 = vmul.f32 0.5, %v9652_v46 }
 0x87e   :  { %v13241_v54 = vadd.f32 %v6907_v41, %v6891_v51  ;;  %v9656_v45 = vpop.eup %9655  ;;  %v6873_v51 = vadd.f32 0.5, %v6857_v50  ;;  %v6580_v41 = vunpack.c.l.bf16 %v14539_v58 }
 0x87f   :  { %v6908_v23 = vmul.f32 %v9654_v17, %v6796_v6  ;;  %v6874_v10 = vadd.f32 0.5, %v6858_v60  ;;  %v6584_v6 = vunpack.c.h.bf16 %v14539_v58 }
 0x880   :  { %v6381_v59 = vpop.f32.mrb[168].mxu0  ;;  %v6494_v24 = vpop.f32.mrb[168].mxu1  ;;  %9663 = vtanh.f32 %v13241_v54 }
 0x881   :  { %v6633_v27 = vadd.f32 %v6569_v7, %v6381_v59  ;;  %v6635_v15 = vadd.f32 %v6571_v30, %v6494_v24  ;;  %v6383_v18 = vpop.f32.mrb[169].mxu0  ;;  %v6496_v16 = vpop.f32.mrb[169].mxu1  ;;  %v13248_v7 = vadd.f32 %v6908_v23, %v6892_v55 }
 0x882   :  { %v6634_v28 = vadd.f32 %v6570_v49, %v6383_v18  ;;  %v6636_v5 = vadd.f32 %v6572_v37, %v6496_v16  ;;  %v6385_v43 = vpop.f32.mrb[170].mxu0  ;;  %v6498_v42 = vpop.f32.mrb[170].mxu1  ;;  %v6859_v37 = vmul.f32 0.5, %v9656_v45 }
 0x883   :  { %v6685_v9 = vmul.f32 0.5, %v6633_v27  ;;  %v6637_v36 = vadd.f32 %v6573_v20, %v6385_v43  ;;  %v6639_v29 = vadd.f32 %v6575_v22, %v6498_v42  ;;  %v6387_v40 = vpop.f32.mrb[171].mxu0  ;;  %v6500_v33 = vpop.f32.mrb[171].mxu1  ;;  %v14538_v20 = vld [vmem:[#allocation155_spill] sm:$0xff] }
 0x884   :  { %v6749_v21 = vmul.f32 0.5, %v6634_v28  ;;  %v6638_v39 = vadd.f32 %v6574_v61, %v6387_v40  ;;  %v9658_v47 = vpop.eup %9657  ;;  %v6640_v30 = vadd.f32 %v6576_v38, %v6500_v33  ;;  %v6578_v22 = vunpack.c.l.bf16 %v14538_v20 }
 0x885   :  { %9665 = vtanh.f32 %v6685_v9  ;;  %v6686_v52 = vmul.f32 0.5, %v6637_v36  ;;  %v9660_v25 = vpop.eup %9659  ;;  %v6582_v14 = vunpack.c.h.bf16 %v14538_v20  ;;  %v6953_v31 = vmul.f32 %v9658_v47, %v6873_v51  ;;  %v10333_v20 = vld [vmem:[#allocation9] ss:$16 sps:$4 sm:$0xff]  }
 0x886   :  { %9667 = vtanh.f32 %v13248_v7  ;;  %v6750_v46 = vmul.f32 0.5, %v6638_v39  ;;  %v9662_v49 = vpop.eup %9661  ;;  %v6829_v61 = vmul.f32 0.5, %v6636_v5  ;;  %v6860_v18 = vmul.f32 0.5, %v9660_v25  ;;  %v14541_v39 = vld [vmem:[#allocation158_spill] sm:$0xff] }
 0x887   :  { %9669 = vtanh.f32 %v6749_v21  ;;  %v6954_v59 = vmul.f32 %v9662_v49, %v6874_v10  ;;  %v6830_v9 = vmul.f32 0.5, %v6640_v30  ;;  %v6587_v47 = vunpack.c.l.bf16 %v14541_v39 }
 0x888   :  { %9671 = vtanh.f32 %v6686_v52  ;;  %v6875_v30 = vadd.f32 0.5, %v6859_v37  ;;  %v6591_v10 = vunpack.c.h.bf16 %v14541_v39 }
 0x889   :  { %9673 = vtanh.f32 %v6635_v15  ;;  %v7004_v28 = vpack.c.bf16 %v6954_v59, %v6953_v31  ;;  %v14540_v15 = vld [vmem:[#allocation157_spill] sm:$0xff] }
 0x88a   :  { %v6391_v38 = vpop.f32.mrb[172].mxu0  ;;  %v6504_v55 = vpop.f32.mrb[172].mxu1  ;;  %9675 = vtanh.f32 %v6750_v46  ;;  %v6585_v33 = vunpack.c.l.bf16 %v14540_v15  ;;  %v10335_v46 = vld [vmem:[#allocation9 + $0x24] ss:$16 sps:$4 sm:$0xff]  }
 0x88b   :  { %v6641_v24 = vadd.f32 %v6577_v34, %v6391_v38  ;;  %v6643_v1 = vadd.f32 %v6579_v2, %v6504_v55  ;;  %v6393_v17 = vpop.f32.mrb[173].mxu0  ;;  %v6506_v27 = vpop.f32.mrb[173].mxu1  ;;  %9677 = vtanh.f32 %v6829_v61  ;;  %7045 = vmatmul.mubr.bf16.vlgmr.msra.gmra.mrb[192].mxu0 %v7004_v28  ;;  %7158 = vmatmul.mubr.bf16.vlgmr.msra.gmra.mrb[192].mxu1 %v7004_v28  ;;  %v14543_v61 = vld [vmem:[#allocation160_spill] sm:$0xff] }
 0x88c   :  { %v6642_v16 = vadd.f32 %v6578_v22, %v6393_v17  ;;  %v13256_v53 = vadd.f32 %v6580_v41, %v6506_v27  ;;  %v6395_v50 = vpop.f32.mrb[174].mxu0  ;;  %v6508_v23 = vpop.f32.mrb[174].mxu1  ;;  %7054 = vmatprep.mubr.bf16.mxu0 %v14015_v44  ;;  %7167 = vmatprep.mubr.bf16.mxu1 %v14015_v44  ;;  %v10334_v22 = vld [vmem:[#allocation9 + $0x8] ss:$16 sps:$4 sm:$0xff]   ;;  %v14542_v41 = vld [vmem:[#allocation159_spill] sm:$0xff]  ;;  %v6588_v38 = vunpack.c.l.bf16 %v14543_v61  ;;  %v6592_v27 = vunpack.c.h.bf16 %v14543_v61 }
 0x88d   :  { %v6687_v5 = vmul.f32 0.5, %v6641_v24  ;;  %v6645_v43 = vadd.f32 %v6581_v32, %v6395_v50  ;;  %v6397_v42 = vpop.f32.mrb[175].mxu0  ;;  %v6510_v60 = vpop.f32.mrb[175].mxu1  ;;  %v13258_v34 = vadd.f32 %v6583_v35, %v6508_v23  ;;  %v6589_v32 = vunpack.c.h.bf16 %v14540_v15  ;;  %7698 = vmatpush1.bf16.msra.mxu0 %v10333_v20  ;;  %7811 = vmatpush1.bf16.msra.mxu1 %v10334_v22  ;;  %v10337_v50 = vld [vmem:[#allocation9 + $0x20] ss:$16 sps:$4 sm:$0xff]  }
 0x88e   :  { %v6751_v36 = vmul.f32 0.5, %v6642_v16  ;;  %v6646_v40 = vadd.f32 %v6582_v14, %v6397_v42  ;;  %v9664_v45 = vpop.eup %9663  ;;  %v6648_v21 = vadd.f32 %v6584_v6, %v6510_v60  ;;  %v6876_v35 = vadd.f32 0.5, %v6860_v18  ;;  %7699 = vmatprep.subr.bf16.mxu0 %v10335_v46  ;;  %v10336_v14 = vld [vmem:[#allocation9 + $0x2c] ss:$16 sps:$4 sm:$0xff]   ;;  %v10338_v23 = vld [vmem:[#allocation9 + $0x28] ss:$16 sps:$4 sm:$0xff]  }
 0x88f   :  { %9679 = vtanh.f32 %v6687_v5  ;;  %v6688_v2 = vmul.f32 0.5, %v6645_v43  ;;  %v9666_v52 = vpop.eup %9665  ;;  %v6586_v25 = vunpack.c.l.bf16 %v14542_v41  ;;  %7812 = vmatprep.subr.bf16.mxu1 %v10336_v14  ;;  %v6955_v31 = vmul.f32 %v9664_v45, %v6875_v30  ;;  %v14544_v18 = vld [vmem:[#allocation161_spill] sm:$0xff]  ;;  %v14545_v60 = vld [vmem:[#allocation162_spill] sm:$0xff]  ;;  %v14546_v45 = vld [vmem:[#allocation163_spill] sm:$0xff] }
 0x890   :  { %9681 = vtanh.f32 %v6639_v29  ;;  %v6752_v51 = vmul.f32 0.5, %v6646_v40  ;;  %v9668_v58 = vpop.eup %9667  ;;  %v6717_v29 = vmul.f32 0.5, %v9666_v52  ;;  %v6590_v59 = vunpack.c.h.bf16 %v14542_v41  ;;  %v10347_v14 = vld [vmem:[#allocation9 + $0x84] ss:$16 sps:$4 sm:$0xff]   ;;  %v10354_v61 = vld [vmem:[#allocation9 + $0xa8] ss:$16 sps:$4 sm:$0xff]  }
 0x891   :  { %9683 = vtanh.f32 %v6751_v36  ;;  %v9670_v49 = vpop.eup %9669  ;;  %v6956_v37 = vmul.f32 %v9668_v58, %v6876_v35  ;;  %v6593_v16 = vunpack.c.l.bf16 %v14544_v18  ;;  %7700 = vmatpush1.bf16.msra.mxu0 %v10337_v50  ;;  %7813 = vmatpush1.bf16.msra.mxu1 %v10338_v23  ;;  %v10340_v36 = vld [vmem:[#allocation9 + $0x4c] ss:$16 sps:$4 sm:$0xff]   ;;  %v6831_v40 = vmul.f32 0.5, %v13256_v53 }
 0x892   :  { %9685 = vtanh.f32 %v6830_v9  ;;  %v6733_v55 = vadd.f32 0.5, %v6717_v29  ;;  %v6781_v6 = vmul.f32 0.5, %v9670_v49  ;;  %v9672_v24 = vpop.eup %9671  ;;  %v10339_v9 = vld [vmem:[#allocation9 + $0x44] ss:$16 sps:$4 sm:$0xff]   ;;  %7814 = vmatprep.subr.bf16.mxu1 %v10340_v36  ;;  %v6594_v52 = vunpack.c.l.bf16 %v14546_v45  ;;  %v10345_v49 = vld [vmem:[#allocation9 + $0x60] ss:$16 sps:$4 sm:$0xff]  }
 0x893   :  { %9687 = vtanh.f32 %v6688_v2  ;;  %v7005_v17 = vpack.c.bf16 %v6956_v37, %v6955_v31  ;;  %v9674_v28 = vpop.eup %9673  ;;  %v6718_v42 = vmul.f32 0.5, %v9672_v24  ;;  %7701 = vmatprep.subr.bf16.mxu0 %v10339_v9  ;;  %v6597_v30 = vunpack.c.h.bf16 %v14544_v18  ;;  %v14547_v53 = vld [vmem:[#allocation164_spill] sm:$0xff]  ;;  %v10341_v31 = vld [vmem:[#allocation9 + $0x40] ss:$16 sps:$4 sm:$0xff]  }
 0x894   :  { %9689 = vtanh.f32 %v6643_v1  ;;  %v6893_v5 = vmul.f32 %v6733_v55, %v13063_v56  ;;  %v6797_v43 = vadd.f32 0.5, %v6781_v6  ;;  %v6595_v1 = vunpack.c.l.bf16 %v14545_v60  ;;  %v9676_v2 = vpop.eup %9675  ;;  %v10342_v37 = vld [vmem:[#allocation9 + $0x48] ss:$16 sps:$4 sm:$0xff]  }
 0x895   :  { %9691 = vtanh.f32 %v6752_v51  ;;  %v6599_v35 = vunpack.c.h.bf16 %v14545_v60  ;;  %7055 = vmatmul.mubr.bf16.gmra.mrb[196].mxu0 %v7005_v17  ;;  %7168 = vmatmul.mubr.bf16.gmra.mrb[196].mxu1 %v7005_v17  ;;  %v13277_v56 = vpop.eup %9677  ;;  %v6734_v20 = vadd.f32 0.5, %v6718_v42  ;;  %v6782_v22 = vmul.f32 0.5, %v9676_v2  ;;  %v14548_v2 = vld [vmem:[#allocation165_spill] sm:$0xff] }
 0x896   :  { %v6909_v51 = vmul.f32 %v9674_v28, %v6797_v43  ;;  %v6832_v58 = vmul.f32 0.5, %v6648_v21  ;;  %7064 = vmatprep.mubr.bf16.mxu0 %v14015_v44  ;;  %7177 = vmatprep.mubr.bf16.mxu1 %v14015_v44  ;;  %9693 = vtanh.f32 %v13258_v34  ;;  %v6596_v46 = vunpack.c.l.bf16 %v14547_v53  ;;  %v10343_v34 = vld [vmem:[#allocation9 + $0x64] ss:$16 sps:$4 sm:$0xff]   ;;  %v10344_v28 = vld [vmem:[#allocation9 + $0x6c] ss:$16 sps:$4 sm:$0xff]  }
 0x897   :  { %7702 = vmatpush1.bf16.msra.mxu0 %v10341_v31  ;;  %7815 = vmatpush1.bf16.msra.mxu1 %v10342_v37  ;;  %v6894_v21 = vmul.f32 %v6734_v20, %v13082_v63  ;;  %v6798_v24 = vadd.f32 0.5, %v6782_v22  ;;  %9695 = vtanh.f32 %v6831_v40  ;;  %v10346_v63 = vld [vmem:[#allocation9 + $0x68] ss:$16 sps:$4 sm:$0xff]  }
 0x898   :  { %v13285_v6 = vadd.f32 %v6909_v51, %v6893_v5  ;;  %7703 = vmatprep.subr.bf16.mxu0 %v10343_v34  ;;  %7816 = vmatprep.subr.bf16.mxu1 %v10344_v28  ;;  %9697 = vtanh.f32 %v6832_v58 }
 0x899   :  { %v9680_v29 = vpop.eup %9679 }
 0x89a   :  { %v9682_v55 = vpop.eup %9681  ;;  %v6719_v17 = vmul.f32 0.5, %v9680_v29  ;;  %9699 = vtanh.f32 %v13285_v6 }
 0x89b   :  { %v6401_v50 = vpop.f32.mrb[176].mxu0  ;;  %v6514_v23 = vpop.f32.mrb[176].mxu1  ;;  %v6910_v20 = vmul.f32 %v9682_v55, %v6798_v24  ;;  %7704 = vmatpush1.bf16.msra.mxu0 %v10345_v49  ;;  %7817 = vmatpush1.bf16.msra.mxu1 %v10346_v63  ;;  %v6605_v49 = vunpack.c.h.bf16 %v14548_v2 }
 0x89c   :  { %v9684_v43 = vpop.eup %9683  ;;  %v6649_v42 = vadd.f32 %v6585_v33, %v6401_v50  ;;  %v6651_v9 = vadd.f32 %v6587_v47, %v6514_v23  ;;  %v6403_v5 = vpop.f32.mrb[177].mxu0  ;;  %v6735_v22 = vadd.f32 0.5, %v6719_v17  ;;  %v14549_v23 = vld [vmem:[#allocation166_spill] sm:$0xff]  ;;  %7705 = vmatprep.subr.bf16.mxu0 %v10347_v14 }
 0x89d   :  { %v6516_v36 = vpop.f32.mrb[177].mxu1  ;;  %v9686_v51 = vpop.eup %9685  ;;  %v6783_v29 = vmul.f32 0.5, %v9684_v43  ;;  %v6650_v33 = vadd.f32 %v6586_v25, %v6403_v5  ;;  %v13297_v24 = vadd.f32 %v6910_v20, %v6894_v21 }
 0x89e   :  { %v6405_v31 = vpop.f32.mrb[178].mxu0  ;;  %v6518_v37 = vpop.f32.mrb[178].mxu1  ;;  %v6689_v40 = vmul.f32 0.5, %v6649_v42  ;;  %v6895_v58 = vmul.f32 %v6735_v22, %v13093_v12  ;;  %v10348_v42 = vld [vmem:[#allocation9 + $0x8c] ss:$16 sps:$4 sm:$0xff]   ;;  %v6652_v28 = vadd.f32 %v6588_v38, %v6516_v36  ;;  %v6861_v12 = vmul.f32 0.5, %v13277_v56 }
 0x89f   :  { %v9688_v34 = vpop.eup %9687  ;;  %v6407_v50 = vpop.f32.mrb[179].mxu0  ;;  %v6799_v17 = vadd.f32 0.5, %v6783_v29  ;;  %7818 = vmatprep.subr.bf16.mxu1 %v10348_v42  ;;  %v6753_v5 = vmul.f32 0.5, %v6650_v33  ;;  %v6862_v22 = vmul.f32 0.5, %v9686_v51  ;;  %v6653_v14 = vadd.f32 %v6589_v32, %v6405_v31  ;;  %v10349_v29 = vld [vmem:[#allocation9 + $0x80] ss:$16 sps:$4 sm:$0xff]  }
 0x8a0   :  { %v6520_v47 = vpop.f32.mrb[179].mxu1  ;;  %v9690_v55 = vpop.eup %9689  ;;  %v6720_v43 = vmul.f32 0.5, %v9688_v34  ;;  %9701 = vtanh.f32 %v6689_v40  ;;  %7706 = vmatpush1.bf16.msra.mxu0 %v10349_v29  ;;  %v10350_v34 = vld [vmem:[#allocation9 + $0x88] ss:$16 sps:$4 sm:$0xff]   ;;  %v13312_v33 = vadd.f32 %v6591_v10, %v6518_v37  ;;  %v10352_v56 = vld [vmem:[#allocation9 + $0xac] ss:$16 sps:$4 sm:$0xff]   ;;  %v6654_v31 = vadd.f32 %v6590_v59, %v6407_v50 }
 0x8a1   :  { %v9692_v25 = vpop.eup %9691  ;;  %9703 = vtanh.f32 %v13297_v24  ;;  %v6911_v21 = vmul.f32 %v9690_v55, %v6799_v17  ;;  %7819 = vmatpush1.bf16.msra.mxu1 %v10350_v34  ;;  %v10351_v55 = vld [vmem:[#allocation9 + $0xa4] ss:$16 sps:$4 sm:$0xff]   ;;  %v6833_v15 = vmul.f32 0.5, %v6652_v28  ;;  %v6690_v32 = vmul.f32 0.5, %v6653_v14  ;;  %v10356_v29 = vld [vmem:[#allocation9 + $0xcc] ss:$16 sps:$4 sm:$0xff]  }
 0x8a2   :  { %v6736_v63 = vadd.f32 0.5, %v6720_v43  ;;  %v6784_v20 = vmul.f32 0.5, %v9692_v25  ;;  %9705 = vtanh.f32 %v6753_v5  ;;  %7707 = vmatprep.subr.bf16.mxu0 %v10351_v55  ;;  %7820 = vmatprep.subr.bf16.mxu1 %v10352_v56  ;;  %v9694_v51 = vpop.eup %9693  ;;  %v6656_v39 = vadd.f32 %v6592_v27, %v6520_v47  ;;  %v10353_v25 = vld [vmem:[#allocation9 + $0xa0] ss:$16 sps:$4 sm:$0xff]   ;;  %v10355_v14 = vld [vmem:[#allocation9 + $0xc4] ss:$16 sps:$4 sm:$0xff]  }
 0x8a3   :  { %v13307_v40 = vadd.f32 %v6911_v21, %v6895_v58  ;;  %9707 = vtanh.f32 %v6651_v9  ;;  %v6411_v58 = vpop.f32.mrb[180].mxu0  ;;  %v6524_v17 = vpop.f32.mrb[180].mxu1  ;;  %v6754_v9 = vmul.f32 0.5, %v6654_v31  ;;  %v6877_v34 = vadd.f32 0.5, %v6861_v12 }
 0x8a4   :  { %v6896_v38 = vmul.f32 %v6736_v63, %v13108_v3  ;;  %v6800_v36 = vadd.f32 0.5, %v6784_v20  ;;  %v6657_v10 = vadd.f32 %v6593_v16, %v6411_v58  ;;  %v6413_v37 = vpop.f32.mrb[181].mxu0  ;;  %v6526_v43 = vpop.f32.mrb[181].mxu1  ;;  %v13323_v41 = vadd.f32 %v6595_v1, %v6524_v17  ;;  %7708 = vmatpush1.bf16.msra.mxu0 %v10353_v25  ;;  %v14550_v63 = vld [vmem:[#allocation167_spill] sm:$0xff] }
 0x8a5   :  { %9709 = vtanh.f32 %v13307_v40  ;;  %v9696_v42 = vpop.eup %9695  ;;  %v6658_v59 = vadd.f32 %v6594_v52, %v6413_v37  ;;  %v6415_v50 = vpop.f32.mrb[182].mxu0  ;;  %7821 = vmatpush1.bf16.msra.mxu1 %v10354_v61  ;;  %v6602_v20 = vunpack.c.l.bf16 %v14550_v63  ;;  %v6607_v1 = vunpack.c.h.bf16 %v14549_v23  ;;  %7709 = vmatprep.subr.bf16.mxu0 %v10355_v14 }
 0x8a6   :  { %v6912_v3 = vmul.f32 %v9694_v51, %v6800_v36  ;;  %9711 = vtanh.f32 %v6690_v32  ;;  %v6528_v28 = vpop.f32.mrb[182].mxu1  ;;  %v9698_v27 = vpop.eup %9697  ;;  %v6691_v47 = vmul.f32 0.5, %v6657_v10  ;;  %7822 = vmatprep.subr.bf16.mxu1 %v10356_v29  ;;  %v6660_v55 = vadd.f32 %v6596_v46, %v6526_v43  ;;  %v10357_v46 = vld [vmem:[#allocation9 + $0xc0] ss:$16 sps:$4 sm:$0xff]   ;;  %v10358_v10 = vld [vmem:[#allocation9 + $0xc8] ss:$16 sps:$4 sm:$0xff]  }
 0x8a7   :  { %v6417_v5 = vpop.f32.mrb[183].mxu0  ;;  %v6530_v21 = vpop.f32.mrb[183].mxu1  ;;  %9713 = vtanh.f32 %v6754_v9  ;;  %v6755_v36 = vmul.f32 0.5, %v6658_v59  ;;  %v13338_v56 = vadd.f32 %v6599_v35, %v6528_v28  ;;  %v14551_v51 = vunpack.c.h.bf16 %v14546_v45  ;;  %v14553_v35 = vld [vmem:[#allocation168_spill] sm:$0xff] }
 0x8a8   :  { %v13327_v16 = vadd.f32 %v6912_v3, %v6896_v38  ;;  %v9700_v52 = vpop.eup %9699  ;;  %v6661_v38 = vadd.f32 %v6597_v30, %v6415_v50  ;;  %v6878_v58 = vadd.f32 0.5, %v6862_v22  ;;  %v6834_v12 = vmul.f32 0.5, %v6656_v39  ;;  %7710 = vmatpush1.bf16.msra.mxu0 %v10357_v46  ;;  %v10359_v43 = vld [vmem:[#allocation9 + $0xe4] ss:$16 sps:$4 sm:$0xff]   ;;  %v10360_v45 = vld [vmem:[#allocation9 + $0xec] ss:$16 sps:$4 sm:$0xff]  }
 0x8a9   :  { %v6662_v32 = vadd.f32 %v14551_v51, %v6417_v5  ;;  %v14552_v17 = vunpack.c.h.bf16 %v14547_v53  ;;  %7823 = vmatpush1.bf16.msra.mxu1 %v10358_v10  ;;  %v6604_v37 = vunpack.c.l.bf16 %v14553_v35  ;;  %7711 = vmatprep.subr.bf16.mxu0 %v10359_v43  ;;  %v6863_v9 = vmul.f32 0.5, %v9696_v42  ;;  %v10361_v5 = vld [vmem:[#allocation9 + $0xe0] ss:$16 sps:$4 sm:$0xff]  }
 0x8aa   :  { %9715 = vtanh.f32 %v13327_v16  ;;  %v9702_v31 = vpop.eup %9701  ;;  %v6692_v60 = vmul.f32 0.5, %v6661_v38  ;;  %7824 = vmatprep.subr.bf16.mxu1 %v10360_v45  ;;  %v6864_v61 = vmul.f32 0.5, %v9698_v27  ;;  %v14554_v27 = vld [vmem:[#allocation169_spill] sm:$0xff]  ;;  %v14556_v43 = vunpack.c.l.bf16 %v14548_v2 }
 0x8ab   :  { %9717 = vtanh.f32 %v6833_v15  ;;  %v6664_v3 = vadd.f32 %v14552_v17, %v6530_v21  ;;  %v9704_v18 = vpop.eup %9703  ;;  %v6721_v30 = vmul.f32 0.5, %v9702_v31  ;;  %v6957_v15 = vmul.f32 %v9700_v52, %v6877_v34  ;;  %v10362_v21 = vld [vmem:[#allocation9 + $0xe8] ss:$16 sps:$4 sm:$0xff]  }
 0x8ac   :  { %9719 = vtanh.f32 %v6691_v47  ;;  %v9706_v22 = vpop.eup %9705  ;;  %v6958_v39 = vmul.f32 %v9704_v18, %v6878_v58  ;;  %v6756_v50 = vmul.f32 0.5, %v6662_v32  ;;  %v6835_v47 = vmul.f32 0.5, %v6660_v55  ;;  %7712 = vmatpush1.bf16.msra.mxu0 %v10361_v5  ;;  %v14555_v32 = vld [vmem:[#allocation170_spill] sm:$0xff] }
 0x8ad   :  { %9721 = vtanh.f32 %v13312_v33  ;;  %v6737_v53 = vadd.f32 0.5, %v6721_v30  ;;  %v6785_v59 = vmul.f32 0.5, %v9706_v22  ;;  %v9708_v28 = vpop.eup %9707  ;;  %7825 = vmatpush1.bf16.msra.mxu1 %v10362_v21  ;;  %v6606_v33 = vunpack.c.h.bf16 %v14550_v63 }
 0x8ae   :  { %9723 = vtanh.f32 %v6755_v36  ;;  %v7006_v25 = vpack.c.bf16 %v6958_v39, %v6957_v15  ;;  %v6879_v34 = vadd.f32 0.5, %v6863_v9  ;;  %v6608_v36 = vunpack.c.h.bf16 %v14553_v35 }
 0x8af   :  { %9725 = vtanh.f32 %v6834_v12  ;;  %v9710_v14 = vpop.eup %9709  ;;  %v6897_v29 = vmul.f32 %v6737_v53, %v13130_v4  ;;  %v6801_v52 = vadd.f32 0.5, %v6785_v59  ;;  %v6609_v38 = vunpack.c.l.bf16 %v14554_v27 }
 0x8b0   :  { %9727 = vtanh.f32 %v6692_v60  ;;  %v9712_v42 = vpop.eup %9711  ;;  %7065 = vmatmul.mubr.bf16.gmra.mrb[200].mxu0 %v7006_v25  ;;  %7178 = vmatmul.mubr.bf16.gmra.mrb[200].mxu1 %v7006_v25  ;;  %v6611_v31 = vunpack.c.l.bf16 %v14555_v32  ;;  %v6959_v58 = vmul.f32 %v9710_v14, %v6879_v34  ;;  %v6880_v12 = vadd.f32 0.5, %v6864_v61  ;;  %v6421_v17 = vpop.f32.mrb[184].mxu0 }
 0x8b1   :  { %9729 = vtanh.f32 %v13323_v41  ;;  %v6913_v55 = vmul.f32 %v9708_v28, %v6801_v52  ;;  %v6722_v51 = vmul.f32 0.5, %v9712_v42  ;;  %7074 = vmatprep.mubr.bf16.mxu0 %v14015_v44  ;;  %7187 = vmatprep.mubr.bf16.mxu1 %v14015_v44  ;;  %v9714_v4 = vpop.eup %9713  ;;  %v6836_v41 = vmul.f32 0.5, %v6664_v3  ;;  %v6534_v46 = vpop.f32.mrb[184].mxu1 }
 0x8b2   :  { %9731 = vtanh.f32 %v6756_v50  ;;  %v6786_v60 = vmul.f32 0.5, %v9714_v4  ;;  %v6665_v45 = vadd.f32 %v14556_v43, %v6421_v17  ;;  %v6423_v22 = vpop.f32.mrb[185].mxu0  ;;  %v6536_v15 = vpop.f32.mrb[185].mxu1  ;;  %v14557_v53 = vunpack.c.l.bf16 %v14549_v23 }
 0x8b3   :  { %9733 = vtanh.f32 %v6835_v47  ;;  %v13354_v18 = vadd.f32 %v6913_v55, %v6897_v29  ;;  %v6738_v30 = vadd.f32 0.5, %v6722_v51  ;;  %v6666_v3 = vadd.f32 %v6602_v20, %v6423_v22  ;;  %v6425_v28 = vpop.f32.mrb[186].mxu0  ;;  %v6538_v25 = vpop.f32.mrb[186].mxu1 }
 0x8b4   :  { %v9716_v10 = vpop.eup %9715  ;;  %v6667_v59 = vadd.f32 %v14557_v53, %v6534_v46  ;;  %v6668_v50 = vadd.f32 %v6604_v37, %v6536_v15  ;;  %v6802_v5 = vadd.f32 0.5, %v6786_v60  ;;  %9735 = vtanh.f32 %v13338_v56  ;;  %v6427_v21 = vpop.f32.mrb[187].mxu0 }
 0x8b5   :  { %v13358_v39 = vpop.eup %9717  ;;  %v6960_v9 = vmul.f32 %v9716_v10, %v6880_v12  ;;  %v6898_v47 = vmul.f32 %v6738_v30, %v13148_v26  ;;  %v6540_v14 = vpop.f32.mrb[187].mxu1  ;;  %v6613_v29 = vunpack.c.h.bf16 %v14554_v27  ;;  %9737 = vtanh.f32 %v6836_v41  ;;  %v14558_v10 = vld [vmem:[#allocation171_spill] sm:$0xff] }
 0x8b6   :  { %v9720_v61 = vpop.eup %9719  ;;  %v6693_v55 = vmul.f32 0.5, %v6665_v45  ;;  %9739 = vtanh.f32 %v13354_v18  ;;  %v6757_v37 = vmul.f32 0.5, %v6666_v3  ;;  %v6615_v4 = vunpack.c.h.bf16 %v14555_v32 }
 0x8b7   :  { %v9722_v52 = vpop.eup %9721  ;;  %v7007_v42 = vpack.c.bf16 %v6960_v9, %v6959_v58  ;;  %v6723_v34 = vmul.f32 0.5, %v9720_v61  ;;  %v6669_v56 = vadd.f32 %v6605_v49, %v6425_v28  ;;  %v6671_v41 = vadd.f32 %v6607_v1, %v6538_v25  ;;  %v14559_v1 = vld [vmem:[#allocation172_spill] sm:$0xff] }
 0x8b8   :  { %v9724_v51 = vpop.eup %9723  ;;  %v6914_v20 = vmul.f32 %v9722_v52, %v6802_v5  ;;  %9741 = vtanh.f32 %v6693_v55  ;;  %v6610_v30 = vunpack.c.l.bf16 %v14558_v10  ;;  %v6670_v23 = vadd.f32 %v6606_v33, %v6427_v21 }
 0x8b9   :  { %v9726_v26 = vpop.eup %9725  ;;  %v6739_v12 = vadd.f32 0.5, %v6723_v34  ;;  %v6787_v17 = vmul.f32 0.5, %v9724_v51  ;;  %7075 = vmatmul.mubr.bf16.gmra.mrb[204].mxu0 %v7007_v42  ;;  %7188 = vmatmul.mubr.bf16.gmra.mrb[204].mxu1 %v7007_v42  ;;  %9743 = vtanh.f32 %v6757_v37  ;;  %v6694_v22 = vmul.f32 0.5, %v6669_v56 }
 0x8ba   :  { %v9728_v58 = vpop.eup %9727  ;;  %v13371_v46 = vadd.f32 %v6914_v20, %v6898_v47  ;;  %7084 = vmatprep.mubr.bf16.mxu0 %v14015_v44  ;;  %7197 = vmatprep.mubr.bf16.mxu1 %v14015_v44  ;;  %9745 = vtanh.f32 %v6667_v59  ;;  %v6612_v15 = vunpack.c.l.bf16 %v14559_v1  ;;  %v6837_v25 = vmul.f32 0.5, %v6668_v50  ;;  %v6431_v61 = vpop.f32.mrb[188].mxu0 }
 0x8bb   :  { %v9730_v60 = vpop.eup %9729  ;;  %v6899_v43 = vmul.f32 %v6739_v12, %v13167_v0  ;;  %v6803_v2 = vadd.f32 0.5, %v6787_v17  ;;  %v6724_v49 = vmul.f32 0.5, %v9728_v58  ;;  %v6544_v0 = vpop.f32.mrb[188].mxu1  ;;  %v6758_v47 = vmul.f32 0.5, %v6670_v23 }
 0x8bc   :  { %v9732_v45 = vpop.eup %9731  ;;  %9747 = vtanh.f32 %v13371_v46  ;;  %v6672_v59 = vadd.f32 %v6608_v36, %v6540_v14  ;;  %v6433_v5 = vpop.f32.mrb[189].mxu0  ;;  %v6614_v63 = vunpack.c.h.bf16 %v14558_v10  ;;  %v6673_v34 = vadd.f32 %v6609_v38, %v6431_v61 }
 0x8bd   :  { %v13383_v9 = vpop.eup %9733  ;;  %v6915_v53 = vmul.f32 %v9730_v60, %v6803_v2  ;;  %v6740_v3 = vadd.f32 0.5, %v6724_v49  ;;  %v6788_v28 = vmul.f32 0.5, %v9732_v45  ;;  %9749 = vtanh.f32 %v6694_v22  ;;  %v6546_v52 = vpop.f32.mrb[189].mxu1 }
 0x8be   :  { %v6435_v50 = vpop.f32.mrb[190].mxu0  ;;  %v6548_v55 = vpop.f32.mrb[190].mxu1  ;;  %v6865_v20 = vmul.f32 0.5, %v13358_v39  ;;  %9751 = vtanh.f32 %v6758_v47  ;;  %v6675_v35 = vadd.f32 %v6611_v31, %v6544_v0  ;;  %v6616_v37 = vunpack.c.h.bf16 %v14559_v1 }
 0x8bf   :  { %v13388_v33 = vadd.f32 %v6915_v53, %v6899_v43  ;;  %v6900_v21 = vmul.f32 %v6740_v3, %v13176_v48  ;;  %v6804_v42 = vadd.f32 0.5, %v6788_v28  ;;  %v9736_v51 = vpop.eup %9735  ;;  %v6437_v36 = vpop.f32.mrb[191].mxu0  ;;  %v6866_v17 = vmul.f32 0.5, %v9726_v26 }
 0x8c0   :  { %v6550_v14 = vpop.f32.mrb[191].mxu1  ;;  %v9738_v12 = vpop.eup %9737  ;;  %9753 = vtanh.f32 %v6837_v25  ;;  %v6695_v56 = vmul.f32 0.5, %v6673_v34  ;;  %v6674_v38 = vadd.f32 %v6610_v30, %v6433_v5  ;;  %v6676_v10 = vadd.f32 %v6612_v15, %v6546_v52 }
 0x8c1   :  { %v6916_v48 = vmul.f32 %v9736_v51, %v6804_v42  ;;  %v9740_v58 = vpop.eup %9739  ;;  %9755 = vtanh.f32 %v13388_v33  ;;  %v6677_v39 = vadd.f32 %v6613_v29, %v6435_v50  ;;  %v6679_v31 = vadd.f32 %v6615_v4, %v6548_v55 }
 0x8c2   :  { %v9742_v60 = vpop.eup %9741  ;;  %9757 = vtanh.f32 %v6695_v56  ;;  %v6678_v2 = vadd.f32 %v6614_v63, %v6437_v36  ;;  %v6881_v49 = vadd.f32 0.5, %v6865_v20  ;;  %v6759_v22 = vmul.f32 0.5, %v6674_v38 }
 0x8c3   :  { %v13400_v43 = vadd.f32 %v6916_v48, %v6900_v21  ;;  %v9744_v26 = vpop.eup %9743  ;;  %v6725_v45 = vmul.f32 0.5, %v9742_v60  ;;  %9759 = vtanh.f32 %v6671_v41  ;;  %v6882_v1 = vadd.f32 0.5, %v6866_v17 }
 0x8c4   :  { %v9746_v23 = vpop.eup %9745  ;;  %v6789_v30 = vmul.f32 0.5, %v9744_v26  ;;  %v6696_v27 = vmul.f32 0.5, %v6677_v39  ;;  %v6760_v53 = vmul.f32 0.5, %v6678_v2  ;;  %v6680_v3 = vadd.f32 %v6616_v37, %v6550_v14 }
 0x8c5   :  { %9761 = vtanh.f32 %v13400_v43  ;;  %v6741_v15 = vadd.f32 0.5, %v6725_v45  ;;  %v6961_v28 = vmul.f32 %v9740_v58, %v6881_v49  ;;  %v6838_v25 = vmul.f32 0.5, %v6672_v59 }
 0x8c6   :  { %v9748_v29 = vpop.eup %9747  ;;  %9763 = vtanh.f32 %v6759_v22  ;;  %v6805_v4 = vadd.f32 0.5, %v6789_v30  ;;  %v6867_v63 = vmul.f32 0.5, %v13383_v9  ;;  %v6868_v21 = vmul.f32 0.5, %v9738_v12 }
 0x8c7   :  { %v6962_v32 = vmul.f32 %v9748_v29, %v6882_v1  ;;  %v9750_v61 = vpop.eup %9749  ;;  %v6901_v0 = vmul.f32 %v6741_v15, %v13185_v62  ;;  %9765 = vtanh.f32 %v6696_v27  ;;  %v6839_v38 = vmul.f32 0.5, %v6676_v10 }
 0x8c8   :  { %v6917_v47 = vmul.f32 %v9746_v23, %v6805_v4  ;;  %v6726_v5 = vmul.f32 0.5, %v9750_v61  ;;  %9767 = vtanh.f32 %v6675_v35  ;;  %v9752_v52 = vpop.eup %9751  ;;  %v6883_v35 = vadd.f32 0.5, %v6867_v63 }
 0x8c9   :  { %v7008_v41 = vpack.c.bf16 %v6962_v32, %v6961_v28  ;;  %9769 = vtanh.f32 %v6760_v53  ;;  %v6790_v55 = vmul.f32 0.5, %v9752_v52  ;;  %v6884_v36 = vadd.f32 0.5, %v6868_v21 }
 0x8ca   :  { %v9754_v42 = vpop.eup %9753  ;;  %v13407_v34 = vadd.f32 %v6917_v47, %v6901_v0  ;;  %v6742_v50 = vadd.f32 0.5, %v6726_v5  ;;  %9771 = vtanh.f32 %v6838_v25  ;;  %v6840_v2 = vmul.f32 0.5, %v6680_v3 }
 0x8cb   :  { %7085 = vmatmul.mubr.bf16.gmra.mrb[208].mxu0 %v7008_v41  ;;  %7198 = vmatmul.mubr.bf16.gmra.mrb[208].mxu1 %v7008_v41  ;;  %v9756_v59 = vpop.eup %9755  ;;  %v6806_v20 = vadd.f32 0.5, %v6790_v55  ;;  %9773 = vtanh.f32 %v6679_v31  ;;  %v6869_v3 = vmul.f32 0.5, %v9754_v42 }
 0x8cc   :  { %7094 = vmatprep.mubr.bf16.mxu0 %v14015_v44  ;;  %7207 = vmatprep.mubr.bf16.mxu1 %v14015_v44  ;;  %v9758_v62 = vpop.eup %9757  ;;  %v6902_v51 = vmul.f32 %v6742_v50, %v13191_v8  ;;  %v6963_v48 = vmul.f32 %v9756_v59, %v6883_v35  ;;  %9775 = vtanh.f32 %v13407_v34  ;;  %v14560_v35 = vld [vmem:[#allocation173_spill] sm:$0xff] }
 0x8cd   :  { %v9760_v9 = vpop.eup %9759  ;;  %v6727_v14 = vmul.f32 0.5, %v9758_v62  ;;  %v6885_v61 = vadd.f32 0.5, %v6869_v3 }
 0x8ce   :  { %v6918_v12 = vmul.f32 %v9760_v9, %v6806_v20 }
 0x8cf   :  { %v9762_v37 = vpop.eup %9761  ;;  %v6743_v58 = vadd.f32 0.5, %v6727_v14  ;;  %v14561_v14 = vld [vmem:[#allocation174_spill] sm:$0xff] }
 0x8d0   :  { %v9764_v17 = vpop.eup %9763  ;;  %v6964_v56 = vmul.f32 %v9762_v37, %v6884_v36  ;;  %v13413_v39 = vadd.f32 %v6918_v12, %v6902_v51  ;;  %v7238_v36 = vunpack.c.l.bf16 %v14560_v35  ;;  %v7240_v37 = vunpack.c.l.bf16 %v14561_v14 }
 0x8d1   :  { %v6791_v60 = vmul.f32 0.5, %v9764_v17  ;;  %v9766_v8 = vpop.eup %9765  ;;  %v6903_v31 = vmul.f32 %v6743_v58, %v13197_v57  ;;  %v14563_v58 = vld [vmem:[#allocation176_spill] sm:$0xff] }
 0x8d2   :  { %v7009_v26 = vpack.c.bf16 %v6964_v56, %v6963_v48  ;;  %v9768_v49 = vpop.eup %9767  ;;  %9777 = vtanh.f32 %v13413_v39  ;;  %v6728_v22 = vmul.f32 0.5, %v9766_v8  ;;  %v14562_v48 = vld [vmem:[#allocation175_spill] sm:$0xff] }
 0x8d3   :  { %v6807_v45 = vadd.f32 0.5, %v6791_v60  ;;  %v9770_v23 = vpop.eup %9769  ;;  %9779 = vtanh.f32 %v6839_v38  ;;  %v7239_v56 = vunpack.c.l.bf16 %v14562_v48  ;;  %v7241_v38 = vunpack.c.l.bf16 %v14563_v58 }
 0x8d4   :  { %7095 = vmatmul.mubr.bf16.gmra.mrb[212].mxu0 %v7009_v26  ;;  %7208 = vmatmul.mubr.bf16.gmra.mrb[212].mxu1 %v7009_v26  ;;  %v9772_v10 = vpop.eup %9771  ;;  %v6744_v30 = vadd.f32 0.5, %v6728_v22  ;;  %v6792_v27 = vmul.f32 0.5, %v9770_v23  ;;  %9781 = vtanh.f32 %v6840_v2 }
 0x8d5   :  { %v6919_v1 = vmul.f32 %v9768_v49, %v6807_v45  ;;  %7104 = vmatprep.mubr.bf16.mxu0 %v14015_v44  ;;  %7217 = vmatprep.mubr.bf16.mxu1 %v14015_v44  ;;  %v9774_v53 = vpop.eup %9773  ;;  %v6870_v28 = vmul.f32 0.5, %v9772_v10  ;;  %v7242_v49 = vunpack.c.h.bf16 %v14560_v35 }
 0x8d6   :  { %v6904_v15 = vmul.f32 %v6744_v30, %v13201_v11  ;;  %v6808_v57 = vadd.f32 0.5, %v6792_v27  ;;  %v9776_v4 = vpop.eup %9775  ;;  %v7245_v30 = vunpack.c.h.bf16 %v14563_v58 }
 0x8d7   :  { %v13419_v29 = vadd.f32 %v6919_v1, %v6903_v31  ;;  %v6886_v0 = vadd.f32 0.5, %v6870_v28  ;;  %v6965_v5 = vmul.f32 %v9776_v4, %v6885_v61  ;;  %v7244_v31 = vunpack.c.h.bf16 %v14561_v14 }
 0x8d8   :  { %v6920_v32 = vmul.f32 %v9774_v53, %v6808_v57  ;;  %v7243_v1 = vunpack.c.h.bf16 %v14562_v48 }
 0x8d9   :  { %9783 = vtanh.f32 %v13419_v29 }
 0x8da   :  { %v13423_v25 = vadd.f32 %v6920_v32, %v6904_v15 }
 0x8dc   :  { %v9778_v41 = vpop.eup %9777  ;;  %9785 = vtanh.f32 %v13423_v25 }
 0x8dd   :  { %v9780_v47 = vpop.eup %9779  ;;  %v6966_v52 = vmul.f32 %v9778_v41, %v6886_v0  ;;  %v14564_v41 = vld [vmem:[#allocation177_spill] sm:$0xff] }
 0x8de   :  { %v9782_v63 = vpop.eup %9781  ;;  %v6871_v21 = vmul.f32 0.5, %v9780_v47  ;;  %v7246_v47 = vunpack.c.l.bf16 %v14564_v41 }
 0x8df   :  { %v7010_v11 = vpack.c.bf16 %v6966_v52, %v6965_v5  ;;  %v6872_v50 = vmul.f32 0.5, %v9782_v63  ;;  %v14565_v5 = vld [vmem:[#allocation178_spill] sm:$0xff] }
 0x8e0   :  { %v6887_v55 = vadd.f32 0.5, %v6871_v21  ;;  %v7248_v52 = vunpack.c.l.bf16 %v14565_v5  ;;  %v14566_v21 = vld [vmem:[#allocation179_spill] sm:$0xff]  ;;  %v7252_v35 = vunpack.c.h.bf16 %v14565_v5 }
 0x8e1   :  { %7105 = vmatmul.mubr.bf16.gmra.mrb[216].mxu0 %v7010_v11  ;;  %7218 = vmatmul.mubr.bf16.gmra.mrb[216].mxu1 %v7010_v11  ;;  %v6888_v59 = vadd.f32 0.5, %v6872_v50  ;;  %v7247_v50 = vunpack.c.l.bf16 %v14566_v21 }
 0x8e2   :  { %7114 = vmatprep.mubr.bf16.mxu0 %v14015_v44  ;;  %7227 = vmatprep.mubr.bf16.mxu1 %v14015_v44 }
 0x8e3   :  { %v9784_v42 = vpop.eup %9783 }
 0x8e4   :  { %v6967_v51 = vmul.f32 %v9784_v42, %v6887_v55  ;;  %v14567_v42 = vld [vmem:[#allocation180_spill] sm:$0xff] }
 0x8e5   :  { %v7249_v55 = vunpack.c.l.bf16 %v14567_v42 }
 0x8e6   :  { %v9786_v62 = vpop.eup %9785 }
 0x8e7   :  { %v6968_v20 = vmul.f32 %v9786_v62, %v6888_v59  ;;  %v7250_v59 = vunpack.c.h.bf16 %v14564_v41 }
 0x8e9   :  { %v7011_v9 = vpack.c.bf16 %v6968_v20, %v6967_v51 }
 0x8eb   :  { %7115 = vmatmul.mubr.bf16.gmra.mrb[220].mxu0 %v7011_v9  ;;  %7228 = vmatmul.mubr.bf16.gmra.mrb[220].mxu1 %v7011_v9 }
 0x8ec   :  { %7729 = vmatprep.mubr.bf16.mxu0 %v14015_v44  ;;  %7842 = vmatprep.mubr.bf16.mxu1 %v14015_v44 }
 0x95e   :  { %v7046_v12 = vpop.f32.mrb[192].mxu0  ;;  %v7159_v17 = vpop.f32.mrb[192].mxu1 }
 0x95f   :  { %v7302_v60 = vadd.f32 %v7238_v36, %v7046_v12  ;;  %v7304_v2 = vadd.f32 %v7240_v37, %v7159_v17  ;;  %v7048_v8 = vpop.f32.mrb[193].mxu0  ;;  %v7161_v26 = vpop.f32.mrb[193].mxu1  ;;  %v7251_v17 = vunpack.c.h.bf16 %v14566_v21 }
 0x960   :  { %v7303_v45 = vadd.f32 %v7239_v56, %v7048_v8  ;;  %v7305_v22 = vadd.f32 %v7241_v38, %v7161_v26  ;;  %v7050_v23 = vpop.f32.mrb[194].mxu0  ;;  %v7163_v10 = vpop.f32.mrb[194].mxu1 }
 0x961   :  { %v7366_v27 = vmul.f32 0.5, %v7302_v60  ;;  %v7306_v15 = vadd.f32 %v7242_v49, %v7050_v23  ;;  %v7308_v57 = vadd.f32 %v7244_v31, %v7163_v10  ;;  %v7052_v53 = vpop.f32.mrb[195].mxu0  ;;  %v7165_v3 = vpop.f32.mrb[195].mxu1 }
 0x962   :  { %v7430_v28 = vmul.f32 0.5, %v7303_v45  ;;  %v7307_v32 = vadd.f32 %v7243_v1, %v7052_v53  ;;  %v7309_v4 = vadd.f32 %v7245_v30, %v7165_v3  ;;  %v7510_v30 = vmul.f32 0.5, %v7305_v22 }
 0x963   :  { %9787 = vtanh.f32 %v7366_v27  ;;  %v7367_v61 = vmul.f32 0.5, %v7306_v15 }
 0x964   :  { %9789 = vtanh.f32 %v7430_v28  ;;  %v7431_v0 = vmul.f32 0.5, %v7307_v32  ;;  %v7511_v15 = vmul.f32 0.5, %v7309_v4 }
 0x965   :  { %9791 = vtanh.f32 %v7367_v61 }
 0x966   :  { %9793 = vtanh.f32 %v7304_v2  ;;  %v7253_v2 = vunpack.c.h.bf16 %v14567_v42 }
 0x967   :  { %9795 = vtanh.f32 %v7431_v0 }
 0x968   :  { %v7056_v63 = vpop.f32.mrb[196].mxu0  ;;  %v7169_v11 = vpop.f32.mrb[196].mxu1  ;;  %9797 = vtanh.f32 %v7308_v57 }
 0x969   :  { %v7310_v62 = vadd.f32 %v7246_v47, %v7056_v63  ;;  %v7312_v51 = vadd.f32 %v7248_v52, %v7169_v11  ;;  %v7058_v20 = vpop.f32.mrb[197].mxu0  ;;  %v7171_v9 = vpop.f32.mrb[197].mxu1 }
 0x96a   :  { %v7311_v36 = vadd.f32 %v7247_v50, %v7058_v20  ;;  %v7313_v14 = vadd.f32 %v7249_v55, %v7171_v9  ;;  %v7060_v37 = vpop.f32.mrb[198].mxu0  ;;  %v7173_v12 = vpop.f32.mrb[198].mxu1 }
 0x96b   :  { %v7368_v48 = vmul.f32 0.5, %v7310_v62  ;;  %v7314_v56 = vadd.f32 %v7250_v59, %v7060_v37  ;;  %v7316_v58 = vadd.f32 %v7252_v35, %v7173_v12  ;;  %v7062_v38 = vpop.f32.mrb[199].mxu0  ;;  %v7175_v60 = vpop.f32.mrb[199].mxu1 }
 0x96c   :  { %v7432_v8 = vmul.f32 0.5, %v7311_v36  ;;  %v7315_v26 = vadd.f32 %v7251_v17, %v7062_v38  ;;  %v7317_v31 = vadd.f32 %v7253_v2, %v7175_v60  ;;  %v7512_v22 = vmul.f32 0.5, %v7313_v14  ;;  %v14569_v38 = vld [vmem:[#allocation182_spill] sm:$0xff] }
 0x96d   :  { %9799 = vtanh.f32 %v7368_v48  ;;  %v7369_v49 = vmul.f32 0.5, %v7314_v56  ;;  %v9788_v23 = vpop.eup %9787  ;;  %v14568_v56 = vld [vmem:[#allocation181_spill] sm:$0xff]  ;;  %v7256_v60 = vunpack.c.l.bf16 %v14569_v38 }
 0x96e   :  { %9801 = vtanh.f32 %v7432_v8  ;;  %v7433_v45 = vmul.f32 0.5, %v7315_v26  ;;  %v9790_v10 = vpop.eup %9789  ;;  %v7398_v1 = vmul.f32 0.5, %v9788_v23  ;;  %v7513_v55 = vmul.f32 0.5, %v7317_v31 }
 0x96f   :  { %9803 = vtanh.f32 %v7369_v49  ;;  %v7462_v27 = vmul.f32 0.5, %v9790_v10  ;;  %v9792_v53 = vpop.eup %9791  ;;  %v7258_v2 = vunpack.c.h.bf16 %v14568_v56  ;;  %v7260_v8 = vunpack.c.h.bf16 %v14569_v38  ;;  %v14574_v38 = vld [vmem:[#allocation187_spill] sm:$0xff] }
 0x970   :  { %9805 = vtanh.f32 %v7312_v51  ;;  %v7414_v3 = vadd.f32 0.5, %v7398_v1  ;;  %v9794_v28 = vpop.eup %9793  ;;  %v7399_v32 = vmul.f32 0.5, %v9792_v53 }
 0x971   :  { %9807 = vtanh.f32 %v7433_v45  ;;  %v7478_v57 = vadd.f32 0.5, %v7462_v27  ;;  %v9796_v61 = vpop.eup %9795  ;;  %v14570_v45 = vld [vmem:[#allocation183_spill] sm:$0xff]  ;;  %v14571_v27 = vld [vmem:[#allocation184_spill] sm:$0xff] }
 0x972   :  { %v7574_v0 = vmul.f32 %v7414_v3, %v13225_v13  ;;  %9809 = vtanh.f32 %v7510_v30  ;;  %v7415_v47 = vadd.f32 0.5, %v7399_v32  ;;  %v7463_v5 = vmul.f32 0.5, %v9796_v61  ;;  %v9798_v52 = vpop.eup %9797 }
 0x973   :  { %v7590_v41 = vmul.f32 %v9794_v28, %v7478_v57  ;;  %9811 = vtanh.f32 %v7511_v15  ;;  %v7255_v23 = vunpack.c.l.bf16 %v14570_v45  ;;  %v7257_v15 = vunpack.c.l.bf16 %v14571_v27  ;;  %v14572_v28 = vld [vmem:[#allocation185_spill] sm:$0xff] }
 0x974   :  { %9813 = vtanh.f32 %v7316_v58  ;;  %v7575_v11 = vmul.f32 %v7415_v47, %v13230_v19  ;;  %v7479_v21 = vadd.f32 0.5, %v7463_v5  ;;  %v7254_v58 = vunpack.c.l.bf16 %v14568_v56 }
 0x975   :  { %v13447_v4 = vadd.f32 %v7590_v41, %v7574_v0  ;;  %9815 = vtanh.f32 %v7512_v22  ;;  %v7259_v53 = vunpack.c.h.bf16 %v14570_v45  ;;  %v7261_v3 = vunpack.c.h.bf16 %v14571_v27 }
 0x976   :  { %v7591_v59 = vmul.f32 %v9798_v52, %v7479_v21  ;;  %v7262_v57 = vunpack.c.l.bf16 %v14572_v28 }
 0x977   :  { %v9800_v63 = vpop.eup %9799  ;;  %9817 = vtanh.f32 %v13447_v4 }
 0x978   :  { %v9802_v50 = vpop.eup %9801  ;;  %v7400_v42 = vmul.f32 0.5, %v9800_v63  ;;  %v13451_v9 = vadd.f32 %v7591_v59, %v7575_v11  ;;  %9819 = vtanh.f32 %v7513_v55 }
 0x979   :  { %v7464_v62 = vmul.f32 0.5, %v9802_v50  ;;  %v9804_v13 = vpop.eup %9803 }
 0x97a   :  { %v7416_v51 = vadd.f32 0.5, %v7400_v42  ;;  %v9806_v20 = vpop.eup %9805  ;;  %v7401_v36 = vmul.f32 0.5, %v9804_v13  ;;  %9821 = vtanh.f32 %v13451_v9 }
 0x97b   :  { %v7480_v35 = vadd.f32 0.5, %v7464_v62  ;;  %v9808_v14 = vpop.eup %9807 }
 0x97c   :  { %v7576_v37 = vmul.f32 %v7416_v51, %v13241_v54  ;;  %v7417_v12 = vadd.f32 0.5, %v7401_v36  ;;  %v7465_v17 = vmul.f32 0.5, %v9808_v14  ;;  %v9810_v48 = vpop.eup %9809  ;;  %v7266_v36 = vunpack.c.h.bf16 %v14572_v28 }
 0x97d   :  { %v7592_v19 = vmul.f32 %v9806_v20, %v7480_v35  ;;  %v9812_v26 = vpop.eup %9811  ;;  %v7542_v52 = vmul.f32 0.5, %v9810_v48 }
 0x97e   :  { %v7577_v54 = vmul.f32 %v7417_v12, %v13248_v7  ;;  %v7481_v31 = vadd.f32 0.5, %v7465_v17  ;;  %v9814_v10 = vpop.eup %9813  ;;  %v14573_v7 = vld [vmem:[#allocation186_spill] sm:$0xff]  ;;  %v7543_v22 = vmul.f32 0.5, %v9812_v26 }
 0x97f   :  { %v13459_v49 = vadd.f32 %v7592_v19, %v7576_v37  ;;  %v7264_v5 = vunpack.c.l.bf16 %v14573_v7  ;;  %v9816_v51 = vpop.eup %9815  ;;  %v7268_v14 = vunpack.c.h.bf16 %v14573_v7  ;;  %v7558_v56 = vadd.f32 0.5, %v7542_v52 }
 0x980   :  { %v7593_v32 = vmul.f32 %v9814_v10, %v7481_v31  ;;  %v7267_v31 = vunpack.c.h.bf16 %v14574_v38  ;;  %v7544_v10 = vmul.f32 0.5, %v9816_v51 }
 0x981   :  { %9823 = vtanh.f32 %v13459_v49  ;;  %v9818_v37 = vpop.eup %9817 }
 0x982   :  { %v13469_v42 = vadd.f32 %v7593_v32, %v7577_v54  ;;  %v9820_v48 = vpop.eup %9819  ;;  %v7638_v45 = vmul.f32 %v9818_v37, %v7558_v56 }
 0x983   :  { %v7066_v1 = vpop.f32.mrb[200].mxu0  ;;  %v7179_v30 = vpop.f32.mrb[200].mxu1 }
 0x984   :  { %v7318_v61 = vadd.f32 %v7254_v58, %v7066_v1  ;;  %v7320_v0 = vadd.f32 %v7256_v60, %v7179_v30  ;;  %v7068_v41 = vpop.f32.mrb[201].mxu0  ;;  %v7181_v47 = vpop.f32.mrb[201].mxu1  ;;  %9825 = vtanh.f32 %v13469_v42  ;;  %v7559_v58 = vadd.f32 0.5, %v7543_v22 }
 0x985   :  { %v7319_v63 = vadd.f32 %v7255_v23, %v7068_v41  ;;  %v7321_v11 = vadd.f32 %v7257_v15, %v7181_v47  ;;  %v7070_v21 = vpop.f32.mrb[202].mxu0  ;;  %v7183_v50 = vpop.f32.mrb[202].mxu1  ;;  %v7263_v60 = vunpack.c.l.bf16 %v14574_v38  ;;  %v7545_v15 = vmul.f32 0.5, %v9820_v48 }
 0x986   :  { %v7370_v55 = vmul.f32 0.5, %v7318_v61  ;;  %v7322_v59 = vadd.f32 %v7258_v2, %v7070_v21  ;;  %v7072_v62 = vpop.f32.mrb[203].mxu0  ;;  %v7185_v13 = vpop.f32.mrb[203].mxu1  ;;  %v7324_v35 = vadd.f32 %v7260_v8, %v7183_v50  ;;  %v14575_v8 = vld [vmem:[#allocation188_spill] sm:$0xff] }
 0x987   :  { %v7434_v20 = vmul.f32 0.5, %v7319_v63  ;;  %v7323_v12 = vadd.f32 %v7259_v53, %v7072_v62  ;;  %v7325_v17 = vadd.f32 %v7261_v3, %v7185_v13  ;;  %v9822_v2 = vpop.eup %9821  ;;  %v7265_v54 = vunpack.c.l.bf16 %v14575_v8 }
 0x988   :  { %v7371_v19 = vmul.f32 0.5, %v7322_v59  ;;  %9827 = vtanh.f32 %v7370_v55  ;;  %v7639_v23 = vmul.f32 %v9822_v2, %v7559_v58  ;;  %v7269_v27 = vunpack.c.h.bf16 %v14575_v8 }
 0x989   :  { %9829 = vtanh.f32 %v7434_v20  ;;  %v7435_v26 = vmul.f32 0.5, %v7323_v12  ;;  %v7514_v59 = vmul.f32 0.5, %v7321_v11  ;;  %v7561_v20 = vadd.f32 0.5, %v7545_v15  ;;  %v14579_v15 = vld [vmem:[#allocation192_spill] sm:$0xff] }
 0x98a   :  { %9831 = vtanh.f32 %v7371_v19  ;;  %v7689_v61 = vpack.c.bf16 %v7639_v23, %v7638_v45  ;;  %v7515_v12 = vmul.f32 0.5, %v7325_v17 }
 0x98b   :  { %9833 = vtanh.f32 %v7320_v0  ;;  %v7560_v0 = vadd.f32 0.5, %v7544_v10 }
 0x98c   :  { %v7076_v1 = vpop.f32.mrb[204].mxu0  ;;  %v7189_v30 = vpop.f32.mrb[204].mxu1  ;;  %9835 = vtanh.f32 %v7435_v26  ;;  %7730 = vmatmul.mubr.bf16.vlgmr.msra.gmra.mrb[224].mxu0 %v7689_v61  ;;  %7843 = vmatmul.mubr.bf16.vlgmr.msra.gmra.mrb[224].mxu1 %v7689_v61  ;;  %v14576_v26 = vld [vmem:[#allocation189_spill] sm:$0xff] }
 0x98d   :  { %v7326_v53 = vadd.f32 %v7262_v57, %v7076_v1  ;;  %v7328_v3 = vadd.f32 %v7264_v5, %v7189_v30  ;;  %v7078_v28 = vpop.f32.mrb[205].mxu0  ;;  %v7191_v32 = vpop.f32.mrb[205].mxu1  ;;  %7739 = vmatprep.mubr.bf16.mxu0 %v14015_v44  ;;  %7852 = vmatprep.mubr.bf16.mxu1 %v14015_v44  ;;  %v7270_v8 = vunpack.c.l.bf16 %v14576_v26  ;;  %v7274_v10 = vunpack.c.h.bf16 %v14576_v26  ;;  %v14578_v30 = vld [vmem:[#allocation191_spill] sm:$0xff] }
 0x98e   :  { %v7327_v41 = vadd.f32 %v7263_v60, %v7078_v28  ;;  %v7329_v47 = vadd.f32 %v7265_v54, %v7191_v32  ;;  %v7080_v7 = vpop.f32.mrb[206].mxu0  ;;  %v7193_v52 = vpop.f32.mrb[206].mxu1 }
 0x98f   :  { %v7372_v22 = vmul.f32 0.5, %v7326_v53  ;;  %v7330_v63 = vadd.f32 %v7266_v36, %v7080_v7  ;;  %v7332_v21 = vadd.f32 %v7268_v14, %v7193_v52  ;;  %v7082_v50 = vpop.f32.mrb[207].mxu0  ;;  %v7195_v55 = vpop.f32.mrb[207].mxu1  ;;  %v7273_v53 = vunpack.c.l.bf16 %v14579_v15 }
 0x990   :  { %v7436_v62 = vmul.f32 0.5, %v7327_v41  ;;  %v9824_v57 = vpop.eup %9823  ;;  %v7331_v13 = vadd.f32 %v7267_v31, %v7082_v50  ;;  %v7333_v51 = vadd.f32 %v7269_v27, %v7195_v55  ;;  %v7271_v27 = vunpack.c.l.bf16 %v14578_v30 }
 0x991   :  { %9837 = vtanh.f32 %v7372_v22  ;;  %v7373_v5 = vmul.f32 0.5, %v7330_v63  ;;  %v9826_v36 = vpop.eup %9825  ;;  %v7640_v11 = vmul.f32 %v9824_v57, %v7560_v0  ;;  %v7516_v41 = vmul.f32 0.5, %v7329_v47  ;;  %v14580_v22 = vld [vmem:[#allocation193_spill] sm:$0xff]  ;;  %v14581_v0 = vld [vmem:[#allocation194_spill] sm:$0xff] }
 0x992   :  { %9839 = vtanh.f32 %v7324_v35  ;;  %v7437_v14 = vmul.f32 0.5, %v7331_v13  ;;  %v9828_v37 = vpop.eup %9827  ;;  %v7641_v19 = vmul.f32 %v9826_v36, %v7561_v20  ;;  %v14577_v35 = vld [vmem:[#allocation190_spill] sm:$0xff]  ;;  %v7275_v52 = vunpack.c.h.bf16 %v14578_v30 }
 0x993   :  { %9841 = vtanh.f32 %v7436_v62  ;;  %v9830_v48 = vpop.eup %9829  ;;  %v7402_v56 = vmul.f32 0.5, %v9828_v37  ;;  %v7272_v54 = vunpack.c.l.bf16 %v14577_v35  ;;  %v7278_v63 = vunpack.c.l.bf16 %v14580_v22 }
 0x994   :  { %9843 = vtanh.f32 %v7514_v59  ;;  %v7690_v58 = vpack.c.bf16 %v7641_v19, %v7640_v11  ;;  %v7466_v38 = vmul.f32 0.5, %v9830_v48  ;;  %v9832_v60 = vpop.eup %9831  ;;  %v7517_v13 = vmul.f32 0.5, %v7333_v51 }
 0x995   :  { %9845 = vtanh.f32 %v7373_v5  ;;  %v7418_v2 = vadd.f32 0.5, %v7402_v56  ;;  %v9834_v31 = vpop.eup %9833  ;;  %v7403_v23 = vmul.f32 0.5, %v9832_v60  ;;  %v7280_v20 = vunpack.c.l.bf16 %v14581_v0 }
 0x996   :  { %9847 = vtanh.f32 %v7328_v3  ;;  %v7482_v45 = vadd.f32 0.5, %v7466_v38  ;;  %7740 = vmatmul.mubr.bf16.gmra.mrb[228].mxu0 %v7690_v58  ;;  %7853 = vmatmul.mubr.bf16.gmra.mrb[228].mxu1 %v7690_v58  ;;  %v9836_v17 = vpop.eup %9835  ;;  %v7276_v3 = vunpack.c.h.bf16 %v14577_v35  ;;  %v7282_v47 = vunpack.c.h.bf16 %v14580_v22  ;;  %v14582_v38 = vld [vmem:[#allocation195_spill] sm:$0xff] }
 0x997   :  { %9849 = vtanh.f32 %v7437_v14  ;;  %v7578_v1 = vmul.f32 %v7418_v2, %v13285_v6  ;;  %7749 = vmatprep.mubr.bf16.mxu0 %v14015_v44  ;;  %7862 = vmatprep.mubr.bf16.mxu1 %v14015_v44  ;;  %v7419_v32 = vadd.f32 0.5, %v7403_v23  ;;  %v7467_v61 = vmul.f32 0.5, %v9836_v17 }
 0x998   :  { %9851 = vtanh.f32 %v7515_v12  ;;  %v7594_v28 = vmul.f32 %v9834_v31, %v7482_v45  ;;  %v7277_v6 = vunpack.c.h.bf16 %v14579_v15  ;;  %v7279_v60 = vunpack.c.l.bf16 %v14582_v38 }
 0x999   :  { %9853 = vtanh.f32 %v7332_v21  ;;  %v7579_v59 = vmul.f32 %v7419_v32, %v13297_v24  ;;  %v7483_v62 = vadd.f32 0.5, %v7467_v61  ;;  %v7284_v21 = vunpack.c.h.bf16 %v14581_v0 }
 0x99a   :  { %v13492_v55 = vadd.f32 %v7594_v28, %v7578_v1  ;;  %9855 = vtanh.f32 %v7516_v41 }
 0x99b   :  { %v9838_v7 = vpop.eup %9837 }
 0x99c   :  { %v9840_v50 = vpop.eup %9839  ;;  %v7404_v57 = vmul.f32 0.5, %v9838_v7  ;;  %9857 = vtanh.f32 %v13492_v55 }
 0x99d   :  { %v9842_v5 = vpop.eup %9841  ;;  %v7595_v14 = vmul.f32 %v9840_v50, %v7483_v62  ;;  %9859 = vtanh.f32 %v7517_v13 }
 0x99e   :  { %v9844_v36 = vpop.eup %9843  ;;  %v7420_v37 = vadd.f32 0.5, %v7404_v57  ;;  %v7468_v11 = vmul.f32 0.5, %v9842_v5  ;;  %v7086_v19 = vpop.f32.mrb[208].mxu0 }
 0x99f   :  { %v7199_v12 = vpop.f32.mrb[208].mxu1  ;;  %v9846_v48 = vpop.eup %9845  ;;  %v7334_v24 = vadd.f32 %v7270_v8, %v7086_v19  ;;  %v13500_v31 = vadd.f32 %v7595_v14, %v7579_v59  ;;  %v7283_v14 = vunpack.c.h.bf16 %v14582_v38 }
 0x9a0   :  { %v7336_v56 = vadd.f32 %v7272_v54, %v7199_v12  ;;  %v7088_v58 = vpop.f32.mrb[209].mxu0  ;;  %v7201_v51 = vpop.f32.mrb[209].mxu1  ;;  %v7580_v45 = vmul.f32 %v7420_v37, %v13307_v40  ;;  %v7484_v23 = vadd.f32 0.5, %v7468_v11  ;;  %v7405_v17 = vmul.f32 0.5, %v9846_v48  ;;  %v14583_v54 = vld [vmem:[#allocation196_spill] sm:$0xff] }
 0x9a1   :  { %v9848_v2 = vpop.eup %9847  ;;  %v7090_v1 = vpop.f32.mrb[210].mxu0  ;;  %v7374_v32 = vmul.f32 0.5, %v7334_v24  ;;  %v7335_v61 = vadd.f32 %v7271_v27, %v7088_v58  ;;  %v7281_v7 = vunpack.c.l.bf16 %v14583_v54  ;;  %9861 = vtanh.f32 %v13500_v31 }
 0x9a2   :  { %v7203_v30 = vpop.f32.mrb[210].mxu1  ;;  %v9850_v28 = vpop.eup %9849  ;;  %v7596_v62 = vmul.f32 %v9848_v2, %v7484_v23  ;;  %v7421_v59 = vadd.f32 0.5, %v7405_v17  ;;  %v7337_v5 = vadd.f32 %v7273_v53, %v7201_v51  ;;  %v7338_v11 = vadd.f32 %v7274_v10, %v7090_v1 }
 0x9a3   :  { %v7092_v41 = vpop.f32.mrb[211].mxu0  ;;  %v7205_v8 = vpop.f32.mrb[211].mxu1  ;;  %v7469_v57 = vmul.f32 0.5, %v9850_v28  ;;  %9863 = vtanh.f32 %v7374_v32  ;;  %v7438_v40 = vmul.f32 0.5, %v7335_v61  ;;  %v7546_v12 = vmul.f32 0.5, %v9844_v36 }
 0x9a4   :  { %v9852_v50 = vpop.eup %9851  ;;  %v13506_v37 = vadd.f32 %v7596_v62, %v7580_v45  ;;  %v7581_v13 = vmul.f32 %v7421_v59, %v13327_v16  ;;  %v7340_v24 = vadd.f32 %v7276_v3, %v7203_v30  ;;  %v7375_v2 = vmul.f32 0.5, %v7338_v11  ;;  %v14584_v45 = vld [vmem:[#allocation197_spill] sm:$0xff] }
 0x9a5   :  { %v7485_v27 = vadd.f32 0.5, %v7469_v57  ;;  %v9854_v19 = vpop.eup %9853  ;;  %v7547_v48 = vmul.f32 0.5, %v9852_v50  ;;  %9865 = vtanh.f32 %v7438_v40  ;;  %v7339_v53 = vadd.f32 %v7275_v52, %v7092_v41 }
 0x9a6   :  { %v7285_v51 = vunpack.c.h.bf16 %v14583_v54  ;;  %9867 = vtanh.f32 %v13506_v37  ;;  %v7518_v38 = vmul.f32 0.5, %v7337_v5  ;;  %v7341_v16 = vadd.f32 %v7277_v6, %v7205_v8  ;;  %v9856_v23 = vpop.eup %9855 }
 0x9a7   :  { %v7597_v58 = vmul.f32 %v9854_v19, %v7485_v27  ;;  %v7096_v26 = vpop.f32.mrb[212].mxu0  ;;  %v7209_v10 = vpop.f32.mrb[212].mxu1  ;;  %v7286_v36 = vunpack.c.l.bf16 %v14584_v45  ;;  %9869 = vtanh.f32 %v7375_v2  ;;  %v7439_v35 = vmul.f32 0.5, %v7339_v53 }
 0x9a8   :  { %v7342_v3 = vadd.f32 %v7278_v63, %v7096_v26  ;;  %v7098_v52 = vpop.f32.mrb[213].mxu0  ;;  %v7211_v1 = vpop.f32.mrb[213].mxu1  ;;  %v7562_v28 = vadd.f32 0.5, %v7546_v12  ;;  %v7563_v32 = vadd.f32 0.5, %v7547_v48  ;;  %9871 = vtanh.f32 %v7336_v56  ;;  %v14585_v48 = vld [vmem:[#allocation198_spill] sm:$0xff] }
 0x9a9   :  { %v13518_v17 = vadd.f32 %v7597_v58, %v7581_v13  ;;  %v9858_v30 = vpop.eup %9857  ;;  %v7344_v15 = vadd.f32 %v7280_v20, %v7209_v10  ;;  %v7100_v6 = vpop.f32.mrb[214].mxu0  ;;  %v7343_v8 = vadd.f32 %v7279_v60, %v7098_v52  ;;  %v7345_v54 = vadd.f32 %v7281_v7, %v7211_v1 }
 0x9aa   :  { %v7213_v61 = vpop.f32.mrb[214].mxu1  ;;  %v7376_v41 = vmul.f32 0.5, %v7342_v3  ;;  %v7102_v50 = vpop.f32.mrb[215].mxu0  ;;  %v7346_v63 = vadd.f32 %v7282_v47, %v7100_v6  ;;  %v7519_v20 = vmul.f32 0.5, %v7341_v16  ;;  %v7642_v11 = vmul.f32 %v9858_v30, %v7562_v28 }
 0x9ab   :  { %9873 = vtanh.f32 %v13518_v17  ;;  %v7215_v62 = vpop.f32.mrb[215].mxu1  ;;  %v9860_v59 = vpop.eup %9859  ;;  %v7348_v56 = vadd.f32 %v7284_v21, %v7213_v61  ;;  %v7347_v57 = vadd.f32 %v7283_v14, %v7102_v50  ;;  %v7440_v5 = vmul.f32 0.5, %v7343_v8  ;;  %v14587_v61 = vld [vmem:[#allocation200_spill] sm:$0xff] }
 0x9ac   :  { %9875 = vtanh.f32 %v7439_v35  ;;  %v9862_v40 = vpop.eup %9861  ;;  %v7349_v13 = vadd.f32 %v7285_v51, %v7215_v62  ;;  %v7377_v7 = vmul.f32 0.5, %v7346_v63  ;;  %v7548_v19 = vmul.f32 0.5, %v9856_v23 }
 0x9ad   :  { %9877 = vtanh.f32 %v7518_v38  ;;  %v9864_v27 = vpop.eup %9863  ;;  %v7643_v60 = vmul.f32 %v9862_v40, %v7563_v32  ;;  %v7288_v22 = vunpack.c.l.bf16 %v14585_v48  ;;  %v7549_v0 = vmul.f32 0.5, %v9860_v59  ;;  %v14586_v38 = vld [vmem:[#allocation199_spill] sm:$0xff] }
 0x9ae   :  { %9879 = vtanh.f32 %v7376_v41  ;;  %v7406_v12 = vmul.f32 0.5, %v9864_v27  ;;  %v7441_v21 = vmul.f32 0.5, %v7347_v57  ;;  %v7520_v53 = vmul.f32 0.5, %v7345_v54 }
 0x9af   :  { %9881 = vtanh.f32 %v7340_v24  ;;  %v9866_v47 = vpop.eup %9865  ;;  %v7691_v58 = vpack.c.bf16 %v7643_v60, %v7642_v11  ;;  %v7287_v16 = vunpack.c.l.bf16 %v14586_v38  ;;  %v7290_v26 = vunpack.c.h.bf16 %v14584_v45 }
 0x9b0   :  { %9883 = vtanh.f32 %v7440_v5  ;;  %v7422_v14 = vadd.f32 0.5, %v7406_v12  ;;  %v7470_v2 = vmul.f32 0.5, %v9866_v47  ;;  %v9868_v51 = vpop.eup %9867  ;;  %v7292_v10 = vunpack.c.h.bf16 %v14585_v48 }
 0x9b1   :  { %9885 = vtanh.f32 %v7519_v20  ;;  %7750 = vmatmul.mubr.bf16.gmra.mrb[232].mxu0 %v7691_v58  ;;  %7863 = vmatmul.mubr.bf16.gmra.mrb[232].mxu1 %v7691_v58  ;;  %v9870_v24 = vpop.eup %9869  ;;  %v7564_v23 = vadd.f32 0.5, %v7548_v19  ;;  %v7565_v1 = vadd.f32 0.5, %v7549_v0  ;;  %v7521_v28 = vmul.f32 0.5, %v7349_v13 }
 0x9b2   :  { %9887 = vtanh.f32 %v7377_v7  ;;  %v7582_v35 = vmul.f32 %v7422_v14, %v13354_v18  ;;  %v7486_v3 = vadd.f32 0.5, %v7470_v2  ;;  %7759 = vmatprep.mubr.bf16.mxu0 %v14015_v44  ;;  %7872 = vmatprep.mubr.bf16.mxu1 %v14015_v44  ;;  %v9872_v52 = vpop.eup %9871  ;;  %v7407_v30 = vmul.f32 0.5, %v9870_v24  ;;  %v14588_v24 = vld [vmem:[#allocation201_spill] sm:$0xff] }
 0x9b3   :  { %9889 = vtanh.f32 %v7344_v15  ;;  %v7289_v41 = vunpack.c.l.bf16 %v14587_v61  ;;  %v7291_v8 = vunpack.c.h.bf16 %v14586_v38  ;;  %v7644_v18 = vmul.f32 %v9868_v51, %v7564_v23 }
 0x9b4   :  { %9891 = vtanh.f32 %v7441_v21  ;;  %v7598_v6 = vmul.f32 %v9872_v52, %v7486_v3  ;;  %v7423_v15 = vadd.f32 0.5, %v7407_v30  ;;  %v7106_v62 = vpop.f32.mrb[216].mxu0  ;;  %v7219_v59 = vpop.f32.mrb[216].mxu1  ;;  %v14589_v30 = vld [vmem:[#allocation202_spill] sm:$0xff] }
 0x9b5   :  { %v9874_v32 = vpop.eup %9873  ;;  %9893 = vtanh.f32 %v7520_v53  ;;  %v7350_v20 = vadd.f32 %v7286_v36, %v7106_v62  ;;  %v7352_v5 = vadd.f32 %v7288_v22, %v7219_v59  ;;  %v7108_v13 = vpop.f32.mrb[217].mxu0  ;;  %v7300_v45 = vunpack.c.h.bf16 %v14589_v30 }
 0x9b6   :  { %v9876_v54 = vpop.eup %9875  ;;  %v7645_v50 = vmul.f32 %v9874_v32, %v7565_v1  ;;  %9895 = vtanh.f32 %v7348_v56  ;;  %v13540_v57 = vadd.f32 %v7598_v6, %v7582_v35  ;;  %v7221_v27 = vpop.f32.mrb[217].mxu1  ;;  %v7351_v7 = vadd.f32 %v7287_v16, %v7108_v13 }
 0x9b7   :  { %v13538_v63 = vpop.eup %9877  ;;  %v7471_v40 = vmul.f32 0.5, %v9876_v54  ;;  %9897 = vtanh.f32 %v7521_v28  ;;  %v7110_v19 = vpop.f32.mrb[218].mxu0  ;;  %v7293_v56 = vunpack.c.h.bf16 %v14587_v61  ;;  %v7583_v58 = vmul.f32 %v7423_v15, %v13371_v46 }
 0x9b8   :  { %v9880_v11 = vpop.eup %9879  ;;  %v7692_v60 = vpack.c.bf16 %v7645_v50, %v7644_v18  ;;  %v7223_v12 = vpop.f32.mrb[218].mxu1  ;;  %v7378_v14 = vmul.f32 0.5, %v7350_v20  ;;  %9899 = vtanh.f32 %v13540_v57  ;;  %v7442_v22 = vmul.f32 0.5, %v7351_v7 }
 0x9b9   :  { %v9882_v47 = vpop.eup %9881  ;;  %v7487_v0 = vadd.f32 0.5, %v7471_v40  ;;  %v7408_v21 = vmul.f32 0.5, %v9880_v11  ;;  %v7112_v2 = vpop.f32.mrb[219].mxu0  ;;  %v13547_v51 = vadd.f32 %v7289_v41, %v7221_v27  ;;  %v7294_v16 = vunpack.c.l.bf16 %v14588_v24 }
 0x9ba   :  { %v7225_v53 = vpop.f32.mrb[219].mxu1  ;;  %v9884_v36 = vpop.eup %9883  ;;  %7760 = vmatmul.mubr.bf16.gmra.mrb[236].mxu0 %v7692_v60  ;;  %7873 = vmatmul.mubr.bf16.gmra.mrb[236].mxu1 %v7692_v60  ;;  %9901 = vtanh.f32 %v7378_v14  ;;  %v7354_v1 = vadd.f32 %v7290_v26, %v7110_v19  ;;  %v7296_v28 = vunpack.c.l.bf16 %v14589_v30  ;;  %v7298_v32 = vunpack.c.h.bf16 %v14588_v24  ;;  %v14590_v60 = vld [vmem:[#allocation203_spill] sm:$0xff] }
 0x9bb   :  { %v9886_v23 = vpop.eup %9885  ;;  %v7599_v35 = vmul.f32 %v9882_v47, %v7487_v0  ;;  %v7424_v3 = vadd.f32 0.5, %v7408_v21  ;;  %v7472_v52 = vmul.f32 0.5, %v9884_v36  ;;  %7769 = vmatprep.mubr.bf16.mxu0 %v14015_v44  ;;  %7882 = vmatprep.mubr.bf16.mxu1 %v14015_v44  ;;  %9903 = vtanh.f32 %v7442_v22 }
 0x9bc   :  { %v9888_v46 = vpop.eup %9887  ;;  %9905 = vtanh.f32 %v7352_v5  ;;  %v7379_v15 = vmul.f32 0.5, %v7354_v1  ;;  %v7356_v62 = vadd.f32 %v7292_v10, %v7223_v12  ;;  %v7357_v27 = vadd.f32 %v7293_v56, %v7225_v53 }
 0x9bd   :  { %v9890_v6 = vpop.eup %9889  ;;  %v13556_v61 = vadd.f32 %v7599_v35, %v7583_v58  ;;  %v7584_v41 = vmul.f32 %v7424_v3, %v13388_v33  ;;  %v7488_v54 = vadd.f32 0.5, %v7472_v52  ;;  %v7409_v18 = vmul.f32 0.5, %v9888_v46  ;;  %v14591_v58 = vld [vmem:[#allocation204_spill] sm:$0xff] }
 0x9be   :  { %v9892_v50 = vpop.eup %9891  ;;  %v7355_v33 = vadd.f32 %v7291_v8, %v7112_v2  ;;  %v7116_v5 = vpop.f32.mrb[220].mxu0  ;;  %v7295_v48 = vunpack.c.l.bf16 %v14590_v60  ;;  %v7297_v0 = vunpack.c.l.bf16 %v14591_v58  ;;  %v7550_v14 = vmul.f32 0.5, %v13538_v63 }
 0x9bf   :  { %v13562_v26 = vpop.eup %9893  ;;  %9907 = vtanh.f32 %v13556_v61  ;;  %v7600_v59 = vmul.f32 %v9890_v6, %v7488_v54  ;;  %v7425_v40 = vadd.f32 0.5, %v7409_v18  ;;  %v7473_v20 = vmul.f32 0.5, %v9892_v50  ;;  %v7229_v11 = vpop.f32.mrb[220].mxu1 }
 0x9c0   :  { %v9896_v13 = vpop.eup %9895  ;;  %9909 = vtanh.f32 %v7379_v15  ;;  %v7118_v12 = vpop.f32.mrb[221].mxu0  ;;  %v7443_v36 = vmul.f32 0.5, %v7355_v33  ;;  %v7358_v38 = vadd.f32 %v7294_v16, %v7116_v5  ;;  %v7299_v2 = vunpack.c.h.bf16 %v14590_v60 }
 0x9c1   :  { %v13568_v10 = vadd.f32 %v7600_v59, %v7584_v41  ;;  %v7585_v7 = vmul.f32 %v7425_v40, %v13400_v43  ;;  %v7489_v19 = vadd.f32 0.5, %v7473_v20  ;;  %v7231_v47 = vpop.f32.mrb[221].mxu1  ;;  %v9898_v21 = vpop.eup %9897  ;;  %v7360_v22 = vadd.f32 %v7296_v28, %v7229_v11 }
 0x9c2   :  { %v7120_v8 = vpop.f32.mrb[222].mxu0  ;;  %v7233_v56 = vpop.f32.mrb[222].mxu1  ;;  %v7359_v24 = vadd.f32 %v7295_v48, %v7118_v12  ;;  %v7301_v43 = vunpack.c.h.bf16 %v14591_v58  ;;  %v7551_v46 = vmul.f32 0.5, %v9886_v23  ;;  %9911 = vtanh.f32 %v7443_v36 }
 0x9c3   :  { %v7601_v53 = vmul.f32 %v9896_v13, %v7489_v19  ;;  %v7122_v35 = vpop.f32.mrb[223].mxu0  ;;  %v7235_v3 = vpop.f32.mrb[223].mxu1  ;;  %v7380_v1 = vmul.f32 0.5, %v7358_v38  ;;  %v7361_v30 = vadd.f32 %v7297_v0, %v7231_v47  ;;  %9913 = vtanh.f32 %v13568_v10 }
 0x9c4   :  { %v9900_v52 = vpop.eup %9899  ;;  %v7444_v16 = vmul.f32 0.5, %v7359_v24  ;;  %v7362_v41 = vadd.f32 %v7298_v32, %v7120_v8  ;;  %v7566_v18 = vadd.f32 0.5, %v7550_v14  ;;  %v7364_v50 = vadd.f32 %v7300_v45, %v7233_v56 }
 0x9c5   :  { %v9902_v6 = vpop.eup %9901  ;;  %v13576_v63 = vadd.f32 %v7601_v53, %v7585_v7  ;;  %9915 = vtanh.f32 %v7380_v1  ;;  %v7363_v23 = vadd.f32 %v7299_v2, %v7122_v35  ;;  %v7567_v20 = vadd.f32 0.5, %v7551_v46 }
 0x9c6   :  { %v9904_v54 = vpop.eup %9903  ;;  %v7410_v28 = vmul.f32 0.5, %v9902_v6  ;;  %v7381_v59 = vmul.f32 0.5, %v7362_v41  ;;  %v7365_v33 = vadd.f32 %v7301_v43, %v7235_v3  ;;  %v7646_v48 = vmul.f32 %v9900_v52, %v7566_v18 }
 0x9c7   :  { %9917 = vtanh.f32 %v13576_v63  ;;  %v7474_v15 = vmul.f32 0.5, %v9904_v54  ;;  %v9906_v40 = vpop.eup %9905  ;;  %v7445_v60 = vmul.f32 0.5, %v7363_v23  ;;  %v7522_v45 = vmul.f32 0.5, %v13547_v51 }
 0x9c8   :  { %v7426_v13 = vadd.f32 0.5, %v7410_v28  ;;  %9919 = vtanh.f32 %v7356_v62  ;;  %v7523_v58 = vmul.f32 0.5, %v7357_v27  ;;  %v7552_v14 = vmul.f32 0.5, %v13562_v26 }
 0x9c9   :  { %v9908_v5 = vpop.eup %9907  ;;  %v7490_v11 = vadd.f32 0.5, %v7474_v15  ;;  %9921 = vtanh.f32 %v7444_v16  ;;  %v7553_v62 = vmul.f32 0.5, %v9898_v21  ;;  %v7524_v43 = vmul.f32 0.5, %v7361_v30 }
 0x9ca   :  { %v9910_v32 = vpop.eup %9909  ;;  %v7647_v7 = vmul.f32 %v9908_v5, %v7567_v20  ;;  %v7586_v19 = vmul.f32 %v7426_v13, %v13407_v34  ;;  %9923 = vtanh.f32 %v7381_v59  ;;  %v7568_v27 = vadd.f32 0.5, %v7552_v14 }
 0x9cb   :  { %v7602_v12 = vmul.f32 %v9906_v40, %v7490_v11  ;;  %v7411_v47 = vmul.f32 0.5, %v9910_v32  ;;  %9925 = vtanh.f32 %v7360_v22  ;;  %v7569_v26 = vadd.f32 0.5, %v7553_v62 }
 0x9cc   :  { %v7693_v0 = vpack.c.bf16 %v7647_v7, %v7646_v48  ;;  %9927 = vtanh.f32 %v7445_v60  ;;  %v9912_v8 = vpop.eup %9911  ;;  %v7525_v41 = vmul.f32 0.5, %v7365_v33 }
 0x9cd   :  { %v13582_v36 = vadd.f32 %v7602_v12, %v7586_v19  ;;  %v7427_v38 = vadd.f32 0.5, %v7411_v47  ;;  %9929 = vtanh.f32 %v7522_v45  ;;  %v9914_v34 = vpop.eup %9913  ;;  %v7475_v56 = vmul.f32 0.5, %v9912_v8 }
 0x9ce   :  { %7770 = vmatmul.mubr.bf16.gmra.mrb[240].mxu0 %v7693_v0  ;;  %7883 = vmatmul.mubr.bf16.gmra.mrb[240].mxu1 %v7693_v0  ;;  %9931 = vtanh.f32 %v7523_v58  ;;  %v7648_v35 = vmul.f32 %v9914_v34, %v7568_v27 }
 0x9cf   :  { %7779 = vmatprep.mubr.bf16.mxu0 %v14015_v44  ;;  %7892 = vmatprep.mubr.bf16.mxu1 %v14015_v44  ;;  %v9916_v51 = vpop.eup %9915  ;;  %v7587_v2 = vmul.f32 %v7427_v38, %v13413_v39  ;;  %v7491_v53 = vadd.f32 0.5, %v7475_v56  ;;  %9933 = vtanh.f32 %v7364_v50 }
 0x9d0   :  { %v7412_v22 = vmul.f32 0.5, %v9916_v51  ;;  %9935 = vtanh.f32 %v13582_v36 }
 0x9d1   :  { %v9918_v21 = vpop.eup %9917  ;;  %9937 = vtanh.f32 %v7524_v43 }
 0x9d2   :  { %v9920_v24 = vpop.eup %9919  ;;  %v7649_v3 = vmul.f32 %v9918_v21, %v7569_v26  ;;  %v7428_v1 = vadd.f32 0.5, %v7412_v22 }
 0x9d3   :  { %v9922_v52 = vpop.eup %9921  ;;  %v7603_v46 = vmul.f32 %v9920_v24, %v7491_v53  ;;  %v14592_v53 = vld [vmem:[#allocation205_spill] sm:$0xff]  ;;  %v14593_v24 = vld [vmem:[#allocation206_spill] sm:$0xff] }
 0x9d4   :  { %v7694_v6 = vpack.c.bf16 %v7649_v3, %v7648_v35  ;;  %v7476_v16 = vmul.f32 0.5, %v9922_v52  ;;  %v9924_v54 = vpop.eup %9923  ;;  %v7588_v39 = vmul.f32 %v7428_v1, %v13419_v29  ;;  %v7923_v22 = vunpack.c.l.bf16 %v14592_v53  ;;  %v14594_v52 = vld [vmem:[#allocation207_spill] sm:$0xff]  ;;  %v14595_v1 = vld [vmem:[#allocation208_spill] sm:$0xff] }
 0x9d5   :  { %v13588_v18 = vadd.f32 %v7603_v46, %v7587_v2  ;;  %v9926_v28 = vpop.eup %9925  ;;  %v7413_v50 = vmul.f32 0.5, %v9924_v54  ;;  %v7925_v35 = vunpack.c.l.bf16 %v14593_v24  ;;  %v7924_v46 = vunpack.c.l.bf16 %v14594_v52 }
 0x9d6   :  { %v7492_v15 = vadd.f32 0.5, %v7476_v16  ;;  %7780 = vmatmul.mubr.bf16.gmra.mrb[244].mxu0 %v7694_v6  ;;  %7893 = vmatmul.mubr.bf16.gmra.mrb[244].mxu1 %v7694_v6  ;;  %v9928_v30 = vpop.eup %9927  ;;  %v7926_v6 = vunpack.c.l.bf16 %v14595_v1 }
 0x9d7   :  { %9939 = vtanh.f32 %v13588_v18  ;;  %7789 = vmatprep.mubr.bf16.mxu0 %v14015_v44  ;;  %7902 = vmatprep.mubr.bf16.mxu1 %v14015_v44  ;;  %v9930_v59 = vpop.eup %9929  ;;  %v7429_v40 = vadd.f32 0.5, %v7413_v50  ;;  %v7477_v20 = vmul.f32 0.5, %v9928_v30 }
 0x9d8   :  { %v7604_v23 = vmul.f32 %v9926_v28, %v7492_v15  ;;  %9941 = vtanh.f32 %v7525_v41  ;;  %v9932_v13 = vpop.eup %9931  ;;  %v7554_v60 = vmul.f32 0.5, %v9930_v59  ;;  %v7927_v28 = vunpack.c.h.bf16 %v14592_v53 }
 0x9d9   :  { %v7589_v29 = vmul.f32 %v7429_v40, %v13423_v25  ;;  %v7493_v5 = vadd.f32 0.5, %v7477_v20  ;;  %v9934_v11 = vpop.eup %9933  ;;  %v7555_v32 = vmul.f32 0.5, %v9932_v13  ;;  %v7930_v40 = vunpack.c.h.bf16 %v14595_v1 }
 0x9da   :  { %v13594_v33 = vadd.f32 %v7604_v23, %v7588_v39  ;;  %v9936_v19 = vpop.eup %9935  ;;  %v7570_v12 = vadd.f32 0.5, %v7554_v60  ;;  %v7929_v39 = vunpack.c.h.bf16 %v14593_v24  ;;  %v7928_v23 = vunpack.c.h.bf16 %v14594_v52 }
 0x9db   :  { %v7605_v48 = vmul.f32 %v9934_v11, %v7493_v5  ;;  %v9938_v45 = vpop.eup %9937  ;;  %v7571_v47 = vadd.f32 0.5, %v7555_v32 }
 0x9dc   :  { %9943 = vtanh.f32 %v13594_v33  ;;  %v7650_v14 = vmul.f32 %v9936_v19, %v7570_v12  ;;  %v7556_v38 = vmul.f32 0.5, %v9938_v45  ;;  %v14596_v12 = vld [vmem:[#allocation209_spill] sm:$0xff] }
 0x9dd   :  { %v13598_v7 = vadd.f32 %v7605_v48, %v7589_v29 }
 0x9de   :  { %v7572_v56 = vadd.f32 0.5, %v7556_v38 }
 0x9df   :  { %9945 = vtanh.f32 %v13598_v7 }
 0x9e1   :  { %v9940_v58 = vpop.eup %9939 }
 0x9e2   :  { %v9942_v0 = vpop.eup %9941  ;;  %v7651_v62 = vmul.f32 %v9940_v58, %v7571_v47  ;;  %v7931_v47 = vunpack.c.l.bf16 %v14596_v12 }
 0x9e3   :  { %v7557_v8 = vmul.f32 0.5, %v9942_v0  ;;  %v14597_v0 = vld [vmem:[#allocation210_spill] sm:$0xff] }
 0x9e4   :  { %v7695_v25 = vpack.c.bf16 %v7651_v62, %v7650_v14  ;;  %v7933_v14 = vunpack.c.l.bf16 %v14597_v0  ;;  %v7935_v62 = vunpack.c.h.bf16 %v14596_v12 }
 0x9e5   :  { %v7573_v51 = vadd.f32 0.5, %v7557_v8 }
 0x9e6   :  { %7790 = vmatmul.mubr.bf16.gmra.mrb[248].mxu0 %v7695_v25  ;;  %7903 = vmatmul.mubr.bf16.gmra.mrb[248].mxu1 %v7695_v25  ;;  %v9944_v34 = vpop.eup %9943  ;;  %v7937_v25 = vunpack.c.h.bf16 %v14597_v0 }
 0x9e7   :  { %7799 = vmatprep.mubr.bf16.mxu0 %v14015_v44  ;;  %7912 = vmatprep.mubr.bf16.mxu1 %v14015_v44  ;;  %v7652_v26 = vmul.f32 %v9944_v34, %v7572_v56  ;;  %v14598_v34 = vld [vmem:[#allocation211_spill] sm:$0xff] }
 0x9e8   :  { %v7932_v56 = vunpack.c.l.bf16 %v14598_v34 }
 0x9e9   :  { %v9946_v27 = vpop.eup %9945 }
 0x9ea   :  { %v7653_v21 = vmul.f32 %v9946_v27, %v7573_v51  ;;  %v14599_v51 = vld [vmem:[#allocation212_spill] sm:$0xff] }
 0x9eb   :  { %v7934_v27 = vunpack.c.l.bf16 %v14599_v51  ;;  %v7938_v24 = vunpack.c.h.bf16 %v14599_v51 }
 0x9ec   :  { %v7696_v2 = vpack.c.bf16 %v7653_v21, %v7652_v26  ;;  %v7936_v26 = vunpack.c.h.bf16 %v14598_v34 }
 0x9ee   :  { %7800 = vmatmul.mubr.bf16.gmra.mrb[252].mxu0 %v7696_v2  ;;  %7913 = vmatmul.mubr.bf16.gmra.mrb[252].mxu1 %v7696_v2 }
 0xa5f   :  { %v7731_v3 = vpop.f32.mrb[224].mxu0  ;;  %v7844_v43 = vpop.f32.mrb[224].mxu1 }
 0xa60   :  { %v7987_v44 = vadd.f32 %v7923_v22, %v7731_v3  ;;  %v7989_v16 = vadd.f32 %v7925_v35, %v7844_v43  ;;  %v7733_v41 = vpop.f32.mrb[225].mxu0  ;;  %v7846_v54 = vpop.f32.mrb[225].mxu1 }
 0xa61   :  { %v7988_v15 = vadd.f32 %v7924_v46, %v7733_v41  ;;  %v7990_v50 = vadd.f32 %v7926_v6, %v7846_v54  ;;  %v7735_v30 = vpop.f32.mrb[226].mxu0  ;;  %v7848_v59 = vpop.f32.mrb[226].mxu1 }
 0xa62   :  { %v8051_v20 = vmul.f32 0.5, %v7987_v44  ;;  %v7991_v13 = vadd.f32 %v7927_v28, %v7735_v30  ;;  %v7993_v29 = vadd.f32 %v7929_v39, %v7848_v59  ;;  %v7737_v5 = vpop.f32.mrb[227].mxu0  ;;  %v7850_v11 = vpop.f32.mrb[227].mxu1 }
 0xa63   :  { %v8115_v60 = vmul.f32 0.5, %v7988_v15  ;;  %v7992_v32 = vadd.f32 %v7928_v23, %v7737_v5  ;;  %v7994_v48 = vadd.f32 %v7930_v40, %v7850_v11  ;;  %v8195_v58 = vmul.f32 0.5, %v7990_v50 }
 0xa64   :  { %9947 = vtanh.f32 %v8051_v20  ;;  %v8052_v19 = vmul.f32 0.5, %v7991_v13 }
 0xa65   :  { %9949 = vtanh.f32 %v8115_v60  ;;  %v8116_v45 = vmul.f32 0.5, %v7992_v32  ;;  %v8196_v35 = vmul.f32 0.5, %v7994_v48 }
 0xa66   :  { %9951 = vtanh.f32 %v8052_v19 }
 0xa67   :  { %9953 = vtanh.f32 %v7989_v16 }
 0xa68   :  { %9955 = vtanh.f32 %v8116_v45 }
 0xa69   :  { %v7741_v38 = vpop.f32.mrb[228].mxu0  ;;  %v7854_v8 = vpop.f32.mrb[228].mxu1  ;;  %9957 = vtanh.f32 %v8195_v58 }
 0xa6a   :  { %v7995_v21 = vadd.f32 %v7931_v47, %v7741_v38  ;;  %v7997_v2 = vadd.f32 %v7933_v14, %v7854_v8  ;;  %v7743_v53 = vpop.f32.mrb[229].mxu0  ;;  %v7856_v22 = vpop.f32.mrb[229].mxu1  ;;  %9959 = vtanh.f32 %v7993_v29 }
 0xa6b   :  { %v7996_v3 = vadd.f32 %v7932_v56, %v7743_v53  ;;  %v7998_v43 = vadd.f32 %v7934_v27, %v7856_v22  ;;  %v7745_v52 = vpop.f32.mrb[230].mxu0  ;;  %v7858_v46 = vpop.f32.mrb[230].mxu1 }
 0xa6c   :  { %v8053_v1 = vmul.f32 0.5, %v7995_v21  ;;  %v7999_v6 = vadd.f32 %v7935_v62, %v7745_v52  ;;  %v8001_v44 = vadd.f32 %v7937_v25, %v7858_v46  ;;  %v7747_v41 = vpop.f32.mrb[231].mxu0  ;;  %v7860_v54 = vpop.f32.mrb[231].mxu1 }
 0xa6d   :  { %v8117_v16 = vmul.f32 0.5, %v7996_v3  ;;  %v8000_v28 = vadd.f32 %v7936_v26, %v7747_v41  ;;  %v8002_v15 = vadd.f32 %v7938_v24, %v7860_v54  ;;  %v8197_v60 = vmul.f32 0.5, %v7998_v43 }
 0xa6e   :  { %9961 = vtanh.f32 %v8053_v1  ;;  %v8054_v39 = vmul.f32 0.5, %v7999_v6  ;;  %v9948_v30 = vpop.eup %9947  ;;  %v14601_v6 = vld [vmem:[#allocation214_spill] sm:$0xff] }
 0xa6f   :  { %9963 = vtanh.f32 %v8117_v16  ;;  %v8118_v50 = vmul.f32 0.5, %v8000_v28  ;;  %v9950_v59 = vpop.eup %9949  ;;  %v8083_v23 = vmul.f32 0.5, %v9948_v30  ;;  %v8198_v34 = vmul.f32 0.5, %v8002_v15 }
 0xa70   :  { %9965 = vtanh.f32 %v8196_v35  ;;  %v8147_v40 = vmul.f32 0.5, %v9950_v59  ;;  %v9952_v20 = vpop.eup %9951  ;;  %v7945_v54 = vunpack.c.h.bf16 %v14601_v6  ;;  %v14603_v59 = vld [vmem:[#allocation216_spill] sm:$0xff] }
 0xa71   :  { %9967 = vtanh.f32 %v8054_v39  ;;  %v8099_v13 = vadd.f32 0.5, %v8083_v23  ;;  %v9954_v5 = vpop.eup %9953  ;;  %v8084_v29 = vmul.f32 0.5, %v9952_v20  ;;  %v7942_v23 = vunpack.c.l.bf16 %v14603_v59 }
 0xa72   :  { %9969 = vtanh.f32 %v7997_v2  ;;  %v8163_v11 = vadd.f32 0.5, %v8147_v40  ;;  %v9956_v32 = vpop.eup %9955  ;;  %v7946_v20 = vunpack.c.h.bf16 %v14603_v59 }
 0xa73   :  { %9971 = vtanh.f32 %v8118_v50  ;;  %v8259_v48 = vmul.f32 %v8099_v13, %v13447_v4  ;;  %v9958_v19 = vpop.eup %9957  ;;  %v8100_v12 = vadd.f32 0.5, %v8084_v29  ;;  %v8148_v47 = vmul.f32 0.5, %v9956_v32  ;;  %v14602_v50 = vld [vmem:[#allocation215_spill] sm:$0xff] }
 0xa74   :  { %v8275_v45 = vmul.f32 %v9954_v5, %v8163_v11  ;;  %v9960_v58 = vpop.eup %9959  ;;  %9973 = vtanh.f32 %v8001_v44  ;;  %v8227_v1 = vmul.f32 0.5, %v9958_v19  ;;  %v7941_v44 = vunpack.c.l.bf16 %v14601_v6  ;;  %v14606_v6 = vld [vmem:[#allocation219_spill] sm:$0xff] }
 0xa75   :  { %v8260_v62 = vmul.f32 %v8100_v12, %v13451_v9  ;;  %v8164_v25 = vadd.f32 0.5, %v8148_v47  ;;  %9975 = vtanh.f32 %v8197_v60  ;;  %v14600_v9 = vld [vmem:[#allocation213_spill] sm:$0xff]  ;;  %v7940_v30 = vunpack.c.l.bf16 %v14602_v50 }
 0xa76   :  { %v8291_v14 = vadd.f32 %v8275_v45, %v8259_v48  ;;  %v7939_v3 = vunpack.c.l.bf16 %v14600_v9  ;;  %v7943_v41 = vunpack.c.h.bf16 %v14600_v9  ;;  %v7944_v40 = vunpack.c.h.bf16 %v14602_v50  ;;  %v14604_v60 = vld [vmem:[#allocation217_spill] sm:$0xff]  ;;  %v14605_v48 = vld [vmem:[#allocation218_spill] sm:$0xff] }
 0xa77   :  { %v8276_v51 = vmul.f32 %v9960_v58, %v8164_v25  ;;  %v7947_v32 = vunpack.c.l.bf16 %v14604_v60  ;;  %v7949_v19 = vunpack.c.l.bf16 %v14605_v48  ;;  %v7951_v58 = vunpack.c.h.bf16 %v14604_v60 }
 0xa78   :  { %v9962_v0 = vpop.eup %9961  ;;  %9977 = vtanh.f32 %v8291_v14 }
 0xa79   :  { %v9964_v38 = vpop.eup %9963  ;;  %v8085_v8 = vmul.f32 0.5, %v9962_v0  ;;  %v8292_v2 = vadd.f32 %v8276_v51, %v8260_v62  ;;  %9979 = vtanh.f32 %v8198_v34  ;;  %v8243_v0 = vadd.f32 0.5, %v8227_v1 }
 0xa7a   :  { %v9966_v56 = vpop.eup %9965  ;;  %v8149_v27 = vmul.f32 0.5, %v9964_v38 }
 0xa7b   :  { %v9968_v4 = vpop.eup %9967  ;;  %v8101_v26 = vadd.f32 0.5, %v8085_v8  ;;  %9981 = vtanh.f32 %v8292_v2  ;;  %v8228_v16 = vmul.f32 0.5, %v9966_v56 }
 0xa7c   :  { %v9970_v21 = vpop.eup %9969  ;;  %v8165_v53 = vadd.f32 0.5, %v8149_v27  ;;  %v8086_v22 = vmul.f32 0.5, %v9968_v4 }
 0xa7d   :  { %v9972_v24 = vpop.eup %9971  ;;  %v8261_v35 = vmul.f32 %v8101_v26, %v13459_v49  ;;  %v8244_v62 = vadd.f32 0.5, %v8228_v16 }
 0xa7e   :  { %v8277_v43 = vmul.f32 %v9970_v21, %v8165_v53  ;;  %v8102_v52 = vadd.f32 0.5, %v8086_v22  ;;  %v8150_v46 = vmul.f32 0.5, %v9972_v24  ;;  %v9974_v49 = vpop.eup %9973 }
 0xa7f   :  { %v9976_v13 = vpop.eup %9975 }
 0xa80   :  { %v8293_v28 = vadd.f32 %v8277_v43, %v8261_v35  ;;  %v8262_v39 = vmul.f32 %v8102_v52, %v13469_v42  ;;  %v8166_v15 = vadd.f32 0.5, %v8150_v46  ;;  %v8229_v51 = vmul.f32 0.5, %v9976_v13  ;;  %v13634_v35 = vld [vmem:[#allocation12] ss:$0 sm:$0xff] }
 0xa82   :  { %9983 = vtanh.f32 %v8293_v28  ;;  %v8278_v5 = vmul.f32 %v9974_v49, %v8166_v15  ;;  %v9978_v14 = vpop.eup %9977 }
 0xa83   :  { %v9980_v9 = vpop.eup %9979  ;;  %v8323_v52 = vmul.f32 %v9978_v14, %v8243_v0 }
 0xa84   :  { %v7751_v11 = vpop.f32.mrb[232].mxu0  ;;  %v7864_v29 = vpop.f32.mrb[232].mxu1  ;;  %v8294_v25 = vadd.f32 %v8278_v5, %v8262_v39  ;;  %v8230_v15 = vmul.f32 0.5, %v9980_v9  ;;  %v8245_v5 = vadd.f32 0.5, %v8229_v51 }
 0xa85   :  { %v8003_v42 = vadd.f32 %v7939_v3, %v7751_v11  ;;  %v8005_v45 = vadd.f32 %v7941_v44, %v7864_v29  ;;  %v7753_v12 = vpop.f32.mrb[233].mxu0  ;;  %v7866_v47 = vpop.f32.mrb[233].mxu1  ;;  %v7948_v44 = vunpack.c.l.bf16 %v14606_v6  ;;  %v8346_v28 = vmul.f32 %v13634_v35, %v8323_v52 }
 0xa86   :  { %v8004_v38 = vadd.f32 %v7940_v30, %v7753_v12  ;;  %v8006_v8 = vadd.f32 %v7942_v23, %v7866_v47  ;;  %v7755_v34 = vpop.f32.mrb[234].mxu0  ;;  %v7868_v56 = vpop.f32.mrb[234].mxu1  ;;  %9985 = vtanh.f32 %v8294_v25  ;;  %v7952_v30 = vunpack.c.h.bf16 %v14606_v6 }
 0xa87   :  { %v8055_v27 = vmul.f32 0.5, %v8003_v42  ;;  %v8007_v4 = vadd.f32 %v7943_v41, %v7755_v34  ;;  %v8009_v26 = vadd.f32 %v7945_v54, %v7868_v56  ;;  %v7757_v21 = vpop.f32.mrb[235].mxu0  ;;  %v7870_v2 = vpop.f32.mrb[235].mxu1  ;;  %v7953_v41 = vunpack.c.h.bf16 %v14605_v48  ;;  %v14607_v54 = vld [vmem:[#allocation220_spill] sm:$0xff]  ;;  %8362 = vadd.xlane.f32.xlu0 %v8346_v28 }
 0xa88   :  { %v8119_v53 = vmul.f32 0.5, %v8004_v38  ;;  %v8199_v22 = vmul.f32 0.5, %v8006_v8  ;;  %v8008_v24 = vadd.f32 %v7944_v40, %v7757_v21  ;;  %v8010_v43 = vadd.f32 %v7946_v20, %v7870_v2  ;;  %v9982_v46 = vpop.eup %9981 }
 0xa89   :  { %9987 = vtanh.f32 %v8055_v27  ;;  %v8056_v3 = vmul.f32 0.5, %v8007_v4  ;;  %v7950_v16 = vunpack.c.l.bf16 %v14607_v54  ;;  %v8324_v39 = vmul.f32 %v9982_v46, %v8244_v62 }
 0xa8a   :  { %9989 = vtanh.f32 %v8119_v53  ;;  %v8120_v1 = vmul.f32 0.5, %v8008_v24  ;;  %v7954_v59 = vunpack.c.h.bf16 %v14607_v54  ;;  %v8200_v29 = vmul.f32 0.5, %v8010_v43 }
 0xa8b   :  { %9991 = vtanh.f32 %v8005_v45  ;;  %v8347_v25 = vmul.f32 %v13634_v35, %v8324_v39 }
 0xa8c   :  { %9993 = vtanh.f32 %v8056_v3  ;;  %v9984_v11 = vpop.eup %9983 }
 0xa8d   :  { %v7761_v49 = vpop.f32.mrb[236].mxu0  ;;  %v7874_v50 = vpop.f32.mrb[236].mxu1  ;;  %9995 = vtanh.f32 %v8199_v22  ;;  %8364 = vadd.xlane.f32.xlu0 %v8347_v25  ;;  %v8325_v56 = vmul.f32 %v9984_v11, %v8245_v5 }
 0xa8e   :  { %v8011_v23 = vadd.f32 %v7947_v32, %v7761_v49  ;;  %v8013_v40 = vadd.f32 %v7949_v19, %v7874_v50  ;;  %v7763_v20 = vpop.f32.mrb[237].mxu0  ;;  %v7876_v13 = vpop.f32.mrb[237].mxu1  ;;  %9997 = vtanh.f32 %v8120_v1  ;;  %v8246_v32 = vadd.f32 0.5, %v8230_v15  ;;  %v14609_v15 = vld [vmem:[#allocation222_spill] sm:$0xff] }
 0xa8f   :  { %v8012_v60 = vadd.f32 %v7948_v44, %v7763_v20  ;;  %v8014_v48 = vadd.f32 %v7950_v16, %v7876_v13  ;;  %v7765_v42 = vpop.f32.mrb[238].mxu0  ;;  %v7878_v45 = vpop.f32.mrb[238].mxu1  ;;  %9999 = vtanh.f32 %v8009_v26  ;;  %v7957_v49 = vunpack.c.l.bf16 %v14609_v15 }
 0xa90   :  { %v8057_v12 = vmul.f32 0.5, %v8011_v23  ;;  %v8015_v47 = vadd.f32 %v7951_v58, %v7765_v42  ;;  %v8017_v0 = vadd.f32 %v7953_v41, %v7878_v45  ;;  %v7767_v14 = vpop.f32.mrb[239].mxu0  ;;  %v7880_v62 = vpop.f32.mrb[239].mxu1  ;;  %v8348_v58 = vmul.f32 %v13634_v35, %v8325_v56  ;;  %v14608_v41 = vld [vmem:[#allocation221_spill] sm:$0xff] }
 0xa91   :  { %v8121_v19 = vmul.f32 0.5, %v8012_v60  ;;  %v8016_v38 = vadd.f32 %v7952_v30, %v7767_v14  ;;  %v8018_v34 = vadd.f32 %v7954_v59, %v7880_v62  ;;  %v9986_v51 = vpop.eup %9985  ;;  %v8201_v46 = vmul.f32 0.5, %v8014_v48  ;;  %v14610_v30 = vld [vmem:[#allocation223_spill] sm:$0xff]  ;;  %v14611_v48 = vld [vmem:[#allocation224_spill] sm:$0xff] }
 0xa92   :  { %10001 = vtanh.f32 %v8057_v12  ;;  %v8058_v8 = vmul.f32 0.5, %v8015_v47  ;;  %v8326_v21 = vmul.f32 %v9986_v51, %v8246_v32  ;;  %8366 = vadd.xlane.f32.xlu1 %v8348_v58  ;;  %v7955_v54 = vunpack.c.l.bf16 %v14608_v41  ;;  %v14612_v32 = vld [vmem:[#allocation225_spill] sm:$0xff] }
 0xa93   :  { %10003 = vtanh.f32 %v8121_v19  ;;  %v8122_v27 = vmul.f32 0.5, %v8016_v38  ;;  %v9988_v4 = vpop.eup %9987  ;;  %v7956_v59 = vunpack.c.l.bf16 %v14610_v30  ;;  %v7959_v23 = vunpack.c.h.bf16 %v14608_v41 }
 0xa94   :  { %10005 = vtanh.f32 %v8200_v29  ;;  %v9990_v2 = vpop.eup %9989  ;;  %v8087_v53 = vmul.f32 0.5, %v9988_v4  ;;  %v8349_v1 = vmul.f32 %v13634_v35, %v8326_v21  ;;  %v8202_v60 = vmul.f32 0.5, %v8018_v34 }
 0xa95   :  { %10007 = vtanh.f32 %v8058_v8  ;;  %v9992_v22 = vpop.eup %9991  ;;  %v8151_v26 = vmul.f32 0.5, %v9990_v2  ;;  %v7958_v42 = vunpack.c.l.bf16 %v14611_v48  ;;  %v7960_v45 = vunpack.c.h.bf16 %v14610_v30 }
 0xa96   :  { %10009 = vtanh.f32 %v8013_v40  ;;  %v9994_v24 = vpop.eup %9993  ;;  %v8103_v9 = vadd.f32 0.5, %v8087_v53  ;;  %8368 = vadd.xlane.f32.xlu1 %v8349_v1  ;;  %v7961_v40 = vunpack.c.h.bf16 %v14609_v15  ;;  %v7962_v14 = vunpack.c.h.bf16 %v14611_v48 }
 0xa97   :  { %10011 = vtanh.f32 %v8122_v27  ;;  %v9996_v3 = vpop.eup %9995  ;;  %v8167_v43 = vadd.f32 0.5, %v8151_v26  ;;  %v8088_v52 = vmul.f32 0.5, %v9994_v24  ;;  %v7965_v19 = vunpack.c.l.bf16 %v14612_v32  ;;  %v14614_v26 = vld [vmem:[#allocation227_spill] sm:$0xff] }
 0xa98   :  { %v9998_v6 = vpop.eup %9997  ;;  %v8263_v44 = vmul.f32 %v8103_v9, %v13492_v55  ;;  %10013 = vtanh.f32 %v8017_v0  ;;  %v7969_v4 = vunpack.c.h.bf16 %v14612_v32  ;;  %v8231_v21 = vmul.f32 0.5, %v9996_v3 }
 0xa99   :  { %v8279_v16 = vmul.f32 %v9992_v22, %v8167_v43  ;;  %v8104_v28 = vadd.f32 0.5, %v8088_v52  ;;  %v8152_v39 = vmul.f32 0.5, %v9998_v6  ;;  %v10000_v50 = vpop.eup %9999  ;;  %10015 = vtanh.f32 %v8201_v46 }
 0xa9a   :  { %v7964_v24 = vunpack.c.l.bf16 %v14614_v26 }
 0xa9b   :  { %v8295_v13 = vadd.f32 %v8279_v16, %v8263_v44  ;;  %v8264_v55 = vmul.f32 %v8104_v28, %v13500_v31  ;;  %v8168_v5 = vadd.f32 0.5, %v8152_v39  ;;  %v14613_v31 = vld [vmem:[#allocation226_spill] sm:$0xff]  ;;  %v14615_v39 = vld [vmem:[#allocation228_spill] sm:$0xff] }
 0xa9c   :  { %v10002_v20 = vpop.eup %10001  ;;  %v7963_v38 = vunpack.c.l.bf16 %v14613_v31  ;;  %v7967_v8 = vunpack.c.h.bf16 %v14613_v31  ;;  %v7966_v3 = vunpack.c.l.bf16 %v14615_v39 }
 0xa9d   :  { %v10004_v11 = vpop.eup %10003  ;;  %v8089_v29 = vmul.f32 0.5, %v10002_v20  ;;  %10017 = vtanh.f32 %v8295_v13  ;;  %v8280_v47 = vmul.f32 %v10000_v50, %v8168_v5 }
 0xa9e   :  { %v10006_v12 = vpop.eup %10005  ;;  %v8153_v0 = vmul.f32 0.5, %v10004_v11  ;;  %10019 = vtanh.f32 %v8202_v60  ;;  %v7968_v60 = vunpack.c.h.bf16 %v14614_v26 }
 0xa9f   :  { %v10008_v62 = vpop.eup %10007  ;;  %v8105_v25 = vadd.f32 0.5, %v8089_v29  ;;  %v8296_v34 = vadd.f32 %v8280_v47, %v8264_v55  ;;  %v8232_v5 = vmul.f32 0.5, %v10006_v12 }
 0xaa0   :  { %v10010_v56 = vpop.eup %10009  ;;  %v8169_v51 = vadd.f32 0.5, %v8153_v0  ;;  %v8090_v27 = vmul.f32 0.5, %v10008_v62 }
 0xaa1   :  { %v10012_v58 = vpop.eup %10011  ;;  %v8265_v2 = vmul.f32 %v8105_v25, %v13506_v37  ;;  %v7771_v53 = vpop.f32.mrb[240].mxu0  ;;  %10021 = vtanh.f32 %v8296_v34  ;;  %v8248_v12 = vadd.f32 0.5, %v8232_v5 }
 0xaa2   :  { %v7884_v22 = vpop.f32.mrb[240].mxu1  ;;  %v8281_v9 = vmul.f32 %v10010_v56, %v8169_v51  ;;  %v8106_v43 = vadd.f32 0.5, %v8090_v27  ;;  %v8154_v52 = vmul.f32 0.5, %v10012_v58  ;;  %v7773_v46 = vpop.f32.mrb[241].mxu0  ;;  %v8019_v6 = vadd.f32 %v7955_v54, %v7771_v53 }
 0xaa3   :  { %v7886_v1 = vpop.f32.mrb[241].mxu1  ;;  %v8021_v44 = vadd.f32 %v7957_v49, %v7884_v22  ;;  %v8020_v41 = vadd.f32 %v7956_v59, %v7773_v46  ;;  %v7775_v16 = vpop.f32.mrb[242].mxu0  ;;  %v8247_v49 = vadd.f32 0.5, %v8231_v21  ;;  %v7970_v56 = vunpack.c.h.bf16 %v14615_v39 }
 0xaa4   :  { %v7888_v28 = vpop.f32.mrb[242].mxu1  ;;  %v8297_v15 = vadd.f32 %v8281_v9, %v8265_v2  ;;  %v8266_v37 = vmul.f32 %v8106_v43, %v13518_v17  ;;  %v8170_v50 = vadd.f32 0.5, %v8154_v52  ;;  %v8022_v30 = vadd.f32 %v7958_v42, %v7886_v1  ;;  %v7777_v20 = vpop.f32.mrb[243].mxu0 }
 0xaa5   :  { %v7890_v13 = vpop.f32.mrb[243].mxu1  ;;  %v10014_v55 = vpop.eup %10013  ;;  %v8059_v11 = vmul.f32 0.5, %v8019_v6  ;;  %v8123_v29 = vmul.f32 0.5, %v8020_v41  ;;  %v8023_v48 = vadd.f32 %v7959_v23, %v7775_v16  ;;  %v8025_v47 = vadd.f32 %v7961_v40, %v7888_v28 }
 0xaa6   :  { %v10016_v54 = vpop.eup %10015  ;;  %10023 = vtanh.f32 %v8297_v15  ;;  %v8282_v59 = vmul.f32 %v10014_v55, %v8170_v50  ;;  %v8024_v0 = vadd.f32 %v7960_v45, %v7777_v20  ;;  %v8026_v62 = vadd.f32 %v7962_v14, %v7890_v13 }
 0xaa7   :  { %10025 = vtanh.f32 %v8059_v11  ;;  %v10018_v17 = vpop.eup %10017  ;;  %v8060_v42 = vmul.f32 0.5, %v8023_v48  ;;  %v8233_v34 = vmul.f32 0.5, %v10016_v54  ;;  %v8203_v21 = vmul.f32 0.5, %v8022_v30 }
 0xaa8   :  { %v8298_v25 = vadd.f32 %v8282_v59, %v8266_v37  ;;  %10027 = vtanh.f32 %v8123_v29  ;;  %v8124_v51 = vmul.f32 0.5, %v8024_v0  ;;  %v8327_v2 = vmul.f32 %v10018_v17, %v8247_v49  ;;  %v10020_v45 = vpop.eup %10019  ;;  %v14619_v17 = vld [vmem:[#allocation232_spill] sm:$0xff] }
 0xaa9   :  { %v7894_v27 = vpop.f32.mrb[244].mxu1  ;;  %v7781_v58 = vpop.f32.mrb[244].mxu0  ;;  %v8204_v28 = vmul.f32 0.5, %v8026_v62  ;;  %v8249_v15 = vadd.f32 0.5, %v8233_v34  ;;  %v7978_v34 = vunpack.c.h.bf16 %v14619_v17 }
 0xaaa   :  { %10029 = vtanh.f32 %v8298_v25  ;;  %v8029_v53 = vadd.f32 %v7965_v19, %v7894_v27  ;;  %v8027_v23 = vadd.f32 %v7963_v38, %v7781_v58  ;;  %v7783_v22 = vpop.f32.mrb[245].mxu0  ;;  %v7896_v40 = vpop.f32.mrb[245].mxu1  ;;  %v8350_v52 = vmul.f32 %v13634_v35, %v8327_v2 }
 0xaab   :  { %10031 = vtanh.f32 %v8060_v42  ;;  %v8028_v14 = vadd.f32 %v7964_v24, %v7783_v22  ;;  %v8030_v26 = vadd.f32 %v7966_v3, %v7896_v40  ;;  %v7785_v9 = vpop.f32.mrb[246].mxu0  ;;  %v7898_v43 = vpop.f32.mrb[246].mxu1  ;;  %v7974_v25 = vunpack.c.l.bf16 %v14619_v17  ;;  %v14621_v22 = vld [vmem:[#allocation234_spill] sm:$0xff] }
 0xaac   :  { %v10022_v46 = vpop.eup %10021  ;;  %10033 = vtanh.f32 %v8021_v44  ;;  %v8061_v1 = vmul.f32 0.5, %v8027_v23  ;;  %v8031_v6 = vadd.f32 %v7967_v8, %v7785_v9  ;;  %v13670_v19 = vadd.f32 %v7969_v4, %v7898_v43  ;;  %v7787_v38 = vpop.f32.mrb[247].mxu0  ;;  %8370 = vadd.xlane.f32.xlu0 %v8350_v52  ;;  %v14616_v8 = vld [vmem:[#allocation229_spill] sm:$0xff]  ;;  %v14617_v4 = vld [vmem:[#allocation230_spill] sm:$0xff] }
 0xaad   :  { %v7900_v41 = vpop.f32.mrb[247].mxu1  ;;  %10035 = vtanh.f32 %v8124_v51  ;;  %v8125_v16 = vmul.f32 0.5, %v8028_v14  ;;  %v8032_v24 = vadd.f32 %v7968_v60, %v7787_v38  ;;  %v8328_v3 = vmul.f32 %v10022_v46, %v8248_v12  ;;  %v14618_v60 = vld [vmem:[#allocation231_spill] sm:$0xff] }
 0xaae   :  { %10037 = vtanh.f32 %v8203_v21  ;;  %v8034_v39 = vadd.f32 %v7970_v56, %v7900_v41  ;;  %v8234_v44 = vmul.f32 0.5, %v10020_v45  ;;  %v8062_v37 = vmul.f32 0.5, %v8031_v6  ;;  %v14620_v21 = vld [vmem:[#allocation233_spill] sm:$0xff]  ;;  %v14622_v6 = vld [vmem:[#allocation235_spill] sm:$0xff] }
 0xaaf   :  { %10039 = vtanh.f32 %v8025_v47  ;;  %v7973_v32 = vunpack.c.l.bf16 %v14616_v8  ;;  %v7971_v50 = vunpack.c.l.bf16 %v14617_v4  ;;  %v8351_v30 = vmul.f32 %v13634_v35, %v8328_v3 }
 0xab0   :  { %v10024_v31 = vpop.eup %10023  ;;  %10041 = vtanh.f32 %v8061_v1  ;;  %v8126_v13 = vmul.f32 0.5, %v8032_v24  ;;  %v7975_v55 = vunpack.c.h.bf16 %v14617_v4  ;;  %v7972_v54 = vunpack.c.l.bf16 %v14618_v60 }
 0xab1   :  { %v10026_v20 = vpop.eup %10025  ;;  %10043 = vtanh.f32 %v8125_v16  ;;  %v8329_v5 = vmul.f32 %v10024_v31, %v8249_v15  ;;  %v7977_v49 = vunpack.c.h.bf16 %v14616_v8  ;;  %8372 = vadd.xlane.f32.xlu1 %v8351_v30  ;;  %v8250_v59 = vadd.f32 0.5, %v8234_v44  ;;  %v14623_v15 = vld [vmem:[#allocation236_spill] sm:$0xff] }
 0xab2   :  { %v10028_v11 = vpop.eup %10027  ;;  %v8091_v29 = vmul.f32 0.5, %v10026_v20  ;;  %10045 = vtanh.f32 %v8204_v28  ;;  %v7976_v42 = vunpack.c.h.bf16 %v14618_v60  ;;  %v7979_v23 = vunpack.c.l.bf16 %v14620_v21 }
 0xab3   :  { %v8155_v48 = vmul.f32 0.5, %v10028_v11  ;;  %10047 = vtanh.f32 %v8062_v37  ;;  %v8352_v47 = vmul.f32 %v13634_v35, %v8329_v5  ;;  %v7981_v40 = vunpack.c.l.bf16 %v14621_v22 }
 0xab4   :  { %v10030_v0 = vpop.eup %10029  ;;  %v8107_v62 = vadd.f32 0.5, %v8091_v29  ;;  %10049 = vtanh.f32 %v8029_v53  ;;  %v8205_v14 = vmul.f32 0.5, %v8030_v26  ;;  %v7983_v9 = vunpack.c.h.bf16 %v14620_v21 }
 0xab5   :  { %v10032_v56 = vpop.eup %10031  ;;  %v8171_v12 = vadd.f32 0.5, %v8155_v48  ;;  %10051 = vtanh.f32 %v8126_v13  ;;  %8374 = vadd.xlane.f32.xlu0 %v8352_v47  ;;  %v8330_v51 = vmul.f32 %v10030_v0, %v8250_v59  ;;  %v7980_v38 = vunpack.c.l.bf16 %v14622_v6 }
 0xab6   :  { %v10034_v27 = vpop.eup %10033  ;;  %v8267_v58 = vmul.f32 %v8107_v62, %v13540_v57  ;;  %v8092_v2 = vmul.f32 0.5, %v10032_v56  ;;  %v7985_v41 = vunpack.c.h.bf16 %v14621_v22  ;;  %10053 = vtanh.f32 %v13670_v19 }
 0xab7   :  { %v10036_v53 = vpop.eup %10035  ;;  %v8283_v45 = vmul.f32 %v10034_v27, %v8171_v12  ;;  %v8353_v43 = vmul.f32 %v13634_v35, %v8330_v51  ;;  %v8206_v24 = vmul.f32 0.5, %v8034_v39  ;;  %v7982_v26 = vunpack.c.l.bf16 %v14623_v15 }
 0xab8   :  { %v10038_v52 = vpop.eup %10037  ;;  %v8108_v46 = vadd.f32 0.5, %v8092_v2  ;;  %v8156_v1 = vmul.f32 0.5, %v10036_v53  ;;  %10055 = vtanh.f32 %v8205_v14 }
 0xab9   :  { %v10040_v57 = vpop.eup %10039  ;;  %v8299_v16 = vadd.f32 %v8283_v45, %v8267_v58  ;;  %v7904_v28 = vpop.f32.mrb[248].mxu1  ;;  %8376 = vadd.xlane.f32.xlu1 %v8353_v43  ;;  %v8235_v29 = vmul.f32 0.5, %v10038_v52  ;;  %v7984_v43 = vunpack.c.h.bf16 %v14622_v6  ;;  %v7986_v52 = vunpack.c.h.bf16 %v14623_v15 }
 0xaba   :  { %v7791_v3 = vpop.f32.mrb[248].mxu0  ;;  %v10042_v44 = vpop.eup %10041  ;;  %v8268_v37 = vmul.f32 %v8108_v46, %v13556_v61  ;;  %v8172_v31 = vadd.f32 0.5, %v8156_v1  ;;  %v8037_v30 = vadd.f32 %v7973_v32, %v7904_v28 }
 0xabb   :  { %v8035_v20 = vadd.f32 %v7971_v50, %v7791_v3  ;;  %v7793_v13 = vpop.f32.mrb[249].mxu0  ;;  %v7906_v5 = vpop.f32.mrb[249].mxu1  ;;  %v8093_v59 = vmul.f32 0.5, %v10042_v44  ;;  %10057 = vtanh.f32 %v8299_v16  ;;  %v8251_v16 = vadd.f32 0.5, %v8235_v29 }
 0xabc   :  { %v10044_v11 = vpop.eup %10043  ;;  %v8036_v48 = vadd.f32 %v7972_v54, %v7793_v13  ;;  %v7795_v19 = vpop.f32.mrb[250].mxu0  ;;  %v8284_v0 = vmul.f32 %v10040_v57, %v8172_v31  ;;  %10059 = vtanh.f32 %v8206_v24  ;;  %v8038_v50 = vadd.f32 %v7974_v25, %v7906_v5 }
 0xabd   :  { %v7908_v39 = vpop.f32.mrb[250].mxu1  ;;  %v10046_v47 = vpop.eup %10045  ;;  %v8157_v62 = vmul.f32 0.5, %v10044_v11  ;;  %v8063_v56 = vmul.f32 0.5, %v8035_v20  ;;  %v8109_v27 = vadd.f32 0.5, %v8093_v59  ;;  %v8039_v25 = vadd.f32 %v7975_v55, %v7795_v19 }
 0xabe   :  { %v7797_v12 = vpop.f32.mrb[251].mxu0  ;;  %v7910_v51 = vpop.f32.mrb[251].mxu1  ;;  %v8127_v32 = vmul.f32 0.5, %v8036_v48  ;;  %v8300_v2 = vadd.f32 %v8284_v0, %v8268_v37  ;;  %v8236_v24 = vmul.f32 0.5, %v10046_v47  ;;  %v8041_v28 = vadd.f32 %v7977_v49, %v7908_v39 }
 0xabf   :  { %v10048_v61 = vpop.eup %10047  ;;  %v8173_v53 = vadd.f32 0.5, %v8157_v62  ;;  %10061 = vtanh.f32 %v8063_v56  ;;  %v8269_v14 = vmul.f32 %v8109_v27, %v13568_v10  ;;  %v8040_v37 = vadd.f32 %v7976_v42, %v7797_v12 }
 0xac0   :  { %v10050_v58 = vpop.eup %10049  ;;  %v8094_v45 = vmul.f32 0.5, %v10048_v61  ;;  %10063 = vtanh.f32 %v8127_v32  ;;  %v8207_v5 = vmul.f32 0.5, %v8038_v50  ;;  %v8064_v11 = vmul.f32 0.5, %v8039_v25 }
 0xac1   :  { %v10052_v54 = vpop.eup %10051  ;;  %10065 = vtanh.f32 %v8300_v2  ;;  %v8285_v46 = vmul.f32 %v10050_v58, %v8173_v53  ;;  %v7801_v31 = vpop.f32.mrb[252].mxu0  ;;  %v8042_v4 = vadd.f32 %v7978_v34, %v7910_v51  ;;  %v8128_v49 = vmul.f32 0.5, %v8040_v37 }
 0xac2   :  { %v8110_v1 = vadd.f32 0.5, %v8094_v45  ;;  %v8158_v57 = vmul.f32 0.5, %v10052_v54  ;;  %v7914_v20 = vpop.f32.mrb[252].mxu1  ;;  %v10054_v13 = vpop.eup %10053  ;;  %10067 = vtanh.f32 %v8037_v30  ;;  %v8252_v48 = vadd.f32 0.5, %v8236_v24 }
 0xac3   :  { %v8301_v3 = vadd.f32 %v8285_v46, %v8269_v14  ;;  %v7803_v55 = vpop.f32.mrb[253].mxu0  ;;  %v7916_v29 = vpop.f32.mrb[253].mxu1  ;;  %v8045_v30 = vadd.f32 %v7981_v40, %v7914_v20 }
 0xac4   :  { %v8270_v10 = vmul.f32 %v8110_v1, %v13576_v63  ;;  %v8174_v44 = vadd.f32 0.5, %v8158_v57  ;;  %v8043_v63 = vadd.f32 %v7979_v23, %v7801_v31  ;;  %v7805_v59 = vpop.f32.mrb[254].mxu0  ;;  %v7918_v60 = vpop.f32.mrb[254].mxu1  ;;  %v8044_v17 = vadd.f32 %v7980_v38, %v7803_v55 }
 0xac5   :  { %10069 = vtanh.f32 %v8301_v3  ;;  %v10056_v42 = vpop.eup %10055  ;;  %v7807_v34 = vpop.f32.mrb[255].mxu0  ;;  %v8046_v23 = vadd.f32 %v7982_v26, %v7916_v29  ;;  %v8047_v12 = vadd.f32 %v7983_v9, %v7805_v59  ;;  %v8049_v40 = vadd.f32 %v7985_v41, %v7918_v60 }
 0xac6   :  { %v8286_v8 = vmul.f32 %v10054_v13, %v8174_v44  ;;  %10071 = vtanh.f32 %v8064_v11  ;;  %v7920_v19 = vpop.f32.mrb[255].mxu1  ;;  %v10058_v39 = vpop.eup %10057  ;;  %v8065_v0 = vmul.f32 0.5, %v8043_v63  ;;  %v8129_v56 = vmul.f32 0.5, %v8044_v17 }
 0xac7   :  { %10073 = vtanh.f32 %v8128_v49  ;;  %v10060_v62 = vpop.eup %10059  ;;  %v8237_v38 = vmul.f32 0.5, %v10056_v42  ;;  %v8048_v51 = vadd.f32 %v7984_v43, %v7807_v34  ;;  %v8050_v61 = vadd.f32 %v7986_v52, %v7920_v19 }
 0xac8   :  { %v8302_v47 = vadd.f32 %v8286_v8, %v8270_v10  ;;  %10075 = vtanh.f32 %v8207_v5  ;;  %v8066_v50 = vmul.f32 0.5, %v8047_v12  ;;  %v8331_v15 = vmul.f32 %v10058_v39, %v8251_v16 }
 0xac9   :  { %v10062_v6 = vpop.eup %10061  ;;  %v8130_v2 = vmul.f32 0.5, %v8048_v51  ;;  %v8253_v9 = vadd.f32 0.5, %v8237_v38  ;;  %v8238_v41 = vmul.f32 0.5, %v10060_v62  ;;  %v8208_v43 = vmul.f32 0.5, %v8042_v4 }
 0xaca   :  { %10077 = vtanh.f32 %v8302_v47  ;;  %v10064_v27 = vpop.eup %10063  ;;  %v8095_v32 = vmul.f32 0.5, %v10062_v6  ;;  %v8354_v21 = vmul.f32 %v13634_v35, %v8331_v15  ;;  %v8209_v20 = vmul.f32 0.5, %v8046_v23 }
 0xacb   :  { %10079 = vtanh.f32 %v8065_v0  ;;  %v10066_v26 = vpop.eup %10065  ;;  %v8159_v58 = vmul.f32 0.5, %v10064_v27  ;;  %v8254_v10 = vadd.f32 0.5, %v8238_v41  ;;  %v8210_v42 = vmul.f32 0.5, %v8050_v61 }
 0xacc   :  { %10081 = vtanh.f32 %v8041_v28  ;;  %v8111_v53 = vadd.f32 0.5, %v8095_v32  ;;  %v8332_v22 = vmul.f32 %v10066_v26, %v8252_v48  ;;  %v10068_v54 = vpop.eup %10067  ;;  %8378 = vadd.xlane.f32.xlu0 %v8354_v21 }
 0xacd   :  { %10083 = vtanh.f32 %v8129_v56  ;;  %v8175_v45 = vadd.f32 0.5, %v8159_v58 }
 0xace   :  { %v8271_v14 = vmul.f32 %v8111_v53, %v13582_v36  ;;  %10085 = vtanh.f32 %v8066_v50  ;;  %v8355_v52 = vmul.f32 %v13634_v35, %v8332_v22 }
 0xacf   :  { %v10070_v46 = vpop.eup %10069  ;;  %v8287_v1 = vmul.f32 %v10068_v54, %v8175_v45  ;;  %10087 = vtanh.f32 %v8045_v30 }
 0xad0   :  { %v10072_v57 = vpop.eup %10071  ;;  %10089 = vtanh.f32 %v8130_v2  ;;  %8380 = vadd.xlane.f32.xlu1 %v8355_v52  ;;  %v8333_v16 = vmul.f32 %v10070_v46, %v8253_v9 }
 0xad1   :  { %v10074_v24 = vpop.eup %10073  ;;  %v8303_v25 = vadd.f32 %v8287_v1, %v8271_v14  ;;  %v8096_v28 = vmul.f32 0.5, %v10072_v57  ;;  %10091 = vtanh.f32 %v8208_v43  ;;  %v13728_v57 = vld [vmem:[#allocation3] ss:$0 sm:$0xff] }
 0xad2   :  { %v10076_v3 = vpop.eup %10075  ;;  %v8160_v44 = vmul.f32 0.5, %v10074_v24  ;;  %v8356_v36 = vmul.f32 %v13634_v35, %v8333_v16 }
 0xad3   :  { %10093 = vtanh.f32 %v8303_v25  ;;  %v8112_v31 = vadd.f32 0.5, %v8096_v28  ;;  %v8239_v30 = vmul.f32 0.5, %v10076_v3 }
 0xad4   :  { %v10078_v37 = vpop.eup %10077  ;;  %v8176_v5 = vadd.f32 0.5, %v8160_v44  ;;  %10095 = vtanh.f32 %v8049_v40  ;;  %8382 = vadd.xlane.f32.xlu0 %v8356_v36 }
 0xad5   :  { %v10080_v13 = vpop.eup %10079  ;;  %v8334_v11 = vmul.f32 %v10078_v37, %v8254_v10  ;;  %v8272_v55 = vmul.f32 %v8112_v31, %v13588_v18  ;;  %10097 = vtanh.f32 %v8209_v20  ;;  %v8255_v12 = vadd.f32 0.5, %v8239_v30 }
 0xad6   :  { %v10082_v4 = vpop.eup %10081  ;;  %v8097_v29 = vmul.f32 0.5, %v10080_v13 }
 0xad7   :  { %v10084_v8 = vpop.eup %10083  ;;  %v8288_v49 = vmul.f32 %v10082_v4, %v8176_v5  ;;  %v8357_v63 = vmul.f32 %v13634_v35, %v8334_v11 }
 0xad8   :  { %v8113_v59 = vadd.f32 0.5, %v8097_v29  ;;  %v8161_v60 = vmul.f32 0.5, %v10084_v8  ;;  %v10086_v48 = vpop.eup %10085 }
 0xad9   :  { %v8304_v17 = vadd.f32 %v8288_v49, %v8272_v55  ;;  %8384 = vadd.xlane.f32.xlu1 %v8357_v63  ;;  %v10088_v34 = vpop.eup %10087  ;;  %v8098_v47 = vmul.f32 0.5, %v10086_v48 }
 0xada   :  { %v8273_v19 = vmul.f32 %v8113_v59, %v13594_v33  ;;  %v8177_v39 = vadd.f32 0.5, %v8161_v60  ;;  %v10090_v0 = vpop.eup %10089 }
 0xadb   :  { %10099 = vtanh.f32 %v8304_v17  ;;  %v8114_v23 = vadd.f32 0.5, %v8098_v47  ;;  %v8162_v62 = vmul.f32 0.5, %v10090_v0  ;;  %v10092_v56 = vpop.eup %10091 }
 0xadc   :  { %v8289_v18 = vmul.f32 %v10088_v34, %v8177_v39  ;;  %10101 = vtanh.f32 %v8210_v42  ;;  %v8240_v32 = vmul.f32 0.5, %v10092_v56 }
 0xadd   :  { %v10094_v40 = vpop.eup %10093  ;;  %v8274_v38 = vmul.f32 %v8114_v23, %v13598_v7  ;;  %v8178_v51 = vadd.f32 0.5, %v8162_v62 }
 0xade   :  { %v8305_v6 = vadd.f32 %v8289_v18, %v8273_v19  ;;  %v10096_v61 = vpop.eup %10095  ;;  %v8335_v27 = vmul.f32 %v10094_v40, %v8255_v12  ;;  %v8256_v58 = vadd.f32 0.5, %v8240_v32 }
 0xadf   :  { %v8290_v33 = vmul.f32 %v10096_v61, %v8178_v51  ;;  %v10098_v15 = vpop.eup %10097 }
 0xae0   :  { %10103 = vtanh.f32 %v8305_v6  ;;  %v8358_v50 = vmul.f32 %v13634_v35, %v8335_v27  ;;  %v8241_v53 = vmul.f32 0.5, %v10098_v15 }
 0xae1   :  { %v8306_v26 = vadd.f32 %v8290_v33, %v8274_v38 }
 0xae2   :  { %8386 = vadd.xlane.f32.xlu0 %v8358_v50  ;;  %v8257_v7 = vadd.f32 0.5, %v8241_v53 }
 0xae3   :  { %10105 = vtanh.f32 %v8306_v26 }
 0xae5   :  { %v10100_v2 = vpop.eup %10099 }
 0xae6   :  { %v10102_v21 = vpop.eup %10101  ;;  %v8336_v22 = vmul.f32 %v10100_v2, %v8256_v58 }
 0xae7   :  { %v8242_v41 = vmul.f32 0.5, %v10102_v21 }
 0xae8   :  { %v8359_v9 = vmul.f32 %v13634_v35, %v8336_v22 }
 0xae9   :  { %v8258_v14 = vadd.f32 0.5, %v8242_v41 }
 0xaea   :  { %v10104_v45 = vpop.eup %10103  ;;  %8388 = vadd.xlane.f32.xlu1 %v8359_v9 }
 0xaeb   :  { %v8337_v54 = vmul.f32 %v10104_v45, %v8257_v7 }
 0xaed   :  { %v8360_v43 = vmul.f32 %v13634_v35, %v8337_v54  ;;  %v10106_v52 = vpop.eup %10105 }
 0xaee   :  { %v8338_v46 = vmul.f32 %v10106_v52, %v8258_v14 }
 0xaef   :  { %8390 = vadd.xlane.f32.xlu0 %v8360_v43 }
 0xaf0   :  { %v8361_v1 = vmul.f32 %v13634_v35, %v8338_v46 }
 0xaf2   :  { %8392 = vadd.xlane.f32.xlu1 %v8361_v1 }
 0xb14   :  { %v8363_v16 = vpop.xlane.xlu0 %8362 }
 0xb15   :  { %v8401_v24 = vadd.f32 %v13728_v57, %v8363_v16 }
 0xb17   :  { %v8417_v25 = vmul.f32 0.5, %v8401_v24 }
 0xb19   :  { %10107 = vtanh.f32 %v8417_v25 }
 0xb1a   :  { %v8365_v28 = vpop.xlane.xlu0 %8364 }
 0xb1b   :  { %v8402_v3 = vadd.f32 %v13728_v57, %v8365_v28 }
 0xb1d   :  { %v8418_v10 = vmul.f32 0.5, %v8402_v3 }
 0xb1f   :  { %v8367_v44 = vpop.xlane.xlu1 %8366  ;;  %10109 = vtanh.f32 %v8418_v10 }
 0xb20   :  { %v8403_v36 = vadd.f32 %v13728_v57, %v8367_v44 }
 0xb22   :  { %v8419_v37 = vmul.f32 0.5, %v8403_v36 }
 0xb23   :  { %v8369_v31 = vpop.xlane.xlu1 %8368  ;;  %v10108_v20 = vpop.eup %10107 }
 0xb24   :  { %10111 = vtanh.f32 %v8419_v37  ;;  %v8404_v35 = vadd.f32 %v13728_v57, %v8369_v31  ;;  %v8449_v5 = vmul.f32 0.5, %v10108_v20 }
 0xb26   :  { %v8420_v13 = vmul.f32 0.5, %v8404_v35  ;;  %v8465_v11 = vadd.f32 0.5, %v8449_v5 }
 0xb28   :  { %10113 = vtanh.f32 %v8420_v13  ;;  %8482 = vst.msk [vmem:[#allocation13] sm:$0xff] %vm8481_vm0, %v8465_v11 }
 0xb29   :  { %v10110_v4 = vpop.eup %10109 }
 0xb2a   :  { %v8450_v55 = vmul.f32 0.5, %v10110_v4 }
 0xb2c   :  { %v8466_v29 = vadd.f32 0.5, %v8450_v55 }
 0xb2e   :  { %v10112_v8 = vpop.eup %10111  ;;  %8483 = vst.msk [vmem:[#allocation13 + $0x8] sm:$0xff] %vm8481_vm0, %v8466_v29 }
 0xb2f   :  { %v8451_v49 = vmul.f32 0.5, %v10112_v8 }
 0xb31   :  { %v8467_v63 = vadd.f32 0.5, %v8451_v49 }
 0xb32   :  { %v10114_v59 = vpop.eup %10113 }
 0xb33   :  { %8484 = vst.msk [vmem:[#allocation13 + $0x10] sm:$0xff] %vm8481_vm0, %v8467_v63  ;;  %v8452_v60 = vmul.f32 0.5, %v10114_v59 }
 0xb35   :  { %v8468_v42 = vadd.f32 0.5, %v8452_v60 }
 0xb37   :  { %8485 = vst.msk [vmem:[#allocation13 + $0x18] sm:$0xff] %vm8481_vm0, %v8468_v42 }
 0xb39   :  { %v8371_v48 = vpop.xlane.xlu0 %8370 }
 0xb3a   :  { %v8405_v30 = vadd.f32 %v13728_v57, %v8371_v48 }
 0xb3c   :  { %v8421_v17 = vmul.f32 0.5, %v8405_v30 }
 0xb3e   :  { %10115 = vtanh.f32 %v8421_v17  ;;  %v8373_v34 = vpop.xlane.xlu1 %8372 }
 0xb3f   :  { %v8406_v19 = vadd.f32 %v13728_v57, %v8373_v34 }
 0xb41   :  { %v8422_v39 = vmul.f32 0.5, %v8406_v19 }
 0xb42   :  { %v8375_v47 = vpop.xlane.xlu0 %8374 }
 0xb43   :  { %v8407_v0 = vadd.f32 %v13728_v57, %v8375_v47  ;;  %10117 = vtanh.f32 %v8422_v39 }
 0xb45   :  { %v8423_v18 = vmul.f32 0.5, %v8407_v0 }
 0xb46   :  { %v8377_v23 = vpop.xlane.xlu1 %8376 }
 0xb47   :  { %10119 = vtanh.f32 %v8423_v18  ;;  %v8408_v62 = vadd.f32 %v13728_v57, %v8377_v23 }
 0xb48   :  { %v10116_v56 = vpop.eup %10115 }
 0xb49   :  { %v8424_v12 = vmul.f32 0.5, %v8408_v62  ;;  %v8453_v40 = vmul.f32 0.5, %v10116_v56 }
 0xb4b   :  { %10121 = vtanh.f32 %v8424_v12  ;;  %v8469_v6 = vadd.f32 0.5, %v8453_v40 }
 0xb4d   :  { %v10118_v38 = vpop.eup %10117  ;;  %8486 = vst.msk [vmem:[#allocation13 + $0x20] sm:$0xff] %vm8481_vm0, %v8469_v6 }
 0xb4e   :  { %v8454_v51 = vmul.f32 0.5, %v10118_v38 }
 0xb50   :  { %v8470_v27 = vadd.f32 0.5, %v8454_v51 }
 0xb51   :  { %v10120_v61 = vpop.eup %10119 }
 0xb52   :  { %v8455_v32 = vmul.f32 0.5, %v10120_v61  ;;  %8487 = vst.msk [vmem:[#allocation13 + $0x28] sm:$0xff] %vm8481_vm0, %v8470_v27 }
 0xb54   :  { %v8471_v33 = vadd.f32 0.5, %v8455_v32 }
 0xb55   :  { %v10122_v50 = vpop.eup %10121 }
 0xb56   :  { %8488 = vst.msk [vmem:[#allocation13 + $0x30] sm:$0xff] %vm8481_vm0, %v8471_v33  ;;  %v8456_v15 = vmul.f32 0.5, %v10122_v50 }
 0xb58   :  { %v8472_v26 = vadd.f32 0.5, %v8456_v15 }
 0xb59   :  { %v8379_v58 = vpop.xlane.xlu0 %8378 }
 0xb5a   :  { %8489 = vst.msk [vmem:[#allocation13 + $0x38] sm:$0xff] %vm8481_vm0, %v8472_v26  ;;  %v8409_v2 = vadd.f32 %v13728_v57, %v8379_v58 }
 0xb5c   :  { %v8425_v21 = vmul.f32 0.5, %v8409_v2 }
 0xb5d   :  { %v8381_v53 = vpop.xlane.xlu1 %8380 }
 0xb5e   :  { %v8410_v22 = vadd.f32 %v13728_v57, %v8381_v53  ;;  %10123 = vtanh.f32 %v8425_v21 }
 0xb60   :  { %v8426_v9 = vmul.f32 0.5, %v8410_v22 }
 0xb61   :  { %v8383_v7 = vpop.xlane.xlu0 %8382 }
 0xb62   :  { %10125 = vtanh.f32 %v8426_v9  ;;  %v8411_v41 = vadd.f32 %v13728_v57, %v8383_v7 }
 0xb64   :  { %v8427_v45 = vmul.f32 0.5, %v8411_v41 }
 0xb66   :  { %v8385_v54 = vpop.xlane.xlu1 %8384  ;;  %10127 = vtanh.f32 %v8427_v45 }
 0xb67   :  { %v8412_v14 = vadd.f32 %v13728_v57, %v8385_v54 }
 0xb68   :  { %v10124_v52 = vpop.eup %10123 }
 0xb69   :  { %v8428_v43 = vmul.f32 0.5, %v8412_v14  ;;  %v8457_v46 = vmul.f32 0.5, %v10124_v52 }
 0xb6b   :  { %10129 = vtanh.f32 %v8428_v43  ;;  %v8473_v16 = vadd.f32 0.5, %v8457_v46 }
 0xb6c   :  { %v10126_v1 = vpop.eup %10125 }
 0xb6d   :  { %v8458_v24 = vmul.f32 0.5, %v10126_v1  ;;  %8490 = vst.msk [vmem:[#allocation13 + $0x40] sm:$0xff] %vm8481_vm0, %v8473_v16 }
 0xb6f   :  { %v8474_v25 = vadd.f32 0.5, %v8458_v24  ;;  %v8387_v28 = vpop.xlane.xlu0 %8386 }
 0xb70   :  { %v10128_v3 = vpop.eup %10127  ;;  %v8413_v10 = vadd.f32 %v13728_v57, %v8387_v28 }
 0xb71   :  { %8491 = vst.msk [vmem:[#allocation13 + $0x48] sm:$0xff] %vm8481_vm0, %v8474_v25  ;;  %v8459_v44 = vmul.f32 0.5, %v10128_v3 }
 0xb72   :  { %v8429_v36 = vmul.f32 0.5, %v8413_v10 }
 0xb73   :  { %v8475_v37 = vadd.f32 0.5, %v8459_v44 }
 0xb74   :  { %10131 = vtanh.f32 %v8429_v36 }
 0xb75   :  { %v10130_v31 = vpop.eup %10129  ;;  %8492 = vst.msk [vmem:[#allocation13 + $0x50] sm:$0xff] %vm8481_vm0, %v8475_v37 }
 0xb76   :  { %v8460_v35 = vmul.f32 0.5, %v10130_v31 }
 0xb77   :  { %v8389_v20 = vpop.xlane.xlu1 %8388 }
 0xb78   :  { %v8476_v13 = vadd.f32 0.5, %v8460_v35  ;;  %v8414_v5 = vadd.f32 %v13728_v57, %v8389_v20 }
 0xb7a   :  { %8493 = vst.msk [vmem:[#allocation13 + $0x58] sm:$0xff] %vm8481_vm0, %v8476_v13  ;;  %v8430_v11 = vmul.f32 0.5, %v8414_v5 }
 0xb7c   :  { %10133 = vtanh.f32 %v8430_v11  ;;  %v8391_v4 = vpop.xlane.xlu0 %8390 }
 0xb7d   :  { %v8415_v55 = vadd.f32 %v13728_v57, %v8391_v4 }
 0xb7e   :  { %v10132_v29 = vpop.eup %10131 }
 0xb7f   :  { %v8431_v8 = vmul.f32 0.5, %v8415_v55  ;;  %v8461_v49 = vmul.f32 0.5, %v10132_v29  ;;  %v8393_v63 = vpop.xlane.xlu1 %8392 }
 0xb80   :  { %v8416_v59 = vadd.f32 %v13728_v57, %v8393_v63 }
 0xb81   :  { %10135 = vtanh.f32 %v8431_v8  ;;  %v8477_v60 = vadd.f32 0.5, %v8461_v49 }
 0xb82   :  { %v8432_v42 = vmul.f32 0.5, %v8416_v59 }
 0xb83   :  { %8494 = vst.msk [vmem:[#allocation13 + $0x60] sm:$0xff] %vm8481_vm0, %v8477_v60 }
 0xb84   :  { %10137 = vtanh.f32 %v8432_v42 }
 0xb86   :  { %v10134_v48 = vpop.eup %10133 }
 0xb87   :  { %v8462_v30 = vmul.f32 0.5, %v10134_v48 }
 0xb89   :  { %v8478_v17 = vadd.f32 0.5, %v8462_v30 }
 0xb8b   :  { %v10136_v34 = vpop.eup %10135  ;;  %8495 = vst.msk [vmem:[#allocation13 + $0x68] sm:$0xff] %vm8481_vm0, %v8478_v17 }
 0xb8c   :  { %v8463_v19 = vmul.f32 0.5, %v10136_v34 }
 0xb8e   :  { %v8479_v39 = vadd.f32 0.5, %v8463_v19  ;;  %v10138_v47 = vpop.eup %10137 }
 0xb8f   :  { %v8464_v0 = vmul.f32 0.5, %v10138_v47 }
 0xb90   :  { %8496 = vst.msk [vmem:[#allocation13 + $0x70] sm:$0xff] %vm8481_vm0, %v8479_v39 }
 0xb91   :  { %v8480_v57 = vadd.f32 0.5, %v8464_v0 }
 0xb93   :  { %8497 = vst.msk [vmem:[#allocation13 + $0x78] sm:$0xff] %vm8481_vm0, %v8480_v57 }
 0xb94   :  { %10484 = shalt.err (!%p10481_p2)
}
 0xb95   :  { %s10485_s13 = scalar_lea.hbm %s13780_s6, 2048 }
 0xb96   :  { %p10486_p3 = scmp.ne.s32.totalorder %s13780_s6, %s10485_s13  ;;  %p10489_p4 = scmp.lt.u32.totalorder %s10485_s13, %s13780_s6 }
 0xb98   :  { %p10491_p5 = pnand %p10489_p4, %p10486_p3 }
 0xb9a   :  { %10494 = shalt.err (!%p10491_p5)
}
 0xb9b   :  { %s10514_s19 = smov 128   ;;  %s10515_s20 = smov 8  }
 0xb9c   :  { %8509 = dma.vmem_to_hbm [thread:$0]  %s8504_s9, 2048, %s13780_s6, [#allocation6], %s10514_s19, %s10514_s19, %s10515_s20  }
 0xb9d   :  { %10501 = dma.done.wait [#allocation6], 2048  }
 0xb9e   :  { %10502 = vsyncadd [#allocation6], 4294965248 }
 0xb9f   :  { %8513 = vsyncpa [#allocation5], 1 }
 0xba0   :  { %8514 = vsyncpa [#allocation8], 1 }
 0xba1   :  { %8515 = vsyncpa [#allocation11], 1 }
 0xba2   :  { %8516 = vsyncpa [#allocation6], 1 }

</bundles_post_ra>
